<compile_context>
chip_gen: v7x
topology: tpu7x:2x2x1
jax: 0.10.0
libtpu: 0.0.40
codegen_flags: <defaults>
</compile_context>

<pallas_src>
import jax
import jax.numpy as jnp
from jax.experimental import pallas as pl
from jax.experimental.pallas import tpu as pltpu

# MLP dims from the PyTorch module.
DIMS = (784, 512, 256, 128, 64, 10)
LANE = 128
OUT_PAD = 128  # logits 10 -> 128 lanes so the output store is lane-dense


def _round_up(x, m):
    return (x + m - 1) // m * m


def mlp_kernel(x_ref,
               w1_ref, b1_ref,
               w2_ref, b2_ref,
               w3_ref, b3_ref,
               w45_ref, b45_ref,
               out_ref):
    """One batch tile: relu->L1->relu->L2->relu->L3->relu->(L4*L5 fused)."""
    f32 = jnp.float32
    bf16 = jnp.bfloat16
    # relu the raw input (as the module does); bf16 x bf16 dots with f32
    # accumulation, f32 bias adds, re-cast to bf16 between layers.
    h = jnp.maximum(x_ref[...], 0)
    h = jnp.dot(h, w1_ref[...], preferred_element_type=f32) + b1_ref[...]
    h = jnp.maximum(h, 0.0).astype(bf16)
    h = jnp.dot(h, w2_ref[...], preferred_element_type=f32) + b2_ref[...]
    h = jnp.maximum(h, 0.0).astype(bf16)
    h = jnp.dot(h, w3_ref[...], preferred_element_type=f32) + b3_ref[...]
    h = jnp.maximum(h, 0.0).astype(bf16)
    # L4 and L5 have no nonlinearity between them -> fused into a single
    # (128, 128-padded) linear at prepare time.
    out = jnp.dot(h, w45_ref[...], preferred_element_type=f32) + b45_ref[...]
    out_ref[...] = out.astype(out_ref.dtype)


def prepare_params(params):
    """PyTorch-layout params -> kernel layout.

    Input: list of 5 (W, b) with W:(out, in) f32, b:(out,) f32.
    Output: list of 4 (W_t, b2d):
      layers 1..3: W_t = W.T (in, out) bf16, b2d = (1, out) f32
      layer 4/5 fused: W45 = W4^T @ W5^T (128, 10)->(128, 128) bf16 (zero-pad),
                       b45 = b4 @ W5^T + b5  (1, 10)->(1, 128) f32 (zero-pad).
    Zero-padded output lanes are exact (sliced away in the wrapper).
    """
    (w1, b1), (w2, b2), (w3, b3), (w4, b4), (w5, b5) = params
    prepped = []
    for w, b in ((w1, b1), (w2, b2), (w3, b3)):
        w_t = w.astype(jnp.float32).T.astype(jnp.bfloat16)
        b2d = b.astype(jnp.float32).reshape(1, -1)
        prepped.append((w_t, b2d))
    # Exact linear composition of L4 and L5 (done in f32, then cast to bf16).
    w45 = w4.astype(jnp.float32).T @ w5.astype(jnp.float32).T        # (128, 10)
    b45 = b4.astype(jnp.float32) @ w5.astype(jnp.float32).T + b5     # (10,)
    w45 = jnp.pad(w45, ((0, 0), (0, OUT_PAD - w45.shape[1]))).astype(jnp.bfloat16)
    b45 = jnp.pad(b45.reshape(1, -1), ((0, 0), (0, OUT_PAD - b45.shape[0] * 0 - 10)))
    prepped.append((w45, b45))
    return prepped


def net_forward(x, params, tb=512):
    """x: (B, 1, 28, 28) or (B, 784) float. params: PyTorch-layout (W, b) pairs."""
    B = x.shape[0]
    # Reshape + single cast to bf16 (no f32 feature-dim pad, no extra HBM copy).
    x2d = x.reshape(B, DIMS[0]).astype(jnp.bfloat16)

    # Batch tiling: TB rows per grid step (sublane-aligned).
    b8 = _round_up(max(B, 8), 8)
    tb = max(8, min(tb, b8))
    # Keep >= 2 grid steps when the batch is big enough so the "parallel" batch
    # axis can shard across v7x's two TensorCores (no-op on v5e/v6e).
    if b8 // tb < 2 and b8 >= 16:
        tb = _round_up((b8 + 1) // 2, 8)
    b_pad = _round_up(b8, tb)
    if b_pad != B:
        x2d = jnp.pad(x2d, ((0, b_pad - B), (0, 0)))

    prepped = prepare_params(params)

    flat_params = []
    # Activation tiles stream along the batch grid axis; (tb, 784) is legal
    # because the last block dim equals the full array dim.
    in_specs = [pl.BlockSpec((tb, DIMS[0]), lambda i: (i, 0))]
    for (w_t, b2d) in prepped:
        flat_params.append(w_t)
        flat_params.append(b2d)
        # Constant block index -> weights/biases stay resident in VMEM.
        in_specs.append(pl.BlockSpec(w_t.shape, lambda i: (0, 0)))
        in_specs.append(pl.BlockSpec(b2d.shape, lambda i: (0, 0)))

    out_pad = pl.pallas_call(
        mlp_kernel,
        out_shape=jax.ShapeDtypeStruct((b_pad, OUT_PAD), jnp.bfloat16),
        grid_spec=pltpu.PrefetchScalarGridSpec(
            num_scalar_prefetch=0,
            grid=(b_pad // tb,),
            in_specs=in_specs,
            # Lane-dense (tb, 128) bf16 output slab; sliced back to 10 below.
            out_specs=pl.BlockSpec((tb, OUT_PAD), lambda i: (i, 0)),
        ),
        compiler_params=pltpu.CompilerParams(
            dimension_semantics=("parallel",),  # batch tiles across both TCs on v7x
        ),
    )(x2d, *flat_params)

    return out_pad[:B, :DIMS[-1]].astype(jnp.float32)


def init_params(key):
    """PyTorch nn.Linear-style init: W:(out, in), b:(out,), U(+-1/sqrt(fan_in))."""
    params = []
    for i in range(len(DIMS) - 1):
        fan_in, fan_out = DIMS[i], DIMS[i + 1]
        key, kw, kb = jax.random.split(key, 3)
        bound = 1.0 / jnp.sqrt(fan_in)
        w = jax.random.uniform(kw, (fan_out, fan_in), jnp.float32,
                               minval=-bound, maxval=bound)
        b = jax.random.uniform(kb, (fan_out,), jnp.float32,
                               minval=-bound, maxval=bound)
        params.append((w, b))
    return params


if __name__ == "__main__":
    key = jax.random.PRNGKey(0)
    key, kx = jax.random.split(key)

    B = 1024  # two 512-row batch tiles -> grid=(2,), both v7x TCs get work
    x = jax.random.normal(kx, (B, 1, 28, 28), dtype=jnp.float32)
    params = init_params(key)

    out = net_forward(x, params)  # default tb=512
    out = jax.block_until_ready(out)
    assert out.shape == (B, 10)

    # Pure-JAX f32 reference with exact PyTorch forward semantics.
    h = jnp.maximum(x.reshape(B, DIMS[0]).astype(jnp.float32), 0.0)
    h = h @ params[0][0].T + params[0][1]
    h = jnp.maximum(h, 0.0)
    h = h @ params[1][0].T + params[1][1]
    h = jnp.maximum(h, 0.0)
    h = h @ params[2][0].T + params[2][1]
    h = jnp.maximum(h, 0.0)
    h = h @ params[3][0].T + params[3][1]      # no relu between linear4/linear5
    ref = h @ params[4][0].T + params[4][1]

    err = float(jnp.max(jnp.abs(out - ref)))
    assert jnp.allclose(out, ref, atol=3e-2, rtol=3e-2), f"max abs err = {err}"

    print("KERNEL_OK")
</pallas_src>

<mosaic_0001>
module attributes {stable_mosaic.version = 11 : i64} {
  func.func @mlp_kernel(%arg0: i32, %arg1: memref<512x784xbf16, #tpu.memory_space<vmem>>, %arg2: memref<784x512xbf16, #tpu.memory_space<vmem>>, %arg3: memref<1x512xf32, #tpu.memory_space<vmem>>, %arg4: memref<512x256xbf16, #tpu.memory_space<vmem>>, %arg5: memref<1x256xf32, #tpu.memory_space<vmem>>, %arg6: memref<256x128xbf16, #tpu.memory_space<vmem>>, %arg7: memref<1x128xf32, #tpu.memory_space<vmem>>, %arg8: memref<128x128xbf16, #tpu.memory_space<vmem>>, %arg9: memref<1x128xf32, #tpu.memory_space<vmem>>, %arg10: memref<512x128xbf16, #tpu.memory_space<vmem>>) attributes {dimension_semantics = [#tpu.dimension_semantics<parallel>], iteration_bounds = array<i64: 2>, scalar_prefetch = 0 : i64, scratch_operands = 0 : i64, tpu.core_type = #tpu.core_type<tc>, window_params = [{transform_indices = @transform_0, window_bounds = array<i64: 512, 784>}, {pipeline_mode = #tpu.pipeline_mode<synchronous>, transform_indices = @transform_1, window_bounds = array<i64: 784, 512>}, {pipeline_mode = #tpu.pipeline_mode<synchronous>, transform_indices = @transform_2, window_bounds = array<i64: 1, 512>}, {pipeline_mode = #tpu.pipeline_mode<synchronous>, transform_indices = @transform_3, window_bounds = array<i64: 512, 256>}, {pipeline_mode = #tpu.pipeline_mode<synchronous>, transform_indices = @transform_4, window_bounds = array<i64: 1, 256>}, {pipeline_mode = #tpu.pipeline_mode<synchronous>, transform_indices = @transform_5, window_bounds = array<i64: 256, 128>}, {pipeline_mode = #tpu.pipeline_mode<synchronous>, transform_indices = @transform_6, window_bounds = array<i64: 1, 128>}, {pipeline_mode = #tpu.pipeline_mode<synchronous>, transform_indices = @transform_7, window_bounds = array<i64: 128, 128>}, {pipeline_mode = #tpu.pipeline_mode<synchronous>, transform_indices = @transform_8, window_bounds = array<i64: 1, 128>}, {transform_indices = @transform_9, window_bounds = array<i64: 512, 128>}]} {
    %c0 = arith.constant 0 : index
    %c0_0 = arith.constant 0 : index
    %0 = vector.load %arg1[%c0, %c0_0] : memref<512x784xbf16, #tpu.memory_space<vmem>>, vector<512x784xbf16>
    %cst = arith.constant 0.000000e+00 : bf16
    %1 = vector.broadcast %cst : bf16 to vector<512x784xbf16>
    %2 = arith.maximumf %0, %1 : vector<512x784xbf16>
    %c0_1 = arith.constant 0 : index
    %c0_2 = arith.constant 0 : index
    %3 = vector.load %arg2[%c0_1, %c0_2] : memref<784x512xbf16, #tpu.memory_space<vmem>>, vector<784x512xbf16>
    %cst_3 = arith.constant dense<0.000000e+00> : vector<512x512xf32>
    %4 = tpu.matmul %2, %3, %cst_3 {dimension_numbers = #tpu.dot_dimension_numbers<[1], [0], [0], [1], [0, 0, 1, 1], [], []>} : vector<512x784xbf16>, vector<784x512xbf16>, vector<512x512xf32> -> vector<512x512xf32>
    %c0_4 = arith.constant 0 : index
    %c0_5 = arith.constant 0 : index
    %5 = vector.load %arg3[%c0_4, %c0_5] : memref<1x512xf32, #tpu.memory_space<vmem>>, vector<1x512xf32>
    %6 = vector.broadcast %5 : vector<1x512xf32> to vector<512x512xf32>
    %7 = arith.addf %4, %6 : vector<512x512xf32>
    %cst_6 = arith.constant 0.000000e+00 : f32
    %8 = vector.broadcast %cst_6 : f32 to vector<512x512xf32>
    %9 = arith.maximumf %7, %8 : vector<512x512xf32>
    %10 = arith.truncf %9 : vector<512x512xf32> to vector<512x512xbf16>
    %c0_7 = arith.constant 0 : index
    %c0_8 = arith.constant 0 : index
    %11 = vector.load %arg4[%c0_7, %c0_8] : memref<512x256xbf16, #tpu.memory_space<vmem>>, vector<512x256xbf16>
    %cst_9 = arith.constant dense<0.000000e+00> : vector<512x256xf32>
    %12 = tpu.matmul %10, %11, %cst_9 {dimension_numbers = #tpu.dot_dimension_numbers<[1], [0], [0], [1], [0, 0, 1, 1], [], []>} : vector<512x512xbf16>, vector<512x256xbf16>, vector<512x256xf32> -> vector<512x256xf32>
    %c0_10 = arith.constant 0 : index
    %c0_11 = arith.constant 0 : index
    %13 = vector.load %arg5[%c0_10, %c0_11] : memref<1x256xf32, #tpu.memory_space<vmem>>, vector<1x256xf32>
    %14 = vector.broadcast %13 : vector<1x256xf32> to vector<512x256xf32>
    %15 = arith.addf %12, %14 : vector<512x256xf32>
    %cst_12 = arith.constant 0.000000e+00 : f32
    %16 = vector.broadcast %cst_12 : f32 to vector<512x256xf32>
    %17 = arith.maximumf %15, %16 : vector<512x256xf32>
    %18 = arith.truncf %17 : vector<512x256xf32> to vector<512x256xbf16>
    %c0_13 = arith.constant 0 : index
    %c0_14 = arith.constant 0 : index
    %19 = vector.load %arg6[%c0_13, %c0_14] : memref<256x128xbf16, #tpu.memory_space<vmem>>, vector<256x128xbf16>
    %cst_15 = arith.constant dense<0.000000e+00> : vector<512x128xf32>
    %20 = tpu.matmul %18, %19, %cst_15 {dimension_numbers = #tpu.dot_dimension_numbers<[1], [0], [0], [1], [0, 0, 1, 1], [], []>} : vector<512x256xbf16>, vector<256x128xbf16>, vector<512x128xf32> -> vector<512x128xf32>
    %c0_16 = arith.constant 0 : index
    %c0_17 = arith.constant 0 : index
    %21 = vector.load %arg7[%c0_16, %c0_17] : memref<1x128xf32, #tpu.memory_space<vmem>>, vector<1x128xf32>
    %22 = vector.broadcast %21 : vector<1x128xf32> to vector<512x128xf32>
    %23 = arith.addf %20, %22 : vector<512x128xf32>
    %cst_18 = arith.constant 0.000000e+00 : f32
    %24 = vector.broadcast %cst_18 : f32 to vector<512x128xf32>
    %25 = arith.maximumf %23, %24 : vector<512x128xf32>
    %26 = arith.truncf %25 : vector<512x128xf32> to vector<512x128xbf16>
    %c0_19 = arith.constant 0 : index
    %c0_20 = arith.constant 0 : index
    %27 = vector.load %arg8[%c0_19, %c0_20] : memref<128x128xbf16, #tpu.memory_space<vmem>>, vector<128x128xbf16>
    %cst_21 = arith.constant dense<0.000000e+00> : vector<512x128xf32>
    %28 = tpu.matmul %26, %27, %cst_21 {dimension_numbers = #tpu.dot_dimension_numbers<[1], [0], [0], [1], [0, 0, 1, 1], [], []>} : vector<512x128xbf16>, vector<128x128xbf16>, vector<512x128xf32> -> vector<512x128xf32>
    %c0_22 = arith.constant 0 : index
    %c0_23 = arith.constant 0 : index
    %29 = vector.load %arg9[%c0_22, %c0_23] : memref<1x128xf32, #tpu.memory_space<vmem>>, vector<1x128xf32>
    %30 = vector.broadcast %29 : vector<1x128xf32> to vector<512x128xf32>
    %31 = arith.addf %28, %30 : vector<512x128xf32>
    %32 = arith.truncf %31 : vector<512x128xf32> to vector<512x128xbf16>
    %c0_24 = arith.constant 0 : index
    %c0_25 = arith.constant 0 : index
    %33 = vector.load %arg10[%c0_24, %c0_25] : memref<512x128xbf16, #tpu.memory_space<vmem>>, vector<512x128xbf16>
    tpu.vector_store %arg10[%c0_24, %c0_25], %32 {strides = array<i32>} : memref<512x128xbf16, #tpu.memory_space<vmem>>, vector<512x128xbf16>,
    return
  }
  func.func @transform_0(%arg0: i32) -> (i32, i32) {
    %c0_i32 = arith.constant 0 : i32
    %c0_i32_0 = arith.constant 0 : i32
    return %arg0, %c0_i32 : i32, i32
  }
  func.func @transform_1(%arg0: i32) -> (i32, i32) {
    %c0_i32 = arith.constant 0 : i32
    %c0_i32_0 = arith.constant 0 : i32
    %c0_i32_1 = arith.constant 0 : i32
    return %c0_i32, %c0_i32_0 : i32, i32
  }
  func.func @transform_2(%arg0: i32) -> (i32, i32) {
    %c0_i32 = arith.constant 0 : i32
    %c0_i32_0 = arith.constant 0 : i32
    %c0_i32_1 = arith.constant 0 : i32
    return %c0_i32, %c0_i32_0 : i32, i32
  }
  func.func @transform_3(%arg0: i32) -> (i32, i32) {
    %c0_i32 = arith.constant 0 : i32
    %c0_i32_0 = arith.constant 0 : i32
    %c0_i32_1 = arith.constant 0 : i32
    return %c0_i32, %c0_i32_0 : i32, i32
  }
  func.func @transform_4(%arg0: i32) -> (i32, i32) {
    %c0_i32 = arith.constant 0 : i32
    %c0_i32_0 = arith.constant 0 : i32
    %c0_i32_1 = arith.constant 0 : i32
    return %c0_i32, %c0_i32_0 : i32, i32
  }
  func.func @transform_5(%arg0: i32) -> (i32, i32) {
    %c0_i32 = arith.constant 0 : i32
    %c0_i32_0 = arith.constant 0 : i32
    %c0_i32_1 = arith.constant 0 : i32
    return %c0_i32, %c0_i32_0 : i32, i32
  }
  func.func @transform_6(%arg0: i32) -> (i32, i32) {
    %c0_i32 = arith.constant 0 : i32
    %c0_i32_0 = arith.constant 0 : i32
    %c0_i32_1 = arith.constant 0 : i32
    return %c0_i32, %c0_i32_0 : i32, i32
  }
  func.func @transform_7(%arg0: i32) -> (i32, i32) {
    %c0_i32 = arith.constant 0 : i32
    %c0_i32_0 = arith.constant 0 : i32
    %c0_i32_1 = arith.constant 0 : i32
    return %c0_i32, %c0_i32_0 : i32, i32
  }
  func.func @transform_8(%arg0: i32) -> (i32, i32) {
    %c0_i32 = arith.constant 0 : i32
    %c0_i32_0 = arith.constant 0 : i32
    %c0_i32_1 = arith.constant 0 : i32
    return %c0_i32, %c0_i32_0 : i32, i32
  }
  func.func @transform_9(%arg0: i32) -> (i32, i32) {
    %c0_i32 = arith.constant 0 : i32
    %c0_i32_0 = arith.constant 0 : i32
    return %arg0, %c0_i32 : i32, i32
  }
}

</mosaic_0001>

<bundles_post_ra>
// kernel: tpu_custom_call.1
= control target key start
LH: loop header
LB: loop body
LE: loop exit
PB: predicated region body
PF: predicated region fallthrough
CT: control target
= control target key end

     0   :  { %14 = vsyncpa [#allocation3], 0  ;;  %s14961_s0 = inlined_call_operand.vmem [shape: bf16[1024,784], index: 0, kind: input, shape index: {}]   ;;  %s14962_s1 = inlined_call_operand.vmem [shape: bf16[784,512], index: 1, kind: input, shape index: {}]   ;;  %s14963_s2 = inlined_call_operand.vmem [shape: f32[1,512], index: 2, kind: input, shape index: {}]   ;;  %s14964_s3 = inlined_call_operand.vmem [shape: bf16[512,256], index: 3, kind: input, shape index: {}]   ;;  %s14965_s4 = inlined_call_operand.vmem [shape: f32[1,256], index: 4, kind: input, shape index: {}]   ;;  %s14966_s5 = inlined_call_operand.vmem [shape: bf16[256,128], index: 5, kind: input, shape index: {}]   ;;  %s14967_s6 = inlined_call_operand.vmem [shape: f32[1,128], index: 6, kind: input, shape index: {}]   ;;  %s14968_s7 = inlined_call_operand.vmem [shape: bf16[128,128], index: 7, kind: input, shape index: {}]   ;;  %s14969_s8 = inlined_call_operand.vmem [shape: f32[1,128], index: 8, kind: input, shape index: {}]   ;;  %s14970_s9 = inlined_call_operand.hbm [shape: bf16[1024,128], index: 9, kind: output, shape index: {}]  }
   0x1   :  { %16 = vsyncpa [#allocation3 + $0x1], 0  ;;  %s11928_s30 = smov 0   ;;  %s11930_s10 = smov 0  }
   0x2   :  { %s11932_s11 = smov 0   ;;  %s11934_s12 = smov 0  }
   0x3 LB: > { %s11949_s13 = sadd.s32 4294967295, %s11872_s12   ;;  %s9043_s14 = sadd.s32 4294967294, %s11872_s12   ;;  %s11872_s12 = sphi %s11934_s12, %s15060_s12   ;;  %s11868_s11 = sphi %s11932_s11, %s15059_s11   ;;  %s11864_s10 = sphi %s11930_s10, %s15058_s10   ;;  %s11860_s30 = sphi %s11928_s30, %s15057_s30  }
   0x4   : > { %s11953_s15 = sadd.s32 1, %s11872_s12   ;;  %s223_s16 = sadd.s32 1, %s11868_s11 }
   0x5   : > { %s220_s17 = ssub.s32 %s11872_s12, %s11953_s15  ;;  %p233_p0 = scmp.ne.s32.totalorder %s11868_s11, %s11864_s10 }
   0x6   : > { %p221_p1 = scmp.eq.s32.totalorder %s220_s17, 0  ;;  %p234_p2 = scmp.eq.s32.totalorder %s11949_s13, 1 }
   0x7   : > { %p239_p3 = scmp.ne.s32.totalorder %s11864_s10, %s11860_s30  ;;  %p240_p4 = scmp.eq.s32.totalorder %s9043_s14, 1 }
   0x8   : > { %s11964_s18 = scalar_select %p221_p1, %s11868_s11, %s223_s16  }
   0x9   : > { %p11966_p5 = por %p234_p2, %p233_p0  ;;  %p11970_p6 = por %p240_p4, %p239_p3 }
   0xa   : > { %p9046_p7 = scmp.ge.s32.totalorder %s11872_s12, 1  ;;  %p292_p8 = scmp.lt.s32.totalorder %s11872_s12, 3 }
   0xc   : > { %p293_p9 = pnand %p9046_p7, %p292_p8 }
   0xe   : > { %296 = sbr.rel (%p293_p9) target bundleno = 2256 (0x8d0), region = 56 }
  0x15   : > { %v11394_v0 = vld [vmem:[%s14962_s1 + $0x4] ss:$16 sps:$4 sm:$0xff]   ;;  %s9048_s23 = sshll.u32 %s11949_s13, 6  ;;  %v11396_v1 = vld [vmem:[%s14962_s1] ss:$16 sps:$4 sm:$0xff]   ;;  %v14981_v2 = vmov 0  }
  0x16   : > { %4566 = vmatprep.mubr.bf16.mxu1 %v14981_v2  ;;  %p330_p10 = scmp.lt.s32.totalorder %s9048_s23, 127  ;;  %3265 = vmatprep.subr.bf16.mxu0 %v11394_v0  ;;  %v11397_v3 = vld [vmem:[%s14962_s1 + $0x24] ss:$16 sps:$4 sm:$0xff]   ;;  %v11399_v4 = vld [vmem:[%s14962_s1 + $0x20] ss:$16 sps:$4 sm:$0xff]   ;;  %vm3168_vm0 = vcmask 130048  }
  0x17   : > { %3266 = vmatpush1.bf16.msra.mxu0 %v11396_v1  ;;  %v11400_v5 = vld [vmem:[%s14962_s1 + $0x604] ss:$16 sps:$4 sm:$0xff]   ;;  %v11402_v6 = vld [vmem:[%s14962_s1 + $0x600] ss:$16 sps:$4 sm:$0xff]   ;;  %v11424_v23 = vld [vmem:[%s14962_s1 + $0x8] ss:$16 sps:$4 sm:$0xff]  }
  0x18   : > { %s15062_s23 = smov (!%p330_p10, %s9048_s23), 127  ;;  %3267 = vmatprep.subr.bf16.mxu0 %v11397_v3  ;;  %v11403_v7 = vld [vmem:[%s14962_s1 + $0x44] ss:$16 sps:$4 sm:$0xff]   ;;  %10069 = vmatprep.subr.bf16.mxu1 %v11400_v5  ;;  %v11405_v8 = vld [vmem:[%s14962_s1 + $0x40] ss:$16 sps:$4 sm:$0xff]   ;;  %s326_s17 = sand.u32 1, %s11864_s10  }
  0x19   : > { %s11351_s25 = smul.u32 28, %s15062_s23  ;;  %10070 = vmatpush1.bf16.msra.mxu1 %v11402_v6  ;;  %v11406_v11 = vld [vmem:[%s14962_s1 + $0x64] ss:$16 sps:$4 sm:$0xff]   ;;  %v11408_v17 = vld [vmem:[%s14962_s1 + $0x60] ss:$16 sps:$4 sm:$0xff]   ;;  %s9047_s24 = sshll.u32 %s326_s17, 8 }
  0x1a   : > { %v11409_v18 = vld [vmem:[%s14962_s1 + $0x84] ss:$16 sps:$4 sm:$0xff]   ;;  %v11411_v21 = vld [vmem:[%s14962_s1 + $0x80] ss:$16 sps:$4 sm:$0xff]   ;;  %v11426_v26 = vld [vmem:[%s14962_s1 + $0xc] ss:$16 sps:$4 sm:$0xff]  }
  0x1b   : > { %3268 = vmatpush1.bf16.msra.mxu0 %v11399_v4  ;;  %s12005_s14 = scalar_lea.vmem %s14961_s0, %s11351_s25  ;;  %v11412_v22 = vld [vmem:[%s14962_s1 + $0xa4] ss:$16 sps:$4 sm:$0xff]   ;;  %v11414_v25 = vld [vmem:[%s14962_s1 + $0xa0] ss:$16 sps:$4 sm:$0xff]   ;;  %4677 = vmatprep.subr.bf16.mxu1 %v11426_v26  ;;  %v11432_v30 = vld [vmem:[%s14962_s1 + $0x2c] ss:$16 sps:$4 sm:$0xff]  }
  0x1c   : > { %3269 = vmatprep.subr.bf16.mxu0 %v11403_v7  ;;  %v509_v9 = vld [vmem:[%s12005_s14 + $0x4b0] sm:$0xf]  ;;  %v513_v10 = vld [vmem:[%s12005_s14 + $0x4cc] sm:$0xf]  ;;  %v517_v14 = vld [vmem:[%s12005_s14 + $0x4e8] sm:$0xf] }
  0x1d   : > { %v765_v12 = vmax.bf16 %v14981_v2, %v509_v9  ;;  %v769_v13 = vmax.bf16 %v14981_v2, %v513_v10  ;;  %v521_v15 = vld [vmem:[%s12005_s14 + $0x504] sm:$0xf]  ;;  %v773_v19 = vmax.bf16 %v14981_v2, %v517_v14  ;;  %v525_v27 = vld [vmem:[%s12005_s14 + $0x520] sm:$0xf]  ;;  %v529_v28 = vld [vmem:[%s12005_s14 + $0x53c] sm:$0xf] }
  0x1e   : > { %v777_v20 = vmax.bf16 %v14981_v2, %v521_v15  ;;  %v11415_v29 = vld [vmem:[%s14962_s1 + $0xc4] ss:$16 sps:$4 sm:$0xff]   ;;  %v11430_v31 = vld [vmem:[%s14962_s1 + $0x28] ss:$16 sps:$4 sm:$0xff]   ;;  %v781_v32 = vmax.bf16 %v14981_v2, %v525_v27  ;;  %v785_v33 = vmax.bf16 %v14981_v2, %v529_v28  ;;  %v11417_v34 = vld [vmem:[%s14962_s1 + $0xc0] ss:$16 sps:$4 sm:$0xff]  }
  0x1f   : > { %3270 = vmatpush1.bf16.msra.mxu0 %v11405_v8  ;;  %v12016_v16 = vcombine.low %v765_v12, %v769_v13  ;;  %v11438_v35 = vld [vmem:[%s14962_s1 + $0x4c] ss:$16 sps:$4 sm:$0xff]   ;;  %v11418_v36 = vld [vmem:[%s14962_s1 + $0xe4] ss:$16 sps:$4 sm:$0xff]   ;;  %v11436_v37 = vld [vmem:[%s14962_s1 + $0x48] ss:$16 sps:$4 sm:$0xff]  }
  0x20   : > { %3271 = vmatprep.subr.bf16.mxu0 %v11406_v11  ;;  %v12038_v24 = vcombine.low %v773_v19, %v777_v20  ;;  %v12074_v38 = vcombine.low %v781_v32, %v785_v33  ;;  %v533_v39 = vld [vmem:[%s12005_s14 + $0x558] sm:$0xf]  ;;  %v11444_v40 = vld [vmem:[%s14962_s1 + $0x6c] ss:$16 sps:$4 sm:$0xff]   ;;  %v537_v41 = vld [vmem:[%s12005_s14 + $0x574] sm:$0xf] }
  0x21   : > { %14990 = vst [vmem:[#allocation5_spill] sm:$0xff] %v12016_v16  ;;  %9491 = vmatmul.mubr.msk.bf16.vlgmr.msra.gmra.mrb[0].mxu1 %vm3168_vm0, %v12016_v16  ;;  %v11420_v42 = vld [vmem:[%s14962_s1 + $0xe0] ss:$16 sps:$4 sm:$0xff]   ;;  %v11421_v43 = vld [vmem:[%s14962_s1 + $0x104] ss:$16 sps:$4 sm:$0xff]   ;;  %v789_v45 = vmax.bf16 %v14981_v2, %v533_v39  ;;  %v793_v46 = vmax.bf16 %v14981_v2, %v537_v41  ;;  %v346_v33 = vld [vmem:[%s12005_s14 + $0x38] sm:$0xff] }
  0x22   : > { %4576 = vmatprep.mubr.bf16.mxu1 %v14981_v2  ;;  %14991 = vst [vmem:[#allocation6_spill] sm:$0xff] %v12038_v24  ;;  %4678 = vmatpush1.bf16.msra.mxu1 %v11424_v23  ;;  %14992 = vst [vmem:[#allocation7_spill] sm:$0xff] %v12074_v38  ;;  %v11442_v44 = vld [vmem:[%s14962_s1 + $0x68] ss:$16 sps:$4 sm:$0xff]   ;;  %v11450_v47 = vld [vmem:[%s14962_s1 + $0x8c] ss:$16 sps:$4 sm:$0xff]  }
  0x23   : > { %3272 = vmatpush1.bf16.msra.mxu0 %v11408_v17  ;;  %4679 = vmatprep.subr.bf16.mxu1 %v11432_v30  ;;  %v11423_v48 = vld [vmem:[%s14962_s1 + $0x100] ss:$16 sps:$4 sm:$0xff]   ;;  %v11427_v49 = vld [vmem:[%s14962_s1 + $0x124] ss:$16 sps:$4 sm:$0xff]   ;;  %v11448_v50 = vld [vmem:[%s14962_s1 + $0x88] ss:$16 sps:$4 sm:$0xff]   ;;  %v12107_v51 = vcombine.low %v789_v45, %v793_v46 }
  0x24   : > { %3273 = vmatprep.subr.bf16.mxu0 %v11409_v18  ;;  %v541_v52 = vld [vmem:[%s12005_s14 + $0x590] sm:$0xf]  ;;  %v11456_v53 = vld [vmem:[%s14962_s1 + $0xac] ss:$16 sps:$4 sm:$0xff]   ;;  %v11433_v56 = vld [vmem:[%s14962_s1 + $0x144] ss:$16 sps:$4 sm:$0xff]  }
  0x25   : > { %14993 = vst [vmem:[#allocation8_spill] sm:$0xff] %v12107_v51  ;;  %v545_v54 = vld [vmem:[%s12005_s14 + $0x5ac] sm:$0xf]  ;;  %v11429_v55 = vld [vmem:[%s14962_s1 + $0x120] ss:$16 sps:$4 sm:$0xff]   ;;  %v797_v58 = vmax.bf16 %v14981_v2, %v541_v52  ;;  %v547_v16 = vld [vmem:[%s12005_s14 + $0x5b8] sm:$0xff] }
  0x26   : > { %4680 = vmatpush1.bf16.msra.mxu1 %v11430_v31  ;;  %v11454_v57 = vld [vmem:[%s14962_s1 + $0xa8] ss:$16 sps:$4 sm:$0xff]   ;;  %v801_v59 = vmax.bf16 %v14981_v2, %v545_v54  ;;  %v11462_v60 = vld [vmem:[%s14962_s1 + $0xcc] ss:$16 sps:$4 sm:$0xff]   ;;  %v338_v61 = vld [vmem:[%s12005_s14] sm:$0xff]  ;;  %s14815_s25 = scalar_lea.vmem [#allocation2], %s9047_s24 }
  0x27   : > { %3274 = vmatpush1.bf16.msra.mxu0 %v11411_v21  ;;  %4681 = vmatprep.subr.bf16.mxu1 %v11438_v35  ;;  %v342_v62 = vld [vmem:[%s12005_s14 + $0x1c] sm:$0xff]  ;;  %v12137_v0 = vmax.bf16 %v14981_v2, %v338_v61  ;;  %v11439_v3 = vld [vmem:[%s14962_s1 + $0x164] ss:$16 sps:$4 sm:$0xff]   ;;  %v11460_v4 = vld [vmem:[%s14962_s1 + $0xc8] ss:$16 sps:$4 sm:$0xff]   ;;  %s9757_s26 = sshll.u32 %s11949_s13, 12 }
  0x28   : > { %3275 = vmatprep.subr.bf16.mxu0 %v11412_v22  ;;  %v11435_v63 = vld [vmem:[%s14962_s1 + $0x140] ss:$16 sps:$4 sm:$0xff]   ;;  %v12140_v1 = vmax.bf16 %v14981_v2, %v342_v62  ;;  %v12148_v5 = vcombine.low %v797_v58, %v801_v59  ;;  %v549_v6 = vld [vmem:[%s12005_s14 + $0x5c8] sm:$0xf]  ;;  %v11468_v7 = vld [vmem:[%s14962_s1 + $0xec] ss:$16 sps:$4 sm:$0xff]   ;;  %s14912_s29 = scalar_lea.hbm %s14970_s9, %s9757_s26 }
  0x29   : > { %9492 = vmatmul.mubr.msk.bf16.gmra.mrb[4].mxu1 %vm3168_vm0, %v12038_v24  ;;  %v553_v9 = vld [vmem:[%s12005_s14 + $0x5e4] sm:$0xf]  ;;  %v11441_v10 = vld [vmem:[%s14962_s1 + $0x160] ss:$16 sps:$4 sm:$0xff]   ;;  %v11466_v12 = vld [vmem:[%s14962_s1 + $0xe8] ss:$16 sps:$4 sm:$0xff]   ;;  %v805_v13 = vmax.bf16 %v14981_v2, %v549_v6 }
  0x2a   : > { %4586 = vmatprep.mubr.bf16.mxu1 %v14981_v2  ;;  %4682 = vmatpush1.bf16.msra.mxu1 %v11436_v37  ;;  %14994 = vst [vmem:[#allocation9_spill] sm:$0xff] %v12148_v5  ;;  %v12156_v8 = vcombine.high %v12137_v0, %v12140_v1  ;;  %v11445_v11 = vld [vmem:[%s14962_s1 + $0x184] ss:$16 sps:$4 sm:$0xff]   ;;  %v809_v14 = vmax.bf16 %v14981_v2, %v553_v9  ;;  %v11474_v15 = vld [vmem:[%s14962_s1 + $0x10c] ss:$16 sps:$4 sm:$0xff]   ;;  %s14920_s13 = scalar_lea.sflag [#allocation3], %s326_s17 }
  0x2b   : > { %3276 = vmatpush1.bf16.msra.mxu0 %v11414_v25  ;;  %4683 = vmatprep.subr.bf16.mxu1 %v11444_v40  ;;  %v11447_v17 = vld [vmem:[%s14962_s1 + $0x180] ss:$16 sps:$4 sm:$0xff]   ;;  %v11451_v18 = vld [vmem:[%s14962_s1 + $0x1a4] ss:$16 sps:$4 sm:$0xff]   ;;  %v11472_v19 = vld [vmem:[%s14962_s1 + $0x108] ss:$16 sps:$4 sm:$0xff]  }
  0x2c   : > { %3277 = vmatprep.subr.bf16.mxu0 %v11415_v29  ;;  %3297 = vmatprep.mubr.bf16.mxu0 %v12156_v8  ;;  %v12186_v20 = vcombine.low %v805_v13, %v809_v14  ;;  %v557_v21 = vld [vmem:[%s12005_s14 + $0x600] sm:$0xf]  ;;  %v11477_v22 = vld [vmem:[%s14962_s1 + $0x12c] ss:$16 sps:$4 sm:$0xff]   ;;  %v11457_v26 = vld [vmem:[%s14962_s1 + $0x1c4] ss:$16 sps:$4 sm:$0xff]  }
  0x2d   : > { %v561_v23 = vld [vmem:[%s12005_s14 + $0x61c] sm:$0xf]  ;;  %v11453_v25 = vld [vmem:[%s14962_s1 + $0x1a0] ss:$16 sps:$4 sm:$0xff]   ;;  %v11475_v27 = vld [vmem:[%s14962_s1 + $0x128] ss:$16 sps:$4 sm:$0xff]   ;;  %v813_v28 = vmax.bf16 %v14981_v2, %v557_v21 }
  0x2e   : > { %4684 = vmatpush1.bf16.msra.mxu1 %v11442_v44  ;;  %14995 = vst [vmem:[#allocation10_spill] sm:$0xff] %v12186_v20  ;;  %v817_v29 = vmax.bf16 %v14981_v2, %v561_v23  ;;  %v11480_v30 = vld [vmem:[%s14962_s1 + $0x14c] ss:$16 sps:$4 sm:$0xff]   ;;  %v11459_v31 = vld [vmem:[%s14962_s1 + $0x1c0] ss:$16 sps:$4 sm:$0xff]   ;;  %s11875_s23 = smov [#allocation2]  }
  0x2f   : > { %3278 = vmatpush1.bf16.msra.mxu0 %v11417_v34  ;;  %4685 = vmatprep.subr.bf16.mxu1 %v11450_v47  ;;  %v11463_v32 = vld [vmem:[%s14962_s1 + $0x1e4] ss:$16 sps:$4 sm:$0xff]   ;;  %v11478_v35 = vld [vmem:[%s14962_s1 + $0x148] ss:$16 sps:$4 sm:$0xff]   ;;  %v11483_v37 = vld [vmem:[%s14962_s1 + $0x16c] ss:$16 sps:$4 sm:$0xff]  }
  0x30   : > { %3279 = vmatprep.subr.bf16.mxu0 %v11418_v36  ;;  %v350_v34 = vld [vmem:[%s12005_s14 + $0x54] sm:$0xff]  ;;  %v12221_v36 = vcombine.low %v813_v28, %v817_v29  ;;  %v11465_v41 = vld [vmem:[%s14962_s1 + $0x1e0] ss:$16 sps:$4 sm:$0xff]   ;;  %v11492_v58 = vld [vmem:[%s14962_s1 + $0x1ac] ss:$16 sps:$4 sm:$0xff]   ;;  %s11814_s21 = sshll.u32 %s11875_s23, 4  ;;  %s11815_s21 = int_to_ptr.vmem [resolvable:$false] %s11814_s21 }
  0x31   : > { %9493 = vmatmul.mubr.msk.bf16.gmra.mrb[8].mxu1 %vm3168_vm0, %v12074_v38  ;;  %v565_v39 = vld [vmem:[%s12005_s14 + $0x638] sm:$0xf]  ;;  %v569_v40 = vld [vmem:[%s12005_s14 + $0x654] sm:$0xf]  ;;  %v606_v44 = vmax.bf16 %v14981_v2, %v350_v34  ;;  %v358_v54 = vld [vmem:[%s12005_s14 + $0x8c] sm:$0xff]  ;;  %s11816_s22 = scalar_lea.vmem %s11815_s21, 8192 }
  0x32   : > { %4596 = vmatprep.mubr.bf16.mxu1 %v14981_v2  ;;  %4686 = vmatpush1.bf16.msra.mxu1 %v11448_v50  ;;  %14996 = vst [vmem:[#allocation11_spill] sm:$0xff] %v12221_v36  ;;  %v11481_v45 = vld [vmem:[%s14962_s1 + $0x168] ss:$16 sps:$4 sm:$0xff]   ;;  %v821_v46 = vmax.bf16 %v14981_v2, %v565_v39  ;;  %v825_v47 = vmax.bf16 %v14981_v2, %v569_v40  ;;  %v11469_v50 = vld [vmem:[%s14962_s1 + $0x200] ss:$16 sps:$4 sm:$0xff]  }
  0x33   : > { %3280 = vmatpush1.bf16.msra.mxu0 %v11420_v42  ;;  %4687 = vmatprep.subr.bf16.mxu1 %v11456_v53  ;;  %v11471_v42 = vld [vmem:[%s14962_s1 + $0x204] ss:$16 sps:$4 sm:$0xff]   ;;  %v573_v59 = vld [vmem:[%s12005_s14 + $0x670] sm:$0xf]  ;;  %v614_v62 = vmax.bf16 %v14981_v2, %v358_v54  ;;  %v11495_v6 = vld [vmem:[%s14962_s1 + $0x1cc] ss:$16 sps:$4 sm:$0xff]  }
  0x34   : > { %3281 = vmatprep.subr.bf16.mxu0 %v11421_v43  ;;  %v602_v43 = vmax.bf16 %v14981_v2, %v346_v33  ;;  %v354_v53 = vld [vmem:[%s12005_s14 + $0x70] sm:$0xff]  ;;  %v11493_v13 = vld [vmem:[%s14962_s1 + $0x1c8] ss:$16 sps:$4 sm:$0xff]   ;;  %v593_v39 = vld [vmem:[%s12005_s14 + $0x6fc] sm:$0xf] }
  0x35   : > { %v610_v61 = vmax.bf16 %v14981_v2, %v354_v53  ;;  %v11504_v14 = vld [vmem:[%s14962_s1 + $0x264] ss:$16 sps:$4 sm:$0xff]   ;;  %v11502_v23 = vld [vmem:[%s14962_s1 + $0x260] ss:$16 sps:$4 sm:$0xff]  }
  0x36   : > { %4688 = vmatpush1.bf16.msra.mxu1 %v11454_v57  ;;  %v12254_v52 = vcombine.high %v602_v43, %v606_v44  ;;  %v12264_v57 = vcombine.low %v821_v46, %v825_v47  ;;  %v11505_v29 = vld [vmem:[%s14962_s1 + $0x280] ss:$16 sps:$4 sm:$0xff]   ;;  %v11510_v33 = vld [vmem:[%s14962_s1 + $0x2a4] ss:$16 sps:$4 sm:$0xff]  }
  0x37   : > { %3282 = vmatpush1.bf16.msra.mxu0 %v11423_v48  ;;  %4689 = vmatprep.subr.bf16.mxu1 %v11462_v60  ;;  %v11489_v48 = vld [vmem:[%s14962_s1 + $0x18c] ss:$16 sps:$4 sm:$0xff]   ;;  %v12294_v9 = vcombine.high %v610_v61, %v614_v62  ;;  %v11508_v40 = vld [vmem:[%s14962_s1 + $0x2a0] ss:$16 sps:$4 sm:$0xff]   ;;  %v11516_v53 = vld [vmem:[%s14962_s1 + $0x2e4] ss:$16 sps:$4 sm:$0xff]  }
  0x38   : > { %3283 = vmatprep.subr.bf16.mxu0 %v11427_v49  ;;  %v12248_v49 = vcombine.low %v12137_v0, %v12140_v1  ;;  %14997 = vst [vmem:[#allocation12_spill] sm:$0xff] %v12264_v57  ;;  %v577_v60 = vld [vmem:[%s12005_s14 + $0x68c] sm:$0xf]  ;;  %v11490_v0 = vld [vmem:[%s14962_s1 + $0x1a8] ss:$16 sps:$4 sm:$0xff]  }
  0x39   : > { %9494 = vmatmul.mubr.msk.bf16.gmra.mrb[12].mxu1 %vm3168_vm0, %v12107_v51  ;;  %v11501_v1 = vld [vmem:[%s14962_s1 + $0x244] ss:$16 sps:$4 sm:$0xff]   ;;  %v11511_v46 = vld [vmem:[%s14962_s1 + $0x2c0] ss:$16 sps:$4 sm:$0xff]  }
  0x3a   : > { %4606 = vmatprep.mubr.bf16.mxu1 %v14981_v2  ;;  %4690 = vmatpush1.bf16.msra.mxu1 %v11460_v4  ;;  %v833_v4 = vmax.bf16 %v14981_v2, %v577_v60  ;;  %v11519_v60 = vld [vmem:[%s14962_s1 + $0x304] ss:$16 sps:$4 sm:$0xff]  }
  0x3b   : > { %3284 = vmatpush1.bf16.msra.mxu0 %v11429_v55  ;;  %4691 = vmatprep.subr.bf16.mxu1 %v11468_v7  ;;  %v11486_v55 = vld [vmem:[%s14962_s1 + $0x224] ss:$16 sps:$4 sm:$0xff]   ;;  %v12291_v7 = vcombine.low %v602_v43, %v606_v44 }
  0x3c   : > { %3285 = vmatprep.subr.bf16.mxu0 %v11433_v56  ;;  %v11487_v56 = vld [vmem:[%s14962_s1 + $0x188] ss:$16 sps:$4 sm:$0xff]   ;;  %v11513_v43 = vld [vmem:[%s14962_s1 + $0x2c4] ss:$16 sps:$4 sm:$0xff]  }
  0x3e   : > { %4692 = vmatpush1.bf16.msra.mxu1 %v11466_v12  ;;  %v366_v12 = vld [vmem:[%s12005_s14 + $0xc4] sm:$0xff] }
  0x3f   : > { %3286 = vmatpush1.bf16.msra.mxu0 %v11435_v63  ;;  %4693 = vmatprep.subr.bf16.mxu1 %v11474_v15  ;;  %v11484_v63 = vld [vmem:[%s14962_s1 + $0x220] ss:$16 sps:$4 sm:$0xff]  }
  0x40   : > { %3287 = vmatprep.subr.bf16.mxu0 %v11439_v3  ;;  %v829_v3 = vmax.bf16 %v14981_v2, %v573_v59 }
  0x41   : > { %9495 = vmatmul.mubr.msk.bf16.gmra.mrb[16].mxu1 %vm3168_vm0, %v12148_v5 }
  0x42   : > { %4616 = vmatprep.mubr.bf16.mxu1 %v14981_v2  ;;  %4694 = vmatpush1.bf16.msra.mxu1 %v11472_v19  ;;  %v12307_v15 = vcombine.low %v829_v3, %v833_v4  ;;  %v585_v19 = vld [vmem:[%s12005_s14 + $0x6c4] sm:$0xf]  ;;  %v11520_v4 = vld [vmem:[%s14962_s1 + $0x320] ss:$16 sps:$4 sm:$0xff]  }
  0x43   : > { %3288 = vmatpush1.bf16.msra.mxu0 %v11441_v10  ;;  %4695 = vmatprep.subr.bf16.mxu1 %v11477_v22  ;;  %v362_v10 = vld [vmem:[%s12005_s14 + $0xa8] sm:$0xff]  ;;  %v622_v22 = vmax.bf16 %v14981_v2, %v366_v12  ;;  %v841_v28 = vmax.bf16 %v14981_v2, %v585_v19 }
  0x44   : > { %3289 = vmatprep.subr.bf16.mxu0 %v11445_v11  ;;  %v11499_v11 = vld [vmem:[%s14962_s1 + $0x240] ss:$16 sps:$4 sm:$0xff]   ;;  %14998 = vst [vmem:[#allocation13_spill] sm:$0xff] %v12307_v15  ;;  %v618_v21 = vmax.bf16 %v14981_v2, %v362_v10  ;;  %v11525_v10 = vld [vmem:[%s14962_s1 + $0x344] ss:$16 sps:$4 sm:$0xff]  }
  0x46   : > { %4696 = vmatpush1.bf16.msra.mxu1 %v11475_v27  ;;  %v12342_v34 = vcombine.high %v618_v21, %v622_v22  ;;  %v12365_v47 = vcombine.low %v618_v21, %v622_v22  ;;  %v406_v21 = vld [vmem:[%s12005_s14 + $0x1dc] sm:$0xff] }
  0x47   : > { %3290 = vmatpush1.bf16.msra.mxu0 %v11447_v17  ;;  %4697 = vmatprep.subr.bf16.mxu1 %v11480_v30  ;;  %v11498_v17 = vld [vmem:[%s14962_s1 + $0x1ec] ss:$16 sps:$4 sm:$0xff]   ;;  %v12334_v30 = vcombine.low %v610_v61, %v614_v62  ;;  %v11517_v61 = vld [vmem:[%s14962_s1 + $0x300] ss:$16 sps:$4 sm:$0xff]  }
  0x48   : > { %3291 = vmatprep.subr.bf16.mxu0 %v11451_v18  ;;  %v581_v18 = vld [vmem:[%s12005_s14 + $0x6a8] sm:$0xf] }
  0x49   : > { %9496 = vmatmul.mubr.msk.bf16.gmra.mrb[20].mxu1 %vm3168_vm0, %v12186_v20  ;;  %v837_v27 = vmax.bf16 %v14981_v2, %v581_v18 }
  0x4a   : > { %4626 = vmatprep.mubr.bf16.mxu1 %v14981_v2  ;;  %4698 = vmatpush1.bf16.msra.mxu1 %v11478_v35  ;;  %v589_v35 = vld [vmem:[%s12005_s14 + $0x6e0] sm:$0xf] }
  0x4b   : > { %3292 = vmatpush1.bf16.msra.mxu0 %v11453_v25  ;;  %4699 = vmatprep.subr.bf16.mxu1 %v11483_v37  ;;  %v11496_v25 = vld [vmem:[%s14962_s1 + $0x1e8] ss:$16 sps:$4 sm:$0xff]   ;;  %v12345_v37 = vcombine.low %v837_v27, %v841_v28  ;;  %v845_v44 = vmax.bf16 %v14981_v2, %v589_v35  ;;  %v422_v35 = vld [vmem:[%s12005_s14 + $0x24c] sm:$0xff] }
  0x4c   : > { %3293 = vmatprep.subr.bf16.mxu0 %v11457_v26  ;;  %v11507_v26 = vld [vmem:[%s14962_s1 + $0x284] ss:$16 sps:$4 sm:$0xff]   ;;  %v410_v27 = vld [vmem:[%s12005_s14 + $0x1f8] sm:$0xff] }
  0x4d   : > { %14999 = vst [vmem:[#allocation14_spill] sm:$0xff] %v12345_v37  ;;  %v414_v28 = vld [vmem:[%s12005_s14 + $0x214] sm:$0xff] }
  0x4e   : > { %4700 = vmatpush1.bf16.msra.mxu1 %v11481_v45  ;;  %v849_v45 = vmax.bf16 %v14981_v2, %v593_v39 }
  0x4f   : > { %3294 = vmatpush1.bf16.msra.mxu0 %v11459_v31  ;;  %4701 = vmatprep.subr.bf16.mxu1 %v11489_v48  ;;  %v370_v31 = vld [vmem:[%s12005_s14 + $0xe0] sm:$0xff]  ;;  %v378_v48 = vld [vmem:[%s12005_s14 + $0x118] sm:$0xff] }
  0x50   : > { %3295 = vmatprep.subr.bf16.mxu0 %v11463_v32  ;;  %v374_v32 = vld [vmem:[%s12005_s14 + $0xfc] sm:$0xff] }
  0x51   : > { %9497 = vmatmul.mubr.msk.bf16.gmra.mrb[24].mxu1 %vm3168_vm0, %v12221_v36 }
  0x52   : > { %4636 = vmatprep.mubr.bf16.mxu1 %v14981_v2  ;;  %4702 = vmatpush1.bf16.msra.mxu1 %v11487_v56  ;;  %v11514_v56 = vld [vmem:[%s14962_s1 + $0x2e0] ss:$16 sps:$4 sm:$0xff]  }
  0x53   : > { %3296 = vmatpush1.bf16.msra.mxu0 %v11465_v41  ;;  %4703 = vmatprep.subr.bf16.mxu1 %v11492_v58  ;;  %v626_v41 = vmax.bf16 %v14981_v2, %v370_v31  ;;  %v634_v58 = vmax.bf16 %v14981_v2, %v378_v48  ;;  %v666_v31 = vmax.bf16 %v14981_v2, %v410_v27  ;;  %v11544_v27 = vld [vmem:[%s14962_s1 + $0x248] ss:$16 sps:$4 sm:$0xff]  }
  0x54   : > { %3618 = vmatprep.subr.bf16.mxu0 %v11471_v42  ;;  %v630_v42 = vmax.bf16 %v14981_v2, %v374_v32  ;;  %v670_v32 = vmax.bf16 %v14981_v2, %v414_v28  ;;  %v11549_v28 = vld [vmem:[%s14962_s1 + $0x26c] ss:$16 sps:$4 sm:$0xff]  }
  0x56   : > { %3298 = vmatmul.mubr.bf16.vlgmr.msra.gmra.mrb[0].mxu0 %v12248_v49  ;;  %4704 = vmatpush1.bf16.msra.mxu1 %v11490_v0  ;;  %v12373_v54 = vcombine.high %v626_v41, %v630_v42  ;;  %v12392_v62 = vcombine.low %v626_v41, %v630_v42  ;;  %v390_v0 = vld [vmem:[%s12005_s14 + $0x16c] sm:$0xff]  ;;  %v9114_v39 = vcombine.high %v666_v31, %v670_v32 }
  0x57   : > { %3619 = vmatpush1.bf16.msra.mxu0 %v11469_v50  ;;  %3307 = vmatprep.mubr.bf16.mxu0 %v12254_v52  ;;  %v382_v50 = vld [vmem:[%s12005_s14 + $0x134] sm:$0xff]  ;;  %v678_v42 = vmax.bf16 %v14981_v2, %v422_v35  ;;  %v11550_v35 = vld [vmem:[%s14962_s1 + $0x3e0] ss:$16 sps:$4 sm:$0xff]  }
  0x58   : > { %3620 = vmatprep.subr.bf16.mxu0 %v11486_v55  ;;  %4705 = vmatprep.subr.bf16.mxu1 %v11495_v6  ;;  %v12375_v55 = vcombine.low %v845_v44, %v849_v45  ;;  %v638_v59 = vmax.bf16 %v14981_v2, %v382_v50  ;;  %v646_v6 = vmax.bf16 %v14981_v2, %v390_v0  ;;  %v426_v44 = vld [vmem:[%s12005_s14 + $0x268] sm:$0xff]  ;;  %v446_v0 = vld [vmem:[%s12005_s14 + $0x2f4] sm:$0xff] }
  0x59   : > { %9498 = vmatmul.mubr.msk.bf16.gmra.mrb[28].mxu1 %vm3168_vm0, %v12264_v57  ;;  %v430_v45 = vld [vmem:[%s12005_s14 + $0x284] sm:$0xff]  ;;  %v423_v57 = vld [vmem:[%s12005_s14 + $0x254] sm:$0xff] }
  0x5a   : > { %4646 = vmatprep.mubr.bf16.mxu1 %v14981_v2  ;;  %4706 = vmatpush1.bf16.msra.mxu1 %v11493_v13  ;;  %15000 = vst [vmem:[#allocation15_spill] sm:$0xff] %v12375_v55  ;;  %v12400_v3 = vcombine.high %v634_v58, %v638_v59  ;;  %v9085_v12 = vcombine.low %v634_v58, %v638_v59  ;;  %v394_v13 = vld [vmem:[%s12005_s14 + $0x188] sm:$0xff]  ;;  %v11532_v58 = vld [vmem:[%s14962_s1 + $0x3a0] ss:$16 sps:$4 sm:$0xff]   ;;  %v11534_v59 = vld [vmem:[%s14962_s1 + $0x3a4] ss:$16 sps:$4 sm:$0xff]  }
  0x5b   : > { %3621 = vmatpush1.bf16.msra.mxu0 %v11484_v63  ;;  %4707 = vmatprep.subr.bf16.mxu1 %v11498_v17  ;;  %v386_v63 = vld [vmem:[%s12005_s14 + $0x150] sm:$0xff]  ;;  %v650_v18 = vmax.bf16 %v14981_v2, %v394_v13  ;;  %v686_v48 = vmax.bf16 %v14981_v2, %v430_v45 }
  0x5c   : > { %3622 = vmatprep.subr.bf16.mxu0 %v11501_v1  ;;  %v11522_v1 = vld [vmem:[%s14962_s1 + $0x324] ss:$16 sps:$4 sm:$0xff]  }
  0x5d   : > { %v11537_v13 = vld [vmem:[%s14962_s1 + $0x3c4] ss:$16 sps:$4 sm:$0xff]  }
  0x5e   : > { %3308 = vmatmul.mubr.bf16.gmra.mrb[4].mxu0 %v12291_v7  ;;  %4708 = vmatpush1.bf16.msra.mxu1 %v11496_v25  ;;  %v11528_v25 = vld [vmem:[%s14962_s1 + $0x364] ss:$16 sps:$4 sm:$0xff]  }
  0x5f   : > { %3317 = vmatprep.mubr.bf16.mxu0 %v12294_v9  ;;  %3623 = vmatpush1.bf16.msra.mxu0 %v11499_v11  ;;  %v11523_v11 = vld [vmem:[%s14962_s1 + $0x340] ss:$16 sps:$4 sm:$0xff]  }
  0x60   : > { %3624 = vmatprep.subr.bf16.mxu0 %v11504_v14  ;;  %v398_v14 = vld [vmem:[%s12005_s14 + $0x1a4] sm:$0xff] }
  0x61   : > { %9499 = vmatmul.mubr.msk.bf16.gmra.mrb[32].mxu1 %vm3168_vm0, %v12307_v15  ;;  %v419_v15 = vld [vmem:[%s12005_s14 + $0x238] sm:$0xff] }
  0x62   : > { %4656 = vmatprep.mubr.bf16.mxu1 %v14981_v2 }
  0x63   : > { %3625 = vmatpush1.bf16.msra.mxu0 %v11502_v23  ;;  %v11526_v23 = vld [vmem:[%s14962_s1 + $0x360] ss:$16 sps:$4 sm:$0xff]  }
  0x64   : > { %3626 = vmatprep.subr.bf16.mxu0 %v11507_v26  ;;  %v662_v26 = vmax.bf16 %v14981_v2, %v406_v21 }
  0x66   : > { %3318 = vmatmul.mubr.bf16.gmra.mrb[8].mxu0 %v12334_v30 }
  0x67   : > { %3327 = vmatprep.mubr.bf16.mxu0 %v12342_v34  ;;  %3627 = vmatpush1.bf16.msra.mxu0 %v11505_v29 }
  0x68   : > { %3628 = vmatprep.subr.bf16.mxu0 %v11510_v33 }
  0x69   : > { %9500 = vmatmul.mubr.msk.bf16.gmra.mrb[36].mxu1 %vm3168_vm0, %v12345_v37 }
  0x6a   : > { %4666 = vmatprep.mubr.bf16.mxu1 %v14981_v2 }
  0x6b   : > { %3629 = vmatpush1.bf16.msra.mxu0 %v11508_v40  ;;  %v11531_v40 = vld [vmem:[%s14962_s1 + $0x384] ss:$16 sps:$4 sm:$0xff]  }
  0x6c   : > { %3630 = vmatprep.subr.bf16.mxu0 %v11513_v43  ;;  %v12452_v43 = vcombine.low %v666_v31, %v670_v32  ;;  %v11547_v32 = vld [vmem:[%s14962_s1 + $0x268] ss:$16 sps:$4 sm:$0xff]  }
  0x6e   : > { %3328 = vmatmul.mubr.bf16.gmra.mrb[12].mxu0 %v12365_v47 }
  0x6f   : > { %3337 = vmatprep.mubr.bf16.mxu0 %v12373_v54  ;;  %3631 = vmatpush1.bf16.msra.mxu0 %v11511_v46 }
  0x70   : > { %3632 = vmatprep.subr.bf16.mxu0 %v11516_v53  ;;  %v434_v53 = vld [vmem:[%s12005_s14 + $0x2a0] sm:$0xff] }
  0x71   : > { %9501 = vmatmul.mubr.msk.bf16.gmra.mrb[40].mxu1 %vm3168_vm0, %v12375_v55 }
  0x72   : > { %4709 = vmatprep.mubr.bf16.mxu1 %v12156_v8  ;;  %v642_v8 = vmax.bf16 %v14981_v2, %v386_v63  ;;  %v442_v63 = vld [vmem:[%s12005_s14 + $0x2d8] sm:$0xff] }
  0x73   : > { %3633 = vmatpush1.bf16.msra.mxu0 %v11514_v56 }
  0x74   : > { %3634 = vmatprep.subr.bf16.mxu0 %v11519_v60  ;;  %v9093_v17 = vcombine.high %v642_v8, %v646_v6  ;;  %v9092_v19 = vcombine.low %v642_v8, %v646_v6  ;;  %v690_v60 = vmax.bf16 %v14981_v2, %v434_v53  ;;  %v450_v6 = vld [vmem:[%s12005_s14 + $0x310] sm:$0xff] }
  0x76   : > { %3338 = vmatmul.mubr.bf16.gmra.mrb[16].mxu0 %v12392_v62 }
  0x77   : > { %3347 = vmatprep.mubr.bf16.mxu0 %v12400_v3  ;;  %3635 = vmatpush1.bf16.msra.mxu0 %v11517_v61 }
  0x78   : > { %3636 = vmatprep.subr.bf16.mxu0 %v11522_v1 }
  0x79   : > { %4710 = vmatmul.mubr.bf16.vlgmr.msra.gmra.mrb[44].mxu1 %v12248_v49  ;;  %v654_v49 = vmax.bf16 %v14981_v2, %v398_v14  ;;  %v706_v14 = vmax.bf16 %v14981_v2, %v450_v6  ;;  %v11568_v6 = vld [vmem:[%s14962_s1 + $0x308] ss:$16 sps:$4 sm:$0xff]  }
  0x7a   : > { %4719 = vmatprep.mubr.bf16.mxu1 %v12254_v52  ;;  %v402_v52 = vld [vmem:[%s12005_s14 + $0x1c0] sm:$0xff] }
  0x7b   : > { %3637 = vmatpush1.bf16.msra.mxu0 %v11520_v4  ;;  %v9100_v22 = vcombine.high %v650_v18, %v654_v49  ;;  %v702_v4 = vmax.bf16 %v14981_v2, %v446_v0  ;;  %v486_v0 = vld [vmem:[%s12005_s14 + $0x40c] sm:$0xff] }
  0x7c   : > { %3638 = vmatprep.subr.bf16.mxu0 %v11525_v10 }
  0x7e   : > { %3348 = vmatmul.mubr.bf16.gmra.mrb[20].mxu0 %v9085_v12 }
  0x7f   : > { %3357 = vmatprep.mubr.bf16.mxu0 %v9093_v17  ;;  %3639 = vmatpush1.bf16.msra.mxu0 %v11523_v11  ;;  %v454_v11 = vld [vmem:[%s12005_s14 + $0x32c] sm:$0xff] }
  0x80   : > { %3640 = vmatprep.subr.bf16.mxu0 %v11528_v25  ;;  %v462_v25 = vld [vmem:[%s12005_s14 + $0x364] sm:$0xff] }
  0x81   : > { %4720 = vmatmul.mubr.bf16.gmra.mrb[48].mxu1 %v12291_v7  ;;  %v658_v7 = vmax.bf16 %v14981_v2, %v402_v52 }
  0x82   : > { %4729 = vmatprep.mubr.bf16.mxu1 %v12294_v9  ;;  %v9099_v9 = vcombine.low %v650_v18, %v654_v49  ;;  %v11540_v18 = vld [vmem:[%s14962_s1 + $0x20c] ss:$16 sps:$4 sm:$0xff]   ;;  %v11538_v49 = vld [vmem:[%s14962_s1 + $0x208] ss:$16 sps:$4 sm:$0xff]  }
  0x83   : > { %3641 = vmatpush1.bf16.msra.mxu0 %v11526_v23  ;;  %v9107_v29 = vcombine.high %v658_v7, %v662_v26  ;;  %v9106_v33 = vcombine.low %v658_v7, %v662_v26  ;;  %5030 = vmatprep.subr.bf16.mxu1 %v11540_v18  ;;  %v458_v23 = vld [vmem:[%s12005_s14 + $0x348] sm:$0xff]  ;;  %v718_v26 = vmax.bf16 %v14981_v2, %v462_v25 }
  0x84   : > { %3642 = vmatprep.subr.bf16.mxu0 %v11531_v40  ;;  %5031 = vmatpush1.bf16.msra.mxu1 %v11538_v49  ;;  %v714_v7 = vmax.bf16 %v14981_v2, %v458_v23  ;;  %v494_v18 = vld [vmem:[%s12005_s14 + $0x444] sm:$0xff]  ;;  %v11576_v49 = vld [vmem:[%s14962_s1 + $0x34c] ss:$16 sps:$4 sm:$0xff]  }
  0x86   : > { %3358 = vmatmul.mubr.bf16.gmra.mrb[24].mxu0 %v9092_v19  ;;  %v12540_v31 = vcombine.high %v714_v7, %v718_v26 }
  0x87   : > { %3367 = vmatprep.mubr.bf16.mxu0 %v9100_v22 }
  0x89   : > { %4730 = vmatmul.mubr.bf16.gmra.mrb[52].mxu1 %v12334_v30  ;;  %v418_v30 = vld [vmem:[%s12005_s14 + $0x230] sm:$0xff] }
  0x8a   : > { %4739 = vmatprep.mubr.bf16.mxu1 %v12342_v34  ;;  %v11529_v34 = vld [vmem:[%s14962_s1 + $0x380] ss:$16 sps:$4 sm:$0xff]   ;;  %v674_v41 = vmax.bf16 %v14981_v2, %v418_v30 }
  0x8b   : > { %3643 = vmatpush1.bf16.msra.mxu0 %v11529_v34  ;;  %v470_v30 = vld [vmem:[%s12005_s14 + $0x39c] sm:$0xff] }
  0x8c   : > { %v12457_v46 = vcombine.high %v674_v41, %v678_v42  ;;  %v12463_v50 = vcombine.low %v674_v41, %v678_v42  ;;  %3644 = vmatprep.subr.bf16.mxu0 %v11534_v59  ;;  %v726_v40 = vmax.bf16 %v14981_v2, %v470_v30  ;;  %v11555_v41 = vld [vmem:[%s14962_s1 + $0x28c] ss:$16 sps:$4 sm:$0xff]   ;;  %v11553_v42 = vld [vmem:[%s14962_s1 + $0x288] ss:$16 sps:$4 sm:$0xff]  }
  0x8e   : > { %3368 = vmatmul.mubr.bf16.gmra.mrb[28].mxu0 %v9099_v9 }
  0x8f   : > { %3377 = vmatprep.mubr.bf16.mxu0 %v9107_v29  ;;  %3645 = vmatpush1.bf16.msra.mxu0 %v11532_v58  ;;  %v11564_v58 = vld [vmem:[%s14962_s1 + $0x2ec] ss:$16 sps:$4 sm:$0xff]  }
  0x90   : > { %3646 = vmatprep.subr.bf16.mxu0 %v11537_v13 }
  0x91   : > { %4740 = vmatmul.mubr.bf16.gmra.mrb[56].mxu1 %v12365_v47  ;;  %v682_v47 = vmax.bf16 %v14981_v2, %v426_v44  ;;  %v12567_v44 = vcombine.low %v714_v7, %v718_v26  ;;  %v11577_v7 = vld [vmem:[%s14962_s1 + $0x368] ss:$16 sps:$4 sm:$0xff]   ;;  %v498_v26 = vld [vmem:[%s12005_s14 + $0x460] sm:$0xff] }
  0x92   : > { %4749 = vmatprep.mubr.bf16.mxu1 %v12373_v54  ;;  %v438_v54 = vld [vmem:[%s12005_s14 + $0x2bc] sm:$0xff] }
  0x93   : > { %v12467_v56 = vcombine.high %v682_v47, %v686_v48  ;;  %v694_v61 = vmax.bf16 %v14981_v2, %v438_v54  ;;  %v11561_v54 = vld [vmem:[%s14962_s1 + $0x2cc] ss:$16 sps:$4 sm:$0xff]  }
  0x95   : > { %v12483_v1 = vcombine.high %v690_v60, %v694_v61  ;;  %v12489_v8 = vcombine.low %v690_v60, %v694_v61  ;;  %v11562_v61 = vld [vmem:[%s14962_s1 + $0x2e8] ss:$16 sps:$4 sm:$0xff]  }
  0x96   : > { %3378 = vmatmul.mubr.bf16.gmra.mrb[32].mxu0 %v9106_v33 }
  0x97   : > { %3387 = vmatprep.mubr.bf16.mxu0 %v9114_v39 }
  0x99   : > { %4750 = vmatmul.mubr.bf16.gmra.mrb[60].mxu1 %v12392_v62  ;;  %v12479_v62 = vcombine.low %v682_v47, %v686_v48  ;;  %v474_v47 = vld [vmem:[%s12005_s14 + $0x3b8] sm:$0xff] }
  0x9a   : > { %4759 = vmatprep.mubr.bf16.mxu1 %v12400_v3  ;;  %v698_v3 = vmax.bf16 %v14981_v2, %v442_v63  ;;  %v478_v48 = vld [vmem:[%s12005_s14 + $0x3d4] sm:$0xff] }
  0x9b   : > { %v734_v53 = vmax.bf16 %v14981_v2, %v478_v48  ;;  %v482_v63 = vld [vmem:[%s12005_s14 + $0x3f0] sm:$0xff] }
  0x9c   : > { %v12492_v10 = vcombine.high %v698_v3, %v702_v4  ;;  %v12514_v52 = vcombine.low %v698_v3, %v702_v4  ;;  %v742_v3 = vmax.bf16 %v14981_v2, %v486_v0  ;;  %v11570_v4 = vld [vmem:[%s14962_s1 + $0x30c] ss:$16 sps:$4 sm:$0xff]   ;;  %v514_v48 = vld [vmem:[%s12005_s14 + $0x4d0] sm:$0xff] }
  0x9e   : > { %3388 = vmatmul.mubr.bf16.gmra.mrb[36].mxu0 %v12452_v43 }
  0x9f   : > { %3397 = vmatprep.mubr.bf16.mxu0 %v12457_v46 }
  0xa1   : > { %4760 = vmatmul.mubr.bf16.gmra.mrb[64].mxu1 %v9085_v12  ;;  %v11535_v12 = vld [vmem:[%s14962_s1 + $0x3c0] ss:$16 sps:$4 sm:$0xff]  }
  0xa2   : > { %4769 = vmatprep.mubr.bf16.mxu1 %v9093_v17  ;;  %v710_v17 = vmax.bf16 %v14981_v2, %v454_v11  ;;  %3647 = vmatpush1.bf16.msra.mxu0 %v11535_v12  ;;  %v11573_v11 = vld [vmem:[%s14962_s1 + $0x32c] ss:$16 sps:$4 sm:$0xff]  }
  0xa4   : > { %v12516_v21 = vcombine.high %v706_v14, %v710_v17 }
  0xa6   : > { %3398 = vmatmul.mubr.bf16.gmra.mrb[40].mxu0 %v12463_v50 }
  0xa7   : > { %3407 = vmatprep.mubr.bf16.mxu0 %v12467_v56 }
  0xa9   : > { %4770 = vmatmul.mubr.bf16.gmra.mrb[68].mxu1 %v9092_v19  ;;  %v11543_v19 = vld [vmem:[%s14962_s1 + $0x22c] ss:$16 sps:$4 sm:$0xff]  }
  0xaa   : > { %4779 = vmatprep.mubr.bf16.mxu1 %v9100_v22  ;;  %v11541_v22 = vld [vmem:[%s14962_s1 + $0x228] ss:$16 sps:$4 sm:$0xff]   ;;  %5032 = vmatprep.subr.bf16.mxu1 %v11543_v19 }
  0xab   : > { %5033 = vmatpush1.bf16.msra.mxu1 %v11541_v22  ;;  %v11574_v19 = vld [vmem:[%s14962_s1 + $0x348] ss:$16 sps:$4 sm:$0xff]   ;;  %v11579_v22 = vld [vmem:[%s14962_s1 + $0x36c] ss:$16 sps:$4 sm:$0xff]  }
  0xae   : > { %3408 = vmatmul.mubr.bf16.gmra.mrb[44].mxu0 %v12479_v62 }
  0xaf   : > { %3417 = vmatprep.mubr.bf16.mxu0 %v12483_v1 }
  0xb1   : > { %4780 = vmatmul.mubr.bf16.gmra.mrb[72].mxu1 %v9099_v9  ;;  %v11546_v9 = vld [vmem:[%s14962_s1 + $0x24c] ss:$16 sps:$4 sm:$0xff]  }
  0xb2   : > { %4789 = vmatprep.mubr.bf16.mxu1 %v9107_v29  ;;  %5034 = vmatprep.subr.bf16.mxu1 %v11546_v9  ;;  %v12537_v29 = vcombine.low %v706_v14, %v710_v17  ;;  %v11571_v14 = vld [vmem:[%s14962_s1 + $0x328] ss:$16 sps:$4 sm:$0xff]   ;;  %v502_v9 = vld [vmem:[%s12005_s14 + $0x47c] sm:$0xff] }
  0xb3   : > { %5035 = vmatpush1.bf16.msra.mxu1 %v11544_v27  ;;  %v490_v17 = vld [vmem:[%s12005_s14 + $0x428] sm:$0xff] }
  0xb4   : > { %5036 = vmatprep.subr.bf16.mxu1 %v11549_v28  ;;  %v11585_v27 = vld [vmem:[%s14962_s1 + $0x38c] ss:$16 sps:$4 sm:$0xff]   ;;  %v11583_v28 = vld [vmem:[%s14962_s1 + $0x388] ss:$16 sps:$4 sm:$0xff]  }
  0xb6   : > { %3418 = vmatmul.mubr.bf16.gmra.mrb[48].mxu0 %v12489_v8 }
  0xb7   : > { %3427 = vmatprep.mubr.bf16.mxu0 %v12492_v10  ;;  %5037 = vmatpush1.bf16.msra.mxu1 %v11547_v32  ;;  %v11588_v32 = vld [vmem:[%s14962_s1 + $0x3ac] ss:$16 sps:$4 sm:$0xff]  }
  0xb8   : > { %5038 = vmatprep.subr.bf16.mxu1 %v11555_v41  ;;  %v11589_v41 = vld [vmem:[%s14962_s1 + $0x3c8] ss:$16 sps:$4 sm:$0xff]  }
  0xb9   : > { %4790 = vmatmul.mubr.bf16.gmra.mrb[76].mxu1 %v9106_v33  ;;  %v466_v33 = vld [vmem:[%s12005_s14 + $0x380] sm:$0xff] }
  0xba   : > { %4799 = vmatprep.mubr.bf16.mxu1 %v9114_v39  ;;  %v11552_v39 = vld [vmem:[%s14962_s1 + $0x3e4] ss:$16 sps:$4 sm:$0xff]   ;;  %v722_v34 = vmax.bf16 %v14981_v2, %v466_v33 }
  0xbb   : > { %3648 = vmatprep.subr.bf16.mxu0 %v11552_v39  ;;  %5039 = vmatpush1.bf16.msra.mxu1 %v11553_v42  ;;  %v506_v39 = vld [vmem:[%s12005_s14 + $0x498] sm:$0xff] }
  0xbc   : > { %3649 = vmatpush1.bf16.msra.mxu0 %v11550_v35  ;;  %v12570_v45 = vcombine.high %v722_v34, %v726_v40  ;;  %v12591_v59 = vcombine.low %v722_v34, %v726_v40  ;;  %v11586_v35 = vld [vmem:[%s14962_s1 + $0x3a8] ss:$16 sps:$4 sm:$0xff]   ;;  %v11594_v42 = vld [vmem:[%s14962_s1 + $0x3ec] ss:$16 sps:$4 sm:$0xff]  }
  0xbd   : > { %v510_v34 = vld [vmem:[%s12005_s14 + $0x4b4] sm:$0xff] }
  0xbe   : > { %3428 = vmatmul.mubr.bf16.gmra.mrb[52].mxu0 %v12514_v52  ;;  %v766_v40 = vmax.bf16 %v14981_v2, %v510_v34  ;;  %v574_v34 = vld [vmem:[%s12005_s14 + $0x674] sm:$0xff] }
  0xbf   : > { %3437 = vmatprep.mubr.bf16.mxu0 %v12516_v21 }
  0xc1   : > { %4800 = vmatmul.mubr.bf16.gmra.mrb[80].mxu1 %v12452_v43  ;;  %v11558_v43 = vld [vmem:[%s14962_s1 + $0x2ac] ss:$16 sps:$4 sm:$0xff]  }
  0xc2   : > { %4809 = vmatprep.mubr.bf16.mxu1 %v12457_v46  ;;  %v11556_v46 = vld [vmem:[%s14962_s1 + $0x2a8] ss:$16 sps:$4 sm:$0xff]   ;;  %5040 = vmatprep.subr.bf16.mxu1 %v11558_v43 }
  0xc3   : > { %5041 = vmatpush1.bf16.msra.mxu1 %v11556_v46 }
  0xc4   : > { %5042 = vmatprep.subr.bf16.mxu1 %v11561_v54 }
  0xc6   : > { %3438 = vmatmul.mubr.bf16.gmra.mrb[56].mxu0 %v12537_v29 }
  0xc7   : > { %3447 = vmatprep.mubr.bf16.mxu0 %v12540_v31 }
  0xc9   : > { %4810 = vmatmul.mubr.bf16.gmra.mrb[84].mxu1 %v12463_v50  ;;  %v730_v50 = vmax.bf16 %v14981_v2, %v474_v47  ;;  %v11592_v47 = vld [vmem:[%s14962_s1 + $0x3e8] ss:$16 sps:$4 sm:$0xff]  }
  0xca   : > { %4819 = vmatprep.mubr.bf16.mxu1 %v12467_v56  ;;  %v11559_v56 = vld [vmem:[%s14962_s1 + $0x2c8] ss:$16 sps:$4 sm:$0xff]  }
  0xcb   : > { %v12594_v60 = vcombine.high %v730_v50, %v734_v53  ;;  %5043 = vmatpush1.bf16.msra.mxu1 %v11559_v56  ;;  %v12618_v12 = vcombine.low %v730_v50, %v734_v53  ;;  %v518_v50 = vld [vmem:[%s12005_s14 + $0x4ec] sm:$0xff] }
  0xcc   : > { %5044 = vmatprep.subr.bf16.mxu1 %v11564_v58  ;;  %v774_v53 = vmax.bf16 %v14981_v2, %v518_v50  ;;  %v522_v56 = vld [vmem:[%s12005_s14 + $0x508] sm:$0xff] }
  0xcd   : > { %v526_v58 = vld [vmem:[%s12005_s14 + $0x524] sm:$0xff] }
  0xce   : > { %3448 = vmatmul.mubr.bf16.gmra.mrb[60].mxu0 %v12567_v44 }
  0xcf   : > { %3457 = vmatprep.mubr.bf16.mxu0 %v12570_v45  ;;  %5045 = vmatpush1.bf16.msra.mxu1 %v11562_v61  ;;  %v778_v61 = vmax.bf16 %v14981_v2, %v522_v56 }
  0xd0   : > { %5046 = vmatprep.subr.bf16.mxu1 %v11570_v4 }
  0xd1   : > { %4820 = vmatmul.mubr.bf16.gmra.mrb[88].mxu1 %v12479_v62  ;;  %v11567_v62 = vld [vmem:[%s14962_s1 + $0x404] ss:$16 sps:$4 sm:$0xff]  }
  0xd2   : > { %4829 = vmatprep.mubr.bf16.mxu1 %v12483_v1  ;;  %v738_v1 = vmax.bf16 %v14981_v2, %v482_v63  ;;  %3971 = vmatprep.subr.bf16.mxu0 %v11567_v62  ;;  %v782_v63 = vmax.bf16 %v14981_v2, %v526_v58  ;;  %v530_v62 = vld [vmem:[%s12005_s14 + $0x540] sm:$0xff] }
  0xd3   : > { %5047 = vmatpush1.bf16.msra.mxu1 %v11568_v6 }
  0xd4   : > { %v12621_v13 = vcombine.high %v738_v1, %v742_v3  ;;  %5048 = vmatprep.subr.bf16.mxu1 %v11573_v11  ;;  %v12642_v23 = vcombine.low %v738_v1, %v742_v3  ;;  %v534_v1 = vld [vmem:[%s12005_s14 + $0x55c] sm:$0xff]  ;;  %v9211_v4 = vcombine.low %v778_v61, %v782_v63 }
  0xd5   : > { %v790_v3 = vmax.bf16 %v14981_v2, %v534_v1  ;;  %v538_v11 = vld [vmem:[%s12005_s14 + $0x578] sm:$0xff] }
  0xd6   : > { %3458 = vmatmul.mubr.bf16.gmra.mrb[64].mxu0 %v12591_v59 }
  0xd7   : > { %3467 = vmatprep.mubr.bf16.mxu0 %v12594_v60  ;;  %5049 = vmatpush1.bf16.msra.mxu1 %v11571_v14 }
  0xd8   : > { %5050 = vmatprep.subr.bf16.mxu1 %v11576_v49 }
  0xd9   : > { %4830 = vmatmul.mubr.bf16.gmra.mrb[92].mxu1 %v12489_v8  ;;  %v746_v8 = vmax.bf16 %v14981_v2, %v490_v17 }
  0xda   : > { %4839 = vmatprep.mubr.bf16.mxu1 %v12492_v10  ;;  %v750_v10 = vmax.bf16 %v14981_v2, %v494_v18 }
  0xdb   : > { %5051 = vmatpush1.bf16.msra.mxu1 %v11574_v19 }
  0xdc   : > { %v12645_v25 = vcombine.high %v746_v8, %v750_v10  ;;  %5052 = vmatprep.subr.bf16.mxu1 %v11579_v22  ;;  %v9183_v33 = vcombine.low %v746_v8, %v750_v10  ;;  %v546_v8 = vld [vmem:[%s12005_s14 + $0x5b0] sm:$0xff] }
  0xdd   : > { %v550_v10 = vld [vmem:[%s12005_s14 + $0x5cc] sm:$0xff]  ;;  %v802_v49 = vmax.bf16 %v14981_v2, %v546_v8 }
  0xde   : > { %3468 = vmatmul.mubr.bf16.gmra.mrb[68].mxu0 %v12618_v12  ;;  %v806_v19 = vmax.bf16 %v14981_v2, %v550_v10  ;;  %v355_v10 = vld [vmem:[%s12005_s14 + $0x78] sm:$0xff] }
  0xdf   : > { %3477 = vmatprep.mubr.bf16.mxu0 %v12621_v13  ;;  %5053 = vmatpush1.bf16.msra.mxu1 %v11577_v7  ;;  %v558_v7 = vld [vmem:[%s12005_s14 + $0x604] sm:$0xff] }
  0xe0   : > { %5054 = vmatprep.subr.bf16.mxu1 %v11585_v27  ;;  %v562_v27 = vld [vmem:[%s12005_s14 + $0x620] sm:$0xff] }
  0xe1   : > { %4840 = vmatmul.mubr.bf16.gmra.mrb[96].mxu1 %v12514_v52  ;;  %v754_v52 = vmax.bf16 %v14981_v2, %v498_v26 }
  0xe2   : > { %4849 = vmatprep.mubr.bf16.mxu1 %v12516_v21  ;;  %v758_v21 = vmax.bf16 %v14981_v2, %v502_v9  ;;  %v814_v9 = vmax.bf16 %v14981_v2, %v558_v7  ;;  %v11580_v7 = vld [vmem:[%s14962_s1 + $0x420] ss:$16 sps:$4 sm:$0xff]  }
  0xe3   : > { %5055 = vmatpush1.bf16.msra.mxu1 %v11583_v28  ;;  %v566_v28 = vld [vmem:[%s12005_s14 + $0x63c] sm:$0xff] }
  0xe4   : > { %v9191_v30 = vcombine.high %v754_v52, %v758_v21  ;;  %5056 = vmatprep.subr.bf16.mxu1 %v11588_v32  ;;  %v9190_v43 = vcombine.low %v754_v52, %v758_v21  ;;  %v9232_v52 = vcombine.low %v802_v49, %v806_v19  ;;  %v818_v32 = vmax.bf16 %v14981_v2, %v562_v27 }
  0xe6   : > { %3478 = vmatmul.mubr.bf16.gmra.mrb[72].mxu0 %v12642_v23 }
  0xe7   : > { %3487 = vmatprep.mubr.bf16.mxu0 %v12645_v25  ;;  %5057 = vmatpush1.bf16.msra.mxu1 %v11586_v35 }
  0xe9   : > { %4850 = vmatmul.mubr.bf16.gmra.mrb[100].mxu1 %v12537_v29  ;;  %v762_v29 = vmax.bf16 %v14981_v2, %v506_v39  ;;  %v570_v39 = vld [vmem:[%s12005_s14 + $0x658] sm:$0xff] }
  0xea   : > { %4859 = vmatprep.mubr.bf16.mxu1 %v12540_v31  ;;  %v11591_v31 = vld [vmem:[%s14962_s1 + $0x3cc] ss:$16 sps:$4 sm:$0xff]  }
  0xeb   : > { %5058 = vmatprep.subr.bf16.mxu1 %v11591_v31  ;;  %v9198_v46 = vcombine.high %v762_v29, %v766_v40 }
  0xec   : > { %5059 = vmatpush1.bf16.msra.mxu1 %v11589_v41 }
  0xed   : > { %5060 = vmatprep.subr.bf16.mxu1 %v11594_v42  ;;  %v578_v42 = vld [vmem:[%s12005_s14 + $0x690] sm:$0xff] }
  0xee   : > { %3488 = vmatmul.mubr.bf16.gmra.mrb[76].mxu0 %v9183_v33 }
  0xef   : > { %3497 = vmatprep.mubr.bf16.mxu0 %v9191_v30 }
  0xf0   : > { %5061 = vmatpush1.bf16.msra.mxu1 %v11592_v47 }
  0xf1   : > { %4860 = vmatmul.mubr.bf16.gmra.mrb[104].mxu1 %v12567_v44  ;;  %v770_v44 = vmax.bf16 %v14981_v2, %v514_v48 }
  0xf2   : > { %4869 = vmatprep.mubr.bf16.mxu1 %v12570_v45  ;;  %v9197_v45 = vcombine.low %v762_v29, %v766_v40  ;;  %v826_v29 = vmax.bf16 %v14981_v2, %v570_v39  ;;  %v830_v40 = vmax.bf16 %v14981_v2, %v574_v34 }
  0xf3   : > { %v9205_v54 = vcombine.high %v770_v44, %v774_v53  ;;  %v9204_v0 = vcombine.low %v770_v44, %v774_v53  ;;  %v586_v44 = vld [vmem:[%s12005_s14 + $0x6c8] sm:$0xff] }
  0xf4   : > { %v12726_v41 = vcombine.high %v826_v29, %v830_v40  ;;  %v12733_v48 = vcombine.low %v826_v29, %v830_v40  ;;  %v590_v53 = vld [vmem:[%s12005_s14 + $0x6e4] sm:$0xff]  ;;  %v11598_v40 = vld [vmem:[%s14962_s1 + $0x460] ss:$16 sps:$4 sm:$0xff]  }
  0xf6   : > { %3498 = vmatmul.mubr.bf16.gmra.mrb[80].mxu0 %v9190_v43 }
  0xf7   : > { %3507 = vmatprep.mubr.bf16.mxu0 %v9198_v46 }
  0xf9   : > { %4870 = vmatmul.mubr.bf16.gmra.mrb[108].mxu1 %v12591_v59  ;;  %v9212_v59 = vcombine.high %v778_v61, %v782_v63  ;;  %v339_v61 = vld [vmem:[%s12005_s14 + $0x8] sm:$0xff] }
  0xfa   : > { %4879 = vmatprep.mubr.bf16.mxu1 %v12594_v60  ;;  %v786_v60 = vmax.bf16 %v14981_v2, %v530_v62  ;;  %v343_v63 = vld [vmem:[%s12005_s14 + $0x24] sm:$0xff] }
  0xfc   : > { %v9219_v6 = vcombine.high %v786_v60, %v790_v3  ;;  %v9218_v17 = vcombine.low %v786_v60, %v790_v3  ;;  %v347_v60 = vld [vmem:[%s12005_s14 + $0x40] sm:$0xff] }
  0xfd   : > { %v351_v3 = vld [vmem:[%s12005_s14 + $0x5c] sm:$0xff] }
  0xfe   : > { %3508 = vmatmul.mubr.bf16.gmra.mrb[84].mxu0 %v9197_v45 }
  0xff   : > { %3517 = vmatprep.mubr.bf16.mxu0 %v9205_v54 }
 0x101   : > { %4880 = vmatmul.mubr.bf16.gmra.mrb[112].mxu1 %v12618_v12  ;;  %v542_v12 = vld [vmem:[%s12005_s14 + $0x594] sm:$0xff] }
 0x102   : > { %4889 = vmatprep.mubr.bf16.mxu1 %v12621_v13  ;;  %v794_v13 = vmax.bf16 %v14981_v2, %v538_v11  ;;  %v798_v14 = vmax.bf16 %v14981_v2, %v542_v12  ;;  %v607_v11 = vmax.bf16 %v14981_v2, %v351_v3 }
 0x104   : > { %v9226_v18 = vcombine.high %v794_v13, %v798_v14  ;;  %v9225_v22 = vcombine.low %v794_v13, %v798_v14 }
 0x106   : > { %3518 = vmatmul.mubr.bf16.gmra.mrb[88].mxu0 %v9204_v0 }
 0x107   : > { %3527 = vmatprep.mubr.bf16.mxu0 %v9212_v59 }
 0x109   : > { %4890 = vmatmul.mubr.bf16.gmra.mrb[116].mxu1 %v12642_v23  ;;  %v9233_v23 = vcombine.high %v802_v49, %v806_v19  ;;  %v359_v49 = vld [vmem:[%s12005_s14 + $0x94] sm:$0xff] }
 0x10a   : > { %4899 = vmatprep.mubr.bf16.mxu1 %v12645_v25  ;;  %v554_v25 = vld [vmem:[%s12005_s14 + $0x5e8] sm:$0xff]  ;;  %v11582_v19 = vld [vmem:[%s14962_s1 + $0x424] ss:$16 sps:$4 sm:$0xff]  }
 0x10b   : > { %v810_v26 = vmax.bf16 %v14981_v2, %v554_v25  ;;  %v615_v25 = vmax.bf16 %v14981_v2, %v359_v49  ;;  %v383_v49 = vld [vmem:[%s12005_s14 + $0x13c] sm:$0xff] }
 0x10d   : > { %v9240_v21 = vcombine.high %v810_v26, %v814_v9 }
 0x10e   : > { %3528 = vmatmul.mubr.bf16.gmra.mrb[92].mxu0 %v9211_v4 }
 0x10f   : > { %3537 = vmatprep.mubr.bf16.mxu0 %v9219_v6 }
 0x111   : > { %4900 = vmatmul.mubr.bf16.gmra.mrb[120].mxu1 %v9183_v33  ;;  %v822_v33 = vmax.bf16 %v14981_v2, %v566_v28 }
 0x112   : > { %4909 = vmatprep.mubr.bf16.mxu1 %v9191_v30  ;;  %v9239_v30 = vcombine.low %v810_v26, %v814_v9  ;;  %v11597_v9 = vld [vmem:[%s14962_s1 + $0x444] ss:$16 sps:$4 sm:$0xff]  }
 0x113   : > { %v9247_v35 = vcombine.high %v818_v32, %v822_v33  ;;  %v9246_v31 = vcombine.low %v818_v32, %v822_v33  ;;  %v11595_v32 = vld [vmem:[%s14962_s1 + $0x440] ss:$16 sps:$4 sm:$0xff]  }
 0x114   : > { %v363_v33 = vld [vmem:[%s12005_s14 + $0xb0] sm:$0xff] }
 0x115   : > { %v619_v34 = vmax.bf16 %v14981_v2, %v363_v33 }
 0x116   : > { %3538 = vmatmul.mubr.bf16.gmra.mrb[96].mxu0 %v9218_v17 }
 0x117   : > { %3547 = vmatprep.mubr.bf16.mxu0 %v9226_v18 }
 0x119   : > { %4910 = vmatmul.mubr.bf16.gmra.mrb[124].mxu1 %v9190_v43  ;;  %v582_v43 = vld [vmem:[%s12005_s14 + $0x6ac] sm:$0xff] }
 0x11a   : > { %4919 = vmatprep.mubr.bf16.mxu1 %v9198_v46  ;;  %v834_v46 = vmax.bf16 %v14981_v2, %v578_v42  ;;  %v838_v47 = vmax.bf16 %v14981_v2, %v582_v43 }
 0x11c   : > { %v12735_v50 = vcombine.high %v834_v46, %v838_v47  ;;  %v12743_v56 = vcombine.low %v834_v46, %v838_v47 }
 0x11e   : > { %3548 = vmatmul.mubr.bf16.gmra.mrb[100].mxu0 %v9225_v22 }
 0x11f   : > { %3557 = vmatprep.mubr.bf16.mxu0 %v9233_v23 }
 0x121   : > { %4920 = vmatmul.mubr.bf16.gmra.mrb[128].mxu1 %v9197_v45  ;;  %v842_v45 = vmax.bf16 %v14981_v2, %v586_v44  ;;  %v11601_v44 = vld [vmem:[%s14962_s1 + $0x480] ss:$16 sps:$4 sm:$0xff]  }
 0x122   : > { %4929 = vmatprep.mubr.bf16.mxu1 %v9205_v54  ;;  %v846_v54 = vmax.bf16 %v14981_v2, %v590_v53  ;;  %v371_v53 = vld [vmem:[%s12005_s14 + $0xe8] sm:$0xff] }
 0x124   : > { %v12745_v58 = vcombine.high %v842_v45, %v846_v54  ;;  %v12753_v62 = vcombine.low %v842_v45, %v846_v54  ;;  %v375_v45 = vld [vmem:[%s12005_s14 + $0x104] sm:$0xff] }
 0x126   : > { %3558 = vmatmul.mubr.bf16.gmra.mrb[104].mxu0 %v9232_v52 }
 0x127   : > { %3567 = vmatprep.mubr.bf16.mxu0 %v9240_v21 }
 0x129   : > { %4930 = vmatmul.mubr.bf16.gmra.mrb[132].mxu1 %v9204_v0  ;;  %v595_v0 = vmax.bf16 %v14981_v2, %v339_v61  ;;  %v631_v61 = vmax.bf16 %v14981_v2, %v375_v45 }
 0x12a   : > { %4939 = vmatprep.mubr.bf16.mxu1 %v9212_v59  ;;  %v599_v59 = vmax.bf16 %v14981_v2, %v343_v63  ;;  %v11604_v63 = vld [vmem:[%s14962_s1 + $0x4a0] ss:$16 sps:$4 sm:$0xff]  }
 0x12c   : > { %v12755_v1 = vcombine.high %v595_v0, %v599_v59 }
 0x12e   : > { %3568 = vmatmul.mubr.bf16.gmra.mrb[108].mxu0 %v9239_v30 }
 0x12f   : > { %3577 = vmatprep.mubr.bf16.mxu0 %v9247_v35 }
 0x131   : > { %4940 = vmatmul.mubr.bf16.gmra.mrb[136].mxu1 %v9211_v4  ;;  %v12760_v4 = vpop.f32.mrb[0].mxu1 }
 0x132   : > { %4949 = vmatprep.mubr.bf16.mxu1 %v9219_v6  ;;  %v603_v6 = vmax.bf16 %v14981_v2, %v347_v60  ;;  %v12765_v12 = vpop.f32.mrb[1].mxu1 }
 0x133   : > { %v12767_v13 = vpop.f32.mrb[2].mxu1 }
 0x134   : > { %v12769_v14 = vpop.f32.mrb[3].mxu1  ;;  %v12776_v8 = vcombine.high %v603_v6, %v607_v11  ;;  %v12801_v27 = vcombine.low %v603_v6, %v607_v11 }
 0x136   : > { %3578 = vmatmul.mubr.bf16.gmra.mrb[112].mxu0 %v9246_v31 }
 0x137   : > { %3587 = vmatprep.mubr.bf16.mxu0 %v12726_v41 }
 0x139   : > { %4950 = vmatmul.mubr.bf16.gmra.mrb[140].mxu1 %v9218_v17  ;;  %v12771_v17 = vcombine.low %v595_v0, %v599_v59  ;;  %v11609_v59 = vld [vmem:[%s14962_s1 + $0x4c4] ss:$16 sps:$4 sm:$0xff]  }
 0x13a   : > { %4959 = vmatprep.mubr.bf16.mxu1 %v9226_v18  ;;  %v11565_v18 = vld [vmem:[%s14962_s1 + $0x400] ss:$16 sps:$4 sm:$0xff]  }
 0x13e   : > { %3588 = vmatmul.mubr.bf16.gmra.mrb[116].mxu0 %v12733_v48 }
 0x13f   : > { %3597 = vmatprep.mubr.bf16.mxu0 %v12735_v50 }
 0x141   : > { %4960 = vmatmul.mubr.bf16.gmra.mrb[144].mxu1 %v9225_v22  ;;  %v12784_v22 = vpop.f32.mrb[4].mxu1 }
 0x142   : > { %4969 = vmatprep.mubr.bf16.mxu1 %v9233_v23  ;;  %v611_v23 = vmax.bf16 %v14981_v2, %v355_v10  ;;  %v12792_v26 = vpop.f32.mrb[5].mxu1  ;;  %v379_v10 = vld [vmem:[%s12005_s14 + $0x120] sm:$0xff] }
 0x144   : > { %v12804_v28 = vcombine.high %v611_v23, %v615_v25  ;;  %v12833_v46 = vcombine.low %v611_v23, %v615_v25  ;;  %v639_v23 = vmax.bf16 %v14981_v2, %v383_v49  ;;  %v11610_v25 = vld [vmem:[%s14962_s1 + $0x4e0] ss:$16 sps:$4 sm:$0xff]  }
 0x145   : > { %v399_v49 = vld [vmem:[%s12005_s14 + $0x1ac] sm:$0xff] }
 0x146   : > { %3598 = vmatmul.mubr.bf16.gmra.mrb[120].mxu0 %v12743_v56 }
 0x147   : > { %3607 = vmatprep.mubr.bf16.mxu0 %v12745_v58 }
 0x149   : > { %4970 = vmatmul.mubr.bf16.gmra.mrb[148].mxu1 %v9232_v52  ;;  %v12797_v52 = vpop.f32.mrb[6].mxu1 }
 0x14a   : > { %4979 = vmatprep.mubr.bf16.mxu1 %v9240_v21  ;;  %v12799_v21 = vpop.f32.mrb[7].mxu1 }
 0x14b   : > { %v12815_v39 = vpop.f32.mrb[8].mxu1 }
 0x14e   : > { %3608 = vmatmul.mubr.bf16.gmra.mrb[124].mxu0 %v12753_v62 }
 0x14f   : > { %3650 = vmatprep.mubr.bf16.mxu0 %v12755_v1 }
 0x151   : > { %4980 = vmatmul.mubr.bf16.gmra.mrb[152].mxu1 %v9239_v30  ;;  %v367_v30 = vld [vmem:[%s12005_s14 + $0xcc] sm:$0xff] }
 0x152   : > { %4989 = vmatprep.mubr.bf16.mxu1 %v9247_v35  ;;  %v11600_v35 = vld [vmem:[%s14962_s1 + $0x464] ss:$16 sps:$4 sm:$0xff]   ;;  %v623_v29 = vmax.bf16 %v14981_v2, %v367_v30 }
 0x154   : > { %v12836_v47 = vcombine.high %v619_v34, %v623_v29  ;;  %v12865_v6 = vcombine.low %v619_v34, %v623_v29  ;;  %v11613_v34 = vld [vmem:[%s14962_s1 + $0x500] ss:$16 sps:$4 sm:$0xff]   ;;  %v387_v29 = vld [vmem:[%s12005_s14 + $0x158] sm:$0xff] }
 0x156   : > { %3651 = vmatmul.mubr.bf16.vlgmr.msra.gmra.mrb[0].mxu0 %v12771_v17 }
 0x157   : > { %3972 = vmatpush1.bf16.msra.mxu0 %v11565_v18  ;;  %3660 = vmatprep.mubr.bf16.mxu0 %v12776_v8  ;;  %v11607_v18 = vld [vmem:[%s14962_s1 + $0x4c0] ss:$16 sps:$4 sm:$0xff]  }
 0x158   : > { %3973 = vmatprep.subr.bf16.mxu0 %v11582_v19 }
 0x159   : > { %4990 = vmatmul.mubr.bf16.gmra.mrb[156].mxu1 %v9246_v31  ;;  %v12823_v31 = vpop.f32.mrb[9].mxu1 }
 0x15a   : > { %4999 = vmatprep.mubr.bf16.mxu1 %v12726_v41  ;;  %v11603_v41 = vld [vmem:[%s14962_s1 + $0x484] ss:$16 sps:$4 sm:$0xff]   ;;  %v12828_v42 = vpop.f32.mrb[10].mxu1 }
 0x15b   : > { %3974 = vmatpush1.bf16.msra.mxu0 %v11580_v7  ;;  %v12831_v43 = vpop.f32.mrb[11].mxu1 }
 0x15c   : > { %3975 = vmatprep.subr.bf16.mxu0 %v11597_v9  ;;  %v12847_v54 = vpop.f32.mrb[12].mxu1  ;;  %v11615_v9 = vld [vmem:[%s14962_s1 + $0x504] ss:$16 sps:$4 sm:$0xff]  }
 0x15d   : > { %v12855_v0 = vpop.f32.mrb[13].mxu1 }
 0x15e   : > { %3661 = vmatmul.mubr.bf16.gmra.mrb[4].mxu0 %v12801_v27  ;;  %v12860_v60 = vpop.f32.mrb[14].mxu1 }
 0x15f   : > { %3670 = vmatprep.mubr.bf16.mxu0 %v12804_v28  ;;  %3976 = vmatpush1.bf16.msra.mxu0 %v11595_v32  ;;  %v12863_v3 = vpop.f32.mrb[15].mxu1 }
 0x160   : > { %3977 = vmatprep.subr.bf16.mxu0 %v11600_v35  ;;  %v12879_v19 = vpop.f32.mrb[16].mxu1 }
 0x161   : > { %5000 = vmatmul.mubr.bf16.gmra.mrb[160].mxu1 %v12733_v48  ;;  %v11606_v48 = vld [vmem:[%s14962_s1 + $0x4a4] ss:$16 sps:$4 sm:$0xff]   ;;  %v12887_v7 = vpop.f32.mrb[17].mxu1 }
 0x162   : > { %5009 = vmatprep.mubr.bf16.mxu1 %v12735_v50  ;;  %v627_v50 = vmax.bf16 %v14981_v2, %v371_v53  ;;  %v12892_v32 = vpop.f32.mrb[18].mxu1  ;;  %v11616_v53 = vld [vmem:[%s14962_s1 + $0x520] ss:$16 sps:$4 sm:$0xff]  }
 0x163   : > { %3978 = vmatpush1.bf16.msra.mxu0 %v11598_v40  ;;  %v12895_v33 = vpop.f32.mrb[19].mxu1  ;;  %v391_v40 = vld [vmem:[%s12005_s14 + $0x174] sm:$0xff] }
 0x164   : > { %3979 = vmatprep.subr.bf16.mxu0 %v11603_v41  ;;  %v12868_v11 = vcombine.high %v627_v50, %v631_v61  ;;  %v12897_v30 = vcombine.low %v627_v50, %v631_v61  ;;  %v12911_v41 = vpop.f32.mrb[20].mxu1 }
 0x165   : > { %v12919_v45 = vpop.f32.mrb[21].mxu1 }
 0x166   : > { %3671 = vmatmul.mubr.bf16.gmra.mrb[8].mxu0 %v12833_v46  ;;  %v12924_v50 = vpop.f32.mrb[22].mxu1 }
 0x167   : > { %3680 = vmatprep.mubr.bf16.mxu0 %v12836_v47  ;;  %3980 = vmatpush1.bf16.msra.mxu0 %v11601_v44  ;;  %v647_v44 = vmax.bf16 %v14981_v2, %v391_v40  ;;  %v12927_v61 = vpop.f32.mrb[23].mxu1  ;;  %v407_v40 = vld [vmem:[%s12005_s14 + $0x1e4] sm:$0xff] }
 0x168   : > { %3981 = vmatprep.subr.bf16.mxu0 %v11606_v48  ;;  %v11621_v48 = vld [vmem:[%s14962_s1 + $0x544] ss:$16 sps:$4 sm:$0xff]  }
 0x169   : > { %5010 = vmatmul.mubr.bf16.gmra.mrb[164].mxu1 %v12743_v56  ;;  %v11612_v56 = vld [vmem:[%s14962_s1 + $0x4e4] ss:$16 sps:$4 sm:$0xff]  }
 0x16a   : > { %5019 = vmatprep.mubr.bf16.mxu1 %v12745_v58  ;;  %v635_v58 = vmax.bf16 %v14981_v2, %v379_v10  ;;  %v395_v10 = vld [vmem:[%s12005_s14 + $0x190] sm:$0xff] }
 0x16b   : > { %3982 = vmatpush1.bf16.msra.mxu0 %v11604_v63 }
 0x16c   : > { %3983 = vmatprep.subr.bf16.mxu0 %v11609_v59  ;;  %v12900_v35 = vcombine.high %v635_v58, %v639_v23  ;;  %v12929_v63 = vcombine.low %v635_v58, %v639_v23 }
 0x16e   : > { %3681 = vmatmul.mubr.bf16.gmra.mrb[12].mxu0 %v12865_v6 }
 0x16f   : > { %3690 = vmatprep.mubr.bf16.mxu0 %v12868_v11  ;;  %3984 = vmatpush1.bf16.msra.mxu0 %v11607_v18  ;;  %v11619_v18 = vld [vmem:[%s14962_s1 + $0x540] ss:$16 sps:$4 sm:$0xff]  }
 0x170   : > { %3985 = vmatprep.subr.bf16.mxu0 %v11612_v56  ;;  %v655_v56 = vmax.bf16 %v14981_v2, %v399_v49 }
 0x171   : > { %5020 = vmatmul.mubr.bf16.gmra.mrb[168].mxu1 %v12753_v62  ;;  %v11618_v62 = vld [vmem:[%s14962_s1 + $0x524] ss:$16 sps:$4 sm:$0xff]  }
 0x172   : > { %5062 = vmatprep.mubr.bf16.mxu1 %v12755_v1  ;;  %v643_v1 = vmax.bf16 %v14981_v2, %v387_v29  ;;  %v403_v29 = vld [vmem:[%s12005_s14 + $0x1c8] sm:$0xff] }
 0x173   : > { %3986 = vmatpush1.bf16.msra.mxu0 %v11610_v25 }
 0x174   : > { %3987 = vmatprep.subr.bf16.mxu0 %v11615_v9  ;;  %v12932_v59 = vcombine.high %v643_v1, %v647_v44  ;;  %v12952_v9 = vcombine.low %v643_v1, %v647_v44  ;;  %v663_v44 = vmax.bf16 %v14981_v2, %v407_v40  ;;  %v415_v40 = vld [vmem:[%s12005_s14 + $0x21c] sm:$0xff] }
 0x176   : > { %3691 = vmatmul.mubr.bf16.gmra.mrb[16].mxu0 %v12897_v30 }
 0x177   : > { %3700 = vmatprep.mubr.bf16.mxu0 %v12900_v35  ;;  %3988 = vmatpush1.bf16.msra.mxu0 %v11613_v34 }
 0x178   : > { %3989 = vmatprep.subr.bf16.mxu0 %v11618_v62  ;;  %v11622_v62 = vld [vmem:[%s14962_s1 + $0x560] ss:$16 sps:$4 sm:$0xff]  }
 0x179   : > { %5063 = vmatmul.mubr.bf16.vlgmr.msra.gmra.mrb[44].mxu1 %v12771_v17  ;;  %v12940_v17 = vpop.f32.mrb[24].mxu1 }
 0x17a   : > { %5072 = vmatprep.mubr.bf16.mxu1 %v12776_v8  ;;  %v651_v8 = vmax.bf16 %v14981_v2, %v395_v10  ;;  %v12945_v58 = vpop.f32.mrb[25].mxu1 }
 0x17b   : > { %3990 = vmatpush1.bf16.msra.mxu0 %v11616_v53  ;;  %v12947_v23 = vpop.f32.mrb[26].mxu1 }
 0x17c   : > { %3991 = vmatprep.subr.bf16.mxu0 %v11621_v48  ;;  %v12950_v25 = vpop.f32.mrb[27].mxu1  ;;  %v12955_v34 = vcombine.high %v651_v8, %v655_v56  ;;  %v12978_v10 = vcombine.low %v651_v8, %v655_v56 }
 0x17d   : > { %v12966_v1 = vpop.f32.mrb[28].mxu1 }
 0x17e   : > { %3701 = vmatmul.mubr.bf16.gmra.mrb[20].mxu0 %v12929_v63  ;;  %v12971_v53 = vpop.f32.mrb[29].mxu1 }
 0x17f   : > { %3710 = vmatprep.mubr.bf16.mxu0 %v12932_v59  ;;  %3992 = vmatpush1.bf16.msra.mxu0 %v11619_v18  ;;  %v12973_v48 = vpop.f32.mrb[30].mxu1 }
 0x180   : > { %v12976_v18 = vpop.f32.mrb[31].mxu1 }
 0x181   : > { %5073 = vmatmul.mubr.bf16.gmra.mrb[48].mxu1 %v12801_v27  ;;  %v11624_v27 = vld [vmem:[%s14962_s1 + $0x564] ss:$16 sps:$4 sm:$0xff]  }
 0x182   : > { %5082 = vmatprep.mubr.bf16.mxu1 %v12804_v28  ;;  %v659_v28 = vmax.bf16 %v14981_v2, %v403_v29  ;;  %3993 = vmatprep.subr.bf16.mxu0 %v11624_v27  ;;  %v411_v29 = vld [vmem:[%s12005_s14 + $0x200] sm:$0xff]  ;;  %v12986_v27 = vpop.f32.mrb[32].mxu1 }
 0x183   : > { %3994 = vmatpush1.bf16.msra.mxu0 %v11622_v62  ;;  %v671_v62 = vmax.bf16 %v14981_v2, %v415_v40  ;;  %v12991_v8 = vpop.f32.mrb[33].mxu1 }
 0x184   : > { %v12981_v49 = vcombine.high %v659_v28, %v663_v44  ;;  %v12993_v56 = vpop.f32.mrb[34].mxu1  ;;  %v12998_v55 = vcombine.low %v659_v28, %v663_v44  ;;  %v679_v44 = vmax.bf16 %v14981_v2, %v423_v57  ;;  %v431_v57 = vld [vmem:[%s12005_s14 + $0x28c] sm:$0xff] }
 0x186   : > { %3711 = vmatmul.mubr.bf16.gmra.mrb[24].mxu0 %v12952_v9 }
 0x187   : > { %3720 = vmatprep.mubr.bf16.mxu0 %v12955_v34 }
 0x189   : > { %5083 = vmatmul.mubr.bf16.gmra.mrb[52].mxu1 %v12833_v46  ;;  %v667_v46 = vmax.bf16 %v14981_v2, %v411_v29  ;;  %v11625_v29 = vld [vmem:[%s14962_s1 + $0x580] ss:$16 sps:$4 sm:$0xff]  }
 0x18a   : > { %5092 = vmatprep.mubr.bf16.mxu1 %v12836_v47  ;;  %v12996_v47 = vpop.f32.mrb[35].mxu1 }
 0x18b   : > { %v13001_v37 = vcombine.high %v667_v46, %v671_v62  ;;  %v13012_v28 = vpop.f32.mrb[36].mxu1  ;;  %v13024_v5 = vcombine.low %v667_v46, %v671_v62 }
 0x18c   : > { %v13017_v40 = vpop.f32.mrb[37].mxu1 }
 0x18d   : > { %v13019_v36 = vpop.f32.mrb[38].mxu1 }
 0x18e   : > { %3721 = vmatmul.mubr.bf16.gmra.mrb[28].mxu0 %v12978_v10  ;;  %v13022_v20 = vpop.f32.mrb[39].mxu1 }
 0x18f   : > { %3730 = vmatprep.mubr.bf16.mxu0 %v12981_v49  ;;  %15001 = vst [vmem:[#allocation16_spill] sm:$0xff] %v13022_v20  ;;  %v559_v20 = vld [vmem:[%s12005_s14 + $0x60c] sm:$0xff] }
 0x191   : > { %5093 = vmatmul.mubr.bf16.gmra.mrb[56].mxu1 %v12865_v6  ;;  %v11627_v6 = vld [vmem:[%s14962_s1 + $0x584] ss:$16 sps:$4 sm:$0xff]  }
 0x192   : > { %5102 = vmatprep.mubr.bf16.mxu1 %v12868_v11  ;;  %v675_v11 = vmax.bf16 %v14981_v2, %v419_v15  ;;  %3995 = vmatprep.subr.bf16.mxu0 %v11627_v6  ;;  %v427_v15 = vld [vmem:[%s12005_s14 + $0x270] sm:$0xff]  ;;  %v13032_v6 = vpop.f32.mrb[40].mxu1 }
 0x193   : > { %3996 = vmatpush1.bf16.msra.mxu0 %v11625_v29  ;;  %15002 = vst [vmem:[#allocation17_spill] sm:$0xff] %v13032_v6  ;;  %v687_v29 = vmax.bf16 %v14981_v2, %v431_v57  ;;  %v13037_v46 = vpop.f32.mrb[41].mxu1  ;;  %v435_v6 = vld [vmem:[%s12005_s14 + $0x2a8] sm:$0xff]  ;;  %v11628_v57 = vld [vmem:[%s14962_s1 + $0x5a0] ss:$16 sps:$4 sm:$0xff]  }
 0x194   : > { %v13027_v51 = vcombine.high %v675_v11, %v679_v44  ;;  %15003 = vst [vmem:[#allocation18_spill] sm:$0xff] %v13037_v46  ;;  %v13039_v62 = vpop.f32.mrb[42].mxu1  ;;  %v13044_v38 = vcombine.low %v675_v11, %v679_v44  ;;  %v447_v46 = vld [vmem:[%s12005_s14 + $0x2fc] sm:$0xff] }
 0x195   : > { %15004 = vst [vmem:[#allocation19_spill] sm:$0xff] %v13039_v62  ;;  %v443_v62 = vld [vmem:[%s12005_s14 + $0x2e0] sm:$0xff] }
 0x196   : > { %3731 = vmatmul.mubr.bf16.gmra.mrb[32].mxu0 %v12998_v55 }
 0x197   : > { %3740 = vmatprep.mubr.bf16.mxu0 %v13001_v37 }
 0x199   : > { %5103 = vmatmul.mubr.bf16.gmra.mrb[60].mxu1 %v12897_v30  ;;  %v683_v30 = vmax.bf16 %v14981_v2, %v427_v15  ;;  %v439_v15 = vld [vmem:[%s12005_s14 + $0x2c4] sm:$0xff] }
 0x19a   : > { %5112 = vmatprep.mubr.bf16.mxu1 %v12900_v35  ;;  %v13042_v35 = vpop.f32.mrb[43].mxu1  ;;  %v695_v11 = vmax.bf16 %v14981_v2, %v439_v15  ;;  %v703_v15 = vmax.bf16 %v14981_v2, %v447_v46  ;;  %v11633_v46 = vld [vmem:[%s14962_s1 + $0x5c4] ss:$16 sps:$4 sm:$0xff]  }
 0x19b   : > { %15005 = vst [vmem:[#allocation20_spill] sm:$0xff] %v13042_v35  ;;  %v13047_v24 = vcombine.high %v683_v30, %v687_v29  ;;  %v13062_v44 = vcombine.low %v683_v30, %v687_v29  ;;  %v455_v29 = vld [vmem:[%s12005_s14 + $0x334] sm:$0xff] }
 0x19e   : > { %3741 = vmatmul.mubr.bf16.gmra.mrb[36].mxu0 %v13024_v5 }
 0x19f   : > { %3750 = vmatprep.mubr.bf16.mxu0 %v13027_v51 }
 0x1a1   : > { %5113 = vmatmul.mubr.bf16.gmra.mrb[64].mxu1 %v12929_v63  ;;  %v11630_v63 = vld [vmem:[%s14962_s1 + $0x5a4] ss:$16 sps:$4 sm:$0xff]  }
 0x1a2   : > { %5122 = vmatprep.mubr.bf16.mxu1 %v12932_v59  ;;  %v691_v59 = vmax.bf16 %v14981_v2, %v435_v6  ;;  %3997 = vmatprep.subr.bf16.mxu0 %v11630_v63  ;;  %v699_v6 = vmax.bf16 %v14981_v2, %v443_v62  ;;  %v11636_v62 = vld [vmem:[%s14962_s1 + $0x40c] ss:$16 sps:$4 sm:$0xff]   ;;  %v11634_v63 = vld [vmem:[%s14962_s1 + $0x408] ss:$16 sps:$4 sm:$0xff]  }
 0x1a3   : > { %3998 = vmatpush1.bf16.msra.mxu0 %v11628_v57  ;;  %v11631_v57 = vld [vmem:[%s14962_s1 + $0x5c0] ss:$16 sps:$4 sm:$0xff]   ;;  %5383 = vmatprep.subr.bf16.mxu1 %v11636_v62  ;;  %v11645_v62 = vld [vmem:[%s14962_s1 + $0x46c] ss:$16 sps:$4 sm:$0xff]  }
 0x1a4   : > { %v13065_v35 = vcombine.high %v691_v59, %v695_v11  ;;  %v13077_v30 = vcombine.high %v699_v6, %v703_v15  ;;  %3999 = vmatprep.subr.bf16.mxu0 %v11633_v46  ;;  %5384 = vmatpush1.bf16.msra.mxu1 %v11634_v63  ;;  %v459_v46 = vld [vmem:[%s12005_s14 + $0x350] sm:$0xff] }
 0x1a6   : > { %3751 = vmatmul.mubr.bf16.gmra.mrb[40].mxu0 %v13044_v38 }
 0x1a7   : > { %3760 = vmatprep.mubr.bf16.mxu0 %v13047_v24  ;;  %4000 = vmatpush1.bf16.msra.mxu0 %v11631_v57  ;;  %v11640_v57 = vld [vmem:[%s14962_s1 + $0x448] ss:$16 sps:$4 sm:$0xff]  }
 0x1a9   : > { %5123 = vmatmul.mubr.bf16.gmra.mrb[68].mxu1 %v12952_v9  ;;  %v13074_v9 = vcombine.low %v691_v59, %v695_v11  ;;  %v11639_v59 = vld [vmem:[%s14962_s1 + $0x42c] ss:$16 sps:$4 sm:$0xff]   ;;  %v13101_v11 = vcombine.low %v699_v6, %v703_v15 }
 0x1aa   : > { %5132 = vmatprep.mubr.bf16.mxu1 %v12955_v34  ;;  %v451_v34 = vld [vmem:[%s12005_s14 + $0x318] sm:$0xff]  ;;  %5385 = vmatprep.subr.bf16.mxu1 %v11639_v59 }
 0x1ab   : > { %v11642_v15 = vld [vmem:[%s14962_s1 + $0x44c] ss:$16 sps:$4 sm:$0xff]   ;;  %v11643_v59 = vld [vmem:[%s14962_s1 + $0x468] ss:$16 sps:$4 sm:$0xff]  }
 0x1ae   : > { %3761 = vmatmul.mubr.bf16.gmra.mrb[44].mxu0 %v13062_v44 }
 0x1af   : > { %3770 = vmatprep.mubr.bf16.mxu0 %v13065_v35 }
 0x1b1   : > { %5133 = vmatmul.mubr.bf16.gmra.mrb[72].mxu1 %v12978_v10  ;;  %v707_v10 = vmax.bf16 %v14981_v2, %v451_v34 }
 0x1b2   : > { %5142 = vmatprep.mubr.bf16.mxu1 %v12981_v49  ;;  %v711_v49 = vmax.bf16 %v14981_v2, %v455_v29  ;;  %v11637_v29 = vld [vmem:[%s14962_s1 + $0x428] ss:$16 sps:$4 sm:$0xff]   ;;  %v463_v2 = vld [vmem:[%s12005_s14 + $0x36c] sm:$0xff] }
 0x1b3   : > { %5386 = vmatpush1.bf16.msra.mxu1 %v11637_v29  ;;  %v467_v29 = vld [vmem:[%s12005_s14 + $0x388] sm:$0xff] }
 0x1b4   : > { %v13104_v34 = vcombine.high %v707_v10, %v711_v49  ;;  %5387 = vmatprep.subr.bf16.mxu1 %v11642_v15  ;;  %v13125_v63 = vcombine.low %v707_v10, %v711_v49  ;;  %v11651_v15 = vld [vmem:[%s14962_s1 + $0x48c] ss:$16 sps:$4 sm:$0xff]  }
 0x1b6   : > { %3771 = vmatmul.mubr.bf16.gmra.mrb[48].mxu0 %v13074_v9 }
 0x1b7   : > { %3780 = vmatprep.mubr.bf16.mxu0 %v13077_v30  ;;  %5388 = vmatpush1.bf16.msra.mxu1 %v11640_v57  ;;  %v11649_v57 = vld [vmem:[%s14962_s1 + $0x488] ss:$16 sps:$4 sm:$0xff]  }
 0x1b8   : > { %5389 = vmatprep.subr.bf16.mxu1 %v11645_v62  ;;  %v11654_v62 = vld [vmem:[%s14962_s1 + $0x4ac] ss:$16 sps:$4 sm:$0xff]  }
 0x1b9   : > { %5143 = vmatmul.mubr.bf16.gmra.mrb[76].mxu1 %v12998_v55  ;;  %v15006_v55 = vmov 0  }
 0x1ba   : > { %5152 = vmatprep.mubr.bf16.mxu1 %v13001_v37  ;;  %v715_v6 = vmax.bf16 %v15006_v55, %v459_v46  ;;  %v719_v37 = vmax.bf16 %v15006_v55, %v463_v2  ;;  %v471_v46 = vld [vmem:[%s12005_s14 + $0x3a4] sm:$0xff]  ;;  %v723_v10 = vmax.bf16 %v15006_v55, %v467_v29 }
 0x1bb   : > { %v727_v49 = vmax.bf16 %v15006_v55, %v471_v46  ;;  %5390 = vmatpush1.bf16.msra.mxu1 %v11643_v59  ;;  %v11652_v46 = vld [vmem:[%s14962_s1 + $0x4a8] ss:$16 sps:$4 sm:$0xff]  }
 0x1bc   : > { %v13128_v2 = vcombine.high %v715_v6, %v719_v37  ;;  %v13155_v29 = vcombine.low %v715_v6, %v719_v37  ;;  %5391 = vmatprep.subr.bf16.mxu1 %v11651_v15  ;;  %v11657_v37 = vld [vmem:[%s14962_s1 + $0x4cc] ss:$16 sps:$4 sm:$0xff]   ;;  %v11655_v15 = vld [vmem:[%s14962_s1 + $0x4c8] ss:$16 sps:$4 sm:$0xff]  }
 0x1bd   : > { %v13158_v59 = vcombine.high %v723_v10, %v727_v49 }
 0x1be   : > { %3781 = vmatmul.mubr.bf16.gmra.mrb[52].mxu0 %v13101_v11 }
 0x1bf   : > { %3790 = vmatprep.mubr.bf16.mxu0 %v13104_v34  ;;  %5392 = vmatpush1.bf16.msra.mxu1 %v11649_v57  ;;  %v11660_v57 = vld [vmem:[%s14962_s1 + $0x4ec] ss:$16 sps:$4 sm:$0xff]  }
 0x1c0   : > { %5393 = vmatprep.subr.bf16.mxu1 %v11654_v62  ;;  %v13182_v62 = vcombine.low %v723_v10, %v727_v49  ;;  %v11663_v10 = vld [vmem:[%s14962_s1 + $0x50c] ss:$16 sps:$4 sm:$0xff]   ;;  %v11661_v49 = vld [vmem:[%s14962_s1 + $0x508] ss:$16 sps:$4 sm:$0xff]  }
 0x1c1   : > { %5153 = vmatmul.mubr.bf16.gmra.mrb[80].mxu1 %v13024_v5  ;;  %v11646_v5 = vld [vmem:[%s14962_s1 + $0x5e0] ss:$16 sps:$4 sm:$0xff]  }
 0x1c2   : > { %5162 = vmatprep.mubr.bf16.mxu1 %v13027_v51  ;;  %v11648_v51 = vld [vmem:[%s14962_s1 + $0x5e4] ss:$16 sps:$4 sm:$0xff]  }
 0x1c3   : > { %4001 = vmatprep.subr.bf16.mxu0 %v11648_v51  ;;  %v479_v51 = vld [vmem:[%s12005_s14 + $0x3dc] sm:$0xff]  ;;  %5394 = vmatpush1.bf16.msra.mxu1 %v11652_v46 }
 0x1c4   : > { %4002 = vmatpush1.bf16.msra.mxu0 %v11646_v5  ;;  %v475_v5 = vld [vmem:[%s12005_s14 + $0x3c0] sm:$0xff]  ;;  %v735_v6 = vmax.bf16 %v15006_v55, %v479_v51  ;;  %5395 = vmatprep.subr.bf16.mxu1 %v11657_v37  ;;  %v487_v51 = vld [vmem:[%s12005_s14 + $0x414] sm:$0xff]  ;;  %v11666_v37 = vld [vmem:[%s14962_s1 + $0x52c] ss:$16 sps:$4 sm:$0xff]  }
 0x1c6   : > { %3791 = vmatmul.mubr.bf16.gmra.mrb[56].mxu0 %v13125_v63 }
 0x1c7   : > { %3800 = vmatprep.mubr.bf16.mxu0 %v13128_v2  ;;  %5396 = vmatpush1.bf16.msra.mxu1 %v11655_v15 }
 0x1c8   : > { %5397 = vmatprep.subr.bf16.mxu1 %v11660_v57 }
 0x1c9   : > { %5163 = vmatmul.mubr.bf16.gmra.mrb[84].mxu1 %v13044_v38  ;;  %v11808_v38 = vld [vmem:[%s14962_s1 + $0x604] ss:$16 sps:$4 sm:$0xff]  }
 0x1ca   : > { %5172 = vmatprep.mubr.bf16.mxu1 %v13047_v24  ;;  %4324 = vmatprep.subr.bf16.mxu0 %v11808_v38  ;;  %v731_v24 = vmax.bf16 %v15006_v55, %v475_v5  ;;  %v11658_v38 = vld [vmem:[%s14962_s1 + $0x4e8] ss:$16 sps:$4 sm:$0xff]  }
 0x1cb   : > { %v483_v5 = vld [vmem:[%s12005_s14 + $0x3f8] sm:$0xff]  ;;  %5398 = vmatpush1.bf16.msra.mxu1 %v11658_v38 }
 0x1cc   : > { %v13185_v46 = vcombine.high %v731_v24, %v735_v6  ;;  %5399 = vmatprep.subr.bf16.mxu1 %v11663_v10  ;;  %v13206_v15 = vcombine.low %v731_v24, %v735_v6  ;;  %v11664_v38 = vld [vmem:[%s14962_s1 + $0x528] ss:$16 sps:$4 sm:$0xff]   ;;  %v11669_v24 = vld [vmem:[%s14962_s1 + $0x54c] ss:$16 sps:$4 sm:$0xff]  }
 0x1cd   : > { %v11667_v6 = vld [vmem:[%s14962_s1 + $0x548] ss:$16 sps:$4 sm:$0xff]   ;;  %v11672_v10 = vld [vmem:[%s14962_s1 + $0x56c] ss:$16 sps:$4 sm:$0xff]  }
 0x1ce   : > { %3801 = vmatmul.mubr.bf16.gmra.mrb[60].mxu0 %v13155_v29 }
 0x1cf   : > { %3810 = vmatprep.mubr.bf16.mxu0 %v13158_v59  ;;  %5400 = vmatpush1.bf16.msra.mxu1 %v11661_v49 }
 0x1d0   : > { %5401 = vmatprep.subr.bf16.mxu1 %v11666_v37 }
 0x1d1   : > { %5173 = vmatmul.mubr.bf16.gmra.mrb[88].mxu1 %v13062_v44  ;;  %v739_v44 = vmax.bf16 %v15006_v55, %v483_v5  ;;  %v491_v5 = vld [vmem:[%s12005_s14 + $0x430] sm:$0xff] }
 0x1d2   : > { %5182 = vmatprep.mubr.bf16.mxu1 %v13065_v35  ;;  %v743_v35 = vmax.bf16 %v15006_v55, %v487_v51  ;;  %v495_v51 = vld [vmem:[%s12005_s14 + $0x44c] sm:$0xff] }
 0x1d3   : > { %5402 = vmatpush1.bf16.msra.mxu1 %v11664_v38  ;;  %v11670_v38 = vld [vmem:[%s14962_s1 + $0x568] ss:$16 sps:$4 sm:$0xff]  }
 0x1d4   : > { %v13209_v57 = vcombine.high %v739_v44, %v743_v35  ;;  %5403 = vmatprep.subr.bf16.mxu1 %v11669_v24  ;;  %v13230_v49 = vcombine.low %v739_v44, %v743_v35  ;;  %v11675_v44 = vld [vmem:[%s14962_s1 + $0x58c] ss:$16 sps:$4 sm:$0xff]   ;;  %v11673_v35 = vld [vmem:[%s14962_s1 + $0x588] ss:$16 sps:$4 sm:$0xff]  }
 0x1d5   : > { %v11678_v24 = vld [vmem:[%s14962_s1 + $0x5ac] ss:$16 sps:$4 sm:$0xff]  }
 0x1d6   : > { %3811 = vmatmul.mubr.bf16.gmra.mrb[64].mxu0 %v13182_v62 }
 0x1d7   : > { %3820 = vmatprep.mubr.bf16.mxu0 %v13185_v46  ;;  %5404 = vmatpush1.bf16.msra.mxu1 %v11667_v6 }
 0x1d8   : > { %5405 = vmatprep.subr.bf16.mxu1 %v11672_v10 }
 0x1d9   : > { %5183 = vmatmul.mubr.bf16.gmra.mrb[92].mxu1 %v13074_v9  ;;  %v747_v9 = vmax.bf16 %v15006_v55, %v491_v5  ;;  %v499_v5 = vld [vmem:[%s12005_s14 + $0x468] sm:$0xff] }
 0x1da   : > { %5192 = vmatprep.mubr.bf16.mxu1 %v13077_v30  ;;  %v751_v30 = vmax.bf16 %v15006_v55, %v495_v51  ;;  %v503_v51 = vld [vmem:[%s12005_s14 + $0x484] sm:$0xff] }
 0x1db   : > { %5406 = vmatpush1.bf16.msra.mxu1 %v11670_v38  ;;  %v11676_v38 = vld [vmem:[%s14962_s1 + $0x5a8] ss:$16 sps:$4 sm:$0xff]  }
 0x1dc   : > { %v13233_v37 = vcombine.high %v747_v9, %v751_v30  ;;  %5407 = vmatprep.subr.bf16.mxu1 %v11675_v44  ;;  %v9185_v6 = vcombine.low %v747_v9, %v751_v30  ;;  %v11679_v9 = vld [vmem:[%s14962_s1 + $0x5c8] ss:$16 sps:$4 sm:$0xff]   ;;  %v11684_v30 = vld [vmem:[%s14962_s1 + $0x5ec] ss:$16 sps:$4 sm:$0xff]  }
 0x1de   : > { %3821 = vmatmul.mubr.bf16.gmra.mrb[68].mxu0 %v13206_v15 }
 0x1df   : > { %3830 = vmatprep.mubr.bf16.mxu0 %v13209_v57  ;;  %5408 = vmatpush1.bf16.msra.mxu1 %v11673_v35 }
 0x1e0   : > { %5409 = vmatprep.subr.bf16.mxu1 %v11678_v24 }
 0x1e1   : > { %5193 = vmatmul.mubr.bf16.gmra.mrb[96].mxu1 %v13101_v11  ;;  %v755_v11 = vmax.bf16 %v15006_v55, %v499_v5  ;;  %v507_v5 = vld [vmem:[%s12005_s14 + $0x4a0] sm:$0xff] }
 0x1e2   : > { %5202 = vmatprep.mubr.bf16.mxu1 %v13104_v34  ;;  %v759_v34 = vmax.bf16 %v15006_v55, %v503_v51  ;;  %v511_v51 = vld [vmem:[%s12005_s14 + $0x4bc] sm:$0xff] }
 0x1e3   : > { %v767_v44 = vmax.bf16 %v15006_v55, %v511_v51  ;;  %5410 = vmatpush1.bf16.msra.mxu1 %v11676_v38  ;;  %v11682_v38 = vld [vmem:[%s14962_s1 + $0x5e8] ss:$16 sps:$4 sm:$0xff]  }
 0x1e4   : > { %v9193_v10 = vcombine.high %v755_v11, %v759_v34  ;;  %v9192_v35 = vcombine.low %v755_v11, %v759_v34  ;;  %v519_v51 = vld [vmem:[%s12005_s14 + $0x4f4] sm:$0xff] }
 0x1e5   : > { %v523_v34 = vld [vmem:[%s12005_s14 + $0x510] sm:$0xff] }
 0x1e6   : > { %3831 = vmatmul.mubr.bf16.gmra.mrb[72].mxu0 %v13230_v49 }
 0x1e7   : > { %3840 = vmatprep.mubr.bf16.mxu0 %v13233_v37 }
 0x1e9   : > { %5203 = vmatmul.mubr.bf16.gmra.mrb[100].mxu1 %v13125_v63  ;;  %v763_v63 = vmax.bf16 %v15006_v55, %v507_v5  ;;  %v515_v5 = vld [vmem:[%s12005_s14 + $0x4d8] sm:$0xff] }
 0x1ea   : > { %5212 = vmatprep.mubr.bf16.mxu1 %v13128_v2  ;;  %v11681_v2 = vld [vmem:[%s14962_s1 + $0x5cc] ss:$16 sps:$4 sm:$0xff]  }
 0x1eb   : > { %5411 = vmatprep.subr.bf16.mxu1 %v11681_v2  ;;  %v9200_v24 = vcombine.high %v763_v63, %v767_v44  ;;  %v775_v2 = vmax.bf16 %v15006_v55, %v519_v51 }
 0x1ec   : > { %5412 = vmatpush1.bf16.msra.mxu1 %v11679_v9  ;;  %v527_v9 = vld [vmem:[%s12005_s14 + $0x52c] sm:$0xff] }
 0x1ed   : > { %5413 = vmatprep.subr.bf16.mxu1 %v11684_v30  ;;  %v779_v30 = vmax.bf16 %v15006_v55, %v523_v34 }
 0x1ee   : > { %3841 = vmatmul.mubr.bf16.gmra.mrb[76].mxu0 %v9185_v6 }
 0x1ef   : > { %3850 = vmatprep.mubr.bf16.mxu0 %v9193_v10 }
 0x1f0   : > { %5414 = vmatpush1.bf16.msra.mxu1 %v11682_v38 }
 0x1f1   : > { %5213 = vmatmul.mubr.bf16.gmra.mrb[104].mxu1 %v13155_v29  ;;  %v771_v29 = vmax.bf16 %v15006_v55, %v515_v5  ;;  %v783_v5 = vmax.bf16 %v15006_v55, %v527_v9 }
 0x1f2   : > { %5222 = vmatprep.mubr.bf16.mxu1 %v13158_v59  ;;  %v9199_v59 = vcombine.low %v763_v63, %v767_v44  ;;  %v531_v63 = vld [vmem:[%s12005_s14 + $0x548] sm:$0xff] }
 0x1f3   : > { %v9207_v11 = vcombine.high %v771_v29, %v775_v2  ;;  %v9206_v38 = vcombine.low %v771_v29, %v775_v2  ;;  %v535_v44 = vld [vmem:[%s12005_s14 + $0x564] sm:$0xff]  ;;  %v9213_v34 = vcombine.low %v779_v30, %v783_v5  ;;  %v543_v2 = vld [vmem:[%s12005_s14 + $0x59c] sm:$0xff] }
 0x1f4   : > { %v791_v51 = vmax.bf16 %v15006_v55, %v535_v44  ;;  %v539_v29 = vld [vmem:[%s12005_s14 + $0x580] sm:$0xff]  ;;  %v799_v9 = vmax.bf16 %v15006_v55, %v543_v2  ;;  %v555_v2 = vld [vmem:[%s12005_s14 + $0x5f0] sm:$0xff] }
 0x1f6   : > { %3851 = vmatmul.mubr.bf16.gmra.mrb[80].mxu0 %v9192_v35 }
 0x1f7   : > { %3860 = vmatprep.mubr.bf16.mxu0 %v9200_v24 }
 0x1f9   : > { %5223 = vmatmul.mubr.bf16.gmra.mrb[108].mxu1 %v13182_v62  ;;  %v9214_v62 = vcombine.high %v779_v30, %v783_v5 }
 0x1fa   : > { %5232 = vmatprep.mubr.bf16.mxu1 %v13185_v46  ;;  %v787_v46 = vmax.bf16 %v15006_v55, %v531_v63 }
 0x1fc   : > { %v9220_v63 = vcombine.low %v787_v46, %v791_v51 }
 0x1fe   : > { %3861 = vmatmul.mubr.bf16.gmra.mrb[84].mxu0 %v9199_v59 }
 0x1ff   : > { %3870 = vmatprep.mubr.bf16.mxu0 %v9207_v11 }
 0x201   : > { %5233 = vmatmul.mubr.bf16.gmra.mrb[112].mxu1 %v13206_v15  ;;  %v9221_v15 = vcombine.high %v787_v46, %v791_v51  ;;  %v563_v51 = vld [vmem:[%s12005_s14 + $0x628] sm:$0xff] }
 0x202   : > { %5242 = vmatprep.mubr.bf16.mxu1 %v13209_v57  ;;  %v795_v57 = vmax.bf16 %v15006_v55, %v539_v29 }
 0x204   : > { %v9228_v44 = vcombine.high %v795_v57, %v799_v9  ;;  %v9227_v5 = vcombine.low %v795_v57, %v799_v9 }
 0x206   : > { %3871 = vmatmul.mubr.bf16.gmra.mrb[88].mxu0 %v9206_v38 }
 0x207   : > { %3880 = vmatprep.mubr.bf16.mxu0 %v9214_v62 }
 0x209   : > { %5243 = vmatmul.mubr.bf16.gmra.mrb[116].mxu1 %v13230_v49  ;;  %v551_v49 = vld [vmem:[%s12005_s14 + $0x5d4] sm:$0xff] }
 0x20a   : > { %5252 = vmatprep.mubr.bf16.mxu1 %v13233_v37  ;;  %v803_v37 = vmax.bf16 %v15006_v55, %v547_v16  ;;  %v807_v30 = vmax.bf16 %v15006_v55, %v551_v49  ;;  %v567_v49 = vld [vmem:[%s12005_s14 + $0x644] sm:$0xff] }
 0x20c   : > { %v9235_v29 = vcombine.high %v803_v37, %v807_v30  ;;  %v9234_v16 = vcombine.low %v803_v37, %v807_v30 }
 0x20e   : > { %3881 = vmatmul.mubr.bf16.gmra.mrb[92].mxu0 %v9213_v34 }
 0x20f   : > { %3890 = vmatprep.mubr.bf16.mxu0 %v9221_v15 }
 0x211   : > { %5253 = vmatmul.mubr.bf16.gmra.mrb[120].mxu1 %v9185_v6  ;;  %v811_v6 = vmax.bf16 %v15006_v55, %v555_v2  ;;  %v575_v2 = vld [vmem:[%s12005_s14 + $0x67c] sm:$0xff] }
 0x212   : > { %5262 = vmatprep.mubr.bf16.mxu1 %v9193_v10  ;;  %v815_v10 = vmax.bf16 %v15006_v55, %v559_v20  ;;  %v571_v20 = vld [vmem:[%s12005_s14 + $0x660] sm:$0xff] }
 0x214   : > { %v9242_v46 = vcombine.high %v811_v6, %v815_v10  ;;  %v9241_v57 = vcombine.low %v811_v6, %v815_v10 }
 0x216   : > { %3891 = vmatmul.mubr.bf16.gmra.mrb[96].mxu0 %v9220_v63 }
 0x217   : > { %3900 = vmatprep.mubr.bf16.mxu0 %v9228_v44 }
 0x219   : > { %5263 = vmatmul.mubr.bf16.gmra.mrb[124].mxu1 %v9192_v35  ;;  %v819_v35 = vmax.bf16 %v15006_v55, %v563_v51  ;;  %v579_v51 = vld [vmem:[%s12005_s14 + $0x698] sm:$0xff] }
 0x21a   : > { %5272 = vmatprep.mubr.bf16.mxu1 %v9200_v24  ;;  %v823_v24 = vmax.bf16 %v15006_v55, %v567_v49  ;;  %v583_v49 = vld [vmem:[%s12005_s14 + $0x6b4] sm:$0xff] }
 0x21c   : > { %v9249_v9 = vcombine.high %v819_v35, %v823_v24  ;;  %v9248_v37 = vcombine.low %v819_v35, %v823_v24 }
 0x21e   : > { %3901 = vmatmul.mubr.bf16.gmra.mrb[100].mxu0 %v9227_v5 }
 0x21f   : > { %3910 = vmatprep.mubr.bf16.mxu0 %v9235_v29 }
 0x221   : > { %5273 = vmatmul.mubr.bf16.gmra.mrb[128].mxu1 %v9199_v59  ;;  %v827_v59 = vmax.bf16 %v15006_v55, %v571_v20  ;;  %v587_v20 = vld [vmem:[%s12005_s14 + $0x6d0] sm:$0xff] }
 0x222   : > { %5282 = vmatprep.mubr.bf16.mxu1 %v9207_v11  ;;  %v831_v11 = vmax.bf16 %v15006_v55, %v575_v2  ;;  %v591_v2 = vld [vmem:[%s12005_s14 + $0x6ec] sm:$0xff] }
 0x224   : > { %v9256_v30 = vcombine.high %v827_v59, %v831_v11  ;;  %v9255_v6 = vcombine.low %v827_v59, %v831_v11 }
 0x226   : > { %3911 = vmatmul.mubr.bf16.gmra.mrb[104].mxu0 %v9234_v16 }
 0x227   : > { %3920 = vmatprep.mubr.bf16.mxu0 %v9242_v46 }
 0x229   : > { %5283 = vmatmul.mubr.bf16.gmra.mrb[132].mxu1 %v9206_v38  ;;  %v835_v38 = vmax.bf16 %v15006_v55, %v579_v51  ;;  %v340_v51 = vld [vmem:[%s12005_s14 + $0x10] sm:$0xff] }
 0x22a   : > { %5292 = vmatprep.mubr.bf16.mxu1 %v9214_v62  ;;  %v839_v62 = vmax.bf16 %v15006_v55, %v583_v49  ;;  %v344_v49 = vld [vmem:[%s12005_s14 + $0x2c] sm:$0xff] }
 0x22c   : > { %v9263_v10 = vcombine.high %v835_v38, %v839_v62  ;;  %v9262_v35 = vcombine.low %v835_v38, %v839_v62 }
 0x22e   : > { %3921 = vmatmul.mubr.bf16.gmra.mrb[108].mxu0 %v9241_v57 }
 0x22f   : > { %3930 = vmatprep.mubr.bf16.mxu0 %v9249_v9 }
 0x231   : > { %5293 = vmatmul.mubr.bf16.gmra.mrb[136].mxu1 %v9213_v34  ;;  %v843_v34 = vmax.bf16 %v15006_v55, %v587_v20  ;;  %v348_v20 = vld [vmem:[%s12005_s14 + $0x48] sm:$0xff] }
 0x232   : > { %5302 = vmatprep.mubr.bf16.mxu1 %v9221_v15  ;;  %v847_v15 = vmax.bf16 %v15006_v55, %v591_v2  ;;  %v352_v2 = vld [vmem:[%s12005_s14 + $0x64] sm:$0xff] }
 0x234   : > { %v9270_v24 = vcombine.high %v843_v34, %v847_v15  ;;  %v9269_v59 = vcombine.low %v843_v34, %v847_v15  ;;  %v364_v15 = vld [vmem:[%s12005_s14 + $0xb8] sm:$0xff] }
 0x236   : > { %3931 = vmatmul.mubr.bf16.gmra.mrb[112].mxu0 %v9248_v37 }
 0x237   : > { %3940 = vmatprep.mubr.bf16.mxu0 %v9256_v30 }
 0x239   : > { %5303 = vmatmul.mubr.bf16.gmra.mrb[140].mxu1 %v9220_v63  ;;  %v596_v63 = vmax.bf16 %v15006_v55, %v340_v51  ;;  %v356_v51 = vld [vmem:[%s12005_s14 + $0x80] sm:$0xff] }
 0x23a   : > { %5312 = vmatprep.mubr.bf16.mxu1 %v9228_v44  ;;  %v600_v44 = vmax.bf16 %v15006_v55, %v344_v49  ;;  %v360_v49 = vld [vmem:[%s12005_s14 + $0x9c] sm:$0xff] }
 0x23b   : > { %v616_v34 = vmax.bf16 %v15006_v55, %v360_v49  ;;  %v372_v49 = vld [vmem:[%s12005_s14 + $0xf0] sm:$0xff] }
 0x23c   : > { %v9055_v11 = vcombine.high %v596_v63, %v600_v44  ;;  %v9054_v38 = vcombine.low %v596_v63, %v600_v44  ;;  %v368_v63 = vld [vmem:[%s12005_s14 + $0xd4] sm:$0xff]  ;;  %v620_v44 = vmax.bf16 %v15006_v55, %v364_v15  ;;  %v380_v15 = vld [vmem:[%s12005_s14 + $0x128] sm:$0xff] }
 0x23e   : > { %3941 = vmatmul.mubr.bf16.gmra.mrb[116].mxu0 %v9255_v6 }
 0x23f   : > { %3950 = vmatprep.mubr.bf16.mxu0 %v9263_v10 }
 0x241   : > { %5313 = vmatmul.mubr.bf16.gmra.mrb[144].mxu1 %v9227_v5  ;;  %v604_v5 = vmax.bf16 %v15006_v55, %v348_v20  ;;  %v624_v20 = vmax.bf16 %v15006_v55, %v368_v63  ;;  %v384_v63 = vld [vmem:[%s12005_s14 + $0x144] sm:$0xff] }
 0x242   : > { %5322 = vmatprep.mubr.bf16.mxu1 %v9235_v29  ;;  %v608_v29 = vmax.bf16 %v15006_v55, %v352_v2 }
 0x244   : > { %v9062_v62 = vcombine.high %v604_v5, %v608_v29 }
 0x246   : > { %3951 = vmatmul.mubr.bf16.gmra.mrb[120].mxu0 %v9262_v35 }
 0x247   : > { %3960 = vmatprep.mubr.bf16.mxu0 %v9270_v24 }
 0x249   : > { %5323 = vmatmul.mubr.bf16.gmra.mrb[148].mxu1 %v9234_v16  ;;  %v11809_v16 = vld [vmem:[%s14962_s1 + $0x600] ss:$16 sps:$4 sm:$0xff]  }
 0x24a   : > { %5332 = vmatprep.mubr.bf16.mxu1 %v9242_v46  ;;  %v612_v46 = vmax.bf16 %v15006_v55, %v356_v51  ;;  %v9076_v51 = vcombine.high %v620_v44, %v624_v20 }
 0x24c   : > { %v9068_v2 = vcombine.low %v612_v46, %v616_v34 }
 0x24e   : > { %3961 = vmatmul.mubr.bf16.gmra.mrb[124].mxu0 %v9269_v59 }
 0x24f   : > { %4003 = vmatprep.mubr.bf16.mxu0 %v9055_v11 }
 0x251   : > { %5333 = vmatmul.mubr.bf16.gmra.mrb[152].mxu1 %v9241_v57  ;;  %v9061_v57 = vcombine.low %v604_v5, %v608_v29  ;;  %v9075_v5 = vcombine.low %v620_v44, %v624_v20 }
 0x252   : > { %5342 = vmatprep.mubr.bf16.mxu1 %v9249_v9  ;;  %v9069_v9 = vcombine.high %v612_v46, %v616_v34 }
 0x256   : > { %4004 = vmatmul.mubr.bf16.vlgmr.msra.gmra.mrb[0].mxu0 %v9054_v38 }
 0x257   : > { %4325 = vmatpush1.bf16.msra.mxu0 %v11809_v16  ;;  %4013 = vmatprep.mubr.bf16.mxu0 %v9062_v62  ;;  %v376_v16 = vld [vmem:[%s12005_s14 + $0x10c] sm:$0xff] }
 0x259   : > { %5343 = vmatmul.mubr.bf16.gmra.mrb[156].mxu1 %v9248_v37  ;;  %v628_v37 = vmax.bf16 %v15006_v55, %v372_v49  ;;  %v388_v49 = vld [vmem:[%s12005_s14 + $0x160] sm:$0xff] }
 0x25a   : > { %5352 = vmatprep.mubr.bf16.mxu1 %v9256_v30  ;;  %v632_v30 = vmax.bf16 %v15006_v55, %v376_v16  ;;  %v392_v16 = vld [vmem:[%s12005_s14 + $0x17c] sm:$0xff] }
 0x25c   : > { %v9083_v29 = vcombine.high %v628_v37, %v632_v30  ;;  %v9082_v46 = vcombine.low %v628_v37, %v632_v30 }
 0x25e   : > { %4014 = vmatmul.mubr.bf16.gmra.mrb[4].mxu0 %v9061_v57 }
 0x25f   : > { %4023 = vmatprep.mubr.bf16.mxu0 %v9069_v9 }
 0x261   : > { %5353 = vmatmul.mubr.bf16.gmra.mrb[160].mxu1 %v9255_v6  ;;  %v636_v6 = vmax.bf16 %v15006_v55, %v380_v15  ;;  %v396_v15 = vld [vmem:[%s12005_s14 + $0x198] sm:$0xff] }
 0x262   : > { %5362 = vmatprep.mubr.bf16.mxu1 %v9263_v10  ;;  %v640_v10 = vmax.bf16 %v15006_v55, %v384_v63  ;;  %v400_v63 = vld [vmem:[%s12005_s14 + $0x1b4] sm:$0xff] }
 0x264   : > { %v9090_v34 = vcombine.high %v636_v6, %v640_v10  ;;  %v9089_v44 = vcombine.low %v636_v6, %v640_v10 }
 0x266   : > { %4024 = vmatmul.mubr.bf16.gmra.mrb[8].mxu0 %v9068_v2 }
 0x267   : > { %4033 = vmatprep.mubr.bf16.mxu0 %v9076_v51 }
 0x269   : > { %5363 = vmatmul.mubr.bf16.gmra.mrb[164].mxu1 %v9262_v35  ;;  %v644_v35 = vmax.bf16 %v15006_v55, %v388_v49  ;;  %v404_v49 = vld [vmem:[%s12005_s14 + $0x1d0] sm:$0xff] }
 0x26a   : > { %5372 = vmatprep.mubr.bf16.mxu1 %v9270_v24  ;;  %v648_v24 = vmax.bf16 %v15006_v55, %v392_v16  ;;  %v408_v16 = vld [vmem:[%s12005_s14 + $0x1ec] sm:$0xff] }
 0x26c   : > { %v9097_v20 = vcombine.high %v644_v35, %v648_v24  ;;  %v9096_v37 = vcombine.low %v644_v35, %v648_v24 }
 0x26e   : > { %4034 = vmatmul.mubr.bf16.gmra.mrb[12].mxu0 %v9075_v5 }
 0x26f   : > { %4043 = vmatprep.mubr.bf16.mxu0 %v9083_v29 }
 0x271   : > { %5373 = vmatmul.mubr.bf16.gmra.mrb[168].mxu1 %v9269_v59  ;;  %v652_v59 = vmax.bf16 %v15006_v55, %v396_v15  ;;  %v412_v15 = vld [vmem:[%s12005_s14 + $0x208] sm:$0xff] }
 0x272   : > { %5415 = vmatprep.mubr.bf16.mxu1 %v9055_v11  ;;  %v656_v11 = vmax.bf16 %v15006_v55, %v400_v63  ;;  %v416_v63 = vld [vmem:[%s12005_s14 + $0x224] sm:$0xff] }
 0x274   : > { %v9104_v30 = vcombine.high %v652_v59, %v656_v11  ;;  %v9103_v6 = vcombine.low %v652_v59, %v656_v11 }
 0x276   : > { %4044 = vmatmul.mubr.bf16.gmra.mrb[16].mxu0 %v9082_v46 }
 0x277   : > { %4053 = vmatprep.mubr.bf16.mxu0 %v9090_v34 }
 0x279   : > { %5416 = vmatmul.mubr.bf16.vlgmr.msra.gmra.mrb[44].mxu1 %v9054_v38  ;;  %v660_v38 = vmax.bf16 %v15006_v55, %v404_v49  ;;  %v420_v49 = vld [vmem:[%s12005_s14 + $0x240] sm:$0xff] }
 0x27a   : > { %5425 = vmatprep.mubr.bf16.mxu1 %v9062_v62  ;;  %v664_v62 = vmax.bf16 %v15006_v55, %v408_v16  ;;  %v424_v16 = vld [vmem:[%s12005_s14 + $0x25c] sm:$0xff] }
 0x27c   : > { %v9111_v10 = vcombine.high %v660_v38, %v664_v62  ;;  %v9110_v35 = vcombine.low %v660_v38, %v664_v62 }
 0x27e   : > { %4054 = vmatmul.mubr.bf16.gmra.mrb[20].mxu0 %v9089_v44 }
 0x27f   : > { %4063 = vmatprep.mubr.bf16.mxu0 %v9097_v20 }
 0x281   : > { %5426 = vmatmul.mubr.bf16.gmra.mrb[48].mxu1 %v9061_v57  ;;  %v668_v57 = vmax.bf16 %v15006_v55, %v412_v15  ;;  %v428_v15 = vld [vmem:[%s12005_s14 + $0x278] sm:$0xff] }
 0x282   : > { %5435 = vmatprep.mubr.bf16.mxu1 %v9069_v9  ;;  %v672_v9 = vmax.bf16 %v15006_v55, %v416_v63  ;;  %v432_v63 = vld [vmem:[%s12005_s14 + $0x294] sm:$0xff] }
 0x284   : > { %v9118_v24 = vcombine.high %v668_v57, %v672_v9  ;;  %v9117_v59 = vcombine.low %v668_v57, %v672_v9 }
 0x286   : > { %4064 = vmatmul.mubr.bf16.gmra.mrb[24].mxu0 %v9096_v37 }
 0x287   : > { %4073 = vmatprep.mubr.bf16.mxu0 %v9104_v30 }
 0x289   : > { %5436 = vmatmul.mubr.bf16.gmra.mrb[52].mxu1 %v9068_v2  ;;  %v676_v2 = vmax.bf16 %v15006_v55, %v420_v49  ;;  %v436_v49 = vld [vmem:[%s12005_s14 + $0x2b0] sm:$0xff] }
 0x28a   : > { %5445 = vmatprep.mubr.bf16.mxu1 %v9076_v51  ;;  %v680_v51 = vmax.bf16 %v15006_v55, %v424_v16  ;;  %v440_v16 = vld [vmem:[%s12005_s14 + $0x2cc] sm:$0xff] }
 0x28c   : > { %v9125_v11 = vcombine.high %v676_v2, %v680_v51  ;;  %v9124_v38 = vcombine.low %v676_v2, %v680_v51 }
 0x28e   : > { %4074 = vmatmul.mubr.bf16.gmra.mrb[28].mxu0 %v9103_v6 }
 0x28f   : > { %4083 = vmatprep.mubr.bf16.mxu0 %v9111_v10 }
 0x291   : > { %5446 = vmatmul.mubr.bf16.gmra.mrb[56].mxu1 %v9075_v5  ;;  %v684_v5 = vmax.bf16 %v15006_v55, %v428_v15  ;;  %v444_v15 = vld [vmem:[%s12005_s14 + $0x2e8] sm:$0xff] }
 0x292   : > { %5455 = vmatprep.mubr.bf16.mxu1 %v9083_v29  ;;  %v688_v29 = vmax.bf16 %v15006_v55, %v432_v63  ;;  %v448_v63 = vld [vmem:[%s12005_s14 + $0x304] sm:$0xff] }
 0x294   : > { %v9132_v62 = vcombine.high %v684_v5, %v688_v29  ;;  %v9131_v57 = vcombine.low %v684_v5, %v688_v29 }
 0x296   : > { %4084 = vmatmul.mubr.bf16.gmra.mrb[32].mxu0 %v9110_v35 }
 0x297   : > { %4093 = vmatprep.mubr.bf16.mxu0 %v9118_v24 }
 0x299   : > { %5456 = vmatmul.mubr.bf16.gmra.mrb[60].mxu1 %v9082_v46  ;;  %v692_v46 = vmax.bf16 %v15006_v55, %v436_v49  ;;  %v452_v49 = vld [vmem:[%s12005_s14 + $0x320] sm:$0xff] }
 0x29a   : > { %5465 = vmatprep.mubr.bf16.mxu1 %v9090_v34  ;;  %v696_v34 = vmax.bf16 %v15006_v55, %v440_v16  ;;  %v456_v16 = vld [vmem:[%s12005_s14 + $0x33c] sm:$0xff] }
 0x29c   : > { %v9139_v9 = vcombine.high %v692_v46, %v696_v34  ;;  %v9138_v2 = vcombine.low %v692_v46, %v696_v34 }
 0x29e   : > { %4094 = vmatmul.mubr.bf16.gmra.mrb[36].mxu0 %v9117_v59 }
 0x29f   : > { %4103 = vmatprep.mubr.bf16.mxu0 %v9125_v11 }
 0x2a1   : > { %5466 = vmatmul.mubr.bf16.gmra.mrb[64].mxu1 %v9089_v44  ;;  %v700_v44 = vmax.bf16 %v15006_v55, %v444_v15  ;;  %v460_v15 = vld [vmem:[%s12005_s14 + $0x358] sm:$0xff] }
 0x2a2   : > { %5475 = vmatprep.mubr.bf16.mxu1 %v9097_v20  ;;  %v704_v20 = vmax.bf16 %v15006_v55, %v448_v63  ;;  %v464_v63 = vld [vmem:[%s12005_s14 + $0x374] sm:$0xff] }
 0x2a4   : > { %v9146_v51 = vcombine.high %v700_v44, %v704_v20  ;;  %v9145_v5 = vcombine.low %v700_v44, %v704_v20 }
 0x2a6   : > { %4104 = vmatmul.mubr.bf16.gmra.mrb[40].mxu0 %v9124_v38 }
 0x2a7   : > { %4113 = vmatprep.mubr.bf16.mxu0 %v9132_v62 }
 0x2a9   : > { %5476 = vmatmul.mubr.bf16.gmra.mrb[68].mxu1 %v9096_v37  ;;  %v708_v37 = vmax.bf16 %v15006_v55, %v452_v49  ;;  %v468_v49 = vld [vmem:[%s12005_s14 + $0x390] sm:$0xff] }
 0x2aa   : > { %5485 = vmatprep.mubr.bf16.mxu1 %v9104_v30  ;;  %v712_v30 = vmax.bf16 %v15006_v55, %v456_v16  ;;  %v472_v16 = vld [vmem:[%s12005_s14 + $0x3ac] sm:$0xff] }
 0x2ac   : > { %v9153_v29 = vcombine.high %v708_v37, %v712_v30  ;;  %v9152_v46 = vcombine.low %v708_v37, %v712_v30 }
 0x2ae   : > { %4114 = vmatmul.mubr.bf16.gmra.mrb[44].mxu0 %v9131_v57 }
 0x2af   : > { %4123 = vmatprep.mubr.bf16.mxu0 %v9139_v9 }
 0x2b1   : > { %5486 = vmatmul.mubr.bf16.gmra.mrb[72].mxu1 %v9103_v6  ;;  %v716_v6 = vmax.bf16 %v15006_v55, %v460_v15  ;;  %v476_v15 = vld [vmem:[%s12005_s14 + $0x3c8] sm:$0xff] }
 0x2b2   : > { %5495 = vmatprep.mubr.bf16.mxu1 %v9111_v10  ;;  %v720_v10 = vmax.bf16 %v15006_v55, %v464_v63  ;;  %v480_v63 = vld [vmem:[%s12005_s14 + $0x3e4] sm:$0xff] }
 0x2b4   : > { %v9160_v34 = vcombine.high %v716_v6, %v720_v10  ;;  %v9159_v44 = vcombine.low %v716_v6, %v720_v10 }
 0x2b6   : > { %4124 = vmatmul.mubr.bf16.gmra.mrb[48].mxu0 %v9138_v2 }
 0x2b7   : > { %4133 = vmatprep.mubr.bf16.mxu0 %v9146_v51 }
 0x2b9   : > { %5496 = vmatmul.mubr.bf16.gmra.mrb[76].mxu1 %v9110_v35  ;;  %v724_v35 = vmax.bf16 %v15006_v55, %v468_v49  ;;  %v484_v49 = vld [vmem:[%s12005_s14 + $0x400] sm:$0xff] }
 0x2ba   : > { %5505 = vmatprep.mubr.bf16.mxu1 %v9118_v24  ;;  %v728_v24 = vmax.bf16 %v15006_v55, %v472_v16  ;;  %v488_v16 = vld [vmem:[%s12005_s14 + $0x41c] sm:$0xff]  ;;  %v740_v6 = vmax.bf16 %v15006_v55, %v484_v49 }
 0x2bc   : > { %v9167_v20 = vcombine.high %v724_v35, %v728_v24  ;;  %v9166_v37 = vcombine.low %v724_v35, %v728_v24  ;;  %v492_v35 = vld [vmem:[%s12005_s14 + $0x438] sm:$0xff] }
 0x2bd   : > { %v496_v24 = vld [vmem:[%s12005_s14 + $0x454] sm:$0xff] }
 0x2be   : > { %4134 = vmatmul.mubr.bf16.gmra.mrb[52].mxu0 %v9145_v5 }
 0x2bf   : > { %4143 = vmatprep.mubr.bf16.mxu0 %v9153_v29 }
 0x2c1   : > { %5506 = vmatmul.mubr.bf16.gmra.mrb[80].mxu1 %v9117_v59  ;;  %v732_v59 = vmax.bf16 %v15006_v55, %v476_v15  ;;  %v748_v15 = vmax.bf16 %v15006_v55, %v492_v35  ;;  %v508_v35 = vld [vmem:[%s12005_s14 + $0x4a8] sm:$0xff] }
 0x2c2   : > { %5515 = vmatprep.mubr.bf16.mxu1 %v9125_v11  ;;  %v736_v11 = vmax.bf16 %v15006_v55, %v480_v63  ;;  %v752_v63 = vmax.bf16 %v15006_v55, %v496_v24  ;;  %v512_v24 = vld [vmem:[%s12005_s14 + $0x4c4] sm:$0xff] }
 0x2c4   : > { %v9174_v30 = vcombine.high %v732_v59, %v736_v11 }
 0x2c6   : > { %4144 = vmatmul.mubr.bf16.gmra.mrb[56].mxu0 %v9152_v46 }
 0x2c7   : > { %4153 = vmatprep.mubr.bf16.mxu0 %v9160_v34 }
 0x2c9   : > { %5516 = vmatmul.mubr.bf16.gmra.mrb[84].mxu1 %v9124_v38  ;;  %v11685_v38 = vld [vmem:[%s14962_s1 + $0x608] ss:$16 sps:$4 sm:$0xff]  }
 0x2ca   : > { %5525 = vmatprep.mubr.bf16.mxu1 %v9132_v62  ;;  %v11687_v62 = vld [vmem:[%s14962_s1 + $0x60c] ss:$16 sps:$4 sm:$0xff]  }
 0x2cb   : > { %5736 = vmatprep.subr.bf16.mxu1 %v11687_v62 }
 0x2cc   : > { %5737 = vmatpush1.bf16.msra.mxu1 %v11685_v38  ;;  %v9187_v38 = vcombine.low %v748_v15, %v752_v63 }
 0x2cd   : > { %7902 = vmatprep.subr.bf16.mxu1 %v15006_v55 }
 0x2ce   : > { %4154 = vmatmul.mubr.bf16.gmra.mrb[60].mxu0 %v9159_v44 }
 0x2cf   : > { %4163 = vmatprep.mubr.bf16.mxu0 %v9167_v20 }
 0x2d1   : > { %5526 = vmatmul.mubr.bf16.gmra.mrb[88].mxu1 %v9131_v57  ;;  %v744_v57 = vmax.bf16 %v15006_v55, %v488_v16 }
 0x2d2   : > { %5535 = vmatprep.mubr.bf16.mxu1 %v9139_v9  ;;  %v9173_v9 = vcombine.low %v732_v59, %v736_v11  ;;  %v9188_v59 = vcombine.high %v748_v15, %v752_v63  ;;  %v500_v11 = vld [vmem:[%s12005_s14 + $0x470] sm:$0xff] }
 0x2d3   : > { %v9181_v10 = vcombine.high %v740_v6, %v744_v57  ;;  %v756_v49 = vmax.bf16 %v15006_v55, %v500_v11  ;;  %v516_v11 = vld [vmem:[%s12005_s14 + $0x4e0] sm:$0xff] }
 0x2d6   : > { %4164 = vmatmul.mubr.bf16.gmra.mrb[64].mxu0 %v9166_v37 }
 0x2d7   : > { %4173 = vmatprep.mubr.bf16.mxu0 %v9174_v30 }
 0x2d9   : > { %5536 = vmatmul.mubr.bf16.gmra.mrb[92].mxu1 %v9138_v2  ;;  %v9180_v2 = vcombine.low %v740_v6, %v744_v57 }
 0x2da   : > { %5545 = vmatprep.mubr.bf16.mxu1 %v9146_v51  ;;  %v504_v51 = vld [vmem:[%s12005_s14 + $0x48c] sm:$0xff] }
 0x2db   : > { %v760_v16 = vmax.bf16 %v15006_v55, %v504_v51  ;;  %v520_v51 = vld [vmem:[%s12005_s14 + $0x4fc] sm:$0xff] }
 0x2dd   : > { %v9195_v62 = vcombine.high %v756_v49, %v760_v16  ;;  %v9194_v6 = vcombine.low %v756_v49, %v760_v16 }
 0x2de   : > { %4174 = vmatmul.mubr.bf16.gmra.mrb[68].mxu0 %v9173_v9 }
 0x2df   : > { %4183 = vmatprep.mubr.bf16.mxu0 %v9181_v10 }
 0x2e1   : > { %5546 = vmatmul.mubr.bf16.gmra.mrb[96].mxu1 %v9145_v5  ;;  %v764_v5 = vmax.bf16 %v15006_v55, %v508_v35  ;;  %v524_v35 = vld [vmem:[%s12005_s14 + $0x518] sm:$0xff] }
 0x2e2   : > { %5555 = vmatprep.mubr.bf16.mxu1 %v9153_v29  ;;  %v768_v29 = vmax.bf16 %v15006_v55, %v512_v24  ;;  %v528_v24 = vld [vmem:[%s12005_s14 + $0x534] sm:$0xff] }
 0x2e4   : > { %v9202_v57 = vcombine.high %v764_v5, %v768_v29  ;;  %v9201_v15 = vcombine.low %v764_v5, %v768_v29  ;;  %v11690_v5 = vld [vmem:[%s14964_s3 + $0x4] ss:$8 sps:$4 sm:$0xff]  }
 0x2e5   : > { %6869 = vmatprep.subr.bf16.mxu0 %v11690_v5 }
 0x2e6   : > { %4184 = vmatmul.mubr.bf16.gmra.mrb[72].mxu0 %v9180_v2 }
 0x2e7   : > { %4193 = vmatprep.mubr.bf16.mxu0 %v9188_v59 }
 0x2e9   : > { %5556 = vmatmul.mubr.bf16.gmra.mrb[100].mxu1 %v9152_v46  ;;  %v772_v46 = vmax.bf16 %v15006_v55, %v516_v11  ;;  %v532_v11 = vld [vmem:[%s12005_s14 + $0x550] sm:$0xff] }
 0x2ea   : > { %5565 = vmatprep.mubr.bf16.mxu1 %v9160_v34  ;;  %v776_v34 = vmax.bf16 %v15006_v55, %v520_v51  ;;  %v536_v51 = vld [vmem:[%s12005_s14 + $0x56c] sm:$0xff] }
 0x2ec   : > { %v9209_v63 = vcombine.high %v772_v46, %v776_v34  ;;  %v9208_v49 = vcombine.low %v772_v46, %v776_v34  ;;  %v544_v46 = vld [vmem:[%s12005_s14 + $0x5a4] sm:$0xff] }
 0x2ee   : > { %4194 = vmatmul.mubr.bf16.gmra.mrb[76].mxu0 %v9187_v38 }
 0x2ef   : > { %4203 = vmatprep.mubr.bf16.mxu0 %v9195_v62 }
 0x2f1   : > { %5566 = vmatmul.mubr.bf16.gmra.mrb[104].mxu1 %v9159_v44  ;;  %v780_v44 = vmax.bf16 %v15006_v55, %v524_v35  ;;  %v800_v35 = vmax.bf16 %v15006_v55, %v544_v46  ;;  %v560_v46 = vld [vmem:[%s12005_s14 + $0x614] sm:$0xff] }
 0x2f2   : > { %5575 = vmatprep.mubr.bf16.mxu1 %v9167_v20  ;;  %v784_v20 = vmax.bf16 %v15006_v55, %v528_v24 }
 0x2f4   : > { %v9216_v16 = vcombine.high %v780_v44, %v784_v20 }
 0x2f6   : > { %4204 = vmatmul.mubr.bf16.gmra.mrb[80].mxu0 %v9194_v6 }
 0x2f7   : > { %4213 = vmatprep.mubr.bf16.mxu0 %v9202_v57 }
 0x2f9   : > { %5576 = vmatmul.mubr.bf16.gmra.mrb[108].mxu1 %v9166_v37  ;;  %v788_v37 = vmax.bf16 %v15006_v55, %v532_v11  ;;  %v548_v11 = vld [vmem:[%s12005_s14 + $0x5c0] sm:$0xff] }
 0x2fa   : > { %5585 = vmatprep.mubr.bf16.mxu1 %v9174_v30  ;;  %v792_v30 = vmax.bf16 %v15006_v55, %v536_v51  ;;  %v552_v51 = vld [vmem:[%s12005_s14 + $0x5dc] sm:$0xff] }
 0x2fc   : > { %v9223_v29 = vcombine.high %v788_v37, %v792_v30 }
 0x2fe   : > { %4214 = vmatmul.mubr.bf16.gmra.mrb[84].mxu0 %v9201_v15 }
 0x2ff   : > { %4223 = vmatprep.mubr.bf16.mxu0 %v9209_v63 }
 0x301   : > { %5586 = vmatmul.mubr.bf16.gmra.mrb[112].mxu1 %v9173_v9  ;;  %v9215_v9 = vcombine.low %v780_v44, %v784_v20  ;;  %v808_v44 = vmax.bf16 %v15006_v55, %v552_v51  ;;  %v568_v51 = vld [vmem:[%s12005_s14 + $0x64c] sm:$0xff] }
 0x302   : > { %5595 = vmatprep.mubr.bf16.mxu1 %v9181_v10  ;;  %v540_v10 = vld [vmem:[%s12005_s14 + $0x588] sm:$0xff] }
 0x303   : > { %v796_v34 = vmax.bf16 %v15006_v55, %v540_v10  ;;  %v556_v10 = vld [vmem:[%s12005_s14 + $0x5f8] sm:$0xff] }
 0x305   : > { %v9230_v24 = vcombine.high %v796_v34, %v800_v35  ;;  %v9229_v20 = vcombine.low %v796_v34, %v800_v35 }
 0x306   : > { %4224 = vmatmul.mubr.bf16.gmra.mrb[88].mxu0 %v9208_v49 }
 0x307   : > { %4233 = vmatprep.mubr.bf16.mxu0 %v9216_v16 }
 0x309   : > { %5596 = vmatmul.mubr.bf16.gmra.mrb[116].mxu1 %v9180_v2  ;;  %v9222_v2 = vcombine.low %v788_v37, %v792_v30 }
 0x30a   : > { %5605 = vmatprep.mubr.bf16.mxu1 %v9188_v59  ;;  %v804_v59 = vmax.bf16 %v15006_v55, %v548_v11  ;;  %v564_v11 = vld [vmem:[%s12005_s14 + $0x630] sm:$0xff] }
 0x30c   : > { %v9237_v5 = vcombine.high %v804_v59, %v808_v44  ;;  %v9236_v37 = vcombine.low %v804_v59, %v808_v44 }
 0x30e   : > { %4234 = vmatmul.mubr.bf16.gmra.mrb[92].mxu0 %v9215_v9 }
 0x30f   : > { %4243 = vmatprep.mubr.bf16.mxu0 %v9223_v29 }
 0x311   : > { %5606 = vmatmul.mubr.bf16.gmra.mrb[120].mxu1 %v9187_v38  ;;  %v812_v38 = vmax.bf16 %v15006_v55, %v556_v10  ;;  %v572_v10 = vld [vmem:[%s12005_s14 + $0x668] sm:$0xff] }
 0x312   : > { %5615 = vmatprep.mubr.bf16.mxu1 %v9195_v62  ;;  %v816_v62 = vmax.bf16 %v15006_v55, %v560_v46  ;;  %v576_v46 = vld [vmem:[%s12005_s14 + $0x684] sm:$0xff] }
 0x314   : > { %v9244_v30 = vcombine.high %v812_v38, %v816_v62  ;;  %v9243_v34 = vcombine.low %v812_v38, %v816_v62 }
 0x316   : > { %4244 = vmatmul.mubr.bf16.gmra.mrb[96].mxu0 %v9222_v2 }
 0x317   : > { %4253 = vmatprep.mubr.bf16.mxu0 %v9230_v24 }
 0x319   : > { %5616 = vmatmul.mubr.bf16.gmra.mrb[124].mxu1 %v9194_v6  ;;  %v820_v6 = vmax.bf16 %v15006_v55, %v564_v11  ;;  %v580_v11 = vld [vmem:[%s12005_s14 + $0x6a0] sm:$0xff] }
 0x31a   : > { %5625 = vmatprep.mubr.bf16.mxu1 %v9202_v57  ;;  %v824_v57 = vmax.bf16 %v15006_v55, %v568_v51  ;;  %v584_v51 = vld [vmem:[%s12005_s14 + $0x6bc] sm:$0xff] }
 0x31c   : > { %v9251_v35 = vcombine.high %v820_v6, %v824_v57  ;;  %v9250_v59 = vcombine.low %v820_v6, %v824_v57 }
 0x31e   : > { %4254 = vmatmul.mubr.bf16.gmra.mrb[100].mxu0 %v9229_v20 }
 0x31f   : > { %4263 = vmatprep.mubr.bf16.mxu0 %v9237_v5 }
 0x321   : > { %5626 = vmatmul.mubr.bf16.gmra.mrb[128].mxu1 %v9201_v15  ;;  %v828_v15 = vmax.bf16 %v15006_v55, %v572_v10  ;;  %v588_v10 = vld [vmem:[%s12005_s14 + $0x6d8] sm:$0xff] }
 0x322   : > { %5635 = vmatprep.mubr.bf16.mxu1 %v9209_v63  ;;  %v832_v63 = vmax.bf16 %v15006_v55, %v576_v46  ;;  %v592_v46 = vld [vmem:[%s12005_s14 + $0x6f4] sm:$0xff] }
 0x324   : > { %v9258_v44 = vcombine.high %v828_v15, %v832_v63  ;;  %v9257_v38 = vcombine.low %v828_v15, %v832_v63  ;;  %v345_v15 = vld [vmem:[%s12005_s14 + $0x34] sm:$0xf] }
 0x326   : > { %4264 = vmatmul.mubr.bf16.gmra.mrb[104].mxu0 %v9236_v37 }
 0x327   : > { %4273 = vmatprep.mubr.bf16.mxu0 %v9244_v30 }
 0x329   : > { %5636 = vmatmul.mubr.bf16.gmra.mrb[132].mxu1 %v9208_v49  ;;  %v836_v49 = vmax.bf16 %v15006_v55, %v580_v11  ;;  %v349_v11 = vld [vmem:[%s12005_s14 + $0x50] sm:$0xf] }
 0x32a   : > { %5645 = vmatprep.mubr.bf16.mxu1 %v9216_v16  ;;  %v840_v16 = vmax.bf16 %v15006_v55, %v584_v51  ;;  %v11693_v51 = vld [vmem:[%s14964_s3 + $0x14] ss:$8 sps:$4 sm:$0xff]  }
 0x32c   : > { %v9265_v62 = vcombine.high %v836_v49, %v840_v16  ;;  %v9264_v6 = vcombine.low %v836_v49, %v840_v16  ;;  %v11696_v16 = vld [vmem:[%s14964_s3 + $0x24] ss:$8 sps:$4 sm:$0xff]  }
 0x32e   : > { %4274 = vmatmul.mubr.bf16.gmra.mrb[108].mxu0 %v9243_v34 }
 0x32f   : > { %4283 = vmatprep.mubr.bf16.mxu0 %v9251_v35 }
 0x331   : > { %5646 = vmatmul.mubr.bf16.gmra.mrb[136].mxu1 %v9215_v9  ;;  %v844_v9 = vmax.bf16 %v15006_v55, %v588_v10 }
 0x332   : > { %5655 = vmatprep.mubr.bf16.mxu1 %v9223_v29  ;;  %v848_v29 = vmax.bf16 %v15006_v55, %v592_v46  ;;  %v357_v46 = vld [vmem:[%s12005_s14 + $0x88] sm:$0xf] }
 0x334   : > { %v13463_v57 = vcombine.high %v844_v9, %v848_v29 }
 0x336   : > { %4284 = vmatmul.mubr.bf16.gmra.mrb[112].mxu0 %v9250_v59 }
 0x337   : > { %4293 = vmatprep.mubr.bf16.mxu0 %v9258_v44 }
 0x339   : > { %5656 = vmatmul.mubr.bf16.gmra.mrb[140].mxu1 %v9222_v2  ;;  %v13466_v2 = vcombine.low %v844_v9, %v848_v29  ;;  %v361_v9 = vld [vmem:[%s12005_s14 + $0xa4] sm:$0xf]  ;;  %v11694_v29 = vld [vmem:[%s14964_s3 + $0x20] ss:$8 sps:$4 sm:$0xff]  }
 0x33a   : > { %5665 = vmatprep.mubr.bf16.mxu1 %v9230_v24  ;;  %v341_v24 = vld [vmem:[%s12005_s14 + $0x18] sm:$0xf] }
 0x33b   : > { %v597_v63 = vmax.bf16 %v15006_v55, %v341_v24  ;;  %v11699_v24 = vld [vmem:[%s14964_s3 + $0x34] ss:$8 sps:$4 sm:$0xff]  }
 0x33e   : > { %4294 = vmatmul.mubr.bf16.gmra.mrb[116].mxu0 %v9257_v38 }
 0x33f   : > { %4303 = vmatprep.mubr.bf16.mxu0 %v9265_v62 }
 0x341   : > { %5666 = vmatmul.mubr.bf16.gmra.mrb[144].mxu1 %v9229_v20  ;;  %v601_v20 = vmax.bf16 %v15006_v55, %v345_v15  ;;  %v11697_v15 = vld [vmem:[%s14964_s3 + $0x30] ss:$8 sps:$4 sm:$0xff]  }
 0x342   : > { %5675 = vmatprep.mubr.bf16.mxu1 %v9237_v5 }
 0x343   : > { %v13474_v5 = vcombine.low %v597_v63, %v601_v20  ;;  %v11702_v63 = vld [vmem:[%s14964_s3 + $0x44] ss:$8 sps:$4 sm:$0xff]  }
 0x346   : > { %4304 = vmatmul.mubr.bf16.gmra.mrb[120].mxu0 %v9264_v6 }
 0x347   : > { %4313 = vmatprep.mubr.bf16.mxu0 %v13463_v57 }
 0x349   : > { %5676 = vmatmul.mubr.bf16.gmra.mrb[148].mxu1 %v9236_v37  ;;  %v353_v37 = vld [vmem:[%s12005_s14 + $0x6c] sm:$0xf] }
 0x34a   : > { %5685 = vmatprep.mubr.bf16.mxu1 %v9244_v30  ;;  %v11688_v30 = vld [vmem:[%s14964_s3] ss:$8 sps:$4 sm:$0xff]   ;;  %v609_v49 = vmax.bf16 %v15006_v55, %v353_v37  ;;  %v369_v37 = vld [vmem:[%s12005_s14 + $0xdc] sm:$0xf] }
 0x34e   : > { %4314 = vmatmul.mubr.bf16.gmra.mrb[124].mxu0 %v13466_v2 }
 0x34f   : > { %4356 = vmatprep.mubr.bf16.mxu0 %v15006_v55 }
 0x351   : > { %5686 = vmatmul.mubr.bf16.gmra.mrb[152].mxu1 %v9243_v34  ;;  %v605_v34 = vmax.bf16 %v15006_v55, %v349_v11  ;;  %v365_v11 = vld [vmem:[%s12005_s14 + $0xc0] sm:$0xf] }
 0x352   : > { %5695 = vmatprep.mubr.bf16.mxu1 %v9251_v35  ;;  %v11691_v35 = vld [vmem:[%s14964_s3 + $0x10] ss:$8 sps:$4 sm:$0xff]  }
 0x353   : > { %v13495_v10 = vcombine.low %v605_v34, %v609_v49  ;;  %v11703_v34 = vld [vmem:[%s14964_s3 + $0x50] ss:$8 sps:$4 sm:$0xff]   ;;  %v11708_v49 = vld [vmem:[%s14964_s3 + $0x64] ss:$8 sps:$4 sm:$0xff]  }
 0x356   : > { %9470 = vmatmul.mubr.msk.bf16.vlgmr.msra.gmra.mrb[0].mxu0 %vm3168_vm0, %v13474_v5 }
 0x357   : > { %4366 = vmatprep.mubr.bf16.mxu0 %v15006_v55  ;;  %6870 = vmatpush1.bf16.msra.mxu0 %v11688_v30  ;;  %v11700_v30 = vld [vmem:[%s14964_s3 + $0x40] ss:$8 sps:$4 sm:$0xff]  }
 0x358   : > { %6871 = vmatprep.subr.bf16.mxu0 %v11693_v51  ;;  %v11705_v51 = vld [vmem:[%s14964_s3 + $0x54] ss:$8 sps:$4 sm:$0xff]  }
 0x359   : > { %5696 = vmatmul.mubr.bf16.gmra.mrb[156].mxu1 %v9250_v59  ;;  %v613_v59 = vmax.bf16 %v15006_v55, %v357_v46  ;;  %v377_v46 = vld [vmem:[%s12005_s14 + $0x114] sm:$0xf] }
 0x35a   : > { %5705 = vmatprep.mubr.bf16.mxu1 %v9258_v44  ;;  %v617_v44 = vmax.bf16 %v15006_v55, %v361_v9  ;;  %v11706_v9 = vld [vmem:[%s14964_s3 + $0x60] ss:$8 sps:$4 sm:$0xff]  }
 0x35b   : > { %6872 = vmatpush1.bf16.msra.mxu0 %v11691_v35 }
 0x35c   : > { %6873 = vmatprep.subr.bf16.mxu0 %v11696_v16  ;;  %v13516_v20 = vcombine.low %v613_v59, %v617_v44  ;;  %v373_v16 = vld [vmem:[%s12005_s14 + $0xf8] sm:$0xf]  ;;  %v11714_v59 = vld [vmem:[%s14964_s3 + $0x84] ss:$8 sps:$4 sm:$0xff]  }
 0x35e   : > { %9471 = vmatmul.mubr.msk.bf16.gmra.mrb[4].mxu0 %vm3168_vm0, %v13495_v10 }
 0x35f   : > { %4376 = vmatprep.mubr.bf16.mxu0 %v15006_v55  ;;  %6874 = vmatpush1.bf16.msra.mxu0 %v11694_v29  ;;  %v11711_v29 = vld [vmem:[%s14964_s3 + $0x74] ss:$8 sps:$4 sm:$0xff]  }
 0x360   : > { %6875 = vmatprep.subr.bf16.mxu0 %v11699_v24  ;;  %v11709_v24 = vld [vmem:[%s14964_s3 + $0x70] ss:$8 sps:$4 sm:$0xff]  }
 0x361   : > { %5706 = vmatmul.mubr.bf16.gmra.mrb[160].mxu1 %v9257_v38  ;;  %v621_v38 = vmax.bf16 %v15006_v55, %v365_v11  ;;  %v11712_v11 = vld [vmem:[%s14964_s3 + $0x80] ss:$8 sps:$4 sm:$0xff]  }
 0x362   : > { %5715 = vmatprep.mubr.bf16.mxu1 %v9265_v62  ;;  %v625_v62 = vmax.bf16 %v15006_v55, %v369_v37  ;;  %v11717_v37 = vld [vmem:[%s14964_s3 + $0x94] ss:$8 sps:$4 sm:$0xff]  }
 0x363   : > { %6876 = vmatpush1.bf16.msra.mxu0 %v11697_v15  ;;  %v381_v15 = vld [vmem:[%s12005_s14 + $0x130] sm:$0xf] }
 0x364   : > { %6877 = vmatprep.subr.bf16.mxu0 %v11702_v63  ;;  %v13537_v35 = vcombine.low %v621_v38, %v625_v62  ;;  %v385_v63 = vld [vmem:[%s12005_s14 + $0x14c] sm:$0xf] }
 0x365   : > { %v11720_v38 = vld [vmem:[%s14964_s3 + $0xa4] ss:$8 sps:$4 sm:$0xff]  }
 0x366   : > { %9472 = vmatmul.mubr.msk.bf16.gmra.mrb[8].mxu0 %vm3168_vm0, %v13516_v20 }
 0x367   : > { %4386 = vmatprep.mubr.bf16.mxu0 %v15006_v55  ;;  %6878 = vmatpush1.bf16.msra.mxu0 %v11700_v30  ;;  %v641_v30 = vmax.bf16 %v15006_v55, %v385_v63  ;;  %v405_v63 = vld [vmem:[%s12005_s14 + $0x1d8] sm:$0xf] }
 0x368   : > { %6879 = vmatprep.subr.bf16.mxu0 %v11705_v51  ;;  %v11715_v51 = vld [vmem:[%s14964_s3 + $0x90] ss:$8 sps:$4 sm:$0xff]  }
 0x369   : > { %5716 = vmatmul.mubr.bf16.gmra.mrb[164].mxu1 %v9264_v6  ;;  %v629_v6 = vmax.bf16 %v15006_v55, %v373_v16  ;;  %v11718_v16 = vld [vmem:[%s14964_s3 + $0xa0] ss:$8 sps:$4 sm:$0xff]  }
 0x36a   : > { %5725 = vmatprep.mubr.bf16.mxu1 %v13463_v57  ;;  %v633_v57 = vmax.bf16 %v15006_v55, %v377_v46 }
 0x36b   : > { %6880 = vmatpush1.bf16.msra.mxu0 %v11703_v34  ;;  %v389_v34 = vld [vmem:[%s12005_s14 + $0x168] sm:$0xf] }
 0x36c   : > { %6881 = vmatprep.subr.bf16.mxu0 %v11708_v49  ;;  %v13560_v44 = vcombine.low %v629_v6, %v633_v57  ;;  %v393_v49 = vld [vmem:[%s12005_s14 + $0x184] sm:$0xf]  ;;  %v397_v57 = vld [vmem:[%s12005_s14 + $0x1a0] sm:$0xf] }
 0x36d   : > { %v649_v46 = vmax.bf16 %v15006_v55, %v393_v49 }
 0x36e   : > { %9473 = vmatmul.mubr.msk.bf16.gmra.mrb[12].mxu0 %vm3168_vm0, %v13537_v35 }
 0x36f   : > { %4396 = vmatprep.mubr.bf16.mxu0 %v15006_v55  ;;  %6882 = vmatpush1.bf16.msra.mxu0 %v11706_v9  ;;  %v11721_v9 = vld [vmem:[%s14964_s3 + $0xb0] ss:$8 sps:$4 sm:$0xff]  }
 0x370   : > { %6883 = vmatprep.subr.bf16.mxu0 %v11711_v29  ;;  %v11723_v29 = vld [vmem:[%s14964_s3 + $0xb4] ss:$8 sps:$4 sm:$0xff]  }
 0x371   : > { %5726 = vmatmul.mubr.bf16.gmra.mrb[168].mxu1 %v13466_v2  ;;  %v637_v2 = vmax.bf16 %v15006_v55, %v381_v15 }
 0x372   : > { %5768 = vmatprep.mubr.bf16.mxu1 %v15006_v55 }
 0x373   : > { %6884 = vmatpush1.bf16.msra.mxu0 %v11709_v24  ;;  %v9091_v62 = vcombine.low %v637_v2, %v641_v30  ;;  %v401_v24 = vld [vmem:[%s12005_s14 + $0x1bc] sm:$0xf]  ;;  %v11724_v30 = vld [vmem:[%s14964_s3 + $0xc0] ss:$8 sps:$4 sm:$0xff]  }
 0x374   : > { %6885 = vmatprep.subr.bf16.mxu0 %v11714_v59  ;;  %v657_v59 = vmax.bf16 %v15006_v55, %v401_v24  ;;  %v11730_v24 = vld [vmem:[%s14964_s3 + $0xe0] ss:$8 sps:$4 sm:$0xff]  }
 0x376   : > { %9474 = vmatmul.mubr.msk.bf16.gmra.mrb[16].mxu0 %vm3168_vm0, %v13560_v44 }
 0x377   : > { %4406 = vmatprep.mubr.bf16.mxu0 %v15006_v55  ;;  %6886 = vmatpush1.bf16.msra.mxu0 %v11712_v11  ;;  %v409_v11 = vld [vmem:[%s12005_s14 + $0x1f4] sm:$0xf] }
 0x378   : > { %6887 = vmatprep.subr.bf16.mxu0 %v11717_v37  ;;  %v661_v37 = vmax.bf16 %v15006_v55, %v405_v63  ;;  %v665_v2 = vmax.bf16 %v15006_v55, %v409_v11  ;;  %v429_v63 = vld [vmem:[%s12005_s14 + $0x280] sm:$0xf]  ;;  %v433_v11 = vld [vmem:[%s12005_s14 + $0x29c] sm:$0xf] }
 0x379   : > { %9502 = vmatmul.mubr.msk.bf16.vlgmr.msra.gmra.mrb[44].mxu1 %vm3168_vm0, %v13474_v5  ;;  %v645_v5 = vmax.bf16 %v15006_v55, %v389_v34  ;;  %v417_v34 = vld [vmem:[%s12005_s14 + $0x22c] sm:$0xf] }
 0x37a   : > { %5778 = vmatprep.mubr.bf16.mxu1 %v15006_v55 }
 0x37b   : > { %6888 = vmatpush1.bf16.msra.mxu0 %v11715_v51  ;;  %v9098_v6 = vcombine.low %v645_v5, %v649_v46  ;;  %v9112_v51 = vcombine.low %v661_v37, %v665_v2  ;;  %v11729_v5 = vld [vmem:[%s14964_s3 + $0xd4] ss:$8 sps:$4 sm:$0xff]   ;;  %v689_v37 = vmax.bf16 %v15006_v55, %v433_v11  ;;  %v1048_v11 = vlaneseq }
 0x37c   : > { %6889 = vmatprep.subr.bf16.mxu0 %v11720_v38  ;;  %v413_v38 = vld [vmem:[%s12005_s14 + $0x210] sm:$0xf] }
 0x37d   : > { %v669_v49 = vmax.bf16 %v15006_v55, %v413_v38  ;;  %v11733_v38 = vld [vmem:[%s14964_s3 + $0xf0] ss:$8 sps:$4 sm:$0xff]  }
 0x37e   : > { %9475 = vmatmul.mubr.msk.bf16.gmra.mrb[20].mxu0 %vm3168_vm0, %v9091_v62 }
 0x37f   : > { %4416 = vmatprep.mubr.bf16.mxu0 %v15006_v55  ;;  %6890 = vmatpush1.bf16.msra.mxu0 %v11718_v16  ;;  %v673_v16 = vmax.bf16 %v15006_v55, %v417_v34  ;;  %v11735_v34 = vld [vmem:[%s14964_s3 + $0xf4] ss:$8 sps:$4 sm:$0xff]  }
 0x380   : > { %6891 = vmatprep.subr.bf16.mxu0 %v11723_v29  ;;  %v425_v29 = vld [vmem:[%s12005_s14 + $0x264] sm:$0xf] }
 0x381   : > { %9503 = vmatmul.mubr.msk.bf16.gmra.mrb[48].mxu1 %vm3168_vm0, %v13495_v10  ;;  %v653_v10 = vmax.bf16 %v15006_v55, %v397_v57  ;;  %v9119_v46 = vcombine.low %v669_v49, %v673_v16  ;;  %v681_v57 = vmax.bf16 %v15006_v55, %v425_v29 }
 0x382   : > { %5788 = vmatprep.mubr.bf16.mxu1 %v15006_v55 }
 0x383   : > { %6892 = vmatpush1.bf16.msra.mxu0 %v11721_v9  ;;  %v9105_v15 = vcombine.low %v653_v10, %v657_v59  ;;  %v421_v9 = vld [vmem:[%s12005_s14 + $0x248] sm:$0xf]  ;;  %v11732_v10 = vld [vmem:[%s14964_s3 + $0xe4] ss:$8 sps:$4 sm:$0xff]  }
 0x386   : > { %9476 = vmatmul.mubr.msk.bf16.gmra.mrb[24].mxu0 %vm3168_vm0, %v9098_v6 }
 0x387   : > { %4426 = vmatprep.mubr.bf16.mxu0 %v15006_v55 }
 0x389   : > { %9504 = vmatmul.mubr.msk.bf16.gmra.mrb[52].mxu1 %vm3168_vm0, %v13516_v20  ;;  %v11726_v20 = vld [vmem:[%s14964_s3 + $0xc4] ss:$8 sps:$4 sm:$0xff]  }
 0x38a   : > { %5798 = vmatprep.mubr.bf16.mxu1 %v15006_v55  ;;  %6893 = vmatprep.subr.bf16.mxu0 %v11726_v20  ;;  %v441_v20 = vld [vmem:[%s12005_s14 + $0x2d4] sm:$0xf] }
 0x38b   : > { %6894 = vmatpush1.bf16.msra.mxu0 %v11724_v30  ;;  %v437_v30 = vld [vmem:[%s12005_s14 + $0x2b8] sm:$0xf] }
 0x38c   : > { %6895 = vmatprep.subr.bf16.mxu0 %v11729_v5  ;;  %v693_v49 = vmax.bf16 %v15006_v55, %v437_v30  ;;  %v449_v5 = vld [vmem:[%s12005_s14 + $0x30c] sm:$0xf] }
 0x38d   : > { %v705_v29 = vmax.bf16 %v15006_v55, %v449_v5  ;;  %v473_v5 = vld [vmem:[%s12005_s14 + $0x3b4] sm:$0xf] }
 0x38e   : > { %9477 = vmatmul.mubr.msk.bf16.gmra.mrb[28].mxu0 %vm3168_vm0, %v9105_v15 }
 0x38f   : > { %4436 = vmatprep.mubr.bf16.mxu0 %v15006_v55 }
 0x391   : > { %9505 = vmatmul.mubr.msk.bf16.gmra.mrb[56].mxu1 %vm3168_vm0, %v13537_v35  ;;  %v11727_v35 = vld [vmem:[%s14964_s3 + $0xd0] ss:$8 sps:$4 sm:$0xff]  }
 0x392   : > { %5808 = vmatprep.mubr.bf16.mxu1 %v15006_v55  ;;  %6896 = vmatpush1.bf16.msra.mxu0 %v11727_v35  ;;  %v445_v35 = vld [vmem:[%s12005_s14 + $0x2f0] sm:$0xf] }
 0x393   : > { %6897 = vmatprep.subr.bf16.mxu0 %v11732_v10 }
 0x396   : > { %9478 = vmatmul.mubr.msk.bf16.gmra.mrb[32].mxu0 %vm3168_vm0, %v9112_v51 }
 0x397   : > { %4446 = vmatprep.mubr.bf16.mxu0 %v15006_v55  ;;  %6898 = vmatpush1.bf16.msra.mxu0 %v11730_v24  ;;  %v457_v24 = vld [vmem:[%s12005_s14 + $0x344] sm:$0xf] }
 0x398   : > { %6899 = vmatprep.subr.bf16.mxu0 %v11735_v34  ;;  %v13721_v34 = vld [vmem:[%s14963_s2] sm:$0xf] }
 0x399   : > { %9506 = vmatmul.mubr.msk.bf16.gmra.mrb[60].mxu1 %vm3168_vm0, %v13560_v44  ;;  %v677_v44 = vmax.bf16 %v15006_v55, %v421_v9  ;;  %v701_v9 = vmax.bf16 %v15006_v55, %v445_v35  ;;  %v469_v35 = vld [vmem:[%s12005_s14 + $0x398] sm:$0xf] }
 0x39a   : > { %5818 = vmatprep.mubr.bf16.mxu1 %v15006_v55 }
 0x39b   : > { %v9126_v59 = vcombine.low %v677_v44, %v681_v57  ;;  %6900 = vmatpush1.bf16.msra.mxu0 %v11733_v38  ;;  %v13691_v44 = vcombine.low %v701_v9, %v705_v29  ;;  %v453_v57 = vld [vmem:[%s12005_s14 + $0x328] sm:$0xf]  ;;  %v13711_v38 = vshrl.u32 %v1048_v11, 7  ;;  %v725_v9 = vmax.bf16 %v15006_v55, %v469_v35 }
 0x39c   : > { %v709_v10 = vmax.bf16 %v15006_v55, %v453_v57  ;;  %v729_v29 = vmax.bf16 %v15006_v55, %v473_v5 }
 0x39d   : > { %15007 = vst [vmem:[#allocation21_spill] sm:$0xff] %v13711_v38 }
 0x39e   : > { %9479 = vmatmul.mubr.msk.bf16.gmra.mrb[36].mxu0 %vm3168_vm0, %v9119_v46 }
 0x39f   : > { %4456 = vmatprep.mubr.bf16.mxu0 %v15006_v55 }
 0x3a1   : > { %9507 = vmatmul.mubr.msk.bf16.gmra.mrb[64].mxu1 %vm3168_vm0, %v9091_v62  ;;  %v685_v62 = vmax.bf16 %v15006_v55, %v429_v63  ;;  %v713_v63 = vmax.bf16 %v15006_v55, %v457_v24 }
 0x3a2   : > { %5828 = vmatprep.mubr.bf16.mxu1 %v15006_v55 }
 0x3a3   : > { %v9133_v2 = vcombine.low %v685_v62, %v689_v37  ;;  %v461_v62 = vld [vmem:[%s12005_s14 + $0x360] sm:$0xf]  ;;  %v465_v37 = vld [vmem:[%s12005_s14 + $0x37c] sm:$0xf] }
 0x3a4   : > { %v717_v30 = vmax.bf16 %v15006_v55, %v461_v62 }
 0x3a6   : > { %9480 = vmatmul.mubr.msk.bf16.gmra.mrb[40].mxu0 %vm3168_vm0, %v9126_v59 }
 0x3a7   : > { %4466 = vmatprep.mubr.bf16.mxu0 %v15006_v55 }
 0x3a9   : > { %9508 = vmatmul.mubr.msk.bf16.gmra.mrb[68].mxu1 %vm3168_vm0, %v9098_v6  ;;  %v697_v6 = vmax.bf16 %v15006_v55, %v441_v20  ;;  %v721_v20 = vmax.bf16 %v15006_v55, %v465_v37  ;;  %v477_v37 = vld [vmem:[%s12005_s14 + $0x3d0] sm:$0xf] }
 0x3aa   : > { %5838 = vmatprep.mubr.bf16.mxu1 %v15006_v55 }
 0x3ab   : > { %v13677_v16 = vcombine.low %v693_v49, %v697_v6  ;;  %v14985_v49 = vsub.s32 0, %v13711_v38  ;;  %v14984_v6 = vsub.s32 1, %v13711_v38 }
 0x3ae   : > { %9481 = vmatmul.mubr.msk.bf16.gmra.mrb[44].mxu0 %vm3168_vm0, %v9133_v2 }
 0x3af   : > { %4476 = vmatprep.mubr.bf16.mxu0 %v15006_v55 }
 0x3b1   : > { %9509 = vmatmul.mubr.msk.bf16.gmra.mrb[72].mxu1 %vm3168_vm0, %v9105_v15  ;;  %v11738_v15 = vld [vmem:[%s14964_s3 + $0x104] ss:$8 sps:$4 sm:$0xff]  }
 0x3b2   : > { %5848 = vmatprep.mubr.bf16.mxu1 %v15006_v55  ;;  %7222 = vmatprep.subr.bf16.mxu0 %v11738_v15  ;;  %v13739_v15 = vrot.slane %v13721_v34, %v14984_v6 }
 0x3b6   : > { %9482 = vmatmul.mubr.msk.bf16.gmra.mrb[48].mxu0 %vm3168_vm0, %v13677_v16 }
 0x3b7   : > { %4486 = vmatprep.mubr.bf16.mxu0 %v15006_v55 }
 0x3b9   : > { %9510 = vmatmul.mubr.msk.bf16.gmra.mrb[76].mxu1 %vm3168_vm0, %v9112_v51  ;;  %v13702_v51 = vcombine.low %v709_v10, %v713_v63  ;;  %v13744_v63 = vcombine.low %v725_v9, %v729_v29  ;;  %v733_v9 = vmax.bf16 %v15006_v55, %v477_v37 }
 0x3ba   : > { %5858 = vmatprep.mubr.bf16.mxu1 %v15006_v55 }
 0x3be   : > { %9483 = vmatmul.mubr.msk.bf16.gmra.mrb[52].mxu0 %vm3168_vm0, %v13691_v44 }
 0x3bf   : > { %4496 = vmatprep.mubr.bf16.mxu0 %v15006_v55 }
 0x3c1   : > { %9511 = vmatmul.mubr.msk.bf16.gmra.mrb[80].mxu1 %vm3168_vm0, %v9119_v46  ;;  %v13715_v46 = vcombine.low %v717_v30, %v721_v20  ;;  %v481_v30 = vld [vmem:[%s12005_s14 + $0x3ec] sm:$0xf] }
 0x3c2   : > { %5868 = vmatprep.mubr.bf16.mxu1 %v15006_v55  ;;  %v737_v29 = vmax.bf16 %v15006_v55, %v481_v30 }
 0x3c4   : > { %v13764_v37 = vcombine.low %v733_v9, %v737_v29 }
 0x3c6   : > { %9484 = vmatmul.mubr.msk.bf16.gmra.mrb[56].mxu0 %vm3168_vm0, %v13702_v51 }
 0x3c7   : > { %4506 = vmatprep.mubr.bf16.mxu0 %v15006_v55 }
 0x3c9   : > { %9512 = vmatmul.mubr.msk.bf16.gmra.mrb[84].mxu1 %vm3168_vm0, %v9126_v59  ;;  %v13732_v59 = vrot.slane %v13721_v34, %v14985_v49 }
 0x3ca   : > { %5878 = vmatprep.mubr.bf16.mxu1 %v15006_v55 }
 0x3ce   : > { %9485 = vmatmul.mubr.msk.bf16.gmra.mrb[60].mxu0 %vm3168_vm0, %v13715_v46 }
 0x3cf   : > { %4516 = vmatprep.mubr.bf16.mxu0 %v15006_v55 }
 0x3d1   : > { %9513 = vmatmul.mubr.msk.bf16.gmra.mrb[88].mxu1 %vm3168_vm0, %v9133_v2  ;;  %v4215_v57 = vpop.f32.mrb[84].mxu0 }
 0x3d2   : > { %v10155_v24 = vadd.f32 %v4215_v57, %v13732_v59  ;;  %v4217_v10 = vpop.f32.mrb[85].mxu0  ;;  %5888 = vmatprep.mubr.bf16.mxu1 %v15006_v55 }
 0x3d3   : > { %v10157_v11 = vadd.f32 %v4217_v10, %v13739_v15  ;;  %v4219_v62 = vpop.f32.mrb[86].mxu0 }
 0x3d4   : > { %v10156_v20 = vadd.f32 %v10155_v24, %v12760_v4  ;;  %v10159_v35 = vadd.f32 %v4219_v62, %v13732_v59  ;;  %v4221_v5 = vpop.f32.mrb[87].mxu0 }
 0x3d5   : > { %v10158_v2 = vadd.f32 %v10157_v11, %v12765_v12  ;;  %v10161_v6 = vadd.f32 %v4221_v5, %v13739_v15  ;;  %v489_v5 = vld [vmem:[%s12005_s14 + $0x424] sm:$0xf] }
 0x3d6   : > { %v10160_v57 = vadd.f32 %v10159_v35, %v12767_v13  ;;  %9486 = vmatmul.mubr.msk.bf16.gmra.mrb[64].mxu0 %vm3168_vm0, %v13744_v63  ;;  %v6257_v4 = vmax.f32 %v10156_v20, 0.0  ;;  %v485_v20 = vld [vmem:[%s12005_s14 + $0x408] sm:$0xf] }
 0x3d7   : > { %v10162_v10 = vadd.f32 %v10161_v6, %v12769_v14  ;;  %4526 = vmatprep.mubr.bf16.mxu0 %v15006_v55  ;;  %v6258_v12 = vmax.f32 %v10158_v2, 0.0 }
 0x3d8   : > { %v6261_v24 = vmax.f32 %v10160_v57, 0.0 }
 0x3d9   : > { %v6262_v11 = vmax.f32 %v10162_v10, 0.0  ;;  %9514 = vmatmul.mubr.msk.bf16.gmra.mrb[92].mxu1 %vm3168_vm0, %v13677_v16  ;;  %v4225_v13 = vpop.f32.mrb[88].mxu0 }
 0x3da   : > { %v10163_v62 = vadd.f32 %v4225_v13, %v13732_v59  ;;  %v4227_v35 = vpop.f32.mrb[89].mxu0  ;;  %5898 = vmatprep.mubr.bf16.mxu1 %v15006_v55  ;;  %v13767_v30 = vpack.c.bf16 %v6261_v24, %v6257_v4  ;;  %v741_v4 = vmax.bf16 %v15006_v55, %v485_v20  ;;  %v745_v24 = vmax.bf16 %v15006_v55, %v489_v5 }
 0x3db   : > { %v10165_v14 = vadd.f32 %v4227_v35, %v13739_v15  ;;  %v4229_v6 = vpop.f32.mrb[90].mxu0  ;;  %v13772_v2 = vpack.c.bf16 %v6262_v11, %v6258_v12 }
 0x3dc   : > { %v10164_v57 = vadd.f32 %v10163_v62, %v12784_v22  ;;  %v10167_v16 = vadd.f32 %v4229_v6, %v13732_v59  ;;  %v4231_v10 = vpop.f32.mrb[91].mxu0  ;;  %v13788_v6 = vcombine.low %v741_v4, %v745_v24 }
 0x3dd   : > { %v10166_v13 = vadd.f32 %v10165_v14, %v12792_v26  ;;  %v10169_v9 = vadd.f32 %v4231_v10, %v13739_v15 }
 0x3de   : > { %v10168_v29 = vadd.f32 %v10167_v16, %v12797_v52  ;;  %9487 = vmatmul.mubr.msk.bf16.gmra.mrb[68].mxu0 %vm3168_vm0, %v13764_v37  ;;  %v6265_v22 = vmax.f32 %v10164_v57, 0.0  ;;  %v493_v57 = vld [vmem:[%s12005_s14 + $0x440] sm:$0xf]  ;;  %v497_v16 = vld [vmem:[%s12005_s14 + $0x45c] sm:$0xf] }
 0x3df   : > { %v10170_v12 = vadd.f32 %v10169_v9, %v12799_v21  ;;  %4536 = vmatprep.mubr.bf16.mxu0 %v15006_v55  ;;  %v6266_v26 = vmax.f32 %v10166_v13, 0.0 }
 0x3e0   : > { %v6269_v11 = vmax.f32 %v10168_v29, 0.0 }
 0x3e1   : > { %v6270_v62 = vmax.f32 %v10170_v12, 0.0  ;;  %9515 = vmatmul.mubr.msk.bf16.gmra.mrb[96].mxu1 %vm3168_vm0, %v13691_v44  ;;  %v4235_v52 = vpop.f32.mrb[92].mxu0  ;;  %v749_v12 = vmax.bf16 %v15006_v55, %v493_v57  ;;  %v501_v57 = vld [vmem:[%s12005_s14 + $0x478] sm:$0xf] }
 0x3e2   : > { %v10171_v35 = vadd.f32 %v4235_v52, %v13732_v59  ;;  %v4237_v14 = vpop.f32.mrb[93].mxu0  ;;  %5908 = vmatprep.mubr.bf16.mxu1 %v15006_v55  ;;  %v13791_v20 = vpack.c.bf16 %v6269_v11, %v6265_v22  ;;  %v753_v22 = vmax.bf16 %v15006_v55, %v497_v16  ;;  %v505_v16 = vld [vmem:[%s12005_s14 + $0x494] sm:$0xf]  ;;  %s8981_s14 = sshll.u32 %s14815_s25, 4  ;;  %s14914_s14 = int_to_ptr.vmem [resolvable:$true] %s8981_s14 }
 0x3e3   : > { %v10173_v21 = vadd.f32 %v4237_v14, %v13739_v15  ;;  %v4239_v5 = vpop.f32.mrb[94].mxu0  ;;  %v13796_v10 = vpack.c.bf16 %v6270_v62, %v6266_v26  ;;  %s11810_s16 = scalar_lea.vmem %s14914_s14, 4096  ;;  %p11817_p0 = scmp.lt.s32.totalorder %s14914_s14, %s11815_s21 }
 0x3e4   : > { %v10172_v13 = vadd.f32 %v10171_v35, %v12815_v39  ;;  %v10175_v44 = vadd.f32 %v4239_v5, %v13732_v59  ;;  %v4241_v9 = vpop.f32.mrb[95].mxu0  ;;  %v13812_v14 = vcombine.low %v749_v12, %v753_v22  ;;  %v757_v12 = vmax.bf16 %v15006_v55, %v501_v57  ;;  %p11811_p11 = scmp.ne.s32.totalorder %s14914_s14, %s11810_s16  ;;  %p11818_p1 = scmp.lt.s32.totalorder %s11816_s22, %s11810_s16 }
 0x3e5   : > { %v10174_v29 = vadd.f32 %v10173_v21, %v12823_v31  ;;  %v10177_v4 = vadd.f32 %v4241_v9, %v13739_v15  ;;  %v761_v22 = vmax.bf16 %v15006_v55, %v505_v16 }
 0x3e6   : > { %v10176_v24 = vadd.f32 %v10175_v44, %v12828_v42  ;;  %9488 = vmatmul.mubr.msk.bf16.gmra.mrb[72].mxu0 %vm3168_vm0, %v13788_v6  ;;  %v6273_v39 = vmax.f32 %v10172_v13, 0.0  ;;  %p11812_p12 = pnand %p11811_p11, %p11966_p5  ;;  %p11819_p2 = por %p11818_p1, %p11817_p0 }
 0x3e7   : > { %v10178_v11 = vadd.f32 %v10177_v4, %v12831_v43  ;;  %4546 = vmatprep.mubr.bf16.mxu0 %v15006_v55  ;;  %v6274_v31 = vmax.f32 %v10174_v29, 0.0 }
 0x3e8   : > { %v6277_v26 = vmax.f32 %v10176_v24, 0.0  ;;  %p11813_p13 = pneg %p11812_p12 }
 0x3e9   : > { %v6278_v62 = vmax.f32 %v10178_v11, 0.0  ;;  %9516 = vmatmul.mubr.msk.bf16.gmra.mrb[100].mxu1 %vm3168_vm0, %v13702_v51  ;;  %v4245_v42 = vpop.f32.mrb[96].mxu0 }
 0x3ea   : > { %v10179_v52 = vadd.f32 %v4245_v42, %v13732_v59  ;;  %v4247_v35 = vpop.f32.mrb[97].mxu0  ;;  %5918 = vmatprep.mubr.bf16.mxu1 %v15006_v55  ;;  %v13815_v21 = vpack.c.bf16 %v6277_v26, %v6273_v39  ;;  %v13836_v42 = vcombine.low %v757_v12, %v761_v22  ;;  %p11820_p3 = pnand %p11819_p2, %p11813_p13 }
 0x3eb   : > { %v10181_v43 = vadd.f32 %v4247_v35, %v13739_v15  ;;  %v4249_v5 = vpop.f32.mrb[98].mxu0  ;;  %v13820_v13 = vpack.c.bf16 %v6278_v62, %v6274_v31 }
 0x3ec   : > { %v10180_v44 = vadd.f32 %v10179_v52, %v12847_v54  ;;  %v10183_v51 = vadd.f32 %v4249_v5, %v13732_v59  ;;  %v4251_v9 = vpop.f32.mrb[99].mxu0 }
 0x3ed   : > { %v10182_v29 = vadd.f32 %v10181_v43, %v12855_v0  ;;  %v10185_v4 = vadd.f32 %v4251_v9, %v13739_v15 }
 0x3ee   : > { %v10184_v24 = vadd.f32 %v10183_v51, %v12860_v60  ;;  %9489 = vmatmul.mubr.msk.bf16.gmra.mrb[76].mxu0 %vm3168_vm0, %v13812_v14  ;;  %v6281_v54 = vmax.f32 %v10180_v44, 0.0 }
 0x3ef   : > { %v10186_v11 = vadd.f32 %v10185_v4, %v12863_v3  ;;  %4556 = vmatprep.mubr.bf16.mxu0 %v15006_v55  ;;  %v6282_v26 = vmax.f32 %v10182_v29, 0.0 }
 0x3f0   : > { %v6285_v39 = vmax.f32 %v10184_v24, 0.0 }
 0x3f1   : > { %v6286_v31 = vmax.f32 %v10186_v11, 0.0  ;;  %9517 = vmatmul.mubr.msk.bf16.gmra.mrb[104].mxu1 %vm3168_vm0, %v13715_v46  ;;  %v4255_v0 = vpop.f32.mrb[100].mxu0 }
 0x3f2   : > { %v10187_v60 = vadd.f32 %v4255_v0, %v13732_v59  ;;  %v4257_v62 = vpop.f32.mrb[101].mxu0  ;;  %5928 = vmatprep.mubr.bf16.mxu1 %v15006_v55  ;;  %v13839_v52 = vpack.c.bf16 %v6285_v39, %v6281_v54 }
 0x3f3   : > { %v10189_v3 = vadd.f32 %v4257_v62, %v13739_v15  ;;  %v4259_v35 = vpop.f32.mrb[102].mxu0  ;;  %v13842_v43 = vpack.c.bf16 %v6286_v31, %v6282_v26 }
 0x3f4   : > { %v10188_v5 = vadd.f32 %v10187_v60, %v12879_v19  ;;  %v10191_v57 = vadd.f32 %v4259_v35, %v13732_v59  ;;  %v4261_v46 = vpop.f32.mrb[103].mxu0 }
 0x3f5   : > { %v10190_v16 = vadd.f32 %v10189_v3, %v12887_v7  ;;  %v10193_v44 = vadd.f32 %v4261_v46, %v13739_v15 }
 0x3f6   : > { %v10192_v51 = vadd.f32 %v10191_v57, %v12892_v32  ;;  %9490 = vmatmul.mubr.msk.bf16.gmra.mrb[80].mxu0 %vm3168_vm0, %v13836_v42  ;;  %v6289_v29 = vmax.f32 %v10188_v5, 0.0 }
 0x3f7   : > { %v10194_v9 = vadd.f32 %v10193_v44, %v12895_v33  ;;  %v6290_v24 = vmax.f32 %v10190_v16, 0.0 }
 0x3f8   : > { %v6293_v4 = vmax.f32 %v10192_v51, 0.0 }
 0x3f9   : > { %v6294_v12 = vmax.f32 %v10194_v9, 0.0  ;;  %9518 = vmatmul.mubr.msk.bf16.gmra.mrb[108].mxu1 %vm3168_vm0, %v13744_v63  ;;  %v4265_v19 = vpop.f32.mrb[104].mxu0 }
 0x3fa   : > { %v10195_v22 = vadd.f32 %v4265_v19, %v13732_v59  ;;  %v4267_v7 = vpop.f32.mrb[105].mxu0  ;;  %5938 = vmatprep.mubr.bf16.mxu1 %v15006_v55  ;;  %v13856_v11 = vpack.c.bf16 %v6293_v4, %v6289_v29 }
 0x3fb   : > { %v10197_v32 = vadd.f32 %v4267_v7, %v13739_v15  ;;  %v4269_v54 = vpop.f32.mrb[106].mxu0  ;;  %v13859_v39 = vpack.c.bf16 %v6294_v12, %v6290_v24 }
 0x3fc   : > { %v10196_v33 = vadd.f32 %v10195_v22, %v12911_v41  ;;  %v10199_v26 = vadd.f32 %v4269_v54, %v13732_v59  ;;  %v4271_v31 = vpop.f32.mrb[107].mxu0 }
 0x3fd   : > { %v10198_v63 = vadd.f32 %v10197_v32, %v12919_v45  ;;  %v10201_v0 = vadd.f32 %v4271_v31, %v13739_v15 }
 0x3fe   : > { %v10200_v60 = vadd.f32 %v10199_v26, %v12924_v50  ;;  %v6297_v3 = vmax.f32 %v10196_v33, 0.0 }
 0x3ff   : > { %v10202_v62 = vadd.f32 %v10201_v0, %v12927_v61  ;;  %v6298_v5 = vmax.f32 %v10198_v63, 0.0 }
 0x400   : > { %v6301_v35 = vmax.f32 %v10200_v60, 0.0 }
 0x401   : > { %v6302_v57 = vmax.f32 %v10202_v62, 0.0  ;;  %9519 = vmatmul.mubr.msk.bf16.gmra.mrb[112].mxu1 %vm3168_vm0, %v13764_v37  ;;  %v4275_v46 = vpop.f32.mrb[108].mxu0 }
 0x402   : > { %v10203_v41 = vadd.f32 %v4275_v46, %v13732_v59  ;;  %v4277_v16 = vpop.f32.mrb[109].mxu0  ;;  %5948 = vmatprep.mubr.bf16.mxu1 %v15006_v55  ;;  %v13871_v45 = vpack.c.bf16 %v6301_v35, %v6297_v3 }
 0x403   : > { %v10205_v44 = vadd.f32 %v4277_v16, %v13739_v15  ;;  %v4279_v50 = vpop.f32.mrb[110].mxu0  ;;  %v13874_v51 = vpack.c.bf16 %v6302_v57, %v6298_v5 }
 0x404   : > { %v10204_v61 = vadd.f32 %v10203_v41, %v12940_v17  ;;  %v10207_v9 = vadd.f32 %v4279_v50, %v13732_v59  ;;  %v4281_v29 = vpop.f32.mrb[111].mxu0 }
 0x405   : > { %v10206_v37 = vadd.f32 %v10205_v44, %v12945_v58  ;;  %v10209_v4 = vadd.f32 %v4281_v29, %v13739_v15 }
 0x406   : > { %v10208_v24 = vadd.f32 %v10207_v9, %v12947_v23  ;;  %v6305_v19 = vmax.f32 %v10204_v61, 0.0 }
 0x407   : > { %v10210_v12 = vadd.f32 %v10209_v4, %v12950_v25  ;;  %v6306_v7 = vmax.f32 %v10206_v37, 0.0 }
 0x408   : > { %v6309_v22 = vmax.f32 %v10208_v24, 0.0 }
 0x409   : > { %v6310_v32 = vmax.f32 %v10210_v12, 0.0  ;;  %9520 = vmatmul.mubr.msk.bf16.gmra.mrb[116].mxu1 %vm3168_vm0, %v13788_v6  ;;  %v4285_v54 = vpop.f32.mrb[112].mxu0 }
 0x40a   : > { %v10211_v17 = vadd.f32 %v4285_v54, %v13732_v59  ;;  %v4287_v33 = vpop.f32.mrb[113].mxu0  ;;  %5958 = vmatprep.mubr.bf16.mxu1 %v15006_v55  ;;  %v13886_v58 = vpack.c.bf16 %v6309_v22, %v6305_v19 }
 0x40b   : > { %v10213_v26 = vadd.f32 %v4287_v33, %v13739_v15  ;;  %v4289_v23 = vpop.f32.mrb[114].mxu0  ;;  %v13889_v31 = vpack.c.bf16 %v6310_v32, %v6306_v7 }
 0x40c   : > { %v10212_v25 = vadd.f32 %v10211_v17, %v12966_v1  ;;  %v10215_v63 = vadd.f32 %v4289_v23, %v13732_v59  ;;  %v4291_v0 = vpop.f32.mrb[115].mxu0 }
 0x40d   : > { %v10214_v6 = vadd.f32 %v10213_v26, %v12971_v53  ;;  %v10217_v60 = vadd.f32 %v4291_v0, %v13739_v15 }
 0x40e   : > { %v10216_v62 = vadd.f32 %v10215_v63, %v12973_v48  ;;  %v6313_v35 = vmax.f32 %v10212_v25, 0.0  ;;  %v15008_v63 = vld [vmem:[#allocation16_spill] sm:$0xff] }
 0x40f   : > { %v10218_v3 = vadd.f32 %v10217_v60, %v12976_v18  ;;  %v6314_v57 = vmax.f32 %v10214_v6, 0.0 }
 0x410   : > { %v6317_v5 = vmax.f32 %v10216_v62, 0.0 }
 0x411   : > { %v6318_v46 = vmax.f32 %v10218_v3, 0.0  ;;  %9521 = vmatmul.mubr.msk.bf16.gmra.mrb[120].mxu1 %vm3168_vm0, %v13812_v14  ;;  %v4295_v41 = vpop.f32.mrb[116].mxu0 }
 0x412   : > { %v10219_v1 = vadd.f32 %v4295_v41, %v13732_v59  ;;  %v4297_v16 = vpop.f32.mrb[117].mxu0  ;;  %5968 = vmatprep.mubr.bf16.mxu1 %v15006_v55  ;;  %v13901_v53 = vpack.c.bf16 %v6317_v5, %v6313_v35  ;;  %v15009_v35 = vld [vmem:[#allocation5_spill] sm:$0xff] }
 0x413   : > { %v10221_v44 = vadd.f32 %v4297_v16, %v13739_v15  ;;  %v4299_v48 = vpop.f32.mrb[118].mxu0  ;;  %v13904_v50 = vpack.c.bf16 %v6318_v46, %v6314_v57 }
 0x414   : > { %v10220_v18 = vadd.f32 %v10219_v1, %v12986_v27  ;;  %v10223_v61 = vadd.f32 %v4299_v48, %v13732_v59  ;;  %v4301_v9 = vpop.f32.mrb[119].mxu0  ;;  %v15010_v1 = vld [vmem:[#allocation17_spill] sm:$0xff] }
 0x415   : > { %v10222_v14 = vadd.f32 %v10221_v44, %v12991_v8  ;;  %v10225_v29 = vadd.f32 %v4301_v9, %v13739_v15 }
 0x416   : > { %v10224_v37 = vadd.f32 %v10223_v61, %v12993_v56  ;;  %v6321_v24 = vmax.f32 %v10220_v18, 0.0  ;;  %v15011_v18 = vld [vmem:[#allocation18_spill] sm:$0xff] }
 0x417   : > { %v10226_v4 = vadd.f32 %v10225_v29, %v12996_v47  ;;  %v6322_v19 = vmax.f32 %v10222_v14, 0.0  ;;  %v15012_v14 = vld [vmem:[#allocation19_spill] sm:$0xff] }
 0x418   : > { %v6325_v12 = vmax.f32 %v10224_v37, 0.0  ;;  %v15013_v37 = vld [vmem:[#allocation20_spill] sm:$0xff] }
 0x419   : > { %v6326_v22 = vmax.f32 %v10226_v4, 0.0  ;;  %9522 = vmatmul.mubr.msk.bf16.gmra.mrb[124].mxu1 %vm3168_vm0, %v13836_v42  ;;  %v4305_v7 = vpop.f32.mrb[120].mxu0 }
 0x41a   : > { %v10227_v27 = vadd.f32 %v4305_v7, %v13732_v59  ;;  %v4307_v32 = vpop.f32.mrb[121].mxu0  ;;  %5978 = vmatprep.mubr.bf16.mxu1 %v15006_v55  ;;  %v13916_v8 = vpack.c.bf16 %v6325_v12, %v6321_v24  ;;  %v15014_v7 = vld [vmem:[#allocation6_spill] sm:$0xff] }
 0x41b   : > { %v10229_v54 = vadd.f32 %v4307_v32, %v13739_v15  ;;  %v4309_v56 = vpop.f32.mrb[122].mxu0  ;;  %v13919_v17 = vpack.c.bf16 %v6326_v22, %v6322_v19 }
 0x41c   : > { %v10228_v47 = vadd.f32 %v10227_v27, %v13012_v28  ;;  %v10231_v33 = vadd.f32 %v4309_v56, %v13732_v59  ;;  %v4311_v26 = vpop.f32.mrb[123].mxu0 }
 0x41d   : > { %v10230_v42 = vadd.f32 %v10229_v54, %v13017_v40  ;;  %v10233_v23 = vadd.f32 %v4311_v26, %v13739_v15 }
 0x41e   : > { %v10232_v25 = vadd.f32 %v10231_v33, %v13019_v36  ;;  %v6329_v6 = vmax.f32 %v10228_v47, 0.0 }
 0x41f   : > { %v10234_v0 = vadd.f32 %v10233_v23, %v15008_v63  ;;  %v6330_v62 = vmax.f32 %v10230_v42, 0.0 }
 0x420   : > { %v6333_v60 = vmax.f32 %v10232_v25, 0.0 }
 0x421   : > { %v6334_v3 = vmax.f32 %v10234_v0, 0.0  ;;  %9523 = vmatmul.mubr.msk.bf16.gmra.mrb[128].mxu1 %vm3168_vm0, %v15009_v35  ;;  %v4315_v5 = vpop.f32.mrb[124].mxu0  ;;  %v15015_v35 = vld [vmem:[#allocation7_spill] sm:$0xff] }
 0x422   : > { %v10235_v28 = vadd.f32 %v4315_v5, %v13732_v59  ;;  %v4317_v57 = vpop.f32.mrb[125].mxu0  ;;  %5988 = vmatprep.mubr.bf16.mxu1 %v15006_v55  ;;  %v13931_v40 = vpack.c.bf16 %v6333_v60, %v6329_v6 }
 0x423   : > { %v10237_v46 = vadd.f32 %v4317_v57, %v13739_v15  ;;  %v4319_v36 = vpop.f32.mrb[126].mxu0  ;;  %v13934_v41 = vpack.c.bf16 %v6334_v3, %v6330_v62 }
 0x424   : > { %v10236_v16 = vadd.f32 %v10235_v28, %v15010_v1  ;;  %v10239_v44 = vadd.f32 %v4319_v36, %v13732_v59  ;;  %v4321_v48 = vpop.f32.mrb[127].mxu0  ;;  %v11736_v28 = vld [vmem:[%s14964_s3 + $0x100] ss:$8 sps:$4 sm:$0xff]   ;;  %v11741_v36 = vld [vmem:[%s14964_s3 + $0x114] ss:$8 sps:$4 sm:$0xff]  }
 0x425   : > { %v10238_v61 = vadd.f32 %v10237_v46, %v15011_v18  ;;  %v10241_v9 = vadd.f32 %v4321_v48, %v13739_v15 }
 0x426   : > { %v10240_v29 = vadd.f32 %v10239_v44, %v15012_v14  ;;  %v6337_v24 = vmax.f32 %v10236_v16, 0.0 }
 0x427   : > { %v10242_v4 = vadd.f32 %v10241_v9, %v15013_v37  ;;  %v6338_v19 = vmax.f32 %v10238_v61, 0.0  ;;  %v11739_v61 = vld [vmem:[%s14964_s3 + $0x110] ss:$8 sps:$4 sm:$0xff]  }
 0x428   : > { %v6341_v12 = vmax.f32 %v10240_v29, 0.0  ;;  %v11744_v29 = vld [vmem:[%s14964_s3 + $0x124] ss:$8 sps:$4 sm:$0xff]  }
 0x429   : > { %v6342_v22 = vmax.f32 %v10242_v4, 0.0  ;;  %9524 = vmatmul.mubr.msk.bf16.gmra.mrb[132].mxu1 %vm3168_vm0, %v15014_v7  ;;  %v4358_v27 = vpop.f32.mrb[0].mxu0  ;;  %v11742_v7 = vld [vmem:[%s14964_s3 + $0x120] ss:$8 sps:$4 sm:$0xff]  }
 0x42a   : > { %v10071_v32 = vadd.f32 %v4358_v27, %v13732_v59  ;;  %v4360_v54 = vpop.f32.mrb[1].mxu0  ;;  %5998 = vmatprep.mubr.bf16.mxu1 %v15006_v55  ;;  %v13946_v56 = vpack.c.bf16 %v6341_v12, %v6337_v24 }
 0x42b   : > { %v10072_v47 = vadd.f32 %v4360_v54, %v13739_v15  ;;  %v4362_v33 = vpop.f32.mrb[2].mxu0  ;;  %v13949_v26 = vpack.c.bf16 %v6342_v22, %v6338_v19  ;;  %v15016_v19 = vld [vmem:[#allocation8_spill] sm:$0xff] }
 0x42c   : > { %v10073_v42 = vadd.f32 %v4362_v33, %v13732_v59  ;;  %v4364_v23 = vpop.f32.mrb[3].mxu0  ;;  %v6089_v63 = vmax.f32 %v10071_v32, 0.0  ;;  %v11747_v54 = vld [vmem:[%s14964_s3 + $0x134] ss:$8 sps:$4 sm:$0xff]  }
 0x42d   : > { %v10074_v25 = vadd.f32 %v4364_v23, %v13739_v15  ;;  %v6090_v6 = vmax.f32 %v10072_v47, 0.0 }
 0x42e   : > { %v6093_v0 = vmax.f32 %v10073_v42, 0.0 }
 0x42f   : > { %v6094_v60 = vmax.f32 %v10074_v25, 0.0 }
 0x430   : > { %v6345_v62 = vpack.c.bf16 %v6093_v0, %v6089_v63  ;;  %v11745_v63 = vld [vmem:[%s14964_s3 + $0x130] ss:$8 sps:$4 sm:$0xff]  }
 0x431   : > { %v6346_v3 = vpack.c.bf16 %v6094_v60, %v6090_v6  ;;  %9525 = vmatmul.mubr.msk.bf16.gmra.mrb[136].mxu1 %vm3168_vm0, %v15015_v35  ;;  %v4368_v5 = vpop.f32.mrb[4].mxu0  ;;  %v11750_v60 = vld [vmem:[%s14964_s3 + $0x144] ss:$8 sps:$4 sm:$0xff]  }
 0x432   : > { %v10075_v57 = vadd.f32 %v4368_v5, %v13732_v59  ;;  %v4370_v46 = vpop.f32.mrb[5].mxu0  ;;  %6008 = vmatprep.mubr.bf16.mxu1 %v15006_v55 }
 0x433   : > { %v10076_v1 = vadd.f32 %v4370_v46, %v13739_v15  ;;  %v4372_v16 = vpop.f32.mrb[6].mxu0  ;;  %6901 = vmatprep.mubr.bf16.mxu0 %v6346_v3  ;;  %v11748_v46 = vld [vmem:[%s14964_s3 + $0x140] ss:$8 sps:$4 sm:$0xff]  }
 0x434   : > { %v10077_v44 = vadd.f32 %v4372_v16, %v13732_v59  ;;  %v4374_v48 = vpop.f32.mrb[7].mxu0  ;;  %6902 = vmatmul.mubr.bf16.vlgmr.msra.gmra.mrb[128].mxu0 %v6345_v62  ;;  %v6097_v9 = vmax.f32 %v10075_v57, 0.0  ;;  %v11753_v16 = vld [vmem:[%s14964_s3 + $0x154] ss:$8 sps:$4 sm:$0xff]  }
 0x435   : > { %v10078_v18 = vadd.f32 %v4374_v48, %v13739_v15  ;;  %7223 = vmatpush1.bf16.msra.mxu0 %v11736_v28  ;;  %v6098_v37 = vmax.f32 %v10076_v1, 0.0  ;;  %v15017_v28 = vld [vmem:[#allocation9_spill] sm:$0xff] }
 0x436   : > { %v6101_v14 = vmax.f32 %v10077_v44, 0.0  ;;  %7224 = vmatprep.subr.bf16.mxu0 %v11741_v36 }
 0x437   : > { %v6102_v4 = vmax.f32 %v10078_v18, 0.0 }
 0x438   : > { %v6349_v24 = vpack.c.bf16 %v6101_v14, %v6097_v9  ;;  %v1058_v14 = vsub.s32 2, %v13711_v38 }
 0x439   : > { %v6350_v12 = vpack.c.bf16 %v6102_v4, %v6098_v37  ;;  %9526 = vmatmul.mubr.msk.bf16.gmra.mrb[140].mxu1 %vm3168_vm0, %v15016_v19  ;;  %v4378_v22 = vpop.f32.mrb[8].mxu0  ;;  %7225 = vmatpush1.bf16.msra.mxu0 %v11739_v61 }
 0x43a   : > { %v10079_v27 = vadd.f32 %v4378_v22, %v13732_v59  ;;  %v4380_v32 = vpop.f32.mrb[9].mxu0  ;;  %6018 = vmatprep.mubr.bf16.mxu1 %v15006_v55  ;;  %7226 = vmatprep.subr.bf16.mxu0 %v11744_v29  ;;  %v11751_v29 = vld [vmem:[%s14964_s3 + $0x150] ss:$8 sps:$4 sm:$0xff]  }
 0x43b   : > { %v10080_v47 = vadd.f32 %v4380_v32, %v13739_v15  ;;  %v4382_v33 = vpop.f32.mrb[10].mxu0  ;;  %6911 = vmatprep.mubr.bf16.mxu0 %v6350_v12  ;;  %v11756_v12 = vld [vmem:[%s14964_s3 + $0x164] ss:$8 sps:$4 sm:$0xff]  }
 0x43c   : > { %v10081_v42 = vadd.f32 %v4382_v33, %v13732_v59  ;;  %v4384_v23 = vpop.f32.mrb[11].mxu0  ;;  %6912 = vmatmul.mubr.bf16.gmra.mrb[132].mxu0 %v6349_v24  ;;  %v6105_v0 = vmax.f32 %v10079_v27, 0.0  ;;  %v1062_v24 = vsub.s32 3, %v13711_v38  ;;  %v15018_v32 = vld [vmem:[#allocation10_spill] sm:$0xff] }
 0x43d   : > { %v10082_v25 = vadd.f32 %v4384_v23, %v13739_v15  ;;  %7227 = vmatpush1.bf16.msra.mxu0 %v11742_v7  ;;  %v6106_v62 = vmax.f32 %v10080_v47, 0.0  ;;  %v14015_v47 = vrot.slane %v13721_v34, %v1058_v14  ;;  %v11754_v33 = vld [vmem:[%s14964_s3 + $0x160] ss:$8 sps:$4 sm:$0xff]  }
 0x43e   : > { %v6109_v6 = vmax.f32 %v10081_v42, 0.0  ;;  %7228 = vmatprep.subr.bf16.mxu0 %v11747_v54 }
 0x43f   : > { %v6110_v3 = vmax.f32 %v10082_v25, 0.0  ;;  %v14022_v25 = vrot.slane %v13721_v34, %v1062_v24  ;;  %v15019_v24 = vld [vmem:[#allocation11_spill] sm:$0xff] }
 0x440   : > { %v6353_v35 = vpack.c.bf16 %v6109_v6, %v6105_v0 }
 0x441   : > { %v6354_v5 = vpack.c.bf16 %v6110_v3, %v6106_v62  ;;  %9527 = vmatmul.mubr.msk.bf16.gmra.mrb[144].mxu1 %vm3168_vm0, %v15017_v28  ;;  %v4388_v57 = vpop.f32.mrb[12].mxu0  ;;  %7229 = vmatpush1.bf16.msra.mxu0 %v11745_v63  ;;  %v11759_v63 = vld [vmem:[%s14964_s3 + $0x174] ss:$8 sps:$4 sm:$0xff]   ;;  %v11757_v28 = vld [vmem:[%s14964_s3 + $0x170] ss:$8 sps:$4 sm:$0xff]  }
 0x442   : > { %v10083_v36 = vadd.f32 %v4388_v57, %v13732_v59  ;;  %v4390_v1 = vpop.f32.mrb[13].mxu0  ;;  %6028 = vmatprep.mubr.bf16.mxu1 %v15006_v55  ;;  %7230 = vmatprep.subr.bf16.mxu0 %v11750_v60 }
 0x443   : > { %v10084_v44 = vadd.f32 %v4390_v1, %v13739_v15  ;;  %v4392_v48 = vpop.f32.mrb[14].mxu0  ;;  %6921 = vmatprep.mubr.bf16.mxu0 %v6354_v5 }
 0x444   : > { %v10085_v18 = vadd.f32 %v4392_v48, %v13732_v59  ;;  %v4394_v61 = vpop.f32.mrb[15].mxu0  ;;  %6922 = vmatmul.mubr.bf16.gmra.mrb[136].mxu0 %v6353_v35  ;;  %v6113_v37 = vmax.f32 %v10083_v36, 0.0 }
 0x445   : > { %v10086_v9 = vadd.f32 %v4394_v61, %v13739_v15  ;;  %7231 = vmatpush1.bf16.msra.mxu0 %v11748_v46  ;;  %v6114_v19 = vmax.f32 %v10084_v44, 0.0 }
 0x446   : > { %v6117_v4 = vmax.f32 %v10085_v18, 0.0  ;;  %7232 = vmatprep.subr.bf16.mxu0 %v11753_v16  ;;  %v11762_v16 = vld [vmem:[%s14964_s3 + $0x184] ss:$8 sps:$4 sm:$0xff]  }
 0x447   : > { %v6118_v22 = vmax.f32 %v10086_v9, 0.0 }
 0x448   : > { %v6357_v7 = vpack.c.bf16 %v6117_v4, %v6113_v37 }
 0x449   : > { %v6358_v27 = vpack.c.bf16 %v6118_v22, %v6114_v19  ;;  %9528 = vmatmul.mubr.msk.bf16.gmra.mrb[148].mxu1 %vm3168_vm0, %v15018_v32  ;;  %v4398_v54 = vpop.f32.mrb[16].mxu0  ;;  %7233 = vmatpush1.bf16.msra.mxu0 %v11751_v29  ;;  %v11760_v19 = vld [vmem:[%s14964_s3 + $0x180] ss:$8 sps:$4 sm:$0xff]  }
 0x44a   : > { %v10087_v42 = vadd.f32 %v4398_v54, %v13732_v59  ;;  %v4400_v23 = vpop.f32.mrb[17].mxu0  ;;  %6038 = vmatprep.mubr.bf16.mxu1 %v15006_v55  ;;  %7234 = vmatprep.subr.bf16.mxu0 %v11756_v12  ;;  %v11765_v54 = vld [vmem:[%s14964_s3 + $0x194] ss:$8 sps:$4 sm:$0xff]  }
 0x44b   : > { %v10088_v0 = vadd.f32 %v4400_v23, %v13739_v15  ;;  %v4402_v6 = vpop.f32.mrb[18].mxu0  ;;  %6931 = vmatprep.mubr.bf16.mxu0 %v6358_v27 }
 0x44c   : > { %v10089_v60 = vadd.f32 %v4402_v6, %v13732_v59  ;;  %v5770_v62 = vpop.f32.mrb[44].mxu1  ;;  %v4404_v3 = vpop.f32.mrb[19].mxu0  ;;  %6932 = vmatmul.mubr.bf16.gmra.mrb[140].mxu0 %v6357_v7  ;;  %v6121_v57 = vmax.f32 %v10087_v42, 0.0 }
 0x44d   : > { %v10243_v35 = vadd.f32 %v5770_v62, %v14015_v47  ;;  %v10090_v34 = vadd.f32 %v4404_v3, %v13739_v15  ;;  %v5772_v5 = vpop.f32.mrb[45].mxu1  ;;  %7235 = vmatpush1.bf16.msra.mxu0 %v11754_v33  ;;  %v6122_v44 = vmax.f32 %v10088_v0, 0.0 }
 0x44e   : > { %v6125_v46 = vmax.f32 %v10089_v60, 0.0  ;;  %v10244_v36 = vadd.f32 %v5772_v5, %v14022_v25  ;;  %v5774_v1 = vpop.f32.mrb[46].mxu1  ;;  %7236 = vmatprep.subr.bf16.mxu0 %v11759_v63 }
 0x44f   : > { %v6126_v48 = vmax.f32 %v10090_v34, 0.0  ;;  %v10245_v18 = vadd.f32 %v5774_v1, %v14015_v47  ;;  %v5776_v61 = vpop.f32.mrb[47].mxu1  ;;  %v6091_v29 = vmax.f32 %v10243_v35, 0.0  ;;  %v11763_v34 = vld [vmem:[%s14964_s3 + $0x190] ss:$8 sps:$4 sm:$0xff]  }
 0x450   : > { %v6361_v9 = vpack.c.bf16 %v6125_v46, %v6121_v57  ;;  %v10246_v14 = vadd.f32 %v5776_v61, %v14022_v25  ;;  %v6092_v22 = vmax.f32 %v10244_v36, 0.0  ;;  %v11768_v61 = vld [vmem:[%s14964_s3 + $0x1a4] ss:$8 sps:$4 sm:$0xff]  }
 0x451   : > { %v6362_v37 = vpack.c.bf16 %v6126_v48, %v6122_v44  ;;  %v6095_v4 = vmax.f32 %v10245_v18, 0.0  ;;  %9529 = vmatmul.mubr.msk.bf16.gmra.mrb[152].mxu1 %vm3168_vm0, %v15019_v24  ;;  %v4408_v12 = vpop.f32.mrb[20].mxu0  ;;  %7237 = vmatpush1.bf16.msra.mxu0 %v11757_v28  ;;  %v11766_v24 = vld [vmem:[%s14964_s3 + $0x1a0] ss:$8 sps:$4 sm:$0xff]  }
 0x452   : > { %v6096_v7 = vmax.f32 %v10246_v14, 0.0  ;;  %v10091_v27 = vadd.f32 %v4408_v12, %v13732_v59  ;;  %v4410_v32 = vpop.f32.mrb[21].mxu0  ;;  %6048 = vmatprep.mubr.bf16.mxu1 %v15006_v55  ;;  %7238 = vmatprep.subr.bf16.mxu0 %v11762_v16 }
 0x453   : > { %v14051_v33 = vpack.c.bf16 %v6095_v4, %v6091_v29  ;;  %v10092_v42 = vadd.f32 %v4410_v32, %v13739_v15  ;;  %v4412_v23 = vpop.f32.mrb[22].mxu0  ;;  %6941 = vmatprep.mubr.bf16.mxu0 %v6362_v37  ;;  %v15020_v37 = vld [vmem:[#allocation12_spill] sm:$0xff] }
 0x454   : > { %v10093_v63 = vadd.f32 %v4412_v23, %v13732_v59  ;;  %v5780_v0 = vpop.f32.mrb[48].mxu1  ;;  %v4414_v6 = vpop.f32.mrb[23].mxu0  ;;  %6942 = vmatmul.mubr.bf16.gmra.mrb[144].mxu0 %v6361_v9  ;;  %v14055_v60 = vpack.c.bf16 %v6096_v7, %v6092_v22  ;;  %v6129_v5 = vmax.f32 %v10091_v27, 0.0 }
 0x455   : > { %v10247_v62 = vadd.f32 %v5780_v0, %v14015_v47  ;;  %v10094_v3 = vadd.f32 %v4414_v6, %v13739_v15  ;;  %v5782_v35 = vpop.f32.mrb[49].mxu1  ;;  %7239 = vmatpush1.bf16.msra.mxu0 %v11760_v19  ;;  %v6130_v36 = vmax.f32 %v10092_v42, 0.0 }
 0x456   : > { %v6133_v28 = vmax.f32 %v10093_v63, 0.0  ;;  %v10248_v57 = vadd.f32 %v5782_v35, %v14022_v25  ;;  %v5784_v46 = vpop.f32.mrb[50].mxu1  ;;  %7240 = vmatprep.subr.bf16.mxu0 %v11765_v54 }
 0x457   : > { %v6134_v1 = vmax.f32 %v10094_v3, 0.0  ;;  %v10249_v16 = vadd.f32 %v5784_v46, %v14015_v47  ;;  %v5786_v44 = vpop.f32.mrb[51].mxu1  ;;  %v6099_v9 = vmax.f32 %v10247_v62, 0.0 }
 0x458   : > { %v6365_v48 = vpack.c.bf16 %v6133_v28, %v6129_v5  ;;  %v10250_v18 = vadd.f32 %v5786_v44, %v14022_v25  ;;  %v6100_v12 = vmax.f32 %v10248_v57, 0.0 }
 0x459   : > { %v6366_v14 = vpack.c.bf16 %v6134_v1, %v6130_v36  ;;  %v6103_v29 = vmax.f32 %v10249_v16, 0.0  ;;  %9530 = vmatmul.mubr.msk.bf16.gmra.mrb[156].mxu1 %vm3168_vm0, %v15020_v37  ;;  %v4418_v4 = vpop.f32.mrb[24].mxu0  ;;  %7241 = vmatpush1.bf16.msra.mxu0 %v11763_v34 }
 0x45a   : > { %v6104_v19 = vmax.f32 %v10250_v18, 0.0  ;;  %v10095_v22 = vadd.f32 %v4418_v4, %v13732_v59  ;;  %v4420_v7 = vpop.f32.mrb[25].mxu0  ;;  %6058 = vmatprep.mubr.bf16.mxu1 %v15006_v55  ;;  %7242 = vmatprep.subr.bf16.mxu0 %v11768_v61 }
 0x45b   : > { %v10096_v27 = vadd.f32 %v4420_v7, %v13739_v15  ;;  %v4422_v32 = vpop.f32.mrb[26].mxu0  ;;  %6951 = vmatprep.mubr.bf16.mxu0 %v6366_v14  ;;  %v14076_v54 = vpack.c.bf16 %v6103_v29, %v6099_v9  ;;  %v15021_v9 = vld [vmem:[#allocation13_spill] sm:$0xff] }
 0x45c   : > { %v10097_v42 = vadd.f32 %v4422_v32, %v13732_v59  ;;  %v5790_v23 = vpop.f32.mrb[52].mxu1  ;;  %v4424_v63 = vpop.f32.mrb[27].mxu0  ;;  %6952 = vmatmul.mubr.bf16.gmra.mrb[148].mxu0 %v6365_v48  ;;  %v14079_v0 = vpack.c.bf16 %v6104_v19, %v6100_v12  ;;  %v6137_v35 = vmax.f32 %v10095_v22, 0.0 }
 0x45d   : > { %v10251_v6 = vadd.f32 %v5790_v23, %v14015_v47  ;;  %v10098_v62 = vadd.f32 %v4424_v63, %v13739_v15  ;;  %v5792_v3 = vpop.f32.mrb[53].mxu1  ;;  %7243 = vmatpush1.bf16.msra.mxu0 %v11766_v24  ;;  %v6138_v57 = vmax.f32 %v10096_v27, 0.0 }
 0x45e   : > { %v6141_v34 = vmax.f32 %v10097_v42, 0.0  ;;  %v10252_v5 = vadd.f32 %v5792_v3, %v14022_v25  ;;  %v5794_v28 = vpop.f32.mrb[54].mxu1 }
 0x45f   : > { %v6142_v46 = vmax.f32 %v10098_v62, 0.0  ;;  %v10253_v36 = vadd.f32 %v5794_v28, %v14015_v47  ;;  %v5796_v1 = vpop.f32.mrb[55].mxu1  ;;  %v6107_v48 = vmax.f32 %v10251_v6, 0.0 }
 0x460   : > { %v6369_v16 = vpack.c.bf16 %v6141_v34, %v6137_v35  ;;  %v10254_v44 = vadd.f32 %v5796_v1, %v14022_v25  ;;  %v6108_v29 = vmax.f32 %v10252_v5, 0.0 }
 0x461   : > { %v6370_v18 = vpack.c.bf16 %v6142_v46, %v6138_v57  ;;  %v6111_v61 = vmax.f32 %v10253_v36, 0.0  ;;  %9531 = vmatmul.mubr.msk.bf16.gmra.mrb[160].mxu1 %vm3168_vm0, %v15021_v9  ;;  %v4428_v14 = vpop.f32.mrb[28].mxu0  ;;  %v15022_v9 = vld [vmem:[#allocation14_spill] sm:$0xff] }
 0x462   : > { %v6112_v37 = vmax.f32 %v10254_v44, 0.0  ;;  %v10099_v4 = vadd.f32 %v4428_v14, %v13732_v59  ;;  %v4430_v24 = vpop.f32.mrb[29].mxu0  ;;  %6068 = vmatprep.mubr.bf16.mxu1 %v15006_v55  ;;  %v11771_v44 = vld [vmem:[%s14964_s3 + $0x1b4] ss:$8 sps:$4 sm:$0xff]  }
 0x463   : > { %v10100_v12 = vadd.f32 %v4430_v24, %v13739_v15  ;;  %v4432_v19 = vpop.f32.mrb[30].mxu0  ;;  %6961 = vmatprep.mubr.bf16.mxu0 %v6370_v18  ;;  %v14091_v22 = vpack.c.bf16 %v6111_v61, %v6107_v48  ;;  %7244 = vmatprep.subr.bf16.mxu0 %v11771_v44 }
 0x464   : > { %v10101_v7 = vadd.f32 %v4432_v19, %v13732_v59  ;;  %v5800_v27 = vpop.f32.mrb[56].mxu1  ;;  %v4434_v32 = vpop.f32.mrb[31].mxu0  ;;  %6962 = vmatmul.mubr.bf16.gmra.mrb[152].mxu0 %v6369_v16  ;;  %v14094_v42 = vpack.c.bf16 %v6112_v37, %v6108_v29  ;;  %v6145_v62 = vmax.f32 %v10099_v4, 0.0  ;;  %v11769_v16 = vld [vmem:[%s14964_s3 + $0x1b0] ss:$8 sps:$4 sm:$0xff]  }
 0x465   : > { %v10255_v23 = vadd.f32 %v5800_v27, %v14015_v47  ;;  %v10102_v63 = vadd.f32 %v4434_v32, %v13739_v15  ;;  %v5802_v6 = vpop.f32.mrb[57].mxu1  ;;  %v6146_v5 = vmax.f32 %v10100_v12, 0.0  ;;  %7245 = vmatpush1.bf16.msra.mxu0 %v11769_v16 }
 0x466   : > { %v6149_v3 = vmax.f32 %v10101_v7, 0.0  ;;  %v10256_v35 = vadd.f32 %v5802_v6, %v14022_v25  ;;  %v5804_v34 = vpop.f32.mrb[58].mxu1 }
 0x467   : > { %v6150_v28 = vmax.f32 %v10102_v63, 0.0  ;;  %v10257_v57 = vadd.f32 %v5804_v34, %v14015_v47  ;;  %v5806_v46 = vpop.f32.mrb[59].mxu1  ;;  %v6115_v48 = vmax.f32 %v10255_v23, 0.0 }
 0x468   : > { %v6373_v36 = vpack.c.bf16 %v6149_v3, %v6145_v62  ;;  %v10258_v1 = vadd.f32 %v5806_v46, %v14022_v25  ;;  %v6116_v29 = vmax.f32 %v10256_v35, 0.0 }
 0x469   : > { %v6374_v18 = vpack.c.bf16 %v6150_v28, %v6146_v5  ;;  %v6119_v61 = vmax.f32 %v10257_v57, 0.0  ;;  %9532 = vmatmul.mubr.msk.bf16.gmra.mrb[164].mxu1 %vm3168_vm0, %v15022_v9  ;;  %v4438_v14 = vpop.f32.mrb[32].mxu0  ;;  %v15023_v9 = vld [vmem:[#allocation15_spill] sm:$0xff] }
 0x46a   : > { %v6120_v37 = vmax.f32 %v10258_v1, 0.0  ;;  %v10103_v4 = vadd.f32 %v4438_v14, %v13732_v59  ;;  %v4440_v24 = vpop.f32.mrb[33].mxu0  ;;  %6078 = vmatprep.mubr.bf16.mxu1 %v15006_v55 }
 0x46b   : > { %v10104_v12 = vadd.f32 %v4440_v24, %v13739_v15  ;;  %v4442_v19 = vpop.f32.mrb[34].mxu0  ;;  %6971 = vmatprep.mubr.bf16.mxu0 %v6374_v18  ;;  %v14112_v7 = vpack.c.bf16 %v6119_v61, %v6115_v48 }
 0x46c   : > { %v10105_v27 = vadd.f32 %v4442_v19, %v13732_v59  ;;  %v5810_v32 = vpop.f32.mrb[60].mxu1  ;;  %v4444_v23 = vpop.f32.mrb[35].mxu0  ;;  %6972 = vmatmul.mubr.bf16.gmra.mrb[156].mxu0 %v6373_v36  ;;  %v14115_v63 = vpack.c.bf16 %v6120_v37, %v6116_v29  ;;  %v6153_v35 = vmax.f32 %v10103_v4, 0.0 }
 0x46d   : > { %v10259_v6 = vadd.f32 %v5810_v32, %v14015_v47  ;;  %v10106_v62 = vadd.f32 %v4444_v23, %v13739_v15  ;;  %v5812_v3 = vpop.f32.mrb[61].mxu1  ;;  %v6154_v57 = vmax.f32 %v10104_v12, 0.0 }
 0x46e   : > { %v6157_v34 = vmax.f32 %v10105_v27, 0.0  ;;  %v10260_v5 = vadd.f32 %v5812_v3, %v14022_v25  ;;  %v5814_v28 = vpop.f32.mrb[62].mxu1 }
 0x46f   : > { %v6158_v46 = vmax.f32 %v10106_v62, 0.0  ;;  %v10261_v1 = vadd.f32 %v5814_v28, %v14015_v47  ;;  %v5816_v16 = vpop.f32.mrb[63].mxu1  ;;  %v6123_v48 = vmax.f32 %v10259_v6, 0.0 }
 0x470   : > { %v6377_v44 = vpack.c.bf16 %v6157_v34, %v6153_v35  ;;  %v10262_v36 = vadd.f32 %v5816_v16, %v14022_v25  ;;  %v6124_v29 = vmax.f32 %v10260_v5, 0.0 }
 0x471   : > { %v6378_v18 = vpack.c.bf16 %v6158_v46, %v6154_v57  ;;  %v6127_v61 = vmax.f32 %v10261_v1, 0.0  ;;  %9533 = vmatmul.mubr.msk.bf16.gmra.mrb[168].mxu1 %vm3168_vm0, %v15023_v9  ;;  %v4448_v14 = vpop.f32.mrb[36].mxu0  ;;  %v11774_v9 = vld [vmem:[%s14964_s3 + $0x1c4] ss:$8 sps:$4 sm:$0xff]  }
 0x472   : > { %v6128_v37 = vmax.f32 %v10262_v36, 0.0  ;;  %v10107_v4 = vadd.f32 %v4448_v14, %v13732_v59  ;;  %v4450_v24 = vpop.f32.mrb[37].mxu0  ;;  %7246 = vmatprep.subr.bf16.mxu0 %v11774_v9 }
 0x473   : > { %v10108_v12 = vadd.f32 %v4450_v24, %v13739_v15  ;;  %v4452_v19 = vpop.f32.mrb[38].mxu0  ;;  %6981 = vmatprep.mubr.bf16.mxu0 %v6378_v18  ;;  %v14126_v27 = vpack.c.bf16 %v6127_v61, %v6123_v48  ;;  %v11772_v61 = vld [vmem:[%s14964_s3 + $0x1c0] ss:$8 sps:$4 sm:$0xff]  }
 0x474   : > { %v10109_v32 = vadd.f32 %v4452_v19, %v13732_v59  ;;  %v5820_v23 = vpop.f32.mrb[64].mxu1  ;;  %v4454_v6 = vpop.f32.mrb[39].mxu0  ;;  %6982 = vmatmul.mubr.bf16.gmra.mrb[160].mxu0 %v6377_v44  ;;  %v14129_v62 = vpack.c.bf16 %v6128_v37, %v6124_v29  ;;  %v6161_v5 = vmax.f32 %v10107_v4, 0.0 }
 0x475   : > { %v10263_v3 = vadd.f32 %v5820_v23, %v14015_v47  ;;  %v10110_v35 = vadd.f32 %v4454_v6, %v13739_v15  ;;  %v5822_v34 = vpop.f32.mrb[65].mxu1  ;;  %v6162_v1 = vmax.f32 %v10108_v12, 0.0  ;;  %7247 = vmatpush1.bf16.msra.mxu0 %v11772_v61 }
 0x476   : > { %v6165_v28 = vmax.f32 %v10109_v32, 0.0  ;;  %v10264_v57 = vadd.f32 %v5822_v34, %v14022_v25  ;;  %v5824_v46 = vpop.f32.mrb[66].mxu1 }
 0x477   : > { %v6166_v16 = vmax.f32 %v10110_v35, 0.0  ;;  %v10265_v36 = vadd.f32 %v5824_v46, %v14015_v47  ;;  %v5826_v48 = vpop.f32.mrb[67].mxu1  ;;  %v6131_v14 = vmax.f32 %v10263_v3, 0.0 }
 0x478   : > { %v6381_v18 = vpack.c.bf16 %v6165_v28, %v6161_v5  ;;  %v10266_v44 = vadd.f32 %v5826_v48, %v14022_v25  ;;  %v6132_v24 = vmax.f32 %v10264_v57, 0.0 }
 0x479   : > { %v6382_v29 = vpack.c.bf16 %v6166_v16, %v6162_v1  ;;  %v6135_v37 = vmax.f32 %v10265_v36, 0.0  ;;  %v4458_v4 = vpop.f32.mrb[40].mxu0 }
 0x47a   : > { %v6136_v12 = vmax.f32 %v10266_v44, 0.0  ;;  %v10111_v19 = vadd.f32 %v4458_v4, %v13732_v59  ;;  %v4460_v32 = vpop.f32.mrb[41].mxu0 }
 0x47b   : > { %v10112_v23 = vadd.f32 %v4460_v32, %v13739_v15  ;;  %v4462_v6 = vpop.f32.mrb[42].mxu0  ;;  %6991 = vmatprep.mubr.bf16.mxu0 %v6382_v29  ;;  %v14144_v35 = vpack.c.bf16 %v6135_v37, %v6131_v14 }
 0x47c   : > { %v10113_v34 = vadd.f32 %v4462_v6, %v13732_v59  ;;  %v5830_v5 = vpop.f32.mrb[68].mxu1  ;;  %v4464_v3 = vpop.f32.mrb[43].mxu0  ;;  %6992 = vmatmul.mubr.bf16.gmra.mrb[164].mxu0 %v6381_v18  ;;  %v14147_v28 = vpack.c.bf16 %v6136_v12, %v6132_v24  ;;  %v6169_v16 = vmax.f32 %v10111_v19, 0.0 }
 0x47d   : > { %v10267_v57 = vadd.f32 %v5830_v5, %v14015_v47  ;;  %v10114_v46 = vadd.f32 %v4464_v3, %v13739_v15  ;;  %v5832_v1 = vpop.f32.mrb[69].mxu1  ;;  %v6170_v61 = vmax.f32 %v10112_v23, 0.0 }
 0x47e   : > { %v6173_v36 = vmax.f32 %v10113_v34, 0.0  ;;  %v10268_v48 = vadd.f32 %v5832_v1, %v14022_v25  ;;  %v5834_v44 = vpop.f32.mrb[70].mxu1 }
 0x47f   : > { %v6174_v9 = vmax.f32 %v10114_v46, 0.0  ;;  %v10269_v14 = vadd.f32 %v5834_v44, %v14015_v47  ;;  %v5836_v29 = vpop.f32.mrb[71].mxu1  ;;  %v6139_v4 = vmax.f32 %v10267_v57, 0.0 }
 0x480   : > { %v6385_v37 = vpack.c.bf16 %v6173_v36, %v6169_v16  ;;  %v10270_v18 = vadd.f32 %v5836_v29, %v14022_v25  ;;  %v6140_v6 = vmax.f32 %v10268_v48, 0.0 }
 0x481   : > { %v6386_v24 = vpack.c.bf16 %v6174_v9, %v6170_v61  ;;  %v6143_v12 = vmax.f32 %v10269_v14, 0.0  ;;  %v4468_v32 = vpop.f32.mrb[44].mxu0 }
 0x482   : > { %v6144_v5 = vmax.f32 %v10270_v18, 0.0  ;;  %v10115_v19 = vadd.f32 %v4468_v32, %v13732_v59  ;;  %v4470_v34 = vpop.f32.mrb[45].mxu0 }
 0x483   : > { %v10116_v3 = vadd.f32 %v4470_v34, %v13739_v15  ;;  %v4472_v1 = vpop.f32.mrb[46].mxu0  ;;  %7001 = vmatprep.mubr.bf16.mxu0 %v6386_v24  ;;  %v14156_v23 = vpack.c.bf16 %v6143_v12, %v6139_v4 }
 0x484   : > { %v10117_v46 = vadd.f32 %v4472_v1, %v13732_v59  ;;  %v5840_v16 = vpop.f32.mrb[72].mxu1  ;;  %v4474_v36 = vpop.f32.mrb[47].mxu0  ;;  %7002 = vmatmul.mubr.bf16.gmra.mrb[168].mxu0 %v6385_v37  ;;  %v14159_v57 = vpack.c.bf16 %v6144_v5, %v6140_v6  ;;  %v6177_v9 = vmax.f32 %v10115_v19, 0.0  ;;  %v11775_v6 = vld [vmem:[%s14964_s3 + $0x1d0] ss:$8 sps:$4 sm:$0xff]  }
 0x485   : > { %v10271_v44 = vadd.f32 %v5840_v16, %v14015_v47  ;;  %v10118_v48 = vadd.f32 %v4474_v36, %v13739_v15  ;;  %v5842_v61 = vpop.f32.mrb[73].mxu1  ;;  %v6178_v24 = vmax.f32 %v10116_v3, 0.0  ;;  %v11777_v5 = vld [vmem:[%s14964_s3 + $0x1d4] ss:$8 sps:$4 sm:$0xff]  }
 0x486   : > { %v6181_v14 = vmax.f32 %v10117_v46, 0.0  ;;  %v10272_v29 = vadd.f32 %v5842_v61, %v14022_v25  ;;  %v5844_v18 = vpop.f32.mrb[74].mxu1  ;;  %7248 = vmatprep.subr.bf16.mxu0 %v11777_v5 }
 0x487   : > { %v6182_v4 = vmax.f32 %v10118_v48, 0.0  ;;  %v10273_v12 = vadd.f32 %v5844_v18, %v14015_v47  ;;  %v5846_v32 = vpop.f32.mrb[75].mxu1  ;;  %v6147_v19 = vmax.f32 %v10271_v44, 0.0  ;;  %7249 = vmatpush1.bf16.msra.mxu0 %v11775_v6 }
 0x488   : > { %v6389_v34 = vpack.c.bf16 %v6181_v14, %v6177_v9  ;;  %v10274_v37 = vadd.f32 %v5846_v32, %v14022_v25  ;;  %v6148_v3 = vmax.f32 %v10272_v29, 0.0 }
 0x489   : > { %v6390_v1 = vpack.c.bf16 %v6182_v4, %v6178_v24  ;;  %v6151_v46 = vmax.f32 %v10273_v12, 0.0  ;;  %v4478_v16 = vpop.f32.mrb[48].mxu0 }
 0x48a   : > { %v6152_v36 = vmax.f32 %v10274_v37, 0.0  ;;  %v10119_v48 = vadd.f32 %v4478_v16, %v13732_v59  ;;  %v4480_v61 = vpop.f32.mrb[49].mxu0 }
 0x48b   : > { %v10120_v9 = vadd.f32 %v4480_v61, %v13739_v15  ;;  %v4482_v14 = vpop.f32.mrb[50].mxu0  ;;  %7011 = vmatprep.mubr.bf16.mxu0 %v6390_v1  ;;  %v14174_v18 = vpack.c.bf16 %v6151_v46, %v6147_v19 }
 0x48c   : > { %v10121_v32 = vadd.f32 %v4482_v14, %v13732_v59  ;;  %v5850_v49 = vpop.f32.mrb[76].mxu1  ;;  %v4484_v44 = vpop.f32.mrb[51].mxu0  ;;  %7012 = vmatmul.mubr.bf16.gmra.mrb[172].mxu0 %v6389_v34  ;;  %v14177_v24 = vpack.c.bf16 %v6152_v36, %v6148_v3  ;;  %v6185_v37 = vmax.f32 %v10119_v48, 0.0 }
 0x48d   : > { %15024 = vst [vmem:[#allocation16_spill] sm:$0xff] %v14174_v18  ;;  %v10275_v29 = vadd.f32 %v5850_v49, %v14015_v47  ;;  %v10122_v4 = vadd.f32 %v4484_v44, %v13739_v15  ;;  %v5852_v12 = vpop.f32.mrb[77].mxu1  ;;  %v6186_v6 = vmax.f32 %v10120_v9, 0.0 }
 0x48e   : > { %15025 = vst [vmem:[#allocation5_spill] sm:$0xff] %v14177_v24  ;;  %v6189_v5 = vmax.f32 %v10121_v32, 0.0  ;;  %v10276_v16 = vadd.f32 %v5852_v12, %v14022_v25  ;;  %v5854_v1 = vpop.f32.mrb[78].mxu1 }
 0x48f   : > { %v6190_v19 = vmax.f32 %v10122_v4, 0.0  ;;  %v10277_v46 = vadd.f32 %v5854_v1, %v14015_v47  ;;  %v5856_v61 = vpop.f32.mrb[79].mxu1  ;;  %v6155_v3 = vmax.f32 %v10275_v29, 0.0 }
 0x490   : > { %v6393_v14 = vpack.c.bf16 %v6189_v5, %v6185_v37  ;;  %v10278_v34 = vadd.f32 %v5856_v61, %v14022_v25  ;;  %v6156_v18 = vmax.f32 %v10276_v16, 0.0 }
 0x491   : > { %v6394_v36 = vpack.c.bf16 %v6190_v19, %v6186_v6  ;;  %v6159_v38 = vmax.f32 %v10277_v46, 0.0  ;;  %v4488_v49 = vpop.f32.mrb[52].mxu0 }
 0x492   : > { %v6160_v44 = vmax.f32 %v10278_v34, 0.0  ;;  %v10123_v48 = vadd.f32 %v4488_v49, %v13732_v59  ;;  %v4490_v32 = vpop.f32.mrb[53].mxu0 }
 0x493   : > { %v10124_v12 = vadd.f32 %v4490_v32, %v13739_v15  ;;  %v4492_v24 = vpop.f32.mrb[54].mxu0  ;;  %7021 = vmatprep.mubr.bf16.mxu0 %v6394_v36  ;;  %v14186_v9 = vpack.c.bf16 %v6159_v38, %v6155_v3 }
 0x494   : > { %v10125_v4 = vadd.f32 %v4492_v24, %v13732_v59  ;;  %v5860_v37 = vpop.f32.mrb[80].mxu1  ;;  %v4494_v5 = vpop.f32.mrb[55].mxu0  ;;  %7022 = vmatmul.mubr.bf16.gmra.mrb[176].mxu0 %v6393_v14  ;;  %v14189_v29 = vpack.c.bf16 %v6160_v44, %v6156_v18  ;;  %v6193_v19 = vmax.f32 %v10123_v48, 0.0  ;;  %v11778_v18 = vld [vmem:[%s14966_s5] sm:$0xff]  }
 0x495   : > { %15026 = vst [vmem:[#allocation17_spill] sm:$0xff] %v14186_v9  ;;  %v10279_v1 = vadd.f32 %v5860_v37, %v14015_v47  ;;  %v10126_v16 = vadd.f32 %v4494_v5, %v13739_v15  ;;  %v5862_v6 = vpop.f32.mrb[81].mxu1  ;;  %v6194_v36 = vmax.f32 %v10124_v12, 0.0  ;;  %v11779_v44 = vld [vmem:[%s14964_s3 + $0x1e0] ss:$8 sps:$4 sm:$0xff]   ;;  %7903 = vmatpush1.bf16.msra.mxu1 %v11778_v18 }
 0x496   : > { %15027 = vst [vmem:[#allocation18_spill] sm:$0xff] %v14189_v29  ;;  %v6197_v46 = vmax.f32 %v10125_v4, 0.0  ;;  %v10280_v61 = vadd.f32 %v5862_v6, %v14022_v25  ;;  %v5864_v34 = vpop.f32.mrb[82].mxu1  ;;  %v11781_v48 = vld [vmem:[%s14964_s3 + $0x1e4] ss:$8 sps:$4 sm:$0xff]   ;;  %7904 = vmatprep.subr.bf16.mxu1 %v15006_v55 }
 0x497   : > { %v6198_v38 = vmax.f32 %v10126_v16, 0.0  ;;  %v10281_v3 = vadd.f32 %v5864_v34, %v14015_v47  ;;  %v5866_v24 = vpop.f32.mrb[83].mxu1  ;;  %v6163_v32 = vmax.f32 %v10279_v1, 0.0  ;;  %7250 = vmatprep.subr.bf16.mxu0 %v11781_v48 }
 0x498   : > { %v6397_v14 = vpack.c.bf16 %v6197_v46, %v6193_v19  ;;  %v10282_v49 = vadd.f32 %v5866_v24, %v14022_v25  ;;  %v6164_v5 = vmax.f32 %v10280_v61, 0.0  ;;  %7251 = vmatpush1.bf16.msra.mxu0 %v11779_v44 }
 0x499   : > { %v6398_v12 = vpack.c.bf16 %v6198_v38, %v6194_v36  ;;  %v6167_v4 = vmax.f32 %v10281_v3, 0.0  ;;  %v4498_v37 = vpop.f32.mrb[56].mxu0 }
 0x49a   : > { %v6168_v16 = vmax.f32 %v10282_v49, 0.0  ;;  %v10127_v6 = vadd.f32 %v4498_v37, %v13732_v59  ;;  %v4500_v19 = vpop.f32.mrb[57].mxu0 }
 0x49b   : > { %v10128_v46 = vadd.f32 %v4500_v19, %v13739_v15  ;;  %v4502_v34 = vpop.f32.mrb[58].mxu0  ;;  %7031 = vmatprep.mubr.bf16.mxu0 %v6398_v12  ;;  %v14208_v24 = vpack.c.bf16 %v6167_v4, %v6163_v32 }
 0x49c   : > { %v10129_v1 = vadd.f32 %v4502_v34, %v13732_v59  ;;  %v5870_v36 = vpop.f32.mrb[84].mxu1  ;;  %v4504_v38 = vpop.f32.mrb[59].mxu0  ;;  %7032 = vmatmul.mubr.bf16.gmra.mrb[180].mxu0 %v6397_v14  ;;  %v14211_v61 = vpack.c.bf16 %v6168_v16, %v6164_v5  ;;  %v6201_v48 = vmax.f32 %v10127_v6, 0.0 }
 0x49d   : > { %15028 = vst [vmem:[#allocation19_spill] sm:$0xff] %v14208_v24  ;;  %v10283_v3 = vadd.f32 %v5870_v36, %v14015_v47  ;;  %v10130_v18 = vadd.f32 %v4504_v38, %v13739_v15  ;;  %v5872_v49 = vpop.f32.mrb[85].mxu1  ;;  %v6202_v44 = vmax.f32 %v10128_v46, 0.0 }
 0x49e   : > { %15029 = vst [vmem:[#allocation20_spill] sm:$0xff] %v14211_v61  ;;  %v6205_v37 = vmax.f32 %v10129_v1, 0.0  ;;  %v10284_v19 = vadd.f32 %v5872_v49, %v14022_v25  ;;  %v5874_v12 = vpop.f32.mrb[86].mxu1 }
 0x49f   : > { %v6206_v32 = vmax.f32 %v10130_v18, 0.0  ;;  %v10285_v4 = vadd.f32 %v5874_v12, %v14015_v47  ;;  %v5876_v34 = vpop.f32.mrb[87].mxu1  ;;  %v6171_v5 = vmax.f32 %v10283_v3, 0.0 }
 0x4a0   : > { %v6401_v24 = vpack.c.bf16 %v6205_v37, %v6201_v48  ;;  %v10286_v14 = vadd.f32 %v5876_v34, %v14022_v25  ;;  %v6172_v9 = vmax.f32 %v10284_v19, 0.0 }
 0x4a1   : > { %v6402_v16 = vpack.c.bf16 %v6206_v32, %v6202_v44  ;;  %v6175_v61 = vmax.f32 %v10285_v4, 0.0  ;;  %v4508_v36 = vpop.f32.mrb[60].mxu0 }
 0x4a2   : > { %v6176_v38 = vmax.f32 %v10286_v14, 0.0  ;;  %v10131_v6 = vadd.f32 %v4508_v36, %v13732_v59  ;;  %v4510_v1 = vpop.f32.mrb[61].mxu0 }
 0x4a3   : > { %v10132_v49 = vadd.f32 %v4510_v1, %v13739_v15  ;;  %v4512_v29 = vpop.f32.mrb[62].mxu0  ;;  %7041 = vmatprep.mubr.bf16.mxu0 %v6402_v16  ;;  %v14220_v46 = vpack.c.bf16 %v6175_v61, %v6171_v5 }
 0x4a4   : > { %v10133_v18 = vadd.f32 %v4512_v29, %v13732_v59  ;;  %v5880_v48 = vpop.f32.mrb[88].mxu1  ;;  %v4514_v37 = vpop.f32.mrb[63].mxu0  ;;  %7042 = vmatmul.mubr.bf16.gmra.mrb[184].mxu0 %v6401_v24  ;;  %v14223_v3 = vpack.c.bf16 %v6176_v38, %v6172_v9  ;;  %v6209_v32 = vmax.f32 %v10131_v6, 0.0  ;;  %v11782_v9 = vld [vmem:[%s14966_s5 + $0x8] sm:$0xff]   ;;  %v11783_v38 = vld [vmem:[%s14964_s3 + $0x1f0] ss:$8 sps:$4 sm:$0xff]  }
 0x4a5   : > { %15030 = vst [vmem:[#allocation6_spill] sm:$0xff] %v14220_v46  ;;  %v10287_v12 = vadd.f32 %v5880_v48, %v14015_v47  ;;  %v10134_v19 = vadd.f32 %v4514_v37, %v13739_v15  ;;  %v5882_v44 = vpop.f32.mrb[89].mxu1  ;;  %v6210_v16 = vmax.f32 %v10132_v49, 0.0  ;;  %v11785_v6 = vld [vmem:[%s14964_s3 + $0x1f4] ss:$8 sps:$4 sm:$0xff]   ;;  %7905 = vmatpush1.bf16.msra.mxu1 %v11782_v9 }
 0x4a6   : > { %15031 = vst [vmem:[#allocation7_spill] sm:$0xff] %v14223_v3  ;;  %v6213_v4 = vmax.f32 %v10133_v18, 0.0  ;;  %v10288_v34 = vadd.f32 %v5882_v44, %v14022_v25  ;;  %v5884_v14 = vpop.f32.mrb[90].mxu1  ;;  %7252 = vmatprep.subr.bf16.mxu0 %v11785_v6  ;;  %7906 = vmatprep.subr.bf16.mxu1 %v15006_v55 }
 0x4a7   : > { %v6214_v61 = vmax.f32 %v10134_v19, 0.0  ;;  %v10289_v5 = vadd.f32 %v5884_v14, %v14015_v47  ;;  %v5886_v29 = vpop.f32.mrb[91].mxu1  ;;  %v6179_v1 = vmax.f32 %v10287_v12, 0.0  ;;  %7253 = vmatpush1.bf16.msra.mxu0 %v11783_v38 }
 0x4a8   : > { %v6405_v24 = vpack.c.bf16 %v6213_v4, %v6209_v32  ;;  %v10290_v36 = vadd.f32 %v5886_v29, %v14022_v25  ;;  %v6180_v37 = vmax.f32 %v10288_v34, 0.0 }
 0x4a9   : > { %v6406_v49 = vpack.c.bf16 %v6214_v61, %v6210_v16  ;;  %v6183_v18 = vmax.f32 %v10289_v5, 0.0  ;;  %v4518_v48 = vpop.f32.mrb[64].mxu0 }
 0x4aa   : > { %v6184_v19 = vmax.f32 %v10290_v36, 0.0  ;;  %v10135_v44 = vadd.f32 %v4518_v48, %v13732_v59  ;;  %v4520_v32 = vpop.f32.mrb[65].mxu0 }
 0x4ab   : > { %v10136_v4 = vadd.f32 %v4520_v32, %v13739_v15  ;;  %v4522_v14 = vpop.f32.mrb[66].mxu0  ;;  %7051 = vmatprep.mubr.bf16.mxu0 %v6406_v49  ;;  %v14242_v29 = vpack.c.bf16 %v6183_v18, %v6179_v1 }
 0x4ac   : > { %v10137_v12 = vadd.f32 %v4522_v14, %v13732_v59  ;;  %v5890_v16 = vpop.f32.mrb[92].mxu1  ;;  %v4524_v61 = vpop.f32.mrb[67].mxu0  ;;  %7052 = vmatmul.mubr.bf16.gmra.mrb[188].mxu0 %v6405_v24  ;;  %v14245_v34 = vpack.c.bf16 %v6184_v19, %v6180_v37  ;;  %v6217_v6 = vmax.f32 %v10135_v44, 0.0 }
 0x4ad   : > { %15032 = vst [vmem:[#allocation8_spill] sm:$0xff] %v14242_v29  ;;  %v10291_v5 = vadd.f32 %v5890_v16, %v14015_v47  ;;  %v10138_v9 = vadd.f32 %v4524_v61, %v13739_v15  ;;  %v5892_v36 = vpop.f32.mrb[93].mxu1  ;;  %v6218_v38 = vmax.f32 %v10136_v4, 0.0 }
 0x4ae   : > { %15033 = vst [vmem:[#allocation9_spill] sm:$0xff] %v14245_v34  ;;  %v6221_v48 = vmax.f32 %v10137_v12, 0.0  ;;  %v10292_v32 = vadd.f32 %v5892_v36, %v14022_v25  ;;  %v5894_v49 = vpop.f32.mrb[94].mxu1 }
 0x4af   : > { %v6222_v1 = vmax.f32 %v10138_v9, 0.0  ;;  %v10293_v18 = vadd.f32 %v5894_v49, %v14015_v47  ;;  %v5896_v14 = vpop.f32.mrb[95].mxu1  ;;  %v6187_v37 = vmax.f32 %v10291_v5, 0.0 }
 0x4b0   : > { %v6409_v29 = vpack.c.bf16 %v6221_v48, %v6217_v6  ;;  %v10294_v24 = vadd.f32 %v5896_v14, %v14022_v25  ;;  %v6188_v46 = vmax.f32 %v10292_v32, 0.0 }
 0x4b1   : > { %v6410_v19 = vpack.c.bf16 %v6222_v1, %v6218_v38  ;;  %v6191_v34 = vmax.f32 %v10293_v18, 0.0  ;;  %v4528_v16 = vpop.f32.mrb[68].mxu0 }
 0x4b2   : > { %v6192_v61 = vmax.f32 %v10294_v24, 0.0  ;;  %v10139_v44 = vadd.f32 %v4528_v16, %v13732_v59  ;;  %v4530_v12 = vpop.f32.mrb[69].mxu0 }
 0x4b3   : > { %v10140_v36 = vadd.f32 %v4530_v12, %v13739_v15  ;;  %v4532_v3 = vpop.f32.mrb[70].mxu0  ;;  %7061 = vmatprep.mubr.bf16.mxu0 %v6410_v19  ;;  %v14254_v4 = vpack.c.bf16 %v6191_v34, %v6187_v37 }
 0x4b4   : > { %v10141_v9 = vadd.f32 %v4532_v3, %v13732_v59  ;;  %v5900_v6 = vpop.f32.mrb[96].mxu1  ;;  %v4534_v48 = vpop.f32.mrb[71].mxu0  ;;  %7062 = vmatmul.mubr.bf16.gmra.mrb[192].mxu0 %v6409_v29  ;;  %v14257_v5 = vpack.c.bf16 %v6192_v61, %v6188_v46  ;;  %v6225_v1 = vmax.f32 %v10139_v44, 0.0  ;;  %v11786_v46 = vld [vmem:[%s14966_s5 + $0x10] sm:$0xff]  }
 0x4b5   : > { %15034 = vst [vmem:[#allocation10_spill] sm:$0xff] %v14254_v4  ;;  %v10295_v49 = vadd.f32 %v5900_v6, %v14015_v47  ;;  %v10142_v32 = vadd.f32 %v4534_v48, %v13739_v15  ;;  %v5902_v38 = vpop.f32.mrb[97].mxu1  ;;  %v6226_v19 = vmax.f32 %v10140_v36, 0.0  ;;  %7907 = vmatpush1.bf16.msra.mxu1 %v11786_v46 }
 0x4b6   : > { %15035 = vst [vmem:[#allocation11_spill] sm:$0xff] %v14257_v5  ;;  %v6229_v18 = vmax.f32 %v10141_v9, 0.0  ;;  %v10296_v14 = vadd.f32 %v5902_v38, %v14022_v25  ;;  %v5904_v24 = vpop.f32.mrb[98].mxu1  ;;  %7908 = vmatprep.subr.bf16.mxu1 %v15006_v55 }
 0x4b7   : > { %v6230_v34 = vmax.f32 %v10142_v32, 0.0  ;;  %v10297_v37 = vadd.f32 %v5904_v24, %v14015_v47  ;;  %v5906_v3 = vpop.f32.mrb[99].mxu1  ;;  %v6195_v61 = vmax.f32 %v10295_v49, 0.0 }
 0x4b8   : > { %v6413_v29 = vpack.c.bf16 %v6229_v18, %v6225_v1  ;;  %v10298_v16 = vadd.f32 %v5906_v3, %v14022_v25  ;;  %v6196_v9 = vmax.f32 %v10296_v14, 0.0 }
 0x4b9   : > { %v6414_v12 = vpack.c.bf16 %v6230_v34, %v6226_v19  ;;  %v6199_v6 = vmax.f32 %v10297_v37, 0.0  ;;  %v4538_v44 = vpop.f32.mrb[72].mxu0 }
 0x4ba   : > { %v6200_v48 = vmax.f32 %v10298_v16, 0.0  ;;  %v10143_v36 = vadd.f32 %v4538_v44, %v13732_v59  ;;  %v4540_v32 = vpop.f32.mrb[73].mxu0 }
 0x4bb   : > { %v10144_v38 = vadd.f32 %v4540_v32, %v13739_v15  ;;  %v4542_v24 = vpop.f32.mrb[74].mxu0  ;;  %7071 = vmatprep.mubr.bf16.mxu0 %v6414_v12  ;;  %v14270_v4 = vpack.c.bf16 %v6199_v6, %v6195_v61 }
 0x4bc   : > { %v10145_v1 = vadd.f32 %v4542_v24, %v13732_v59  ;;  %v5910_v49 = vpop.f32.mrb[100].mxu1  ;;  %v4544_v18 = vpop.f32.mrb[75].mxu0  ;;  %7072 = vmatmul.mubr.bf16.gmra.mrb[196].mxu0 %v6413_v29  ;;  %v14273_v19 = vpack.c.bf16 %v6200_v48, %v6196_v9  ;;  %v6233_v3 = vmax.f32 %v10143_v36, 0.0 }
 0x4bd   : > { %15036 = vst [vmem:[#allocation12_spill] sm:$0xff] %v14270_v4  ;;  %v10299_v14 = vadd.f32 %v5910_v49, %v14015_v47  ;;  %v10146_v34 = vadd.f32 %v4544_v18, %v13739_v15  ;;  %v5912_v37 = vpop.f32.mrb[101].mxu1  ;;  %v6234_v12 = vmax.f32 %v10144_v38, 0.0 }
 0x4be   : > { %15037 = vst [vmem:[#allocation13_spill] sm:$0xff] %v14273_v19  ;;  %v6237_v46 = vmax.f32 %v10145_v1, 0.0  ;;  %v10300_v16 = vadd.f32 %v5912_v37, %v14022_v25  ;;  %v5914_v44 = vpop.f32.mrb[102].mxu1 }
 0x4bf   : > { %v6238_v61 = vmax.f32 %v10146_v34, 0.0  ;;  %v10301_v6 = vadd.f32 %v5914_v44, %v14015_v47  ;;  %v5916_v32 = vpop.f32.mrb[103].mxu1  ;;  %v6203_v9 = vmax.f32 %v10299_v14, 0.0 }
 0x4c0   : > { %v6417_v24 = vpack.c.bf16 %v6237_v46, %v6233_v3  ;;  %v10302_v29 = vadd.f32 %v5916_v32, %v14022_v25  ;;  %v6204_v19 = vmax.f32 %v10300_v16, 0.0 }
 0x4c1   : > { %v6418_v48 = vpack.c.bf16 %v6238_v61, %v6234_v12  ;;  %v6207_v4 = vmax.f32 %v10301_v6, 0.0  ;;  %v4548_v49 = vpop.f32.mrb[76].mxu0 }
 0x4c2   : > { %v6208_v18 = vmax.f32 %v10302_v29, 0.0  ;;  %v10147_v36 = vadd.f32 %v4548_v49, %v13732_v59  ;;  %v4550_v1 = vpop.f32.mrb[77].mxu0 }
 0x4c3   : > { %v10148_v37 = vadd.f32 %v4550_v1, %v13739_v15  ;;  %v4552_v5 = vpop.f32.mrb[78].mxu0  ;;  %7081 = vmatprep.mubr.bf16.mxu0 %v6418_v48  ;;  %v14282_v38 = vpack.c.bf16 %v6207_v4, %v6203_v9 }
 0x4c4   : > { %v10149_v34 = vadd.f32 %v4552_v5, %v13732_v59  ;;  %v5920_v3 = vpop.f32.mrb[104].mxu1  ;;  %v4554_v46 = vpop.f32.mrb[79].mxu0  ;;  %7082 = vmatmul.mubr.bf16.gmra.mrb[200].mxu0 %v6417_v24  ;;  %v14285_v14 = vpack.c.bf16 %v6208_v18, %v6204_v19  ;;  %v6241_v61 = vmax.f32 %v10147_v36, 0.0  ;;  %v11787_v19 = vld [vmem:[%s14966_s5 + $0x18] sm:$0xff]  }
 0x4c5   : > { %15038 = vst [vmem:[#allocation14_spill] sm:$0xff] %v14282_v38  ;;  %v10303_v44 = vadd.f32 %v5920_v3, %v14015_v47  ;;  %v10150_v16 = vadd.f32 %v4554_v46, %v13739_v15  ;;  %v5922_v12 = vpop.f32.mrb[105].mxu1  ;;  %v6242_v48 = vmax.f32 %v10148_v37, 0.0  ;;  %7909 = vmatpush1.bf16.msra.mxu1 %v11787_v19 }
 0x4c6   : > { %v6245_v6 = vmax.f32 %v10149_v34, 0.0  ;;  %v10304_v32 = vadd.f32 %v5922_v12, %v14022_v25  ;;  %v5924_v29 = vpop.f32.mrb[106].mxu1  ;;  %7910 = vmatprep.subr.bf16.mxu1 %v15006_v55 }
 0x4c7   : > { %v6246_v4 = vmax.f32 %v10150_v16, 0.0  ;;  %v10305_v9 = vadd.f32 %v5924_v29, %v14015_v47  ;;  %v5926_v5 = vpop.f32.mrb[107].mxu1  ;;  %v6211_v18 = vmax.f32 %v10303_v44, 0.0 }
 0x4c8   : > { %v6421_v24 = vpack.c.bf16 %v6245_v6, %v6241_v61  ;;  %v10306_v49 = vadd.f32 %v5926_v5, %v14022_v25  ;;  %v6212_v34 = vmax.f32 %v10304_v32, 0.0  ;;  %v11788_v5 = vld [vmem:[%s14966_s5 + $0x20] sm:$0xff]  }
 0x4c9   : > { %v6422_v1 = vpack.c.bf16 %v6246_v4, %v6242_v48  ;;  %v6215_v3 = vmax.f32 %v10305_v9, 0.0  ;;  %v4558_v36 = vpop.f32.mrb[80].mxu0  ;;  %7911 = vmatpush1.bf16.msra.mxu1 %v11788_v5 }
 0x4ca   : > { %v6216_v46 = vmax.f32 %v10306_v49, 0.0  ;;  %v10151_v37 = vadd.f32 %v4558_v36, %v13732_v59  ;;  %v4560_v16 = vpop.f32.mrb[81].mxu0  ;;  %7912 = vmatprep.subr.bf16.mxu1 %v15006_v55 }
 0x4cb   : > { %v10152_v12 = vadd.f32 %v4560_v16, %v13739_v15  ;;  %v4562_v29 = vpop.f32.mrb[82].mxu0  ;;  %7091 = vmatprep.mubr.bf16.mxu0 %v6422_v1  ;;  %v14298_v38 = vpack.c.bf16 %v6215_v3, %v6211_v18 }
 0x4cc   : > { %v10153_v61 = vadd.f32 %v4562_v29, %v13732_v59  ;;  %v5930_v44 = vpop.f32.mrb[108].mxu1  ;;  %v4564_v6 = vpop.f32.mrb[83].mxu0  ;;  %7092 = vmatmul.mubr.bf16.gmra.mrb[204].mxu0 %v6421_v24  ;;  %v14301_v48 = vpack.c.bf16 %v6216_v46, %v6212_v34  ;;  %v6249_v19 = vmax.f32 %v10151_v37, 0.0 }
 0x4cd   : > { %v10307_v32 = vadd.f32 %v5930_v44, %v14015_v47  ;;  %v10154_v4 = vadd.f32 %v4564_v6, %v13739_v15  ;;  %v5932_v9 = vpop.f32.mrb[109].mxu1  ;;  %v6250_v59 = vmax.f32 %v10152_v12, 0.0 }
 0x4ce   : > { %v6253_v49 = vmax.f32 %v10153_v61, 0.0  ;;  %v10308_v18 = vadd.f32 %v5932_v9, %v14022_v25  ;;  %v5934_v1 = vpop.f32.mrb[110].mxu1 }
 0x4cf   : > { %v6254_v3 = vmax.f32 %v10154_v4, 0.0  ;;  %v10309_v24 = vadd.f32 %v5934_v1, %v14015_v47  ;;  %v5936_v36 = vpop.f32.mrb[111].mxu1  ;;  %v6219_v15 = vmax.f32 %v10307_v32, 0.0 }
 0x4d0   : > { %v6425_v34 = vpack.c.bf16 %v6253_v49, %v6249_v19  ;;  %v10310_v46 = vadd.f32 %v5936_v36, %v14022_v25  ;;  %v6220_v44 = vmax.f32 %v10308_v18, 0.0 }
 0x4d1   : > { %v6426_v16 = vpack.c.bf16 %v6254_v3, %v6250_v59  ;;  %v6223_v29 = vmax.f32 %v10309_v24, 0.0 }
 0x4d2   : > { %v6224_v37 = vmax.f32 %v10310_v46, 0.0 }
 0x4d3   : > { %v14312_v61 = vpack.c.bf16 %v6223_v29, %v6219_v15  ;;  %7101 = vmatprep.mubr.bf16.mxu0 %v6426_v16  ;;  %v11789_v16 = vld [vmem:[%s14966_s5 + $0x28] sm:$0xff]  }
 0x4d4   : > { %v14314_v6 = vpack.c.bf16 %v6224_v37, %v6220_v44  ;;  %v5940_v12 = vpop.f32.mrb[112].mxu1  ;;  %7102 = vmatmul.mubr.bf16.gmra.mrb[208].mxu0 %v6425_v34  ;;  %7913 = vmatpush1.bf16.msra.mxu1 %v11789_v16 }
 0x4d5   : > { %v10311_v4 = vadd.f32 %v5940_v12, %v14015_v47  ;;  %v5942_v9 = vpop.f32.mrb[113].mxu1  ;;  %7111 = vmatprep.mubr.bf16.mxu0 %v13772_v2  ;;  %7914 = vmatprep.subr.bf16.mxu1 %v15006_v55 }
 0x4d6   : > { %v10312_v5 = vadd.f32 %v5942_v9, %v14022_v25  ;;  %v5944_v19 = vpop.f32.mrb[114].mxu1 }
 0x4d7   : > { %v10313_v32 = vadd.f32 %v5944_v19, %v14015_v47  ;;  %v5946_v49 = vpop.f32.mrb[115].mxu1  ;;  %v6227_v1 = vmax.f32 %v10311_v4, 0.0 }
 0x4d8   : > { %v10314_v18 = vadd.f32 %v5946_v49, %v14022_v25  ;;  %v6228_v3 = vmax.f32 %v10312_v5, 0.0 }
 0x4d9   : > { %v6231_v59 = vmax.f32 %v10313_v32, 0.0 }
 0x4da   : > { %v6232_v24 = vmax.f32 %v10314_v18, 0.0 }
 0x4db   : > { %v14321_v36 = vpack.c.bf16 %v6231_v59, %v6227_v1 }
 0x4dc   : > { %v14323_v34 = vpack.c.bf16 %v6232_v24, %v6228_v3  ;;  %v5950_v46 = vpop.f32.mrb[116].mxu1  ;;  %7112 = vmatmul.mubr.bf16.gmra.mrb[212].mxu0 %v13767_v30 }
 0x4dd   : > { %v10315_v2 = vadd.f32 %v5950_v46, %v14015_v47  ;;  %v5952_v15 = vpop.f32.mrb[117].mxu1  ;;  %7121 = vmatprep.mubr.bf16.mxu0 %v13796_v10 }
 0x4de   : > { %v10316_v29 = vadd.f32 %v5952_v15, %v14022_v25  ;;  %v5954_v44 = vpop.f32.mrb[118].mxu1 }
 0x4df   : > { %v10317_v37 = vadd.f32 %v5954_v44, %v14015_v47  ;;  %v5956_v12 = vpop.f32.mrb[119].mxu1  ;;  %v6235_v30 = vmax.f32 %v10315_v2, 0.0 }
 0x4e0   : > { %v10318_v4 = vadd.f32 %v5956_v12, %v14022_v25  ;;  %v6236_v5 = vmax.f32 %v10316_v29, 0.0 }
 0x4e1   : > { %v6239_v9 = vmax.f32 %v10317_v37, 0.0 }
 0x4e2   : > { %v6240_v19 = vmax.f32 %v10318_v4, 0.0 }
 0x4e3   : > { %v14335_v10 = vpack.c.bf16 %v6239_v9, %v6235_v30  ;;  %v11790_v30 = vld [vmem:[%s14966_s5 + $0x30] sm:$0xff]  }
 0x4e4   : > { %v14337_v32 = vpack.c.bf16 %v6240_v19, %v6236_v5  ;;  %v5960_v49 = vpop.f32.mrb[120].mxu1  ;;  %7122 = vmatmul.mubr.bf16.gmra.mrb[216].mxu0 %v13791_v20  ;;  %7915 = vmatpush1.bf16.msra.mxu1 %v11790_v30 }
 0x4e5   : > { %v10319_v18 = vadd.f32 %v5960_v49, %v14015_v47  ;;  %v5962_v1 = vpop.f32.mrb[121].mxu1  ;;  %7131 = vmatprep.mubr.bf16.mxu0 %v13820_v13  ;;  %7916 = vmatprep.subr.bf16.mxu1 %v15006_v55 }
 0x4e6   : > { %v10320_v59 = vadd.f32 %v5962_v1, %v14022_v25  ;;  %v5964_v3 = vpop.f32.mrb[122].mxu1 }
 0x4e7   : > { %v10321_v24 = vadd.f32 %v5964_v3, %v14015_v47  ;;  %v5966_v46 = vpop.f32.mrb[123].mxu1  ;;  %v6243_v15 = vmax.f32 %v10319_v18, 0.0 }
 0x4e8   : > { %v10322_v2 = vadd.f32 %v5966_v46, %v14022_v25  ;;  %v6244_v29 = vmax.f32 %v10320_v59, 0.0 }
 0x4e9   : > { %v6247_v16 = vmax.f32 %v10321_v24, 0.0 }
 0x4ea   : > { %v6248_v44 = vmax.f32 %v10322_v2, 0.0 }
 0x4eb   : > { %v14345_v37 = vpack.c.bf16 %v6247_v16, %v6243_v15 }
 0x4ec   : > { %v14347_v20 = vpack.c.bf16 %v6248_v44, %v6244_v29  ;;  %v5970_v12 = vpop.f32.mrb[124].mxu1  ;;  %7132 = vmatmul.mubr.bf16.gmra.mrb[220].mxu0 %v13815_v21 }
 0x4ed   : > { %v10323_v13 = vadd.f32 %v5970_v12, %v14015_v47  ;;  %v5972_v4 = vpop.f32.mrb[125].mxu1  ;;  %7141 = vmatprep.mubr.bf16.mxu0 %v13842_v43 }
 0x4ee   : > { %v10324_v9 = vadd.f32 %v5972_v4, %v14022_v25  ;;  %v5974_v5 = vpop.f32.mrb[126].mxu1 }
 0x4ef   : > { %v10325_v19 = vadd.f32 %v5974_v5, %v14015_v47  ;;  %v5976_v49 = vpop.f32.mrb[127].mxu1  ;;  %v6251_v21 = vmax.f32 %v10323_v13, 0.0 }
 0x4f0   : > { %v10326_v18 = vadd.f32 %v5976_v49, %v14022_v25  ;;  %v6252_v59 = vmax.f32 %v10324_v9, 0.0 }
 0x4f1   : > { %v6255_v1 = vmax.f32 %v10325_v19, 0.0 }
 0x4f2   : > { %v6256_v3 = vmax.f32 %v10326_v18, 0.0 }
 0x4f3   : > { %v14359_v43 = vpack.c.bf16 %v6255_v1, %v6251_v21  ;;  %v11791_v21 = vld [vmem:[%s14966_s5 + $0x38] sm:$0xff]  }
 0x4f4   : > { %v14361_v24 = vpack.c.bf16 %v6256_v3, %v6252_v59  ;;  %v5980_v46 = vpop.f32.mrb[128].mxu1  ;;  %7142 = vmatmul.mubr.bf16.gmra.mrb[224].mxu0 %v13839_v52  ;;  %7917 = vmatpush1.bf16.msra.mxu1 %v11791_v21 }
 0x4f5   : > { %v10327_v2 = vadd.f32 %v5980_v46, %v14015_v47  ;;  %v5982_v15 = vpop.f32.mrb[129].mxu1  ;;  %7151 = vmatprep.mubr.bf16.mxu0 %v13859_v39  ;;  %7918 = vmatprep.subr.bf16.mxu1 %v15006_v55 }
 0x4f6   : > { %v10328_v16 = vadd.f32 %v5982_v15, %v14022_v25  ;;  %v5984_v29 = vpop.f32.mrb[130].mxu1 }
 0x4f7   : > { %v10329_v44 = vadd.f32 %v5984_v29, %v14015_v47  ;;  %v5986_v12 = vpop.f32.mrb[131].mxu1  ;;  %v6259_v4 = vmax.f32 %v10327_v2, 0.0 }
 0x4f8   : > { %v10330_v13 = vadd.f32 %v5986_v12, %v14022_v25  ;;  %v6260_v9 = vmax.f32 %v10328_v16, 0.0 }
 0x4f9   : > { %v6263_v30 = vmax.f32 %v10329_v44, 0.0 }
 0x4fa   : > { %v6264_v5 = vmax.f32 %v10330_v13, 0.0 }
 0x4fb   : > { %v14369_v19 = vpack.c.bf16 %v6263_v30, %v6259_v4 }
 0x4fc   : > { %v14371_v52 = vpack.c.bf16 %v6264_v5, %v6260_v9  ;;  %v5990_v49 = vpop.f32.mrb[132].mxu1  ;;  %7152 = vmatmul.mubr.bf16.gmra.mrb[228].mxu0 %v13856_v11 }
 0x4fd   : > { %v10331_v39 = vadd.f32 %v5990_v49, %v14015_v47  ;;  %v5992_v18 = vpop.f32.mrb[133].mxu1  ;;  %7161 = vmatprep.mubr.bf16.mxu0 %v13874_v51 }
 0x4fe   : > { %v10332_v1 = vadd.f32 %v5992_v18, %v14022_v25  ;;  %v5994_v59 = vpop.f32.mrb[134].mxu1 }
 0x4ff   : > { %v10333_v3 = vadd.f32 %v5994_v59, %v14015_v47  ;;  %v5996_v46 = vpop.f32.mrb[135].mxu1  ;;  %v6267_v11 = vmax.f32 %v10331_v39, 0.0 }
 0x500   : > { %v10334_v2 = vadd.f32 %v5996_v46, %v14022_v25  ;;  %v6268_v16 = vmax.f32 %v10332_v1, 0.0 }
 0x501   : > { %v6271_v15 = vmax.f32 %v10333_v3, 0.0 }
 0x502   : > { %v6272_v29 = vmax.f32 %v10334_v2, 0.0 }
 0x503   : > { %v14383_v51 = vpack.c.bf16 %v6271_v15, %v6267_v11  ;;  %v11792_v11 = vld [vmem:[%s14966_s5 + $0x40] sm:$0xff]  }
 0x504   : > { %v14385_v44 = vpack.c.bf16 %v6272_v29, %v6268_v16  ;;  %v6000_v12 = vpop.f32.mrb[136].mxu1  ;;  %7162 = vmatmul.mubr.bf16.gmra.mrb[232].mxu0 %v13871_v45  ;;  %7919 = vmatpush1.bf16.msra.mxu1 %v11792_v11 }
 0x505   : > { %v10335_v13 = vadd.f32 %v6000_v12, %v14015_v47  ;;  %v6002_v4 = vpop.f32.mrb[137].mxu1  ;;  %7171 = vmatprep.mubr.bf16.mxu0 %v13889_v31  ;;  %7920 = vmatprep.subr.bf16.mxu1 %v15006_v55 }
 0x506   : > { %v10336_v30 = vadd.f32 %v6002_v4, %v14022_v25  ;;  %v6004_v9 = vpop.f32.mrb[138].mxu1 }
 0x507   : > { %v10337_v5 = vadd.f32 %v6004_v9, %v14015_v47  ;;  %v6006_v49 = vpop.f32.mrb[139].mxu1  ;;  %v6275_v18 = vmax.f32 %v10335_v13, 0.0 }
 0x508   : > { %v10338_v39 = vadd.f32 %v6006_v49, %v14022_v25  ;;  %v6276_v1 = vmax.f32 %v10336_v30, 0.0 }
 0x509   : > { %v6279_v21 = vmax.f32 %v10337_v5, 0.0 }
 0x50a   : > { %v6280_v59 = vmax.f32 %v10338_v39, 0.0 }
 0x50b   : > { %v14393_v3 = vpack.c.bf16 %v6279_v21, %v6275_v18 }
 0x50c   : > { %v14395_v45 = vpack.c.bf16 %v6280_v59, %v6276_v1  ;;  %v6010_v46 = vpop.f32.mrb[140].mxu1  ;;  %7172 = vmatmul.mubr.bf16.gmra.mrb[236].mxu0 %v13886_v58 }
 0x50d   : > { %v10339_v31 = vadd.f32 %v6010_v46, %v14015_v47  ;;  %v6012_v2 = vpop.f32.mrb[141].mxu1  ;;  %7181 = vmatprep.mubr.bf16.mxu0 %v13904_v50 }
 0x50e   : > { %v10340_v15 = vadd.f32 %v6012_v2, %v14022_v25  ;;  %v6014_v16 = vpop.f32.mrb[142].mxu1 }
 0x50f   : > { %v10341_v29 = vadd.f32 %v6014_v16, %v14015_v47  ;;  %v6016_v12 = vpop.f32.mrb[143].mxu1  ;;  %v6283_v58 = vmax.f32 %v10339_v31, 0.0 }
 0x510   : > { %v10342_v13 = vadd.f32 %v6016_v12, %v14022_v25  ;;  %v6284_v30 = vmax.f32 %v10340_v15, 0.0 }
 0x511   : > { %v6287_v4 = vmax.f32 %v10341_v29, 0.0 }
 0x512   : > { %v6288_v9 = vmax.f32 %v10342_v13, 0.0 }
 0x513   : > { %v14407_v50 = vpack.c.bf16 %v6287_v4, %v6283_v58  ;;  %v11793_v58 = vld [vmem:[%s14966_s5 + $0x48] sm:$0xff]  }
 0x514   : > { %v14409_v5 = vpack.c.bf16 %v6288_v9, %v6284_v30  ;;  %v6020_v49 = vpop.f32.mrb[144].mxu1  ;;  %7182 = vmatmul.mubr.bf16.gmra.mrb[240].mxu0 %v13901_v53  ;;  %7921 = vmatpush1.bf16.msra.mxu1 %v11793_v58 }
 0x515   : > { %v10343_v39 = vadd.f32 %v6020_v49, %v14015_v47  ;;  %v6022_v18 = vpop.f32.mrb[145].mxu1  ;;  %7191 = vmatprep.mubr.bf16.mxu0 %v13919_v17  ;;  %7922 = vmatprep.subr.bf16.mxu1 %v15006_v55 }
 0x516   : > { %v10344_v21 = vadd.f32 %v6022_v18, %v14022_v25  ;;  %v6024_v1 = vpop.f32.mrb[146].mxu1 }
 0x517   : > { %v10345_v59 = vadd.f32 %v6024_v1, %v14015_v47  ;;  %v6026_v46 = vpop.f32.mrb[147].mxu1  ;;  %v6291_v2 = vmax.f32 %v10343_v39, 0.0 }
 0x518   : > { %v10346_v31 = vadd.f32 %v6026_v46, %v14022_v25  ;;  %v6292_v15 = vmax.f32 %v10344_v21, 0.0 }
 0x519   : > { %v6295_v11 = vmax.f32 %v10345_v59, 0.0 }
 0x51a   : > { %v6296_v16 = vmax.f32 %v10346_v31, 0.0 }
 0x51b   : > { %v14417_v29 = vpack.c.bf16 %v6295_v11, %v6291_v2 }
 0x51c   : > { %v14419_v53 = vpack.c.bf16 %v6296_v16, %v6292_v15  ;;  %v6030_v12 = vpop.f32.mrb[148].mxu1  ;;  %7192 = vmatmul.mubr.bf16.gmra.mrb[244].mxu0 %v13916_v8 }
 0x51d   : > { %v10347_v17 = vadd.f32 %v6030_v12, %v14015_v47  ;;  %v6032_v13 = vpop.f32.mrb[149].mxu1  ;;  %7201 = vmatprep.mubr.bf16.mxu0 %v13934_v41 }
 0x51e   : > { %v10348_v4 = vadd.f32 %v6032_v13, %v14022_v25  ;;  %v6034_v30 = vpop.f32.mrb[150].mxu1 }
 0x51f   : > { %v10349_v9 = vadd.f32 %v6034_v30, %v14015_v47  ;;  %v6036_v49 = vpop.f32.mrb[151].mxu1  ;;  %v6299_v8 = vmax.f32 %v10347_v17, 0.0 }
 0x520   : > { %v10350_v39 = vadd.f32 %v6036_v49, %v14022_v25  ;;  %v6300_v21 = vmax.f32 %v10348_v4, 0.0 }
 0x521   : > { %v6303_v18 = vmax.f32 %v10349_v9, 0.0 }
 0x522   : > { %v6304_v1 = vmax.f32 %v10350_v39, 0.0 }
 0x523   : > { %v14431_v41 = vpack.c.bf16 %v6303_v18, %v6299_v8  ;;  %v11794_v8 = vld [vmem:[%s14966_s5 + $0x50] sm:$0xff]  }
 0x524   : > { %v14433_v59 = vpack.c.bf16 %v6304_v1, %v6300_v21  ;;  %v6040_v46 = vpop.f32.mrb[152].mxu1  ;;  %7202 = vmatmul.mubr.bf16.gmra.mrb[248].mxu0 %v13931_v40  ;;  %7923 = vmatpush1.bf16.msra.mxu1 %v11794_v8 }
 0x525   : > { %v10351_v31 = vadd.f32 %v6040_v46, %v14015_v47  ;;  %v6042_v2 = vpop.f32.mrb[153].mxu1  ;;  %7211 = vmatprep.mubr.bf16.mxu0 %v13949_v26  ;;  %7924 = vmatprep.subr.bf16.mxu1 %v15006_v55 }
 0x526   : > { %v10352_v11 = vadd.f32 %v6042_v2, %v14022_v25  ;;  %v6044_v15 = vpop.f32.mrb[154].mxu1 }
 0x527   : > { %v10353_v16 = vadd.f32 %v6044_v15, %v14015_v47  ;;  %v6046_v12 = vpop.f32.mrb[155].mxu1  ;;  %v6307_v13 = vmax.f32 %v10351_v31, 0.0 }
 0x528   : > { %v10354_v17 = vadd.f32 %v6046_v12, %v14022_v25  ;;  %v6308_v4 = vmax.f32 %v10352_v11, 0.0 }
 0x529   : > { %v6311_v58 = vmax.f32 %v10353_v16, 0.0 }
 0x52a   : > { %v6312_v30 = vmax.f32 %v10354_v17, 0.0 }
 0x52b   : > { %v14441_v9 = vpack.c.bf16 %v6311_v58, %v6307_v13 }
 0x52c   : > { %v14443_v40 = vpack.c.bf16 %v6312_v30, %v6308_v4  ;;  %v6050_v49 = vpop.f32.mrb[156].mxu1  ;;  %7212 = vmatmul.mubr.bf16.gmra.mrb[252].mxu0 %v13946_v56 }
 0x52d   : > { %v10355_v26 = vadd.f32 %v6050_v49, %v14015_v47  ;;  %v6052_v39 = vpop.f32.mrb[157].mxu1  ;;  %7254 = vmatprep.mubr.bf16.mxu0 %v14055_v60 }
 0x52e   : > { %v10356_v18 = vadd.f32 %v6052_v39, %v14022_v25  ;;  %v6054_v21 = vpop.f32.mrb[158].mxu1 }
 0x52f   : > { %v10357_v1 = vadd.f32 %v6054_v21, %v14015_v47  ;;  %v6056_v46 = vpop.f32.mrb[159].mxu1  ;;  %v6315_v56 = vmax.f32 %v10355_v26, 0.0 }
 0x530   : > { %v10358_v31 = vadd.f32 %v6056_v46, %v14022_v25  ;;  %v6316_v11 = vmax.f32 %v10356_v18, 0.0 }
 0x531   : > { %v6319_v2 = vmax.f32 %v10357_v1, 0.0 }
 0x532   : > { %v6320_v15 = vmax.f32 %v10358_v31, 0.0 }
 0x533   : > { %v14455_v60 = vpack.c.bf16 %v6319_v2, %v6315_v56  ;;  %v11795_v56 = vld [vmem:[%s14966_s5 + $0x58] sm:$0xff]  }
 0x534   : > { %v14457_v16 = vpack.c.bf16 %v6320_v15, %v6316_v11  ;;  %v6060_v12 = vpop.f32.mrb[160].mxu1  ;;  %7255 = vmatmul.mubr.bf16.vlgmr.msra.gmra.mrb[128].mxu0 %v14051_v33  ;;  %7925 = vmatpush1.bf16.msra.mxu1 %v11795_v56 }
 0x535   : > { %v10359_v17 = vadd.f32 %v6060_v12, %v14015_v47  ;;  %v6062_v13 = vpop.f32.mrb[161].mxu1  ;;  %7264 = vmatprep.mubr.bf16.mxu0 %v14079_v0  ;;  %7926 = vmatprep.subr.bf16.mxu1 %v15006_v55 }
 0x536   : > { %v10360_v58 = vadd.f32 %v6062_v13, %v14022_v25  ;;  %v6064_v4 = vpop.f32.mrb[162].mxu1 }
 0x537   : > { %v10361_v30 = vadd.f32 %v6064_v4, %v14015_v47  ;;  %v6066_v49 = vpop.f32.mrb[163].mxu1  ;;  %v6323_v39 = vmax.f32 %v10359_v17, 0.0 }
 0x538   : > { %v10362_v26 = vadd.f32 %v6066_v49, %v14022_v25  ;;  %v6324_v18 = vmax.f32 %v10360_v58, 0.0 }
 0x539   : > { %v6327_v8 = vmax.f32 %v10361_v30, 0.0 }
 0x53a   : > { %v6328_v21 = vmax.f32 %v10362_v26, 0.0 }
 0x53b   : > { %v14465_v1 = vpack.c.bf16 %v6327_v8, %v6323_v39 }
 0x53c   : > { %v14467_v33 = vpack.c.bf16 %v6328_v21, %v6324_v18  ;;  %v6070_v46 = vpop.f32.mrb[164].mxu1  ;;  %7265 = vmatmul.mubr.bf16.gmra.mrb[132].mxu0 %v14076_v54 }
 0x53d   : > { %v10363_v0 = vadd.f32 %v6070_v46, %v14015_v47  ;;  %v6072_v31 = vpop.f32.mrb[165].mxu1  ;;  %7274 = vmatprep.mubr.bf16.mxu0 %v14094_v42 }
 0x53e   : > { %v10364_v2 = vadd.f32 %v6072_v31, %v14022_v25  ;;  %v6074_v11 = vpop.f32.mrb[166].mxu1 }
 0x53f   : > { %v10365_v15 = vadd.f32 %v6074_v11, %v14015_v47  ;;  %v6076_v12 = vpop.f32.mrb[167].mxu1  ;;  %v6331_v54 = vmax.f32 %v10363_v0, 0.0 }
 0x540   : > { %v10366_v17 = vadd.f32 %v6076_v12, %v14022_v25  ;;  %v6332_v58 = vmax.f32 %v10364_v2, 0.0  ;;  %v11799_v12 = vld [vmem:[%s14966_s5 + $0x78] sm:$0xff]  }
 0x541   : > { %v6335_v13 = vmax.f32 %v10365_v15, 0.0 }
 0x542   : > { %v6336_v4 = vmax.f32 %v10366_v17, 0.0  ;;  %v15046_v17 = vld [vmem:[#allocation6_spill] sm:$0xff] }
 0x543   : > { %v14479_v42 = vpack.c.bf16 %v6335_v13, %v6331_v54  ;;  %v15047_v54 = vld [vmem:[#allocation9_spill] sm:$0xff]  ;;  %v15048_v13 = vld [vmem:[#allocation8_spill] sm:$0xff] }
 0x544   : > { %v14481_v30 = vpack.c.bf16 %v6336_v4, %v6332_v58  ;;  %v6080_v49 = vpop.f32.mrb[168].mxu1  ;;  %7275 = vmatmul.mubr.bf16.gmra.mrb[136].mxu0 %v14091_v22  ;;  %v15050_v58 = vld [vmem:[#allocation10_spill] sm:$0xff]  ;;  %v15051_v4 = vld [vmem:[#allocation13_spill] sm:$0xff] }
 0x545   : > { %v10367_v26 = vadd.f32 %v6080_v49, %v14015_v47  ;;  %v6082_v39 = vpop.f32.mrb[169].mxu1  ;;  %7284 = vmatprep.mubr.bf16.mxu0 %v14115_v63  ;;  %v11796_v63 = vld [vmem:[%s14966_s5 + $0x60] sm:$0xff]   ;;  %v15052_v49 = vld [vmem:[#allocation12_spill] sm:$0xff] }
 0x546   : > { %v10368_v8 = vadd.f32 %v6082_v39, %v14022_v25  ;;  %v6084_v18 = vpop.f32.mrb[170].mxu1  ;;  %7927 = vmatpush1.bf16.msra.mxu1 %v11796_v63 }
 0x547   : > { %v10369_v21 = vadd.f32 %v6084_v18, %v14015_v47  ;;  %v6086_v46 = vpop.f32.mrb[171].mxu1  ;;  %v6339_v31 = vmax.f32 %v10367_v26, 0.0  ;;  %7928 = vmatprep.subr.bf16.mxu1 %v15006_v55  ;;  %v11797_v47 = vld [vmem:[%s14966_s5 + $0x68] sm:$0xff]  }
 0x548   : > { %v10370_v0 = vadd.f32 %v6086_v46, %v14022_v25  ;;  %v6340_v2 = vmax.f32 %v10368_v8, 0.0  ;;  %v15039_v25 = vld [vmem:[#allocation5_spill] sm:$0xff]  ;;  %v15053_v26 = vld [vmem:[#allocation14_spill] sm:$0xff] }
 0x549   : > { %v6343_v56 = vmax.f32 %v10369_v21, 0.0 }
 0x54a   : > { %v6344_v11 = vmax.f32 %v10370_v0, 0.0  ;;  %7929 = vmatpush1.bf16.msra.mxu1 %v11797_v47 }
 0x54b   : > { %v14489_v15 = vpack.c.bf16 %v6343_v56, %v6339_v31  ;;  %7930 = vmatprep.subr.bf16.mxu1 %v15006_v55 }
 0x54c   : > { %v14491_v22 = vpack.c.bf16 %v6344_v11, %v6340_v2  ;;  %7285 = vmatmul.mubr.bf16.gmra.mrb[140].mxu0 %v14112_v7  ;;  %v15040_v7 = vld [vmem:[#allocation16_spill] sm:$0xff] }
 0x54d   : > { %7294 = vmatprep.mubr.bf16.mxu0 %v14129_v62  ;;  %v11798_v62 = vld [vmem:[%s14966_s5 + $0x70] sm:$0xff]  }
 0x54e   : > { %7931 = vmatpush1.bf16.msra.mxu1 %v11798_v62 }
 0x54f   : > { %7932 = vmatprep.subr.bf16.mxu1 %v15006_v55  ;;  %v15049_v55 = vld [vmem:[#allocation11_spill] sm:$0xff] }
 0x552   : > { %7933 = vmatpush1.bf16.msra.mxu1 %v11799_v12 }
 0x554   : > { %7295 = vmatmul.mubr.bf16.gmra.mrb[144].mxu0 %v14126_v27  ;;  %v15041_v27 = vld [vmem:[#allocation18_spill] sm:$0xff] }
 0x555   : > { %7304 = vmatprep.mubr.bf16.mxu0 %v14147_v28  ;;  %v15043_v28 = vld [vmem:[#allocation20_spill] sm:$0xff] }
 0x55c   : > { %7305 = vmatmul.mubr.bf16.gmra.mrb[148].mxu0 %v14144_v35  ;;  %v15042_v35 = vld [vmem:[#allocation17_spill] sm:$0xff] }
 0x55d   : > { %7314 = vmatprep.mubr.bf16.mxu0 %v14159_v57  ;;  %v15044_v57 = vld [vmem:[#allocation19_spill] sm:$0xff] }
 0x564   : > { %7315 = vmatmul.mubr.bf16.gmra.mrb[152].mxu0 %v14156_v23  ;;  %v15045_v23 = vld [vmem:[#allocation7_spill] sm:$0xff] }
 0x565   : > { %7324 = vmatprep.mubr.bf16.mxu0 %v15039_v25 }
 0x56c   : > { %7325 = vmatmul.mubr.bf16.gmra.mrb[156].mxu0 %v15040_v7 }
 0x56d   : > { %7334 = vmatprep.mubr.bf16.mxu0 %v15041_v27 }
 0x574   : > { %7335 = vmatmul.mubr.bf16.gmra.mrb[160].mxu0 %v15042_v35 }
 0x575   : > { %7344 = vmatprep.mubr.bf16.mxu0 %v15043_v28 }
 0x57c   : > { %7345 = vmatmul.mubr.bf16.gmra.mrb[164].mxu0 %v15044_v57 }
 0x57d   : > { %7354 = vmatprep.mubr.bf16.mxu0 %v15045_v23 }
 0x584   : > { %7355 = vmatmul.mubr.bf16.gmra.mrb[168].mxu0 %v15046_v17 }
 0x585   : > { %7364 = vmatprep.mubr.bf16.mxu0 %v15047_v54 }
 0x58c   : > { %7365 = vmatmul.mubr.bf16.gmra.mrb[172].mxu0 %v15048_v13 }
 0x58d   : > { %7374 = vmatprep.mubr.bf16.mxu0 %v15049_v55 }
 0x594   : > { %7375 = vmatmul.mubr.bf16.gmra.mrb[176].mxu0 %v15050_v58 }
 0x595   : > { %7384 = vmatprep.mubr.bf16.mxu0 %v15051_v4 }
 0x59c   : > { %7385 = vmatmul.mubr.bf16.gmra.mrb[180].mxu0 %v15052_v49 }
 0x59d   : > { %7394 = vmatprep.mubr.bf16.mxu0 %v14285_v14  ;;  %v6537_v14 = vld [vmem:[%s14965_s4] sm:$0x3] }
 0x5a4   : > { %7395 = vmatmul.mubr.bf16.gmra.mrb[184].mxu0 %v15053_v26 }
 0x5a5   : > { %7404 = vmatprep.mubr.bf16.mxu0 %v14301_v48  ;;  %v15054_v48 = vld [vmem:[#allocation21_spill] sm:$0xff] }
 0x5ac   : > { %7405 = vmatmul.mubr.bf16.gmra.mrb[188].mxu0 %v14298_v38  ;;  %v11800_v38 = vld [vmem:[%s14968_s7] sm:$0xff]  }
 0x5ad   : > { %7414 = vmatprep.mubr.bf16.mxu0 %v14314_v6  ;;  %9989 = vmatprep.subr.bf16.mxu1 %v11800_v38 }
 0x5b4   : > { %7415 = vmatmul.mubr.bf16.gmra.mrb[192].mxu0 %v14312_v61  ;;  %v15055_v61 = vsub.s32 0, %v15054_v48 }
 0x5b5   : > { %7424 = vmatprep.mubr.bf16.mxu0 %v14323_v34 }
 0x5b6   : > { %v14563_v6 = vrot.slane %v6537_v14, %v15055_v61 }
 0x5bc   : > { %7425 = vmatmul.mubr.bf16.gmra.mrb[196].mxu0 %v14321_v36  ;;  %v15056_v36 = vsub.s32 1, %v15054_v48 }
 0x5bd   : > { %7434 = vmatprep.mubr.bf16.mxu0 %v14337_v32 }
 0x5be   : > { %v14568_v34 = vrot.slane %v6537_v14, %v15056_v36 }
 0x5c4   : > { %7435 = vmatmul.mubr.bf16.gmra.mrb[200].mxu0 %v14335_v10 }
 0x5c5   : > { %7444 = vmatprep.mubr.bf16.mxu0 %v14347_v20 }
 0x5cc   : > { %7445 = vmatmul.mubr.bf16.gmra.mrb[204].mxu0 %v14345_v37 }
 0x5cd   : > { %7454 = vmatprep.mubr.bf16.mxu0 %v14361_v24 }
 0x5d4   : > { %7455 = vmatmul.mubr.bf16.gmra.mrb[208].mxu0 %v14359_v43 }
 0x5d5   : > { %7464 = vmatprep.mubr.bf16.mxu0 %v14371_v52 }
 0x5dc   : > { %7465 = vmatmul.mubr.bf16.gmra.mrb[212].mxu0 %v14369_v19 }
 0x5dd   : > { %7474 = vmatprep.mubr.bf16.mxu0 %v14385_v44 }
 0x5e4   : > { %7475 = vmatmul.mubr.bf16.gmra.mrb[216].mxu0 %v14383_v51 }
 0x5e5   : > { %7484 = vmatprep.mubr.bf16.mxu0 %v14395_v45 }
 0x5ec   : > { %7485 = vmatmul.mubr.bf16.gmra.mrb[220].mxu0 %v14393_v3 }
 0x5ed   : > { %7494 = vmatprep.mubr.bf16.mxu0 %v14409_v5 }
 0x5f4   : > { %7495 = vmatmul.mubr.bf16.gmra.mrb[224].mxu0 %v14407_v50 }
 0x5f5   : > { %7504 = vmatprep.mubr.bf16.mxu0 %v14419_v53 }
 0x5fc   : > { %7505 = vmatmul.mubr.bf16.gmra.mrb[228].mxu0 %v14417_v29 }
 0x5fd   : > { %7514 = vmatprep.mubr.bf16.mxu0 %v14433_v59  ;;  %v11801_v59 = vld [vmem:[%s14968_s7 + $0x8] sm:$0xff]  }
 0x604   : > { %7515 = vmatmul.mubr.bf16.gmra.mrb[232].mxu0 %v14431_v41 }
 0x605   : > { %7524 = vmatprep.mubr.bf16.mxu0 %v14443_v40 }
 0x607   : > { %v7256_v10 = vpop.f32.mrb[128].mxu0 }
 0x608   : > { %v10371_v32 = vadd.f32 %v7256_v10, %v14563_v6  ;;  %v7258_v37 = vpop.f32.mrb[129].mxu0 }
 0x609   : > { %v10372_v20 = vadd.f32 %v7258_v37, %v14568_v34  ;;  %v7260_v43 = vpop.f32.mrb[130].mxu0 }
 0x60a   : > { %v10373_v24 = vadd.f32 %v7260_v43, %v14563_v6  ;;  %v7262_v19 = vpop.f32.mrb[131].mxu0  ;;  %v7575_v51 = vmax.f32 %v10371_v32, 0.0 }
 0x60b   : > { %v10374_v52 = vadd.f32 %v7262_v19, %v14568_v34  ;;  %v7576_v3 = vmax.f32 %v10372_v20, 0.0 }
 0x60c   : > { %v7577_v44 = vmax.f32 %v10373_v24, 0.0  ;;  %7525 = vmatmul.mubr.bf16.gmra.mrb[236].mxu0 %v14441_v9 }
 0x60d   : > { %v7578_v45 = vmax.f32 %v10374_v52, 0.0  ;;  %7534 = vmatprep.mubr.bf16.mxu0 %v14457_v16 }
 0x60e   : > { %v7703_v50 = vpack.c.bf16 %v7577_v44, %v7575_v51 }
 0x60f   : > { %v7704_v5 = vpack.c.bf16 %v7578_v45, %v7576_v3  ;;  %v7266_v29 = vpop.f32.mrb[132].mxu0  ;;  %v11802_v45 = vld [vmem:[%s14968_s7 + $0x10] sm:$0xff]  }
 0x610   : > { %v10375_v53 = vadd.f32 %v7266_v29, %v14563_v6  ;;  %v7268_v41 = vpop.f32.mrb[133].mxu0 }
 0x611   : > { %v10376_v40 = vadd.f32 %v7268_v41, %v14568_v34  ;;  %v7270_v39 = vpop.f32.mrb[134].mxu0  ;;  %7934 = vmatprep.mubr.bf16.mxu1 %v7704_v5 }
 0x612   : > { %v10377_v9 = vadd.f32 %v7270_v39, %v14563_v6  ;;  %v7272_v8 = vpop.f32.mrb[135].mxu0  ;;  %7935 = vmatmul.mubr.bf16.vlgmr.msra.gmra.mrb[172].mxu1 %v7703_v50  ;;  %v7579_v18 = vmax.f32 %v10375_v53, 0.0 }
 0x613   : > { %v10378_v16 = vadd.f32 %v7272_v8, %v14568_v34  ;;  %9990 = vmatpush3.bf16.msra.mxu1 %v11800_v38  ;;  %v7580_v46 = vmax.f32 %v10376_v40, 0.0 }
 0x614   : > { %v7581_v21 = vmax.f32 %v10377_v9, 0.0  ;;  %7535 = vmatmul.mubr.bf16.gmra.mrb[240].mxu0 %v14455_v60  ;;  %9991 = vmatprep.subr.bf16.mxu1 %v11801_v59 }
 0x615   : > { %v7582_v0 = vmax.f32 %v10378_v16, 0.0  ;;  %7544 = vmatprep.mubr.bf16.mxu0 %v14467_v33 }
 0x616   : > { %v7705_v31 = vpack.c.bf16 %v7581_v21, %v7579_v18 }
 0x617   : > { %v7706_v56 = vpack.c.bf16 %v7582_v0, %v7580_v46  ;;  %v7276_v2 = vpop.f32.mrb[136].mxu0  ;;  %9992 = vmatpush3.bf16.msra.mxu1 %v11801_v59 }
 0x618   : > { %v10379_v11 = vadd.f32 %v7276_v2, %v14563_v6  ;;  %v7278_v63 = vpop.f32.mrb[137].mxu0  ;;  %9993 = vmatprep.subr.bf16.mxu1 %v11802_v45 }
 0x619   : > { %v10380_v47 = vadd.f32 %v7278_v63, %v14568_v34  ;;  %v7280_v25 = vpop.f32.mrb[138].mxu0  ;;  %7942 = vmatprep.mubr.bf16.mxu1 %v7706_v56 }
 0x61a   : > { %v10381_v7 = vadd.f32 %v7280_v25, %v14563_v6  ;;  %v7282_v27 = vpop.f32.mrb[139].mxu0  ;;  %7943 = vmatmul.mubr.bf16.gmra.mrb[176].mxu1 %v7705_v31  ;;  %v7583_v62 = vmax.f32 %v10379_v11, 0.0 }
 0x61b   : > { %v10382_v60 = vadd.f32 %v7282_v27, %v14568_v34  ;;  %v7584_v33 = vmax.f32 %v10380_v47, 0.0  ;;  %9994 = vmatpush3.bf16.msra.mxu1 %v11802_v45 }
 0x61c   : > { %v7585_v35 = vmax.f32 %v10381_v7, 0.0  ;;  %7545 = vmatmul.mubr.bf16.gmra.mrb[244].mxu0 %v14465_v1 }
 0x61d   : > { %v7586_v28 = vmax.f32 %v10382_v60, 0.0  ;;  %7554 = vmatprep.mubr.bf16.mxu0 %v14481_v30 }
 0x61e   : > { %v7707_v57 = vpack.c.bf16 %v7585_v35, %v7583_v62 }
 0x61f   : > { %v7708_v23 = vpack.c.bf16 %v7586_v28, %v7584_v33  ;;  %v7286_v12 = vpop.f32.mrb[140].mxu0 }
 0x620   : > { %v10383_v17 = vadd.f32 %v7286_v12, %v14563_v6  ;;  %v7288_v54 = vpop.f32.mrb[141].mxu0 }
 0x621   : > { %v10384_v13 = vadd.f32 %v7288_v54, %v14568_v34  ;;  %v7290_v55 = vpop.f32.mrb[142].mxu0  ;;  %7950 = vmatprep.mubr.bf16.mxu1 %v7708_v23 }
 0x622   : > { %v10385_v58 = vadd.f32 %v7290_v55, %v14563_v6  ;;  %v7292_v4 = vpop.f32.mrb[143].mxu0  ;;  %7951 = vmatmul.mubr.bf16.gmra.mrb[180].mxu1 %v7707_v57  ;;  %v7587_v49 = vmax.f32 %v10383_v17, 0.0 }
 0x623   : > { %v10386_v1 = vadd.f32 %v7292_v4, %v14568_v34  ;;  %v7588_v30 = vmax.f32 %v10384_v13, 0.0 }
 0x624   : > { %v7589_v26 = vmax.f32 %v10385_v58, 0.0  ;;  %7555 = vmatmul.mubr.bf16.gmra.mrb[248].mxu0 %v14479_v42 }
 0x625   : > { %v7590_v38 = vmax.f32 %v10386_v1, 0.0  ;;  %7564 = vmatprep.mubr.bf16.mxu0 %v14491_v22 }
 0x626   : > { %v7709_v14 = vpack.c.bf16 %v7589_v26, %v7587_v49 }
 0x627   : > { %v7710_v48 = vpack.c.bf16 %v7590_v38, %v7588_v30  ;;  %v7296_v61 = vpop.f32.mrb[144].mxu0 }
 0x628   : > { %v10387_v36 = vadd.f32 %v7296_v61, %v14563_v6  ;;  %v7298_v10 = vpop.f32.mrb[145].mxu0 }
 0x629   : > { %v10388_v32 = vadd.f32 %v7298_v10, %v14568_v34  ;;  %v7300_v37 = vpop.f32.mrb[146].mxu0  ;;  %7958 = vmatprep.mubr.bf16.mxu1 %v7710_v48 }
 0x62a   : > { %v10389_v20 = vadd.f32 %v7300_v37, %v14563_v6  ;;  %v7302_v43 = vpop.f32.mrb[147].mxu0  ;;  %7959 = vmatmul.mubr.bf16.gmra.mrb[184].mxu1 %v7709_v14  ;;  %v7591_v24 = vmax.f32 %v10387_v36, 0.0 }
 0x62b   : > { %v10390_v42 = vadd.f32 %v7302_v43, %v14568_v34  ;;  %v7592_v22 = vmax.f32 %v10388_v32, 0.0 }
 0x62c   : > { %v7593_v19 = vmax.f32 %v10389_v20, 0.0  ;;  %7565 = vmatmul.mubr.bf16.gmra.mrb[252].mxu0 %v14489_v15 }
 0x62d   : > { %v7594_v52 = vmax.f32 %v10390_v42, 0.0 }
 0x62e   : > { %v7711_v51 = vpack.c.bf16 %v7593_v19, %v7591_v24 }
 0x62f   : > { %v7712_v44 = vpack.c.bf16 %v7594_v52, %v7592_v22  ;;  %v7306_v3 = vpop.f32.mrb[148].mxu0  ;;  %v11803_v22 = vld [vmem:[%s14968_s7 + $0x18] sm:$0xff]  }
 0x630   : > { %v10391_v50 = vadd.f32 %v7306_v3, %v14563_v6  ;;  %v7308_v5 = vpop.f32.mrb[149].mxu0  ;;  %9995 = vmatprep.subr.bf16.mxu1 %v11803_v22 }
 0x631   : > { %v10392_v29 = vadd.f32 %v7308_v5, %v14568_v34  ;;  %v7310_v53 = vpop.f32.mrb[150].mxu0  ;;  %7966 = vmatprep.mubr.bf16.mxu1 %v7712_v44  ;;  %9996 = vmatpush3.bf16.msra.mxu1 %v11803_v22 }
 0x632   : > { %v10393_v41 = vadd.f32 %v7310_v53, %v14563_v6  ;;  %v7312_v15 = vpop.f32.mrb[151].mxu0  ;;  %7967 = vmatmul.mubr.bf16.gmra.mrb[188].mxu1 %v7711_v51  ;;  %v7595_v40 = vmax.f32 %v10391_v50, 0.0 }
 0x633   : > { %v10394_v59 = vadd.f32 %v7312_v15, %v14568_v34  ;;  %v7596_v9 = vmax.f32 %v10392_v29, 0.0 }
 0x634   : > { %v7597_v39 = vmax.f32 %v10393_v41, 0.0 }
 0x635   : > { %v7598_v8 = vmax.f32 %v10394_v59, 0.0 }
 0x636   : > { %v7713_v16 = vpack.c.bf16 %v7597_v39, %v7595_v40 }
 0x637   : > { %v7714_v18 = vpack.c.bf16 %v7598_v8, %v7596_v9  ;;  %v7316_v21 = vpop.f32.mrb[152].mxu0 }
 0x638   : > { %v10395_v46 = vadd.f32 %v7316_v21, %v14563_v6  ;;  %v7318_v0 = vpop.f32.mrb[153].mxu0 }
 0x639   : > { %v10396_v31 = vadd.f32 %v7318_v0, %v14568_v34  ;;  %v7320_v56 = vpop.f32.mrb[154].mxu0  ;;  %7974 = vmatprep.mubr.bf16.mxu1 %v7714_v18 }
 0x63a   : > { %v10397_v2 = vadd.f32 %v7320_v56, %v14563_v6  ;;  %v7322_v11 = vpop.f32.mrb[155].mxu0  ;;  %7975 = vmatmul.mubr.bf16.gmra.mrb[192].mxu1 %v7713_v16  ;;  %v7599_v47 = vmax.f32 %v10395_v46, 0.0 }
 0x63b   : > { %v10398_v63 = vadd.f32 %v7322_v11, %v14568_v34  ;;  %v7600_v7 = vmax.f32 %v10396_v31, 0.0 }
 0x63c   : > { %v7601_v25 = vmax.f32 %v10397_v2, 0.0 }
 0x63d   : > { %v7602_v27 = vmax.f32 %v10398_v63, 0.0 }
 0x63e   : > { %v7715_v60 = vpack.c.bf16 %v7601_v25, %v7599_v47 }
 0x63f   : > { %v7716_v62 = vpack.c.bf16 %v7602_v27, %v7600_v7  ;;  %v7326_v35 = vpop.f32.mrb[156].mxu0 }
 0x640   : > { %v10399_v33 = vadd.f32 %v7326_v35, %v14563_v6  ;;  %v7328_v28 = vpop.f32.mrb[157].mxu0 }
 0x641   : > { %v10400_v57 = vadd.f32 %v7328_v28, %v14568_v34  ;;  %v7330_v23 = vpop.f32.mrb[158].mxu0  ;;  %7982 = vmatprep.mubr.bf16.mxu1 %v7716_v62 }
 0x642   : > { %v10401_v12 = vadd.f32 %v7330_v23, %v14563_v6  ;;  %v7332_v17 = vpop.f32.mrb[159].mxu0  ;;  %7983 = vmatmul.mubr.bf16.gmra.mrb[196].mxu1 %v7715_v60  ;;  %v7603_v13 = vmax.f32 %v10399_v33, 0.0 }
 0x643   : > { %v10402_v54 = vadd.f32 %v7332_v17, %v14568_v34  ;;  %v7604_v58 = vmax.f32 %v10400_v57, 0.0 }
 0x644   : > { %v7605_v55 = vmax.f32 %v10401_v12, 0.0 }
 0x645   : > { %v7606_v4 = vmax.f32 %v10402_v54, 0.0 }
 0x646   : > { %v7717_v1 = vpack.c.bf16 %v7605_v55, %v7603_v13 }
 0x647   : > { %v7718_v49 = vpack.c.bf16 %v7606_v4, %v7604_v58  ;;  %v7336_v26 = vpop.f32.mrb[160].mxu0 }
 0x648   : > { %v10403_v30 = vadd.f32 %v7336_v26, %v14563_v6  ;;  %v7338_v38 = vpop.f32.mrb[161].mxu0 }
 0x649   : > { %v10404_v14 = vadd.f32 %v7338_v38, %v14568_v34  ;;  %v7340_v48 = vpop.f32.mrb[162].mxu0  ;;  %7990 = vmatprep.mubr.bf16.mxu1 %v7718_v49 }
 0x64a   : > { %v10405_v61 = vadd.f32 %v7340_v48, %v14563_v6  ;;  %v7342_v36 = vpop.f32.mrb[163].mxu0  ;;  %7991 = vmatmul.mubr.bf16.gmra.mrb[200].mxu1 %v7717_v1  ;;  %v7607_v32 = vmax.f32 %v10403_v30, 0.0 }
 0x64b   : > { %v10406_v10 = vadd.f32 %v7342_v36, %v14568_v34  ;;  %v7608_v20 = vmax.f32 %v10404_v14, 0.0 }
 0x64c   : > { %v7609_v37 = vmax.f32 %v10405_v61, 0.0 }
 0x64d   : > { %v7610_v43 = vmax.f32 %v10406_v10, 0.0 }
 0x64e   : > { %v7719_v42 = vpack.c.bf16 %v7609_v37, %v7607_v32 }
 0x64f   : > { %v7720_v24 = vpack.c.bf16 %v7610_v43, %v7608_v20  ;;  %v7346_v19 = vpop.f32.mrb[164].mxu0 }
 0x650   : > { %v10407_v52 = vadd.f32 %v7346_v19, %v14563_v6  ;;  %v7348_v51 = vpop.f32.mrb[165].mxu0 }
 0x651   : > { %v10408_v44 = vadd.f32 %v7348_v51, %v14568_v34  ;;  %v7350_v3 = vpop.f32.mrb[166].mxu0  ;;  %7998 = vmatprep.mubr.bf16.mxu1 %v7720_v24 }
 0x652   : > { %v10409_v45 = vadd.f32 %v7350_v3, %v14563_v6  ;;  %v7352_v50 = vpop.f32.mrb[167].mxu0  ;;  %7999 = vmatmul.mubr.bf16.gmra.mrb[204].mxu1 %v7719_v42  ;;  %v7611_v29 = vmax.f32 %v10407_v52, 0.0  ;;  %v11804_v42 = vld [vmem:[%s14968_s7 + $0x20] sm:$0xff]  }
 0x653   : > { %v10410_v5 = vadd.f32 %v7352_v50, %v14568_v34  ;;  %v7612_v41 = vmax.f32 %v10408_v44, 0.0  ;;  %9997 = vmatprep.subr.bf16.mxu1 %v11804_v42 }
 0x654   : > { %v7613_v53 = vmax.f32 %v10409_v45, 0.0  ;;  %9998 = vmatpush3.bf16.msra.mxu1 %v11804_v42 }
 0x655   : > { %v7614_v15 = vmax.f32 %v10410_v5, 0.0 }
 0x656   : > { %v7721_v59 = vpack.c.bf16 %v7613_v53, %v7611_v29 }
 0x657   : > { %v7722_v40 = vpack.c.bf16 %v7614_v15, %v7612_v41  ;;  %v7356_v39 = vpop.f32.mrb[168].mxu0 }
 0x658   : > { %v10411_v9 = vadd.f32 %v7356_v39, %v14563_v6  ;;  %v7358_v8 = vpop.f32.mrb[169].mxu0 }
 0x659   : > { %v10412_v16 = vadd.f32 %v7358_v8, %v14568_v34  ;;  %v7360_v18 = vpop.f32.mrb[170].mxu0  ;;  %8006 = vmatprep.mubr.bf16.mxu1 %v7722_v40 }
 0x65a   : > { %v10413_v21 = vadd.f32 %v7360_v18, %v14563_v6  ;;  %v7362_v46 = vpop.f32.mrb[171].mxu0  ;;  %8007 = vmatmul.mubr.bf16.gmra.mrb[208].mxu1 %v7721_v59  ;;  %v7615_v31 = vmax.f32 %v10411_v9, 0.0 }
 0x65b   : > { %v10414_v0 = vadd.f32 %v7362_v46, %v14568_v34  ;;  %v7616_v2 = vmax.f32 %v10412_v16, 0.0 }
 0x65c   : > { %v7617_v56 = vmax.f32 %v10413_v21, 0.0 }
 0x65d   : > { %v7618_v11 = vmax.f32 %v10414_v0, 0.0 }
 0x65e   : > { %v7723_v63 = vpack.c.bf16 %v7617_v56, %v7615_v31 }
 0x65f   : > { %v7724_v47 = vpack.c.bf16 %v7618_v11, %v7616_v2  ;;  %v7366_v25 = vpop.f32.mrb[172].mxu0 }
 0x660   : > { %v10415_v7 = vadd.f32 %v7366_v25, %v14563_v6  ;;  %v7368_v27 = vpop.f32.mrb[173].mxu0 }
 0x661   : > { %v10416_v60 = vadd.f32 %v7368_v27, %v14568_v34  ;;  %v7370_v62 = vpop.f32.mrb[174].mxu0  ;;  %8014 = vmatprep.mubr.bf16.mxu1 %v7724_v47 }
 0x662   : > { %v10417_v35 = vadd.f32 %v7370_v62, %v14563_v6  ;;  %v7372_v33 = vpop.f32.mrb[175].mxu0  ;;  %8015 = vmatmul.mubr.bf16.gmra.mrb[212].mxu1 %v7723_v63  ;;  %v7619_v57 = vmax.f32 %v10415_v7, 0.0 }
 0x663   : > { %v10418_v28 = vadd.f32 %v7372_v33, %v14568_v34  ;;  %v7620_v12 = vmax.f32 %v10416_v60, 0.0 }
 0x664   : > { %v7621_v23 = vmax.f32 %v10417_v35, 0.0  ;;  %v11805_v35 = vld [vmem:[%s14968_s7 + $0x28] sm:$0xff]  }
 0x665   : > { %v7622_v17 = vmax.f32 %v10418_v28, 0.0  ;;  %9999 = vmatprep.subr.bf16.mxu1 %v11805_v35 }
 0x666   : > { %v7725_v54 = vpack.c.bf16 %v7621_v23, %v7619_v57  ;;  %10000 = vmatpush3.bf16.msra.mxu1 %v11805_v35 }
 0x667   : > { %v7726_v13 = vpack.c.bf16 %v7622_v17, %v7620_v12  ;;  %v7376_v55 = vpop.f32.mrb[176].mxu0 }
 0x668   : > { %v10419_v58 = vadd.f32 %v7376_v55, %v14563_v6  ;;  %v7378_v4 = vpop.f32.mrb[177].mxu0 }
 0x669   : > { %v10420_v1 = vadd.f32 %v7378_v4, %v14568_v34  ;;  %v7380_v49 = vpop.f32.mrb[178].mxu0  ;;  %8022 = vmatprep.mubr.bf16.mxu1 %v7726_v13  ;;  %v11806_v13 = vld [vmem:[%s14968_s7 + $0x30] sm:$0xff]  }
 0x66a   : > { %v10421_v26 = vadd.f32 %v7380_v49, %v14563_v6  ;;  %v7382_v30 = vpop.f32.mrb[179].mxu0  ;;  %8023 = vmatmul.mubr.bf16.gmra.mrb[216].mxu1 %v7725_v54  ;;  %v7623_v14 = vmax.f32 %v10419_v58, 0.0  ;;  %10001 = vmatprep.subr.bf16.mxu1 %v11806_v13 }
 0x66b   : > { %v10422_v38 = vadd.f32 %v7382_v30, %v14568_v34  ;;  %v7624_v61 = vmax.f32 %v10420_v1, 0.0  ;;  %10002 = vmatpush3.bf16.msra.mxu1 %v11806_v13 }
 0x66c   : > { %v7625_v48 = vmax.f32 %v10421_v26, 0.0 }
 0x66d   : > { %v7626_v36 = vmax.f32 %v10422_v38, 0.0  ;;  %v11807_v38 = vld [vmem:[%s14968_s7 + $0x38] sm:$0xff]  }
 0x66e   : > { %v7727_v10 = vpack.c.bf16 %v7625_v48, %v7623_v14  ;;  %10003 = vmatprep.subr.bf16.mxu1 %v11807_v38 }
 0x66f   : > { %v7728_v32 = vpack.c.bf16 %v7626_v36, %v7624_v61  ;;  %v7386_v37 = vpop.f32.mrb[180].mxu0  ;;  %10004 = vmatpush3.bf16.msra.mxu1 %v11807_v38 }
 0x670   : > { %v10423_v20 = vadd.f32 %v7386_v37, %v14563_v6  ;;  %v7388_v43 = vpop.f32.mrb[181].mxu0 }
 0x671   : > { %v10424_v24 = vadd.f32 %v7388_v43, %v14568_v34  ;;  %v7390_v19 = vpop.f32.mrb[182].mxu0  ;;  %8030 = vmatprep.mubr.bf16.mxu1 %v7728_v32 }
 0x672   : > { %v10425_v22 = vadd.f32 %v7390_v19, %v14563_v6  ;;  %v7392_v52 = vpop.f32.mrb[183].mxu0  ;;  %8031 = vmatmul.mubr.bf16.gmra.mrb[220].mxu1 %v7727_v10  ;;  %v7627_v44 = vmax.f32 %v10423_v20, 0.0 }
 0x673   : > { %v10426_v51 = vadd.f32 %v7392_v52, %v14568_v34  ;;  %v7628_v45 = vmax.f32 %v10424_v24, 0.0 }
 0x674   : > { %v7629_v3 = vmax.f32 %v10425_v22, 0.0 }
 0x675   : > { %v7630_v50 = vmax.f32 %v10426_v51, 0.0 }
 0x676   : > { %v7729_v5 = vpack.c.bf16 %v7629_v3, %v7627_v44 }
 0x677   : > { %v7730_v29 = vpack.c.bf16 %v7630_v50, %v7628_v45  ;;  %v7396_v53 = vpop.f32.mrb[184].mxu0 }
 0x678   : > { %v10427_v41 = vadd.f32 %v7396_v53, %v14563_v6  ;;  %v7398_v15 = vpop.f32.mrb[185].mxu0 }
 0x679   : > { %v10428_v59 = vadd.f32 %v7398_v15, %v14568_v34  ;;  %v7400_v40 = vpop.f32.mrb[186].mxu0  ;;  %8038 = vmatprep.mubr.bf16.mxu1 %v7730_v29 }
 0x67a   : > { %v10429_v39 = vadd.f32 %v7400_v40, %v14563_v6  ;;  %v7402_v9 = vpop.f32.mrb[187].mxu0  ;;  %8039 = vmatmul.mubr.bf16.gmra.mrb[224].mxu1 %v7729_v5  ;;  %v7631_v16 = vmax.f32 %v10427_v41, 0.0 }
 0x67b   : > { %v10430_v8 = vadd.f32 %v7402_v9, %v14568_v34  ;;  %v7632_v21 = vmax.f32 %v10428_v59, 0.0 }
 0x67c   : > { %v7633_v18 = vmax.f32 %v10429_v39, 0.0 }
 0x67d   : > { %v7634_v46 = vmax.f32 %v10430_v8, 0.0 }
 0x67e   : > { %v7731_v0 = vpack.c.bf16 %v7633_v18, %v7631_v16 }
 0x67f   : > { %v7732_v31 = vpack.c.bf16 %v7634_v46, %v7632_v21  ;;  %v7406_v56 = vpop.f32.mrb[188].mxu0 }
 0x680   : > { %v10431_v2 = vadd.f32 %v7406_v56, %v14563_v6  ;;  %v7408_v11 = vpop.f32.mrb[189].mxu0 }
 0x681   : > { %v10432_v63 = vadd.f32 %v7408_v11, %v14568_v34  ;;  %v7410_v47 = vpop.f32.mrb[190].mxu0  ;;  %8046 = vmatprep.mubr.bf16.mxu1 %v7732_v31 }
 0x682   : > { %v10433_v25 = vadd.f32 %v7410_v47, %v14563_v6  ;;  %v7412_v7 = vpop.f32.mrb[191].mxu0  ;;  %8047 = vmatmul.mubr.bf16.gmra.mrb[228].mxu1 %v7731_v0  ;;  %v7635_v60 = vmax.f32 %v10431_v2, 0.0 }
 0x683   : > { %v10434_v27 = vadd.f32 %v7412_v7, %v14568_v34  ;;  %v7636_v33 = vmax.f32 %v10432_v63, 0.0 }
 0x684   : > { %v7637_v62 = vmax.f32 %v10433_v25, 0.0 }
 0x685   : > { %v7638_v28 = vmax.f32 %v10434_v27, 0.0 }
 0x686   : > { %v7733_v57 = vpack.c.bf16 %v7637_v62, %v7635_v60 }
 0x687   : > { %v7734_v23 = vpack.c.bf16 %v7638_v28, %v7636_v33  ;;  %v7416_v12 = vpop.f32.mrb[192].mxu0 }
 0x688   : > { %v10435_v17 = vadd.f32 %v7416_v12, %v14563_v6  ;;  %v7418_v54 = vpop.f32.mrb[193].mxu0 }
 0x689   : > { %v10436_v55 = vadd.f32 %v7418_v54, %v14568_v34  ;;  %v7420_v58 = vpop.f32.mrb[194].mxu0  ;;  %8054 = vmatprep.mubr.bf16.mxu1 %v7734_v23 }
 0x68a   : > { %v10437_v4 = vadd.f32 %v7420_v58, %v14563_v6  ;;  %v7422_v1 = vpop.f32.mrb[195].mxu0  ;;  %8055 = vmatmul.mubr.bf16.gmra.mrb[232].mxu1 %v7733_v57  ;;  %v7639_v26 = vmax.f32 %v10435_v17, 0.0 }
 0x68b   : > { %v10438_v49 = vadd.f32 %v7422_v1, %v14568_v34  ;;  %v7640_v14 = vmax.f32 %v10436_v55, 0.0 }
 0x68c   : > { %v7641_v30 = vmax.f32 %v10437_v4, 0.0 }
 0x68d   : > { %v7642_v48 = vmax.f32 %v10438_v49, 0.0 }
 0x68e   : > { %v7735_v61 = vpack.c.bf16 %v7641_v30, %v7639_v26 }
 0x68f   : > { %v7736_v36 = vpack.c.bf16 %v7642_v48, %v7640_v14  ;;  %v7426_v10 = vpop.f32.mrb[196].mxu0 }
 0x690   : > { %v10439_v32 = vadd.f32 %v7426_v10, %v14563_v6  ;;  %v7428_v37 = vpop.f32.mrb[197].mxu0 }
 0x691   : > { %v10440_v20 = vadd.f32 %v7428_v37, %v14568_v34  ;;  %v7430_v43 = vpop.f32.mrb[198].mxu0  ;;  %8062 = vmatprep.mubr.bf16.mxu1 %v7736_v36 }
 0x692   : > { %v10441_v42 = vadd.f32 %v7430_v43, %v14563_v6  ;;  %v7432_v24 = vpop.f32.mrb[199].mxu0  ;;  %8063 = vmatmul.mubr.bf16.gmra.mrb[236].mxu1 %v7735_v61  ;;  %v7643_v22 = vmax.f32 %v10439_v32, 0.0 }
 0x693   : > { %v10442_v19 = vadd.f32 %v7432_v24, %v14568_v34  ;;  %v7644_v51 = vmax.f32 %v10440_v20, 0.0 }
 0x694   : > { %v7645_v52 = vmax.f32 %v10441_v42, 0.0 }
 0x695   : > { %v7646_v44 = vmax.f32 %v10442_v19, 0.0 }
 0x696   : > { %v7737_v3 = vpack.c.bf16 %v7645_v52, %v7643_v22 }
 0x697   : > { %v7738_v45 = vpack.c.bf16 %v7646_v44, %v7644_v51  ;;  %v7436_v50 = vpop.f32.mrb[200].mxu0 }
 0x698   : > { %v10443_v5 = vadd.f32 %v7436_v50, %v14563_v6  ;;  %v7438_v29 = vpop.f32.mrb[201].mxu0 }
 0x699   : > { %v10444_v53 = vadd.f32 %v7438_v29, %v14568_v34  ;;  %v7440_v41 = vpop.f32.mrb[202].mxu0  ;;  %8070 = vmatprep.mubr.bf16.mxu1 %v7738_v45 }
 0x69a   : > { %v10445_v15 = vadd.f32 %v7440_v41, %v14563_v6  ;;  %v7442_v59 = vpop.f32.mrb[203].mxu0  ;;  %8071 = vmatmul.mubr.bf16.gmra.mrb[240].mxu1 %v7737_v3  ;;  %v7647_v39 = vmax.f32 %v10443_v5, 0.0 }
 0x69b   : > { %v10446_v40 = vadd.f32 %v7442_v59, %v14568_v34  ;;  %v7648_v8 = vmax.f32 %v10444_v53, 0.0 }
 0x69c   : > { %v7649_v9 = vmax.f32 %v10445_v15, 0.0 }
 0x69d   : > { %v7650_v16 = vmax.f32 %v10446_v40, 0.0 }
 0x69e   : > { %v7739_v18 = vpack.c.bf16 %v7649_v9, %v7647_v39 }
 0x69f   : > { %v7740_v21 = vpack.c.bf16 %v7650_v16, %v7648_v8  ;;  %v7446_v46 = vpop.f32.mrb[204].mxu0 }
 0x6a0   : > { %v10447_v0 = vadd.f32 %v7446_v46, %v14563_v6  ;;  %v7448_v31 = vpop.f32.mrb[205].mxu0 }
 0x6a1   : > { %v10448_v56 = vadd.f32 %v7448_v31, %v14568_v34  ;;  %v7450_v2 = vpop.f32.mrb[206].mxu0  ;;  %8078 = vmatprep.mubr.bf16.mxu1 %v7740_v21 }
 0x6a2   : > { %v10449_v11 = vadd.f32 %v7450_v2, %v14563_v6  ;;  %v7452_v63 = vpop.f32.mrb[207].mxu0  ;;  %8079 = vmatmul.mubr.bf16.gmra.mrb[244].mxu1 %v7739_v18  ;;  %v7651_v25 = vmax.f32 %v10447_v0, 0.0 }
 0x6a3   : > { %v10450_v47 = vadd.f32 %v7452_v63, %v14568_v34  ;;  %v7652_v27 = vmax.f32 %v10448_v56, 0.0 }
 0x6a4   : > { %v7653_v7 = vmax.f32 %v10449_v11, 0.0 }
 0x6a5   : > { %v7654_v60 = vmax.f32 %v10450_v47, 0.0 }
 0x6a6   : > { %v7741_v62 = vpack.c.bf16 %v7653_v7, %v7651_v25 }
 0x6a7   : > { %v7742_v35 = vpack.c.bf16 %v7654_v60, %v7652_v27  ;;  %v7456_v33 = vpop.f32.mrb[208].mxu0 }
 0x6a8   : > { %v10451_v28 = vadd.f32 %v7456_v33, %v14563_v6  ;;  %v7458_v57 = vpop.f32.mrb[209].mxu0 }
 0x6a9   : > { %v10452_v23 = vadd.f32 %v7458_v57, %v14568_v34  ;;  %v7460_v12 = vpop.f32.mrb[210].mxu0  ;;  %8086 = vmatprep.mubr.bf16.mxu1 %v7742_v35 }
 0x6aa   : > { %v10453_v17 = vadd.f32 %v7460_v12, %v14563_v6  ;;  %v7462_v54 = vpop.f32.mrb[211].mxu0  ;;  %8087 = vmatmul.mubr.bf16.gmra.mrb[248].mxu1 %v7741_v62  ;;  %v7655_v55 = vmax.f32 %v10451_v28, 0.0 }
 0x6ab   : > { %v10454_v13 = vadd.f32 %v7462_v54, %v14568_v34  ;;  %v7656_v4 = vmax.f32 %v10452_v23, 0.0 }
 0x6ac   : > { %v7657_v58 = vmax.f32 %v10453_v17, 0.0 }
 0x6ad   : > { %v7658_v1 = vmax.f32 %v10454_v13, 0.0 }
 0x6ae   : > { %v7743_v49 = vpack.c.bf16 %v7657_v58, %v7655_v55 }
 0x6af   : > { %v7744_v26 = vpack.c.bf16 %v7658_v1, %v7656_v4  ;;  %v7466_v30 = vpop.f32.mrb[212].mxu0 }
 0x6b0   : > { %v10455_v38 = vadd.f32 %v7466_v30, %v14563_v6  ;;  %v7468_v14 = vpop.f32.mrb[213].mxu0 }
 0x6b1   : > { %v10456_v48 = vadd.f32 %v7468_v14, %v14568_v34  ;;  %v7470_v61 = vpop.f32.mrb[214].mxu0  ;;  %8094 = vmatprep.mubr.bf16.mxu1 %v7744_v26 }
 0x6b2   : > { %v10457_v36 = vadd.f32 %v7470_v61, %v14563_v6  ;;  %v7472_v10 = vpop.f32.mrb[215].mxu0  ;;  %8095 = vmatmul.mubr.bf16.gmra.mrb[252].mxu1 %v7743_v49  ;;  %v7659_v37 = vmax.f32 %v10455_v38, 0.0 }
 0x6b3   : > { %v10458_v32 = vadd.f32 %v7472_v10, %v14568_v34  ;;  %v7660_v43 = vmax.f32 %v10456_v48, 0.0 }
 0x6b4   : > { %v7661_v20 = vmax.f32 %v10457_v36, 0.0 }
 0x6b5   : > { %v7662_v42 = vmax.f32 %v10458_v32, 0.0 }
 0x6b6   : > { %v7745_v24 = vpack.c.bf16 %v7661_v20, %v7659_v37 }
 0x6b7   : > { %v7746_v19 = vpack.c.bf16 %v7662_v42, %v7660_v43  ;;  %v7476_v22 = vpop.f32.mrb[216].mxu0 }
 0x6b8   : > { %v10459_v52 = vadd.f32 %v7476_v22, %v14563_v6  ;;  %v7478_v51 = vpop.f32.mrb[217].mxu0 }
 0x6b9   : > { %v10460_v44 = vadd.f32 %v7478_v51, %v14568_v34  ;;  %v7480_v3 = vpop.f32.mrb[218].mxu0  ;;  %8102 = vmatprep.mubr.bf16.mxu1 %v7746_v19 }
 0x6ba   : > { %v10461_v45 = vadd.f32 %v7480_v3, %v14563_v6  ;;  %v7482_v50 = vpop.f32.mrb[219].mxu0  ;;  %8103 = vmatmul.mubr.bf16.gmra.mrb[0].mxu1 %v7745_v24  ;;  %v7663_v29 = vmax.f32 %v10459_v52, 0.0 }
 0x6bb   : > { %v10462_v5 = vadd.f32 %v7482_v50, %v14568_v34  ;;  %v7664_v41 = vmax.f32 %v10460_v44, 0.0 }
 0x6bc   : > { %v7665_v53 = vmax.f32 %v10461_v45, 0.0 }
 0x6bd   : > { %v7666_v15 = vmax.f32 %v10462_v5, 0.0 }
 0x6be   : > { %v7747_v59 = vpack.c.bf16 %v7665_v53, %v7663_v29 }
 0x6bf   : > { %v7748_v40 = vpack.c.bf16 %v7666_v15, %v7664_v41  ;;  %v7486_v39 = vpop.f32.mrb[220].mxu0 }
 0x6c0   : > { %v10463_v9 = vadd.f32 %v7486_v39, %v14563_v6  ;;  %v7488_v8 = vpop.f32.mrb[221].mxu0 }
 0x6c1   : > { %v10464_v16 = vadd.f32 %v7488_v8, %v14568_v34  ;;  %v7490_v18 = vpop.f32.mrb[222].mxu0  ;;  %8110 = vmatprep.mubr.bf16.mxu1 %v7748_v40  ;;  %v14715_v8 = vld [vmem:[%s14967_s6] ss:$0 sm:$0xff] }
 0x6c2   : > { %v10465_v21 = vadd.f32 %v7490_v18, %v14563_v6  ;;  %v7492_v46 = vpop.f32.mrb[223].mxu0  ;;  %8111 = vmatmul.mubr.bf16.gmra.mrb[4].mxu1 %v7747_v59  ;;  %v7667_v31 = vmax.f32 %v10463_v9, 0.0 }
 0x6c3   : > { %v10466_v0 = vadd.f32 %v7492_v46, %v14568_v34  ;;  %v7668_v2 = vmax.f32 %v10464_v16, 0.0 }
 0x6c4   : > { %v7669_v56 = vmax.f32 %v10465_v21, 0.0 }
 0x6c5   : > { %v7670_v11 = vmax.f32 %v10466_v0, 0.0 }
 0x6c6   : > { %v7749_v63 = vpack.c.bf16 %v7669_v56, %v7667_v31 }
 0x6c7   : > { %v7750_v47 = vpack.c.bf16 %v7670_v11, %v7668_v2  ;;  %v7496_v25 = vpop.f32.mrb[224].mxu0 }
 0x6c8   : > { %v10467_v7 = vadd.f32 %v7496_v25, %v14563_v6  ;;  %v7498_v27 = vpop.f32.mrb[225].mxu0 }
 0x6c9   : > { %v10468_v60 = vadd.f32 %v7498_v27, %v14568_v34  ;;  %v7500_v62 = vpop.f32.mrb[226].mxu0  ;;  %8118 = vmatprep.mubr.bf16.mxu1 %v7750_v47 }
 0x6ca   : > { %v10469_v35 = vadd.f32 %v7500_v62, %v14563_v6  ;;  %v7502_v33 = vpop.f32.mrb[227].mxu0  ;;  %8119 = vmatmul.mubr.bf16.gmra.mrb[8].mxu1 %v7749_v63  ;;  %v7671_v57 = vmax.f32 %v10467_v7, 0.0 }
 0x6cb   : > { %v10470_v28 = vadd.f32 %v7502_v33, %v14568_v34  ;;  %v7672_v12 = vmax.f32 %v10468_v60, 0.0 }
 0x6cc   : > { %v7673_v23 = vmax.f32 %v10469_v35, 0.0 }
 0x6cd   : > { %v7674_v17 = vmax.f32 %v10470_v28, 0.0 }
 0x6ce   : > { %v7751_v54 = vpack.c.bf16 %v7673_v23, %v7671_v57 }
 0x6cf   : > { %v7752_v13 = vpack.c.bf16 %v7674_v17, %v7672_v12  ;;  %v7506_v55 = vpop.f32.mrb[228].mxu0 }
 0x6d0   : > { %v10471_v58 = vadd.f32 %v7506_v55, %v14563_v6  ;;  %v7508_v4 = vpop.f32.mrb[229].mxu0 }
 0x6d1   : > { %v10472_v1 = vadd.f32 %v7508_v4, %v14568_v34  ;;  %v7510_v49 = vpop.f32.mrb[230].mxu0  ;;  %8126 = vmatprep.mubr.bf16.mxu1 %v7752_v13 }
 0x6d2   : > { %v10473_v26 = vadd.f32 %v7510_v49, %v14563_v6  ;;  %v7512_v30 = vpop.f32.mrb[231].mxu0  ;;  %8127 = vmatmul.mubr.bf16.gmra.mrb[12].mxu1 %v7751_v54  ;;  %v7675_v14 = vmax.f32 %v10471_v58, 0.0 }
 0x6d3   : > { %v10474_v38 = vadd.f32 %v7512_v30, %v14568_v34  ;;  %v7676_v61 = vmax.f32 %v10472_v1, 0.0 }
 0x6d4   : > { %v7677_v48 = vmax.f32 %v10473_v26, 0.0 }
 0x6d5   : > { %v7678_v36 = vmax.f32 %v10474_v38, 0.0 }
 0x6d6   : > { %v7753_v10 = vpack.c.bf16 %v7677_v48, %v7675_v14 }
 0x6d7   : > { %v7754_v32 = vpack.c.bf16 %v7678_v36, %v7676_v61  ;;  %v7516_v37 = vpop.f32.mrb[232].mxu0 }
 0x6d8   : > { %v10475_v20 = vadd.f32 %v7516_v37, %v14563_v6  ;;  %v7518_v43 = vpop.f32.mrb[233].mxu0 }
 0x6d9   : > { %v10476_v42 = vadd.f32 %v7518_v43, %v14568_v34  ;;  %v7520_v24 = vpop.f32.mrb[234].mxu0  ;;  %8134 = vmatprep.mubr.bf16.mxu1 %v7754_v32 }
 0x6da   : > { %v10477_v19 = vadd.f32 %v7520_v24, %v14563_v6  ;;  %v7522_v22 = vpop.f32.mrb[235].mxu0  ;;  %8135 = vmatmul.mubr.bf16.gmra.mrb[16].mxu1 %v7753_v10  ;;  %v7679_v51 = vmax.f32 %v10475_v20, 0.0 }
 0x6db   : > { %v10478_v52 = vadd.f32 %v7522_v22, %v14568_v34  ;;  %v7680_v3 = vmax.f32 %v10476_v42, 0.0 }
 0x6dc   : > { %v7681_v44 = vmax.f32 %v10477_v19, 0.0 }
 0x6dd   : > { %v7682_v45 = vmax.f32 %v10478_v52, 0.0 }
 0x6de   : > { %v7755_v50 = vpack.c.bf16 %v7681_v44, %v7679_v51 }
 0x6df   : > { %v7756_v5 = vpack.c.bf16 %v7682_v45, %v7680_v3  ;;  %v7526_v29 = vpop.f32.mrb[236].mxu0 }
 0x6e0   : > { %v10479_v53 = vadd.f32 %v7526_v29, %v14563_v6  ;;  %v7528_v41 = vpop.f32.mrb[237].mxu0 }
 0x6e1   : > { %v10480_v15 = vadd.f32 %v7528_v41, %v14568_v34  ;;  %v7530_v59 = vpop.f32.mrb[238].mxu0  ;;  %8142 = vmatprep.mubr.bf16.mxu1 %v7756_v5 }
 0x6e2   : > { %v10481_v40 = vadd.f32 %v7530_v59, %v14563_v6  ;;  %v7532_v39 = vpop.f32.mrb[239].mxu0  ;;  %8143 = vmatmul.mubr.bf16.gmra.mrb[20].mxu1 %v7755_v50  ;;  %v7683_v16 = vmax.f32 %v10479_v53, 0.0 }
 0x6e3   : > { %v10482_v9 = vadd.f32 %v7532_v39, %v14568_v34  ;;  %v7684_v21 = vmax.f32 %v10480_v15, 0.0 }
 0x6e4   : > { %v7685_v18 = vmax.f32 %v10481_v40, 0.0 }
 0x6e5   : > { %v7686_v46 = vmax.f32 %v10482_v9, 0.0  ;;  %v7936_v0 = vpop.f32.mrb[172].mxu1 }
 0x6e6   : > { %v7757_v31 = vpack.c.bf16 %v7685_v18, %v7683_v16  ;;  %v7937_v56 = vadd.f32 %v14715_v8, %v7936_v0  ;;  %v7938_v2 = vpop.f32.mrb[173].mxu1 }
 0x6e7   : > { %v7758_v11 = vpack.c.bf16 %v7686_v46, %v7684_v21  ;;  %v7536_v63 = vpop.f32.mrb[240].mxu0  ;;  %v7939_v47 = vpop.f32.mrb[174].mxu1 }
 0x6e8   : > { %v10483_v25 = vadd.f32 %v7536_v63, %v14563_v6  ;;  %v7940_v7 = vadd.f32 %v14715_v8, %v7939_v47  ;;  %v7538_v27 = vpop.f32.mrb[241].mxu0  ;;  %v7941_v60 = vpop.f32.mrb[175].mxu1  ;;  %v8191_v33 = vmax.f32 %v7937_v56, 0.0 }
 0x6e9   : > { %v10484_v62 = vadd.f32 %v7538_v27, %v14568_v34  ;;  %v7540_v35 = vpop.f32.mrb[242].mxu0  ;;  %8150 = vmatprep.mubr.bf16.mxu1 %v7758_v11 }
 0x6ea   : > { %v8192_v28 = vmax.f32 %v7940_v7, 0.0  ;;  %v10485_v57 = vadd.f32 %v7540_v35, %v14563_v6  ;;  %v7542_v23 = vpop.f32.mrb[243].mxu0  ;;  %8151 = vmatmul.mubr.bf16.gmra.mrb[24].mxu1 %v7757_v31  ;;  %v7687_v17 = vmax.f32 %v10483_v25, 0.0 }
 0x6eb   : > { %v10486_v12 = vadd.f32 %v7542_v23, %v14568_v34  ;;  %v7688_v55 = vmax.f32 %v10484_v62, 0.0 }
 0x6ec   : > { %v14723_v54 = vpack.c.bf16 %v8192_v28, %v8191_v33  ;;  %v7689_v13 = vmax.f32 %v10485_v57, 0.0 }
 0x6ed   : > { %v7690_v58 = vmax.f32 %v10486_v12, 0.0  ;;  %v7944_v4 = vpop.f32.mrb[176].mxu1 }
 0x6ee   : > { %v7759_v1 = vpack.c.bf16 %v7689_v13, %v7687_v17  ;;  %v7945_v49 = vadd.f32 %v14715_v8, %v7944_v4  ;;  %v7946_v26 = vpop.f32.mrb[177].mxu1 }
 0x6ef   : > { %v7760_v30 = vpack.c.bf16 %v7690_v58, %v7688_v55  ;;  %v7546_v38 = vpop.f32.mrb[244].mxu0  ;;  %v7947_v14 = vpop.f32.mrb[178].mxu1 }
 0x6f0   : > { %v10487_v48 = vadd.f32 %v7546_v38, %v14563_v6  ;;  %v7948_v61 = vadd.f32 %v14715_v8, %v7947_v14  ;;  %v7548_v36 = vpop.f32.mrb[245].mxu0  ;;  %v7949_v10 = vpop.f32.mrb[179].mxu1  ;;  %v8193_v20 = vmax.f32 %v7945_v49, 0.0 }
 0x6f1   : > { %v10488_v32 = vadd.f32 %v7548_v36, %v14568_v34  ;;  %v7550_v37 = vpop.f32.mrb[246].mxu0  ;;  %8158 = vmatprep.mubr.bf16.mxu1 %v7760_v30 }
 0x6f2   : > { %v8194_v43 = vmax.f32 %v7948_v61, 0.0  ;;  %v10489_v42 = vadd.f32 %v7550_v37, %v14563_v6  ;;  %v7552_v24 = vpop.f32.mrb[247].mxu0  ;;  %8159 = vmatmul.mubr.bf16.gmra.mrb[28].mxu1 %v7759_v1  ;;  %v7691_v22 = vmax.f32 %v10487_v48, 0.0 }
 0x6f3   : > { %v10490_v19 = vadd.f32 %v7552_v24, %v14568_v34  ;;  %v7692_v44 = vmax.f32 %v10488_v32, 0.0 }
 0x6f4   : > { %v14731_v52 = vpack.c.bf16 %v8194_v43, %v8193_v20  ;;  %v7693_v51 = vmax.f32 %v10489_v42, 0.0 }
 0x6f5   : > { %v7694_v3 = vmax.f32 %v10490_v19, 0.0  ;;  %v7952_v45 = vpop.f32.mrb[180].mxu1 }
 0x6f6   : > { %v7761_v50 = vpack.c.bf16 %v7693_v51, %v7691_v22  ;;  %v7953_v5 = vadd.f32 %v14715_v8, %v7952_v45  ;;  %v7954_v29 = vpop.f32.mrb[181].mxu1 }
 0x6f7   : > { %v7762_v53 = vpack.c.bf16 %v7694_v3, %v7692_v44  ;;  %v7556_v41 = vpop.f32.mrb[248].mxu0  ;;  %v7955_v15 = vpop.f32.mrb[182].mxu1 }
 0x6f8   : > { %v10491_v59 = vadd.f32 %v7556_v41, %v14563_v6  ;;  %v7956_v40 = vadd.f32 %v14715_v8, %v7955_v15  ;;  %v7558_v39 = vpop.f32.mrb[249].mxu0  ;;  %v7957_v9 = vpop.f32.mrb[183].mxu1  ;;  %v8195_v21 = vmax.f32 %v7953_v5, 0.0 }
 0x6f9   : > { %v10492_v16 = vadd.f32 %v7558_v39, %v14568_v34  ;;  %v7560_v18 = vpop.f32.mrb[250].mxu0  ;;  %8166 = vmatprep.mubr.bf16.mxu1 %v7762_v53 }
 0x6fa   : > { %v8196_v46 = vmax.f32 %v7956_v40, 0.0  ;;  %v10493_v0 = vadd.f32 %v7560_v18, %v14563_v6  ;;  %v7562_v31 = vpop.f32.mrb[251].mxu0  ;;  %8167 = vmatmul.mubr.bf16.gmra.mrb[32].mxu1 %v7761_v50  ;;  %v7695_v2 = vmax.f32 %v10491_v59, 0.0 }
 0x6fb   : > { %v10494_v56 = vadd.f32 %v7562_v31, %v14568_v34  ;;  %v7696_v47 = vmax.f32 %v10492_v16, 0.0 }
 0x6fc   : > { %v8257_v11 = vpack.c.bf16 %v8196_v46, %v8195_v21  ;;  %v7697_v63 = vmax.f32 %v10493_v0, 0.0 }
 0x6fd   : > { %v7698_v25 = vmax.f32 %v10494_v56, 0.0  ;;  %v7960_v7 = vpop.f32.mrb[184].mxu1 }
 0x6fe   : > { %v7763_v27 = vpack.c.bf16 %v7697_v63, %v7695_v2  ;;  %v7961_v60 = vadd.f32 %v14715_v8, %v7960_v7  ;;  %v7962_v62 = vpop.f32.mrb[185].mxu1 }
 0x6ff   : > { %v7764_v35 = vpack.c.bf16 %v7698_v25, %v7696_v47  ;;  %v7566_v33 = vpop.f32.mrb[252].mxu0  ;;  %v7963_v28 = vpop.f32.mrb[186].mxu1 }
 0x700   : > { %v10495_v57 = vadd.f32 %v7566_v33, %v14563_v6  ;;  %v7964_v23 = vadd.f32 %v14715_v8, %v7963_v28  ;;  %v7568_v12 = vpop.f32.mrb[253].mxu0  ;;  %v7965_v17 = vpop.f32.mrb[187].mxu1  ;;  %v8197_v58 = vmax.f32 %v7961_v60, 0.0 }
 0x701   : > { %v10496_v13 = vadd.f32 %v7568_v12, %v14568_v34  ;;  %v7570_v55 = vpop.f32.mrb[254].mxu0  ;;  %8174 = vmatprep.mubr.bf16.mxu1 %v7764_v35 }
 0x702   : > { %v8198_v4 = vmax.f32 %v7964_v23, 0.0  ;;  %v10497_v1 = vadd.f32 %v7570_v55, %v14563_v6  ;;  %v7572_v49 = vpop.f32.mrb[255].mxu0  ;;  %8175 = vmatmul.mubr.bf16.gmra.mrb[36].mxu1 %v7763_v27  ;;  %v7699_v30 = vmax.f32 %v10495_v57, 0.0 }
 0x703   : > { %v10498_v26 = vadd.f32 %v7572_v49, %v14568_v34  ;;  %v7700_v48 = vmax.f32 %v10496_v13, 0.0 }
 0x704   : > { %v8258_v38 = vpack.c.bf16 %v8198_v4, %v8197_v58  ;;  %v7701_v14 = vmax.f32 %v10497_v1, 0.0 }
 0x705   : > { %v7702_v61 = vmax.f32 %v10498_v26, 0.0  ;;  %v7968_v36 = vpop.f32.mrb[188].mxu1 }
 0x706   : > { %v7765_v10 = vpack.c.bf16 %v7701_v14, %v7699_v30  ;;  %v7969_v32 = vadd.f32 %v14715_v8, %v7968_v36  ;;  %v7970_v37 = vpop.f32.mrb[189].mxu1 }
 0x707   : > { %v7766_v20 = vpack.c.bf16 %v7702_v61, %v7700_v48  ;;  %v7971_v43 = vpop.f32.mrb[190].mxu1 }
 0x708   : > { %v7972_v42 = vadd.f32 %v14715_v8, %v7971_v43  ;;  %v7973_v24 = vpop.f32.mrb[191].mxu1  ;;  %v8199_v6 = vmax.f32 %v7969_v32, 0.0 }
 0x709   : > { %8182 = vmatprep.mubr.bf16.mxu1 %v7766_v20 }
 0x70a   : > { %v8200_v19 = vmax.f32 %v7972_v42, 0.0  ;;  %8183 = vmatmul.mubr.bf16.gmra.mrb[40].mxu1 %v7765_v10 }
 0x70b   : > { %10005 = vmatprep.mubr.bf16.mxu1 %v14723_v54 }
 0x70c   : > { %v8259_v34 = vpack.c.bf16 %v8200_v19, %v8199_v6 }
 0x70d   : > { %v7976_v22 = vpop.f32.mrb[192].mxu1 }
 0x70e   : > { %v7977_v51 = vadd.f32 %v14715_v8, %v7976_v22  ;;  %v7978_v44 = vpop.f32.mrb[193].mxu1 }
 0x70f   : > { %v7979_v3 = vpop.f32.mrb[194].mxu1 }
 0x710   : > { %v7980_v45 = vadd.f32 %v14715_v8, %v7979_v3  ;;  %v7981_v50 = vpop.f32.mrb[195].mxu1  ;;  %v8201_v5 = vmax.f32 %v7977_v51, 0.0 }
 0x712   : > { %v8202_v29 = vmax.f32 %v7980_v45, 0.0  ;;  %10006 = vmatmul.mubr.bf16.vlgmr.msra.gmra.mrb[44].mxu1 %v14731_v52 }
 0x713   : > { %10009 = vmatprep.mubr.bf16.mxu1 %v8257_v11 }
 0x714   : > { %v8260_v53 = vpack.c.bf16 %v8202_v29, %v8201_v5 }
 0x715   : > { %v7984_v41 = vpop.f32.mrb[196].mxu1 }
 0x716   : > { %v7985_v15 = vadd.f32 %v14715_v8, %v7984_v41  ;;  %v7986_v59 = vpop.f32.mrb[197].mxu1 }
 0x717   : > { %v7987_v54 = vpop.f32.mrb[198].mxu1 }
 0x718   : > { %v7988_v40 = vadd.f32 %v14715_v8, %v7987_v54  ;;  %v7989_v39 = vpop.f32.mrb[199].mxu1  ;;  %v8203_v9 = vmax.f32 %v7985_v15, 0.0 }
 0x71a   : > { %v8204_v16 = vmax.f32 %v7988_v40, 0.0  ;;  %10010 = vmatmul.mubr.bf16.gmra.mrb[48].mxu1 %v8258_v38 }
 0x71b   : > { %10013 = vmatprep.mubr.bf16.mxu1 %v8259_v34 }
 0x71c   : > { %v8261_v18 = vpack.c.bf16 %v8204_v16, %v8203_v9 }
 0x71d   : > { %v7992_v21 = vpop.f32.mrb[200].mxu1 }
 0x71e   : > { %v7993_v46 = vadd.f32 %v14715_v8, %v7992_v21  ;;  %v7994_v0 = vpop.f32.mrb[201].mxu1 }
 0x71f   : > { %v7995_v52 = vpop.f32.mrb[202].mxu1 }
 0x720   : > { %v7996_v31 = vadd.f32 %v14715_v8, %v7995_v52  ;;  %v7997_v56 = vpop.f32.mrb[203].mxu1  ;;  %v8205_v2 = vmax.f32 %v7993_v46, 0.0 }
 0x722   : > { %v8206_v11 = vmax.f32 %v7996_v31, 0.0  ;;  %10014 = vmatmul.mubr.bf16.gmra.mrb[52].mxu1 %v8260_v53 }
 0x723   : > { %10017 = vmatprep.mubr.bf16.mxu1 %v8261_v18 }
 0x724   : > { %v8262_v63 = vpack.c.bf16 %v8206_v11, %v8205_v2 }
 0x725   : > { %v8000_v47 = vpop.f32.mrb[204].mxu1 }
 0x726   : > { %v8001_v25 = vadd.f32 %v14715_v8, %v8000_v47  ;;  %v8002_v7 = vpop.f32.mrb[205].mxu1 }
 0x727   : > { %v8003_v27 = vpop.f32.mrb[206].mxu1 }
 0x728   : > { %v8004_v60 = vadd.f32 %v14715_v8, %v8003_v27  ;;  %v8005_v62 = vpop.f32.mrb[207].mxu1  ;;  %v8207_v35 = vmax.f32 %v8001_v25, 0.0 }
 0x72a   : > { %v8208_v33 = vmax.f32 %v8004_v60, 0.0  ;;  %10018 = vmatmul.mubr.bf16.gmra.mrb[56].mxu1 %v8262_v63 }
 0x72c   : > { %v8263_v28 = vpack.c.bf16 %v8208_v33, %v8207_v35 }
 0x72d   : > { %v8008_v57 = vpop.f32.mrb[208].mxu1 }
 0x72e   : > { %v8009_v23 = vadd.f32 %v14715_v8, %v8008_v57  ;;  %v8010_v12 = vpop.f32.mrb[209].mxu1  ;;  %10021 = vmatprep.mubr.bf16.mxu1 %v8263_v28 }
 0x72f   : > { %v8011_v17 = vpop.f32.mrb[210].mxu1 }
 0x730   : > { %v8012_v13 = vadd.f32 %v14715_v8, %v8011_v17  ;;  %v8013_v55 = vpop.f32.mrb[211].mxu1  ;;  %v8209_v58 = vmax.f32 %v8009_v23, 0.0 }
 0x732   : > { %v8210_v4 = vmax.f32 %v8012_v13, 0.0 }
 0x734   : > { %v8264_v1 = vpack.c.bf16 %v8210_v4, %v8209_v58 }
 0x735   : > { %v8016_v49 = vpop.f32.mrb[212].mxu1 }
 0x736   : > { %v8017_v26 = vadd.f32 %v14715_v8, %v8016_v49  ;;  %v8018_v30 = vpop.f32.mrb[213].mxu1  ;;  %10022 = vmatmul.mubr.bf16.gmra.mrb[60].mxu1 %v8264_v1 }
 0x737   : > { %v8019_v38 = vpop.f32.mrb[214].mxu1 }
 0x738   : > { %v8020_v14 = vadd.f32 %v14715_v8, %v8019_v38  ;;  %v8021_v48 = vpop.f32.mrb[215].mxu1  ;;  %v8211_v61 = vmax.f32 %v8017_v26, 0.0 }
 0x73a   : > { %v8212_v36 = vmax.f32 %v8020_v14, 0.0 }
 0x73c   : > { %v8265_v10 = vpack.c.bf16 %v8212_v36, %v8211_v61 }
 0x73d   : > { %v8024_v32 = vpop.f32.mrb[216].mxu1 }
 0x73e   : > { %v8025_v37 = vadd.f32 %v14715_v8, %v8024_v32  ;;  %v8026_v20 = vpop.f32.mrb[217].mxu1  ;;  %10025 = vmatprep.mubr.bf16.mxu1 %v8265_v10 }
 0x73f   : > { %v8027_v43 = vpop.f32.mrb[218].mxu1 }
 0x740   : > { %v8028_v42 = vadd.f32 %v14715_v8, %v8027_v43  ;;  %v8029_v24 = vpop.f32.mrb[219].mxu1  ;;  %v8213_v6 = vmax.f32 %v8025_v37, 0.0 }
 0x742   : > { %v8214_v19 = vmax.f32 %v8028_v42, 0.0 }
 0x744   : > { %v8266_v34 = vpack.c.bf16 %v8214_v19, %v8213_v6 }
 0x745   : > { %v8032_v22 = vpop.f32.mrb[220].mxu1 }
 0x746   : > { %v8033_v51 = vadd.f32 %v14715_v8, %v8032_v22  ;;  %v8034_v44 = vpop.f32.mrb[221].mxu1  ;;  %10026 = vmatmul.mubr.bf16.gmra.mrb[64].mxu1 %v8266_v34 }
 0x747   : > { %v8035_v3 = vpop.f32.mrb[222].mxu1 }
 0x748   : > { %v8036_v45 = vadd.f32 %v14715_v8, %v8035_v3  ;;  %v8037_v50 = vpop.f32.mrb[223].mxu1  ;;  %v8215_v5 = vmax.f32 %v8033_v51, 0.0 }
 0x74a   : > { %v8216_v29 = vmax.f32 %v8036_v45, 0.0 }
 0x74c   : > { %v8267_v53 = vpack.c.bf16 %v8216_v29, %v8215_v5 }
 0x74d   : > { %v8040_v41 = vpop.f32.mrb[224].mxu1 }
 0x74e   : > { %v8041_v15 = vadd.f32 %v14715_v8, %v8040_v41  ;;  %v8042_v59 = vpop.f32.mrb[225].mxu1  ;;  %10029 = vmatprep.mubr.bf16.mxu1 %v8267_v53 }
 0x74f   : > { %v8043_v54 = vpop.f32.mrb[226].mxu1 }
 0x750   : > { %v8044_v40 = vadd.f32 %v14715_v8, %v8043_v54  ;;  %v8045_v39 = vpop.f32.mrb[227].mxu1  ;;  %v8217_v9 = vmax.f32 %v8041_v15, 0.0 }
 0x752   : > { %v8218_v16 = vmax.f32 %v8044_v40, 0.0 }
 0x754   : > { %v8268_v18 = vpack.c.bf16 %v8218_v16, %v8217_v9 }
 0x755   : > { %v8048_v21 = vpop.f32.mrb[228].mxu1 }
 0x756   : > { %v8049_v46 = vadd.f32 %v14715_v8, %v8048_v21  ;;  %v8050_v0 = vpop.f32.mrb[229].mxu1  ;;  %10030 = vmatmul.mubr.bf16.gmra.mrb[68].mxu1 %v8268_v18 }
 0x757   : > { %v8051_v52 = vpop.f32.mrb[230].mxu1 }
 0x758   : > { %v8052_v31 = vadd.f32 %v14715_v8, %v8051_v52  ;;  %v8053_v56 = vpop.f32.mrb[231].mxu1  ;;  %v8219_v2 = vmax.f32 %v8049_v46, 0.0 }
 0x75a   : > { %v8220_v11 = vmax.f32 %v8052_v31, 0.0 }
 0x75c   : > { %v8269_v63 = vpack.c.bf16 %v8220_v11, %v8219_v2 }
 0x75d   : > { %v8056_v47 = vpop.f32.mrb[232].mxu1 }
 0x75e   : > { %v8057_v25 = vadd.f32 %v14715_v8, %v8056_v47  ;;  %v8058_v7 = vpop.f32.mrb[233].mxu1  ;;  %10033 = vmatprep.mubr.bf16.mxu1 %v8269_v63 }
 0x75f   : > { %v8059_v27 = vpop.f32.mrb[234].mxu1 }
 0x760   : > { %v8060_v60 = vadd.f32 %v14715_v8, %v8059_v27  ;;  %v8061_v62 = vpop.f32.mrb[235].mxu1  ;;  %v8221_v35 = vmax.f32 %v8057_v25, 0.0 }
 0x762   : > { %v8222_v33 = vmax.f32 %v8060_v60, 0.0 }
 0x764   : > { %v8270_v28 = vpack.c.bf16 %v8222_v33, %v8221_v35 }
 0x765   : > { %v8064_v57 = vpop.f32.mrb[236].mxu1 }
 0x766   : > { %v8065_v23 = vadd.f32 %v14715_v8, %v8064_v57  ;;  %v8066_v12 = vpop.f32.mrb[237].mxu1  ;;  %10034 = vmatmul.mubr.bf16.gmra.mrb[72].mxu1 %v8270_v28 }
 0x767   : > { %v8067_v17 = vpop.f32.mrb[238].mxu1 }
 0x768   : > { %v8068_v13 = vadd.f32 %v14715_v8, %v8067_v17  ;;  %v8069_v55 = vpop.f32.mrb[239].mxu1  ;;  %v8223_v58 = vmax.f32 %v8065_v23, 0.0 }
 0x76a   : > { %v8224_v4 = vmax.f32 %v8068_v13, 0.0 }
 0x76c   : > { %v8271_v1 = vpack.c.bf16 %v8224_v4, %v8223_v58 }
 0x76d   : > { %v8072_v49 = vpop.f32.mrb[240].mxu1 }
 0x76e   : > { %v8073_v26 = vadd.f32 %v14715_v8, %v8072_v49  ;;  %v8074_v30 = vpop.f32.mrb[241].mxu1  ;;  %10037 = vmatprep.mubr.bf16.mxu1 %v8271_v1 }
 0x76f   : > { %v8075_v38 = vpop.f32.mrb[242].mxu1 }
 0x770   : > { %v8076_v14 = vadd.f32 %v14715_v8, %v8075_v38  ;;  %v8077_v48 = vpop.f32.mrb[243].mxu1  ;;  %v8225_v61 = vmax.f32 %v8073_v26, 0.0 }
 0x772   : > { %v8226_v36 = vmax.f32 %v8076_v14, 0.0 }
 0x774   : > { %v8272_v10 = vpack.c.bf16 %v8226_v36, %v8225_v61 }
 0x775   : > { %v8080_v32 = vpop.f32.mrb[244].mxu1 }
 0x776   : > { %v8081_v37 = vadd.f32 %v14715_v8, %v8080_v32  ;;  %v8082_v20 = vpop.f32.mrb[245].mxu1  ;;  %10038 = vmatmul.mubr.bf16.gmra.mrb[76].mxu1 %v8272_v10 }
 0x777   : > { %v8083_v43 = vpop.f32.mrb[246].mxu1 }
 0x778   : > { %v8084_v42 = vadd.f32 %v14715_v8, %v8083_v43  ;;  %v8085_v24 = vpop.f32.mrb[247].mxu1  ;;  %v8227_v6 = vmax.f32 %v8081_v37, 0.0 }
 0x77a   : > { %v8228_v19 = vmax.f32 %v8084_v42, 0.0 }
 0x77c   : > { %v8273_v34 = vpack.c.bf16 %v8228_v19, %v8227_v6 }
 0x77d   : > { %v8088_v22 = vpop.f32.mrb[248].mxu1 }
 0x77e   : > { %v8089_v51 = vadd.f32 %v14715_v8, %v8088_v22  ;;  %v8090_v44 = vpop.f32.mrb[249].mxu1  ;;  %10041 = vmatprep.mubr.bf16.mxu1 %v8273_v34 }
 0x77f   : > { %v8091_v3 = vpop.f32.mrb[250].mxu1 }
 0x780   : > { %v8092_v45 = vadd.f32 %v14715_v8, %v8091_v3  ;;  %v8093_v50 = vpop.f32.mrb[251].mxu1  ;;  %v8229_v5 = vmax.f32 %v8089_v51, 0.0 }
 0x782   : > { %v8230_v29 = vmax.f32 %v8092_v45, 0.0 }
 0x784   : > { %v8274_v53 = vpack.c.bf16 %v8230_v29, %v8229_v5 }
 0x785   : > { %v8096_v41 = vpop.f32.mrb[252].mxu1 }
 0x786   : > { %v8097_v15 = vadd.f32 %v14715_v8, %v8096_v41  ;;  %v8098_v59 = vpop.f32.mrb[253].mxu1  ;;  %10042 = vmatmul.mubr.bf16.gmra.mrb[80].mxu1 %v8274_v53 }
 0x787   : > { %v8099_v54 = vpop.f32.mrb[254].mxu1 }
 0x788   : > { %v8100_v40 = vadd.f32 %v14715_v8, %v8099_v54  ;;  %v8101_v39 = vpop.f32.mrb[255].mxu1  ;;  %v8231_v9 = vmax.f32 %v8097_v15, 0.0 }
 0x78a   : > { %v8232_v16 = vmax.f32 %v8100_v40, 0.0 }
 0x78c   : > { %v8275_v18 = vpack.c.bf16 %v8232_v16, %v8231_v9 }
 0x78d   : > { %v8104_v21 = vpop.f32.mrb[0].mxu1 }
 0x78e   : > { %v8105_v46 = vadd.f32 %v14715_v8, %v8104_v21  ;;  %v8106_v0 = vpop.f32.mrb[1].mxu1  ;;  %10045 = vmatprep.mubr.bf16.mxu1 %v8275_v18 }
 0x78f   : > { %v8107_v52 = vpop.f32.mrb[2].mxu1 }
 0x790   : > { %v8108_v31 = vadd.f32 %v14715_v8, %v8107_v52  ;;  %v8109_v56 = vpop.f32.mrb[3].mxu1  ;;  %v8233_v2 = vmax.f32 %v8105_v46, 0.0 }
 0x792   : > { %v8234_v11 = vmax.f32 %v8108_v31, 0.0 }
 0x794   : > { %v8276_v63 = vpack.c.bf16 %v8234_v11, %v8233_v2 }
 0x795   : > { %v8112_v47 = vpop.f32.mrb[4].mxu1 }
 0x796   : > { %v8113_v25 = vadd.f32 %v14715_v8, %v8112_v47  ;;  %v8114_v7 = vpop.f32.mrb[5].mxu1  ;;  %10046 = vmatmul.mubr.bf16.gmra.mrb[84].mxu1 %v8276_v63 }
 0x797   : > { %v8115_v27 = vpop.f32.mrb[6].mxu1 }
 0x798   : > { %v8116_v60 = vadd.f32 %v14715_v8, %v8115_v27  ;;  %v8117_v62 = vpop.f32.mrb[7].mxu1  ;;  %v8235_v35 = vmax.f32 %v8113_v25, 0.0 }
 0x79a   : > { %v8236_v33 = vmax.f32 %v8116_v60, 0.0 }
 0x79c   : > { %v8277_v28 = vpack.c.bf16 %v8236_v33, %v8235_v35 }
 0x79d   : > { %v8120_v57 = vpop.f32.mrb[8].mxu1 }
 0x79e   : > { %v8121_v23 = vadd.f32 %v14715_v8, %v8120_v57  ;;  %v8122_v12 = vpop.f32.mrb[9].mxu1  ;;  %10049 = vmatprep.mubr.bf16.mxu1 %v8277_v28 }
 0x79f   : > { %v8123_v17 = vpop.f32.mrb[10].mxu1 }
 0x7a0   : > { %v8124_v13 = vadd.f32 %v14715_v8, %v8123_v17  ;;  %v8125_v55 = vpop.f32.mrb[11].mxu1  ;;  %v8237_v58 = vmax.f32 %v8121_v23, 0.0 }
 0x7a2   : > { %v8238_v4 = vmax.f32 %v8124_v13, 0.0 }
 0x7a4   : > { %v8278_v1 = vpack.c.bf16 %v8238_v4, %v8237_v58 }
 0x7a5   : > { %v8128_v49 = vpop.f32.mrb[12].mxu1 }
 0x7a6   : > { %v8129_v26 = vadd.f32 %v14715_v8, %v8128_v49  ;;  %v8130_v30 = vpop.f32.mrb[13].mxu1  ;;  %10050 = vmatmul.mubr.bf16.gmra.mrb[88].mxu1 %v8278_v1 }
 0x7a7   : > { %v8131_v38 = vpop.f32.mrb[14].mxu1 }
 0x7a8   : > { %v8132_v14 = vadd.f32 %v14715_v8, %v8131_v38  ;;  %v8133_v48 = vpop.f32.mrb[15].mxu1  ;;  %v8239_v61 = vmax.f32 %v8129_v26, 0.0 }
 0x7aa   : > { %v8240_v36 = vmax.f32 %v8132_v14, 0.0 }
 0x7ac   : > { %v8279_v10 = vpack.c.bf16 %v8240_v36, %v8239_v61 }
 0x7ad   : > { %v8136_v32 = vpop.f32.mrb[16].mxu1 }
 0x7ae   : > { %v8137_v37 = vadd.f32 %v14715_v8, %v8136_v32  ;;  %v8138_v20 = vpop.f32.mrb[17].mxu1  ;;  %10053 = vmatprep.mubr.bf16.mxu1 %v8279_v10 }
 0x7af   : > { %v8139_v43 = vpop.f32.mrb[18].mxu1 }
 0x7b0   : > { %v8140_v42 = vadd.f32 %v14715_v8, %v8139_v43  ;;  %v8141_v24 = vpop.f32.mrb[19].mxu1  ;;  %v8241_v6 = vmax.f32 %v8137_v37, 0.0  ;;  %v14807_v37 = vld [vmem:[%s14969_s8] ss:$0 sm:$0xff] }
 0x7b2   : > { %v8242_v19 = vmax.f32 %v8140_v42, 0.0 }
 0x7b4   : > { %v8280_v34 = vpack.c.bf16 %v8242_v19, %v8241_v6 }
 0x7b5   : > { %v8144_v22 = vpop.f32.mrb[20].mxu1 }
 0x7b6   : > { %v8145_v51 = vadd.f32 %v14715_v8, %v8144_v22  ;;  %v8146_v44 = vpop.f32.mrb[21].mxu1  ;;  %10054 = vmatmul.mubr.bf16.gmra.mrb[92].mxu1 %v8280_v34 }
 0x7b7   : > { %v8147_v3 = vpop.f32.mrb[22].mxu1 }
 0x7b8   : > { %v8148_v45 = vadd.f32 %v14715_v8, %v8147_v3  ;;  %v8149_v50 = vpop.f32.mrb[23].mxu1  ;;  %v8243_v5 = vmax.f32 %v8145_v51, 0.0 }
 0x7ba   : > { %v8244_v29 = vmax.f32 %v8148_v45, 0.0 }
 0x7bc   : > { %v8281_v53 = vpack.c.bf16 %v8244_v29, %v8243_v5 }
 0x7bd   : > { %v8152_v41 = vpop.f32.mrb[24].mxu1 }
 0x7be   : > { %v8153_v15 = vadd.f32 %v14715_v8, %v8152_v41  ;;  %v8154_v59 = vpop.f32.mrb[25].mxu1  ;;  %10057 = vmatprep.mubr.bf16.mxu1 %v8281_v53 }
 0x7bf   : > { %v8155_v54 = vpop.f32.mrb[26].mxu1 }
 0x7c0   : > { %v8156_v40 = vadd.f32 %v14715_v8, %v8155_v54  ;;  %v8157_v39 = vpop.f32.mrb[27].mxu1  ;;  %v8245_v9 = vmax.f32 %v8153_v15, 0.0 }
 0x7c2   : > { %v8246_v16 = vmax.f32 %v8156_v40, 0.0 }
 0x7c4   : > { %v8282_v18 = vpack.c.bf16 %v8246_v16, %v8245_v9 }
 0x7c5   : > { %v8160_v21 = vpop.f32.mrb[28].mxu1 }
 0x7c6   : > { %v8161_v46 = vadd.f32 %v14715_v8, %v8160_v21  ;;  %v8162_v0 = vpop.f32.mrb[29].mxu1  ;;  %10058 = vmatmul.mubr.bf16.gmra.mrb[96].mxu1 %v8282_v18 }
 0x7c7   : > { %v8163_v52 = vpop.f32.mrb[30].mxu1 }
 0x7c8   : > { %v8164_v31 = vadd.f32 %v14715_v8, %v8163_v52  ;;  %v8165_v56 = vpop.f32.mrb[31].mxu1  ;;  %v8247_v2 = vmax.f32 %v8161_v46, 0.0 }
 0x7ca   : > { %v8248_v11 = vmax.f32 %v8164_v31, 0.0 }
 0x7cc   : > { %v8283_v63 = vpack.c.bf16 %v8248_v11, %v8247_v2 }
 0x7cd   : > { %v8168_v47 = vpop.f32.mrb[32].mxu1 }
 0x7ce   : > { %v8169_v25 = vadd.f32 %v14715_v8, %v8168_v47  ;;  %v8170_v7 = vpop.f32.mrb[33].mxu1  ;;  %10061 = vmatprep.mubr.bf16.mxu1 %v8283_v63 }
 0x7cf   : > { %v8171_v27 = vpop.f32.mrb[34].mxu1 }
 0x7d0   : > { %v8172_v60 = vadd.f32 %v14715_v8, %v8171_v27  ;;  %v8173_v62 = vpop.f32.mrb[35].mxu1  ;;  %v8249_v35 = vmax.f32 %v8169_v25, 0.0 }
 0x7d2   : > { %v8250_v33 = vmax.f32 %v8172_v60, 0.0 }
 0x7d4   : > { %v8284_v28 = vpack.c.bf16 %v8250_v33, %v8249_v35 }
 0x7d5   : > { %v8176_v57 = vpop.f32.mrb[36].mxu1 }
 0x7d6   : > { %v8177_v23 = vadd.f32 %v14715_v8, %v8176_v57  ;;  %v8178_v12 = vpop.f32.mrb[37].mxu1  ;;  %10062 = vmatmul.mubr.bf16.gmra.mrb[100].mxu1 %v8284_v28 }
 0x7d7   : > { %v8179_v17 = vpop.f32.mrb[38].mxu1 }
 0x7d8   : > { %v8180_v13 = vadd.f32 %v14715_v8, %v8179_v17  ;;  %v8181_v55 = vpop.f32.mrb[39].mxu1  ;;  %v8251_v58 = vmax.f32 %v8177_v23, 0.0 }
 0x7da   : > { %v8252_v4 = vmax.f32 %v8180_v13, 0.0 }
 0x7dc   : > { %v8285_v1 = vpack.c.bf16 %v8252_v4, %v8251_v58 }
 0x7dd   : > { %v8184_v49 = vpop.f32.mrb[40].mxu1 }
 0x7de   : > { %v8185_v26 = vadd.f32 %v14715_v8, %v8184_v49  ;;  %v8186_v30 = vpop.f32.mrb[41].mxu1  ;;  %10065 = vmatprep.mubr.bf16.mxu1 %v8285_v1 }
 0x7df   : > { %v8187_v38 = vpop.f32.mrb[42].mxu1 }
 0x7e0   : > { %v8188_v14 = vadd.f32 %v14715_v8, %v8187_v38  ;;  %v8189_v48 = vpop.f32.mrb[43].mxu1  ;;  %v8253_v61 = vmax.f32 %v8185_v26, 0.0 }
 0x7e2   : > { %v8254_v36 = vmax.f32 %v8188_v14, 0.0 }
 0x7e4   : > { %v8286_v10 = vpack.c.bf16 %v8254_v36, %v8253_v61 }
 0x7e5   : > { %v10007_v32 = vpop.f32.mrb[44].mxu1 }
 0x7e6   : > { %v8392_v20 = vpop.f32.mrb[45].mxu1  ;;  %10066 = vmatmul.mubr.bf16.gmra.mrb[104].mxu1 %v8286_v10  ;;  %v8401_v42 = vadd.f32 %v10007_v32, %v14807_v37 }
 0x7e7   : > { %v10008_v43 = vpop.f32.mrb[46].mxu1  ;;  %v8393_v6 = vadd.f32 %v14807_v37, %v8392_v20 }
 0x7e8   : > { %v8404_v8 = vadd.f32 %v10008_v43, %v14807_v37  ;;  %v8395_v24 = vpop.f32.mrb[47].mxu1 }
 0x7e9   : > { %v8396_v19 = vadd.f32 %v14807_v37, %v8395_v24 }
 0x7ea   : > { %v9766_v34 = vpack.c.bf16 %v8404_v8, %v8401_v42 }
 0x7eb   : > { %v9761_v22 = vpack.c.bf16 %v8396_v19, %v8393_v6 }
 0x7ec   : > { %9918 = vst [vmem:[%s14815_s25 + $0x8] sm:$0xff] %v9766_v34  }
 0x7ed   : > { %9762 = vst [vmem:[%s14815_s25] sm:$0xff] %v9761_v22   ;;  %v10011_v51 = vpop.f32.mrb[48].mxu1 }
 0x7ee   : > { %v8408_v44 = vpop.f32.mrb[49].mxu1  ;;  %v8417_v45 = vadd.f32 %v10011_v51, %v14807_v37 }
 0x7ef   : > { %v10012_v3 = vpop.f32.mrb[50].mxu1  ;;  %v8409_v29 = vadd.f32 %v14807_v37, %v8408_v44 }
 0x7f0   : > { %v8420_v50 = vadd.f32 %v10012_v3, %v14807_v37  ;;  %v8411_v5 = vpop.f32.mrb[51].mxu1 }
 0x7f1   : > { %v8412_v53 = vadd.f32 %v14807_v37, %v8411_v5 }
 0x7f2   : > { %v9776_v41 = vpack.c.bf16 %v8420_v50, %v8417_v45 }
 0x7f3   : > { %v9771_v15 = vpack.c.bf16 %v8412_v53, %v8409_v29 }
 0x7f4   : > { %9920 = vst [vmem:[%s14815_s25 + $0x18] sm:$0xff] %v9776_v41  }
 0x7f5   : > { %9919 = vst [vmem:[%s14815_s25 + $0x10] sm:$0xff] %v9771_v15   ;;  %v10015_v59 = vpop.f32.mrb[52].mxu1 }
 0x7f6   : > { %v8424_v54 = vpop.f32.mrb[53].mxu1  ;;  %v8433_v39 = vadd.f32 %v10015_v59, %v14807_v37 }
 0x7f7   : > { %v10016_v40 = vpop.f32.mrb[54].mxu1  ;;  %v8425_v18 = vadd.f32 %v14807_v37, %v8424_v54 }
 0x7f8   : > { %v8436_v9 = vadd.f32 %v10016_v40, %v14807_v37  ;;  %v8427_v16 = vpop.f32.mrb[55].mxu1 }
 0x7f9   : > { %v8428_v21 = vadd.f32 %v14807_v37, %v8427_v16 }
 0x7fa   : > { %v9786_v46 = vpack.c.bf16 %v8436_v9, %v8433_v39 }
 0x7fb   : > { %v9781_v0 = vpack.c.bf16 %v8428_v21, %v8425_v18 }
 0x7fc   : > { %9922 = vst [vmem:[%s14815_s25 + $0x28] sm:$0xff] %v9786_v46  }
 0x7fd   : > { %9921 = vst [vmem:[%s14815_s25 + $0x20] sm:$0xff] %v9781_v0   ;;  %v10019_v52 = vpop.f32.mrb[56].mxu1 }
 0x7fe   : > { %v8440_v31 = vpop.f32.mrb[57].mxu1  ;;  %v8449_v2 = vadd.f32 %v10019_v52, %v14807_v37 }
 0x7ff   : > { %v10020_v56 = vpop.f32.mrb[58].mxu1  ;;  %v8441_v47 = vadd.f32 %v14807_v37, %v8440_v31 }
 0x800   : > { %v8452_v11 = vadd.f32 %v10020_v56, %v14807_v37  ;;  %v8443_v63 = vpop.f32.mrb[59].mxu1 }
 0x801   : > { %v8444_v25 = vadd.f32 %v14807_v37, %v8443_v63 }
 0x802   : > { %v9796_v7 = vpack.c.bf16 %v8452_v11, %v8449_v2 }
 0x803   : > { %v9791_v27 = vpack.c.bf16 %v8444_v25, %v8441_v47 }
 0x804   : > { %9924 = vst [vmem:[%s14815_s25 + $0x38] sm:$0xff] %v9796_v7  }
 0x805   : > { %9923 = vst [vmem:[%s14815_s25 + $0x30] sm:$0xff] %v9791_v27  }
 0x809   : > { %v10023_v60 = vpop.f32.mrb[60].mxu1 }
 0x80a   : > { %v8456_v62 = vpop.f32.mrb[61].mxu1  ;;  %v8465_v33 = vadd.f32 %v10023_v60, %v14807_v37 }
 0x80b   : > { %v10024_v35 = vpop.f32.mrb[62].mxu1  ;;  %v8457_v23 = vadd.f32 %v14807_v37, %v8456_v62 }
 0x80c   : > { %v8468_v28 = vadd.f32 %v10024_v35, %v14807_v37  ;;  %v8459_v57 = vpop.f32.mrb[63].mxu1 }
 0x80d   : > { %v8460_v12 = vadd.f32 %v14807_v37, %v8459_v57 }
 0x80e   : > { %v9806_v17 = vpack.c.bf16 %v8468_v28, %v8465_v33 }
 0x80f   : > { %v9801_v13 = vpack.c.bf16 %v8460_v12, %v8457_v23 }
 0x810   : > { %9926 = vst [vmem:[%s14815_s25 + $0x48] sm:$0xff] %v9806_v17  }
 0x811   : > { %9925 = vst [vmem:[%s14815_s25 + $0x40] sm:$0xff] %v9801_v13  }
 0x819   : > { %v10027_v55 = vpop.f32.mrb[64].mxu1 }
 0x81a   : > { %v8472_v58 = vpop.f32.mrb[65].mxu1  ;;  %v8481_v1 = vadd.f32 %v10027_v55, %v14807_v37 }
 0x81b   : > { %v10028_v4 = vpop.f32.mrb[66].mxu1  ;;  %v8473_v30 = vadd.f32 %v14807_v37, %v8472_v58 }
 0x81c   : > { %v8484_v49 = vadd.f32 %v10028_v4, %v14807_v37  ;;  %v8475_v26 = vpop.f32.mrb[67].mxu1 }
 0x81d   : > { %v8476_v38 = vadd.f32 %v14807_v37, %v8475_v26 }
 0x81e   : > { %v9816_v14 = vpack.c.bf16 %v8484_v49, %v8481_v1 }
 0x81f   : > { %v9811_v48 = vpack.c.bf16 %v8476_v38, %v8473_v30 }
 0x820   : > { %9928 = vst [vmem:[%s14815_s25 + $0x58] sm:$0xff] %v9816_v14  }
 0x821   : > { %9927 = vst [vmem:[%s14815_s25 + $0x50] sm:$0xff] %v9811_v48  }
 0x829   : > { %v10031_v61 = vpop.f32.mrb[68].mxu1 }
 0x82a   : > { %v8488_v36 = vpop.f32.mrb[69].mxu1  ;;  %v8497_v32 = vadd.f32 %v10031_v61, %v14807_v37 }
 0x82b   : > { %v10032_v10 = vpop.f32.mrb[70].mxu1  ;;  %v8489_v42 = vadd.f32 %v14807_v37, %v8488_v36 }
 0x82c   : > { %v8500_v20 = vadd.f32 %v10032_v10, %v14807_v37  ;;  %v8491_v43 = vpop.f32.mrb[71].mxu1 }
 0x82d   : > { %v8492_v8 = vadd.f32 %v14807_v37, %v8491_v43 }
 0x82e   : > { %v9826_v24 = vpack.c.bf16 %v8500_v20, %v8497_v32 }
 0x82f   : > { %v9821_v6 = vpack.c.bf16 %v8492_v8, %v8489_v42 }
 0x830   : > { %9930 = vst [vmem:[%s14815_s25 + $0x68] sm:$0xff] %v9826_v24  }
 0x831   : > { %9929 = vst [vmem:[%s14815_s25 + $0x60] sm:$0xff] %v9821_v6  }
 0x839   : > { %v10035_v19 = vpop.f32.mrb[72].mxu1 }
 0x83a   : > { %v8504_v34 = vpop.f32.mrb[73].mxu1  ;;  %v8513_v51 = vadd.f32 %v10035_v19, %v14807_v37 }
 0x83b   : > { %v10036_v22 = vpop.f32.mrb[74].mxu1  ;;  %v8505_v45 = vadd.f32 %v14807_v37, %v8504_v34 }
 0x83c   : > { %v8516_v44 = vadd.f32 %v10036_v22, %v14807_v37  ;;  %v8507_v3 = vpop.f32.mrb[75].mxu1 }
 0x83d   : > { %v8508_v50 = vadd.f32 %v14807_v37, %v8507_v3 }
 0x83e   : > { %v9836_v5 = vpack.c.bf16 %v8516_v44, %v8513_v51 }
 0x83f   : > { %v9831_v29 = vpack.c.bf16 %v8508_v50, %v8505_v45 }
 0x840   : > { %9932 = vst [vmem:[%s14815_s25 + $0x78] sm:$0xff] %v9836_v5  }
 0x841   : > { %9931 = vst [vmem:[%s14815_s25 + $0x70] sm:$0xff] %v9831_v29  }
 0x849   : > { %v10039_v53 = vpop.f32.mrb[76].mxu1 }
 0x84a   : > { %v8520_v41 = vpop.f32.mrb[77].mxu1  ;;  %v8529_v59 = vadd.f32 %v10039_v53, %v14807_v37 }
 0x84b   : > { %v10040_v15 = vpop.f32.mrb[78].mxu1  ;;  %v8521_v39 = vadd.f32 %v14807_v37, %v8520_v41 }
 0x84c   : > { %v8532_v54 = vadd.f32 %v10040_v15, %v14807_v37  ;;  %v8523_v40 = vpop.f32.mrb[79].mxu1 }
 0x84d   : > { %v8524_v9 = vadd.f32 %v14807_v37, %v8523_v40 }
 0x84e   : > { %v9846_v16 = vpack.c.bf16 %v8532_v54, %v8529_v59 }
 0x84f   : > { %v9841_v18 = vpack.c.bf16 %v8524_v9, %v8521_v39 }
 0x850   : > { %9934 = vst [vmem:[%s14815_s25 + $0x88] sm:$0xff] %v9846_v16  }
 0x851   : > { %9933 = vst [vmem:[%s14815_s25 + $0x80] sm:$0xff] %v9841_v18  }
 0x859   : > { %v10043_v21 = vpop.f32.mrb[80].mxu1 }
 0x85a   : > { %v8536_v46 = vpop.f32.mrb[81].mxu1  ;;  %v8545_v52 = vadd.f32 %v10043_v21, %v14807_v37 }
 0x85b   : > { %v10044_v0 = vpop.f32.mrb[82].mxu1  ;;  %v8537_v2 = vadd.f32 %v14807_v37, %v8536_v46 }
 0x85c   : > { %v8548_v31 = vadd.f32 %v10044_v0, %v14807_v37  ;;  %v8539_v56 = vpop.f32.mrb[83].mxu1 }
 0x85d   : > { %v8540_v11 = vadd.f32 %v14807_v37, %v8539_v56 }
 0x85e   : > { %v9856_v63 = vpack.c.bf16 %v8548_v31, %v8545_v52 }
 0x85f   : > { %v9851_v47 = vpack.c.bf16 %v8540_v11, %v8537_v2 }
 0x860   : > { %9936 = vst [vmem:[%s14815_s25 + $0x98] sm:$0xff] %v9856_v63  }
 0x861   : > { %9935 = vst [vmem:[%s14815_s25 + $0x90] sm:$0xff] %v9851_v47  }
 0x869   : > { %v10047_v25 = vpop.f32.mrb[84].mxu1 }
 0x86a   : > { %v8552_v7 = vpop.f32.mrb[85].mxu1  ;;  %v8561_v60 = vadd.f32 %v10047_v25, %v14807_v37 }
 0x86b   : > { %v10048_v27 = vpop.f32.mrb[86].mxu1  ;;  %v8553_v33 = vadd.f32 %v14807_v37, %v8552_v7 }
 0x86c   : > { %v8564_v62 = vadd.f32 %v10048_v27, %v14807_v37  ;;  %v8555_v35 = vpop.f32.mrb[87].mxu1 }
 0x86d   : > { %v8556_v28 = vadd.f32 %v14807_v37, %v8555_v35 }
 0x86e   : > { %v9866_v57 = vpack.c.bf16 %v8564_v62, %v8561_v60 }
 0x86f   : > { %v9861_v23 = vpack.c.bf16 %v8556_v28, %v8553_v33 }
 0x870   : > { %9938 = vst [vmem:[%s14815_s25 + $0xa8] sm:$0xff] %v9866_v57  }
 0x871   : > { %9937 = vst [vmem:[%s14815_s25 + $0xa0] sm:$0xff] %v9861_v23  }
 0x879   : > { %v10051_v12 = vpop.f32.mrb[88].mxu1 }
 0x87a   : > { %v8568_v17 = vpop.f32.mrb[89].mxu1  ;;  %v8577_v55 = vadd.f32 %v10051_v12, %v14807_v37 }
 0x87b   : > { %v10052_v13 = vpop.f32.mrb[90].mxu1  ;;  %v8569_v1 = vadd.f32 %v14807_v37, %v8568_v17 }
 0x87c   : > { %v8580_v58 = vadd.f32 %v10052_v13, %v14807_v37  ;;  %v8571_v4 = vpop.f32.mrb[91].mxu1 }
 0x87d   : > { %v8572_v49 = vadd.f32 %v14807_v37, %v8571_v4 }
 0x87e   : > { %v9876_v26 = vpack.c.bf16 %v8580_v58, %v8577_v55 }
 0x87f   : > { %v9871_v30 = vpack.c.bf16 %v8572_v49, %v8569_v1 }
 0x880   : > { %9940 = vst [vmem:[%s14815_s25 + $0xb8] sm:$0xff] %v9876_v26  }
 0x881   : > { %9939 = vst [vmem:[%s14815_s25 + $0xb0] sm:$0xff] %v9871_v30  }
 0x889   : > { %v10055_v38 = vpop.f32.mrb[92].mxu1 }
 0x88a   : > { %v8584_v14 = vpop.f32.mrb[93].mxu1  ;;  %v8593_v61 = vadd.f32 %v10055_v38, %v14807_v37 }
 0x88b   : > { %v10056_v48 = vpop.f32.mrb[94].mxu1  ;;  %v8585_v32 = vadd.f32 %v14807_v37, %v8584_v14 }
 0x88c   : > { %v8596_v36 = vadd.f32 %v10056_v48, %v14807_v37  ;;  %v8587_v10 = vpop.f32.mrb[95].mxu1 }
 0x88d   : > { %v8588_v20 = vadd.f32 %v14807_v37, %v8587_v10 }
 0x88e   : > { %v9886_v43 = vpack.c.bf16 %v8596_v36, %v8593_v61 }
 0x88f   : > { %v9881_v42 = vpack.c.bf16 %v8588_v20, %v8585_v32 }
 0x890   : > { %9942 = vst [vmem:[%s14815_s25 + $0xc8] sm:$0xff] %v9886_v43  }
 0x891   : > { %9941 = vst [vmem:[%s14815_s25 + $0xc0] sm:$0xff] %v9881_v42  }
 0x899   : > { %v10059_v8 = vpop.f32.mrb[96].mxu1 }
 0x89a   : > { %v8600_v24 = vpop.f32.mrb[97].mxu1  ;;  %v8609_v19 = vadd.f32 %v10059_v8, %v14807_v37 }
 0x89b   : > { %v10060_v6 = vpop.f32.mrb[98].mxu1  ;;  %v8601_v51 = vadd.f32 %v14807_v37, %v8600_v24 }
 0x89c   : > { %v8612_v34 = vadd.f32 %v10060_v6, %v14807_v37  ;;  %v8603_v22 = vpop.f32.mrb[99].mxu1 }
 0x89d   : > { %v8604_v44 = vadd.f32 %v14807_v37, %v8603_v22 }
 0x89e   : > { %v9896_v3 = vpack.c.bf16 %v8612_v34, %v8609_v19 }
 0x89f   : > { %v9891_v45 = vpack.c.bf16 %v8604_v44, %v8601_v51 }
 0x8a0   : > { %9944 = vst [vmem:[%s14815_s25 + $0xd8] sm:$0xff] %v9896_v3  }
 0x8a1   : > { %9943 = vst [vmem:[%s14815_s25 + $0xd0] sm:$0xff] %v9891_v45  }
 0x8a9   : > { %v10063_v50 = vpop.f32.mrb[100].mxu1 }
 0x8aa   : > { %v8616_v5 = vpop.f32.mrb[101].mxu1  ;;  %v8625_v53 = vadd.f32 %v10063_v50, %v14807_v37 }
 0x8ab   : > { %v10064_v29 = vpop.f32.mrb[102].mxu1  ;;  %v8617_v59 = vadd.f32 %v14807_v37, %v8616_v5 }
 0x8ac   : > { %v8628_v41 = vadd.f32 %v10064_v29, %v14807_v37  ;;  %v8619_v15 = vpop.f32.mrb[103].mxu1 }
 0x8ad   : > { %v8620_v54 = vadd.f32 %v14807_v37, %v8619_v15 }
 0x8ae   : > { %v9906_v40 = vpack.c.bf16 %v8628_v41, %v8625_v53 }
 0x8af   : > { %v9901_v39 = vpack.c.bf16 %v8620_v54, %v8617_v59 }
 0x8b0   : > { %9946 = vst [vmem:[%s14815_s25 + $0xe8] sm:$0xff] %v9906_v40  }
 0x8b1   : > { %9945 = vst [vmem:[%s14815_s25 + $0xe0] sm:$0xff] %v9901_v39  }
 0x8b9   : > { %v10067_v9 = vpop.f32.mrb[104].mxu1 }
 0x8ba   : > { %v8632_v16 = vpop.f32.mrb[105].mxu1  ;;  %v8641_v21 = vadd.f32 %v10067_v9, %v14807_v37 }
 0x8bb   : > { %v10068_v18 = vpop.f32.mrb[106].mxu1  ;;  %v8633_v52 = vadd.f32 %v14807_v37, %v8632_v16 }
 0x8bc   : > { %v8644_v46 = vadd.f32 %v10068_v18, %v14807_v37  ;;  %v8635_v0 = vpop.f32.mrb[107].mxu1 }
 0x8bd   : > { %v8636_v31 = vadd.f32 %v14807_v37, %v8635_v0 }
 0x8be   : > { %v9916_v56 = vpack.c.bf16 %v8644_v46, %v8641_v21 }
 0x8bf   : > { %v9911_v2 = vpack.c.bf16 %v8636_v31, %v8633_v52 }
 0x8c0   : > { %9948 = vst [vmem:[%s14815_s25 + $0xf8] sm:$0xff] %v9916_v56  }
 0x8c1   : > { %9947 = vst [vmem:[%s14815_s25 + $0xf0] sm:$0xff] %v9911_v2  }
 0x8c2   : > { %11823 = shalt.err (!%p11820_p3)
}
 0x8c3   : > { %s11824_s17 = scalar_lea.hbm %s14912_s29, 4096  ;;  %s11828_s26 = scalar_lea.hbm %s14970_s9, 8192 }
 0x8c4   : > { %p11825_p4 = scmp.ne.s32.totalorder %s14912_s29, %s11824_s17  ;;  %p11829_p9 = scmp.lt.u32.totalorder %s14912_s29, %s14970_s9 }
 0x8c5   : > { %p11830_p10 = scmp.lt.u32.totalorder %s11828_s26, %s11824_s17  ;;  %p11832_p12 = scmp.lt.u32.totalorder %s11824_s17, %s14912_s29 }
 0x8c6   : > { %p11826_p7 = pnand %p11825_p4, %p11966_p5 }
 0x8c7   : > { %p11831_p11 = por %p11830_p10, %p11829_p9 }
 0x8c8   : > { %p11827_p8 = pneg %p11826_p7 }
 0x8c9   : > { %p11833_p13 = por %p11832_p12, %p11831_p11 }
 0x8cb   : > { %p11834_p0 = pnand %p11833_p13, %p11827_p8 }
 0x8cd   : > { %11837 = shalt.err (!%p11834_p0)
}
 0x8ce   : > { %s11876_s16 = smov 64   ;;  %s11877_s23 = smov 4  }
 0x8cf   : > { %11352 = dma.vmem_to_hbm [thread:$0]  (%p11966_p5), %s14914_s14, 4096, %s14912_s29, %s14920_s13, %s11876_s16, %s11876_s16, %s11877_s23  }
 0x8d0 PF: > { %p11358_p1 = scmp.ge.s32.totalorder %s11872_s12, 2  ;;  %s8996_s21 = sand.u32 1, %s11860_s30  }
 0x8d1   : > { %s8997_s22 = scalar_lea.sflag [#allocation3], %s8996_s21 }
 0x8d2   : > { %p11355_p2 = pnand %p11358_p1, %p11970_p6 }
 0x8d4   : > { %11855 = dma.done.wait (!%p11355_p2), %s8997_s22, 4096  }
 0x8d5   : > { %11857 = vsyncadd (!%p11355_p2), %s8997_s22, 4294963200  ;;  %p19_p3 = scmp.ge.s32.totalorder %s11953_s15, 4   ;;  %s15057_s30 = smov %s11864_s10 }
 0x8d6   : > { %s15058_s10 = smov %s11868_s11  ;;  %s15059_s11 = smov %s11964_s18 }
 0x8d7   : > { %s15060_s12 = smov %s11953_s15  ;;  %21 = sbr.rel (!%p19_p3) target bundleno = 3 (0x3), region = 91 }
 0x8de   :  { %9002 = vsyncpa [#allocation3], 1 }
 0x8df   :  { %9004 = vsyncpa [#allocation3 + $0x1], 1 }

</bundles_post_ra>
